<compile_context>
chip_gen: v5e
topology: v5e:2x2
jax: 0.10.0
libtpu: 0.0.40
codegen_flags: <defaults>
</compile_context>

<pallas_src>
import functools

import jax
import jax.numpy as jnp
from jax.experimental import pallas as pl
from jax.experimental.pallas import tpu as pltpu

BN_EPS = 1e-5
LANE = 128
F32 = jnp.float32
BF16 = jnp.bfloat16


def _rup(x, m):
    return (x + m - 1) // m * m


def _tile_rows(m, align=16, target=1024):
    """Fixed row tile (multiple of `align`); the last grid block may be partial."""
    return min(target, _rup(m, align))


def _compiler_params(sem):
    """Per-generation VMEM limit: ~3/4 of physical, capped at 100 MiB."""
    try:
        cap = getattr(pltpu.get_tpu_info(), "vmem_capacity_bytes",
                      64 * 1024 * 1024)
    except Exception:
        cap = 64 * 1024 * 1024
    return pltpu.CompilerParams(
        dimension_semantics=sem,
        vmem_limit_bytes=int(min(cap * 3 // 4, 100 * 1024 * 1024)))


# ---------------------------------------------------------------------------
# Kernel 1: ConvTranspose2d(k=2, s=2) as one lane-dense bf16 matmul per tile.
#   out[m, (ky*2 + kx)*CmP + c] = sum_ic x[m, ic] * W[ic, c, ky, kx] + b[c]
# ---------------------------------------------------------------------------
def _upsample_kernel(x_ref, w_ref, b_ref, o_ref):
    o_ref[...] = (
        jnp.dot(x_ref[...], w_ref[...], preferred_element_type=jnp.float32)
        + b_ref[...]
    )


# ---------------------------------------------------------------------------
# Shared helper: 3x3 "same" conv of a zero-padded tile.
#
# `x` is (hp, wp, cp) f32 with valid image data at rows [2, 2+out_h) and
# columns [0, out_w); everything else is zero (2 zero rows on top, >=2 below,
# >=1 zero column on the right).  `w_ref` is (3, cp, 3*coutp): dim0 = dx, and
# the three dy taps are packed along N (dy-major).
#
# Per dx we take ONE flattened-row window (the only possibly sublane-unaligned
# slice), then aligned sub-slices per dy-group feed the MXU.  When coutp==128
# the dy=0/1 taps are packed into a single N=256 matmul (full 256-wide MXU on
# v6e/v7x; still optimal on the 128-wide v5e).  Operands are cast to bf16,
# accumulation is f32, acc stays flattened as (out_h*wp, coutp).
# ---------------------------------------------------------------------------
def _conv3x3_acc(x, w_ref, out_h, acc):
    hp, wp, cp = x.shape
    coutp = w_ref.shape[-1] // 3
    m = out_h * wp
    win = (out_h + 2) * wp
    groups = ((0, 2), (2, 1)) if coutp == 128 else ((0, 1), (1, 1), (2, 1))
    xf = x.reshape(hp * wp, cp)                      # layout-free (wp % 8 == 0)
    for dx in range(3):
        # One window per dx; the wrapped-in elements at row boundaries land in
        # zero padding columns, so no roll is needed.
        xs = xf[wp + dx - 1: wp + dx - 1 + win, :]
        w_dx = w_ref[dx]                              # (cp, 3*coutp) bf16
        for d0, g in groups:
            rows = xs[d0 * wp: d0 * wp + m + (g - 1) * wp, :].astype(BF16)
            r = jnp.dot(rows, w_dx[:, d0 * coutp:(d0 + g) * coutp],
                        preferred_element_type=jnp.float32)
            for j in range(g):
                part = r[j * wp: j * wp + m, j * coutp:(j + 1) * coutp]
                acc = part if acc is None else acc + part
    return acc


# ---------------------------------------------------------------------------
# Kernel 2: DoubleConv conv #1.  The channel concat is fused by accumulating
# two matmul streams (x2-part weights, x1_up-part weights) into one acc.
# Writes the raw conv output already spatially zero-padded for conv2 (halo
# rows get tiny zero stores only) and per-image BN partials (sum, sumsq).
# ---------------------------------------------------------------------------
def _conv1_kernel(xa_ref, xb_ref, wa_ref, wb_ref, ypad_ref, st_ref, *,
                  out_h, out_w):
    hp, wp, _ = xa_ref.shape
    coutp = ypad_ref.shape[-1]

    acc = _conv3x3_acc(xa_ref[...], wa_ref, out_h, None)
    acc = _conv3x3_acc(xb_ref[...], wb_ref, out_h, acc)

    y3 = acc.reshape(out_h, wp, coutp)
    cmask = jax.lax.broadcasted_iota(jnp.int32, (1, wp, 1), 1) < out_w
    y3 = jnp.where(cmask, y3, 0.0)                    # zero the garbage columns

    # Halo-only zero init + one aligned interior store (no full-tile zero pass).
    ypad_ref[0:2, :, :] = jnp.zeros((2, wp, coutp), jnp.float32)
    ypad_ref[2:2 + out_h, :, :] = y3
    ypad_ref[2 + out_h:hp, :, :] = jnp.zeros((hp - 2 - out_h, wp, coutp),
                                             jnp.float32)

    yf = y3.reshape(out_h * wp, coutp)
    st_ref[...] = jnp.concatenate(
        [jnp.sum(yf, axis=0, keepdims=True),
         jnp.sum(yf * yf, axis=0, keepdims=True)], axis=0)


# ---------------------------------------------------------------------------
# Kernel 3: DoubleConv conv #2.  BN1 scale/shift + ReLU are applied on the fly
# to the valid rows only (column mask keeps the zero halo zero; halo rows are
# re-attached with a cheap leading-dim concat), then the same 3x3 conv.
# ---------------------------------------------------------------------------
def _conv2_kernel(ypad_ref, sc_ref, sh_ref, w_ref, y2_ref, st_ref, *,
                  out_h, out_w):
    hp, wp, coutp = ypad_ref.shape
    scale = sc_ref[...].reshape(1, 1, coutp)
    shift = sh_ref[...].reshape(1, 1, coutp)
    cmask = jax.lax.broadcasted_iota(jnp.int32, (1, wp, 1), 1) < out_w

    z_mid = jnp.maximum(ypad_ref[2:2 + out_h, :, :] * scale + shift, 0.0)
    z_mid = jnp.where(cmask, z_mid, 0.0)
    z = jnp.concatenate(
        [jnp.zeros((2, wp, coutp), jnp.float32),
         z_mid,
         jnp.zeros((hp - 2 - out_h, wp, coutp), jnp.float32)], axis=0)

    acc = _conv3x3_acc(z, w_ref, out_h, None)
    y3 = acc.reshape(out_h, wp, coutp)
    y3 = jnp.where(cmask, y3, 0.0)
    y2_ref[...] = y3                                  # lane/sublane dense store

    yf = y3.reshape(out_h * wp, coutp)
    st_ref[...] = jnp.concatenate(
        [jnp.sum(yf, axis=0, keepdims=True),
         jnp.sum(yf * yf, axis=0, keepdims=True)], axis=0)


# ---------------------------------------------------------------------------
# Kernel 4: BatchNorm2 + ReLU, tiled elementwise over flattened rows.
# ---------------------------------------------------------------------------
def _bn_relu_kernel(y_ref, sc_ref, sh_ref, o_ref):
    o_ref[...] = jnp.maximum(y_ref[...] * sc_ref[...] + sh_ref[...], 0.0)


# ---------------------------------------------------------------------------
# Host-side packing / tiny XLA glue
# ---------------------------------------------------------------------------
def _pack_conv3x3_weight(w, cin_p, cout_p):
    """(Cout, Cin, 3, 3) torch layout -> (3=dx, cin_p, 3*cout_p), dy packed
    along N (dy-major), zero padded, bf16."""
    cout, cin = w.shape[0], w.shape[1]
    w = jnp.transpose(w, (3, 2, 1, 0))                 # (dx, dy, cin, cout)
    w = jnp.pad(w, ((0, 0), (0, 0), (0, cin_p - cin), (0, cout_p - cout)))
    w = jnp.transpose(w, (0, 2, 1, 3)).reshape(3, cin_p, 3 * cout_p)
    return w.astype(BF16)


def _bn_scale_shift(stats, gamma, beta, count, c_pad):
    """Per-image (sum, sumsq) partials -> training-mode BN scale/shift.
    NOTE: single-pass E[x^2] - mean^2 (biased, clamped at 0) in f32."""
    s = jnp.sum(stats, axis=0)                         # (2, c_pad)
    mean = s[0] / count
    var = jnp.maximum(s[1] / count - mean * mean, 0.0)
    g = jnp.pad(gamma, (0, c_pad - gamma.shape[0]))
    b = jnp.pad(beta, (0, c_pad - beta.shape[0]))
    scale = g * jax.lax.rsqrt(var + BN_EPS)
    shift = b - mean * scale
    return scale.reshape(1, c_pad), shift.reshape(1, c_pad)


def up_forward(x1_nchw, x2_nchw, params):
    """Forward of Up(in_ch, out_ch, bilinear=False). Inputs/outputs are NCHW."""
    n, cin, h1, w1 = x1_nchw.shape
    _, c2, h2, w2 = x2_nchw.shape
    cmid = params["up_w"].shape[1]                     # = in_ch // 2 (== c2)
    cout = params["c1_w"].shape[0]

    cin_p, c2_p = _rup(cin, LANE), _rup(c2, LANE)
    cmid_p, cout_p = _rup(cmid, LANE), _rup(cout, LANE)

    # ------------------ ConvTranspose2d(k=2, s=2) ---------------------------
    x1 = jnp.transpose(x1_nchw, (0, 2, 3, 1)).reshape(n * h1 * w1, cin)
    x1 = jnp.pad(x1, ((0, 0), (0, cin_p - cin))).astype(BF16)
    w_up = jnp.transpose(params["up_w"], (0, 2, 3, 1))  # (Cin, ky, kx, Cmid)
    w_up = jnp.pad(w_up, ((0, cin_p - cin), (0, 0), (0, 0),
                          (0, cmid_p - cmid)))
    w_up = w_up.reshape(cin_p, 4 * cmid_p).astype(BF16)
    b_up = jnp.tile(jnp.pad(params["up_b"], (0, cmid_p - cmid)), 4)
    b_up = b_up.reshape(1, 4 * cmid_p).astype(F32)

    m1 = n * h1 * w1
    tm1 = _tile_rows(m1)
    up = pl.pallas_call(
        _upsample_kernel,
        out_shape=jax.ShapeDtypeStruct((m1, 4 * cmid_p), F32),
        grid=(pl.cdiv(m1, tm1),),
        in_specs=[
            pl.BlockSpec((tm1, cin_p), lambda i: (i, 0)),
            pl.BlockSpec((cin_p, 4 * cmid_p), lambda i: (0, 0)),
            pl.BlockSpec((1, 4 * cmid_p), lambda i: (0, 0)),
        ],
        out_specs=pl.BlockSpec((tm1, 4 * cmid_p), lambda i: (i, 0)),
        compiler_params=_compiler_params(("parallel",)),
    )(x1, w_up, b_up)

    # De-interleave the 2x2 output patches (XLA glue; fuses with the pad below).
    up = up.reshape(n, h1, w1, 2, 2, cmid_p)
    up = jnp.transpose(up, (0, 1, 3, 2, 4, 5)).reshape(n, 2 * h1, 2 * w1, cmid_p)

    # Conv-tile geometry: valid data at rows [2, 2+h2), cols [0, w2); zeros
    # elsewhere (2 zero rows on top for the flattened-window slices, >=2 below,
    # >=1 zero column on the right).
    hp = _rup(h2 + 4, 8)
    wp = _rup(w2 + 1, 8)

    diff_h = h2 - 2 * h1
    diff_w = w2 - 2 * w1
    # Exact F.pad semantics (negative amounts crop, like PyTorch).
    up = jax.lax.pad(up, jnp.asarray(0.0, up.dtype),
                     ((0, 0, 0),
                      (diff_h // 2, diff_h - diff_h // 2, 0),
                      (diff_w // 2, diff_w - diff_w // 2, 0),
                      (0, 0, 0)))
    x1u = jnp.pad(up, ((0, 0), (2, hp - h2 - 2), (0, wp - w2), (0, 0)))
    x2t = jnp.transpose(x2_nchw, (0, 2, 3, 1))
    x2t = jnp.pad(x2t, ((0, 0), (2, hp - h2 - 2), (0, wp - w2),
                        (0, c2_p - c2)))

    # ------------------ DoubleConv conv #1 (+ BN1 partials) ------------------
    # Channel concat fused via two accumulating matmul streams.  Conv biases
    # are omitted: they cancel exactly under training-mode BatchNorm.
    wt = params["c1_w"]
    w1a = _pack_conv3x3_weight(wt[:, :c2], c2_p, cout_p)
    w1b = _pack_conv3x3_weight(wt[:, c2:], cmid_p, cout_p)

    conv_cp = _compiler_params(("parallel",))

    y1pad, st1 = pl.pallas_call(
        functools.partial(_conv1_kernel, out_h=h2, out_w=w2),
        out_shape=(jax.ShapeDtypeStruct((n, hp, wp, cout_p), F32),
                   jax.ShapeDtypeStruct((n, 2, cout_p), F32)),
        grid=(n,),
        in_specs=[
            pl.BlockSpec((None, hp, wp, c2_p), lambda b: (b, 0, 0, 0)),
            pl.BlockSpec((None, hp, wp, cmid_p), lambda b: (b, 0, 0, 0)),
            pl.BlockSpec((3, c2_p, 3 * cout_p), lambda b: (0, 0, 0)),
            pl.BlockSpec((3, cmid_p, 3 * cout_p), lambda b: (0, 0, 0)),
        ],
        out_specs=(
            pl.BlockSpec((None, hp, wp, cout_p), lambda b: (b, 0, 0, 0)),
            pl.BlockSpec((None, 2, cout_p), lambda b: (b, 0, 0)),
        ),
        compiler_params=conv_cp,
    )(x2t, x1u, w1a, w1b)

    count = n * h2 * w2
    sc1, sh1 = _bn_scale_shift(st1, params["bn1_g"], params["bn1_b"],
                               count, cout_p)

    # ------------------ DoubleConv conv #2 (+ BN2 partials) ------------------
    w2p = _pack_conv3x3_weight(params["c2_w"], cout_p, cout_p)
    y2, st2 = pl.pallas_call(
        functools.partial(_conv2_kernel, out_h=h2, out_w=w2),
        out_shape=(jax.ShapeDtypeStruct((n, h2, wp, cout_p), F32),
                   jax.ShapeDtypeStruct((n, 2, cout_p), F32)),
        grid=(n,),
        in_specs=[
            pl.BlockSpec((None, hp, wp, cout_p), lambda b: (b, 0, 0, 0)),
            pl.BlockSpec((1, cout_p), lambda b: (0, 0)),
            pl.BlockSpec((1, cout_p), lambda b: (0, 0)),
            pl.BlockSpec((3, cout_p, 3 * cout_p), lambda b: (0, 0, 0)),
        ],
        out_specs=(
            pl.BlockSpec((None, h2, wp, cout_p), lambda b: (b, 0, 0, 0)),
            pl.BlockSpec((None, 2, cout_p), lambda b: (b, 0, 0)),
        ),
        compiler_params=conv_cp,
    )(y1pad, sc1, sh1, w2p)

    sc2, sh2 = _bn_scale_shift(st2, params["bn2_g"], params["bn2_b"],
                               count, cout_p)

    # ------------------ BN2 + ReLU (lane-dense, fixed row tile) --------------
    m2 = n * h2 * wp
    tm2 = _tile_rows(m2)
    out = pl.pallas_call(
        _bn_relu_kernel,
        out_shape=jax.ShapeDtypeStruct((m2, cout_p), F32),
        grid=(pl.cdiv(m2, tm2),),
        in_specs=[
            pl.BlockSpec((tm2, cout_p), lambda i: (i, 0)),
            pl.BlockSpec((1, cout_p), lambda i: (0, 0)),
            pl.BlockSpec((1, cout_p), lambda i: (0, 0)),
        ],
        out_specs=pl.BlockSpec((tm2, cout_p), lambda i: (i, 0)),
        compiler_params=_compiler_params(("parallel",)),
    )(y2.reshape(m2, cout_p), sc2, sh2)

    out = out.reshape(n, h2, wp, cout_p)[:, :, :w2, :cout]
    return jnp.transpose(out, (0, 3, 1, 2))            # back to NCHW


def init_params(key, in_ch, out_ch):
    ks = jax.random.split(key, 4)
    half = in_ch // 2
    return {
        # ConvTranspose2d(in_ch, in_ch//2, k=2, s=2): weight (Cin, Cout, 2, 2)
        "up_w": 0.1 * jax.random.normal(ks[0], (in_ch, half, 2, 2), jnp.float32),
        "up_b": 0.01 * jnp.arange(half, dtype=jnp.float32),
        # Conv2d(in_ch, out_ch, 3, padding=1): weight (Cout, Cin, 3, 3)
        "c1_w": 0.1 * jax.random.normal(ks[1], (out_ch, in_ch, 3, 3), jnp.float32),
        # Conv biases kept for interface parity but NOT consumed: a per-channel
        # constant added before training-mode BatchNorm cancels exactly.
        "c1_b": 0.01 * jnp.arange(out_ch, dtype=jnp.float32),
        "bn1_g": jnp.ones((out_ch,), jnp.float32),
        "bn1_b": jnp.zeros((out_ch,), jnp.float32),
        # Conv2d(out_ch, out_ch, 3, padding=1)
        "c2_w": 0.1 * jax.random.normal(ks[2], (out_ch, out_ch, 3, 3), jnp.float32),
        "c2_b": 0.01 * jnp.arange(out_ch, dtype=jnp.float32),
        "bn2_g": jnp.ones((out_ch,), jnp.float32),
        "bn2_b": jnp.zeros((out_ch,), jnp.float32),
    }


if __name__ == "__main__":
    key = jax.random.PRNGKey(0)
    k_x1, k_x2, k_p = jax.random.split(key, 3)

    in_ch, out_ch = 8, 4
    batch = 2
    # x1: deep feature map (in_ch channels, 8x8); x2: skip connection
    # (in_ch//2 channels, 16x16) - same convention as the PyTorch module.
    x1 = jax.random.normal(k_x1, (batch, in_ch, 8, 8), jnp.float32)
    x2 = jax.random.normal(k_x2, (batch, in_ch // 2, 16, 16), jnp.float32)

    params = init_params(k_p, in_ch, out_ch)

    out = jax.jit(up_forward)(x1, x2, params)
    out = jax.block_until_ready(out)

    assert out.shape == (batch, out_ch, 16, 16), out.shape
    assert bool(jnp.all(jnp.isfinite(out)))
    print("KERNEL_OK")
</pallas_src>

<mosaic_0001>
module attributes {stable_mosaic.version = 11 : i64} {
  func.func @_upsample_kernel(%arg0: i32, %arg1: memref<128x128xbf16, #tpu.memory_space<vmem>>, %arg2: memref<128x512xbf16, #tpu.memory_space<vmem>>, %arg3: memref<1x512xf32, #tpu.memory_space<vmem>>, %arg4: memref<128x512xf32, #tpu.memory_space<vmem>>) attributes {dimension_semantics = [#tpu.dimension_semantics<parallel>], iteration_bounds = array<i64: 1>, scalar_prefetch = 0 : i64, scratch_operands = 0 : i64, tpu.core_type = #tpu.core_type<tc>, window_params = [{transform_indices = @transform_0, window_bounds = array<i64: 128, 128>}, {pipeline_mode = #tpu.pipeline_mode<synchronous>, transform_indices = @transform_1, window_bounds = array<i64: 128, 512>}, {pipeline_mode = #tpu.pipeline_mode<synchronous>, transform_indices = @transform_2, window_bounds = array<i64: 1, 512>}, {transform_indices = @transform_3, window_bounds = array<i64: 128, 512>}]} {
    %c0 = arith.constant 0 : index
    %c0_0 = arith.constant 0 : index
    %0 = vector.load %arg1[%c0, %c0_0] : memref<128x128xbf16, #tpu.memory_space<vmem>>, vector<128x128xbf16>
    %c0_1 = arith.constant 0 : index
    %c0_2 = arith.constant 0 : index
    %1 = vector.load %arg2[%c0_1, %c0_2] : memref<128x512xbf16, #tpu.memory_space<vmem>>, vector<128x512xbf16>
    %cst = arith.constant dense<0.000000e+00> : vector<128x512xf32>
    %2 = tpu.matmul %0, %1, %cst {dimension_numbers = #tpu.dot_dimension_numbers<[1], [0], [0], [1], [0, 0, 1, 1], [], []>} : vector<128x128xbf16>, vector<128x512xbf16>, vector<128x512xf32> -> vector<128x512xf32>
    %c0_3 = arith.constant 0 : index
    %c0_4 = arith.constant 0 : index
    %3 = vector.load %arg3[%c0_3, %c0_4] : memref<1x512xf32, #tpu.memory_space<vmem>>, vector<1x512xf32>
    %4 = vector.broadcast %3 : vector<1x512xf32> to vector<128x512xf32>
    %5 = arith.addf %2, %4 : vector<128x512xf32>
    %c0_5 = arith.constant 0 : index
    %c0_6 = arith.constant 0 : index
    %6 = vector.load %arg4[%c0_5, %c0_6] : memref<128x512xf32, #tpu.memory_space<vmem>>, vector<128x512xf32>
    tpu.vector_store %arg4[%c0_5, %c0_6], %5 {strides = array<i32>} : memref<128x512xf32, #tpu.memory_space<vmem>>, vector<128x512xf32>,
    return
  }
  func.func @transform_0(%arg0: i32) -> (i32, i32) {
    %c0_i32 = arith.constant 0 : i32
    %c0_i32_0 = arith.constant 0 : i32
    return %arg0, %c0_i32 : i32, i32
  }
  func.func @transform_1(%arg0: i32) -> (i32, i32) {
    %c0_i32 = arith.constant 0 : i32
    %c0_i32_0 = arith.constant 0 : i32
    %c0_i32_1 = arith.constant 0 : i32
    return %c0_i32, %c0_i32_0 : i32, i32
  }
  func.func @transform_2(%arg0: i32) -> (i32, i32) {
    %c0_i32 = arith.constant 0 : i32
    %c0_i32_0 = arith.constant 0 : i32
    %c0_i32_1 = arith.constant 0 : i32
    return %c0_i32, %c0_i32_0 : i32, i32
  }
  func.func @transform_3(%arg0: i32) -> (i32, i32) {
    %c0_i32 = arith.constant 0 : i32
    %c0_i32_0 = arith.constant 0 : i32
    return %arg0, %c0_i32 : i32, i32
  }
}

module attributes {stable_mosaic.version = 11 : i64} {
  func.func @_conv1_kernel(%arg0: i32, %arg1: memref<1x24x24x128xf32, #tpu.memory_space<vmem>>, %arg2: memref<1x24x24x128xf32, #tpu.memory_space<vmem>>, %arg3: memref<3x128x384xbf16, #tpu.memory_space<vmem>>, %arg4: memref<3x128x384xbf16, #tpu.memory_space<vmem>>, %arg5: memref<1x24x24x128xf32, #tpu.memory_space<vmem>>, %arg6: memref<1x2x128xf32, #tpu.memory_space<vmem>>) attributes {dimension_semantics = [#tpu.dimension_semantics<parallel>], iteration_bounds = array<i64: 2>, scalar_prefetch = 0 : i64, scratch_operands = 0 : i64, tpu.core_type = #tpu.core_type<tc>, window_params = [{transform_indices = @transform_0, window_bounds = array<i64: 1, 24, 24, 128>}, {transform_indices = @transform_1, window_bounds = array<i64: 1, 24, 24, 128>}, {pipeline_mode = #tpu.pipeline_mode<synchronous>, transform_indices = @transform_2, window_bounds = array<i64: 3, 128, 384>}, {pipeline_mode = #tpu.pipeline_mode<synchronous>, transform_indices = @transform_3, window_bounds = array<i64: 3, 128, 384>}, {transform_indices = @transform_4, window_bounds = array<i64: 1, 24, 24, 128>}, {transform_indices = @transform_5, window_bounds = array<i64: 1, 2, 128>}]} {
    %c0 = arith.constant 0 : index
    %c0_0 = arith.constant 0 : index
    %c0_1 = arith.constant 0 : index
    %c0_2 = arith.constant 0 : index
    %0 = vector.load %arg1[%c0, %c0_0, %c0_1, %c0_2] : memref<1x24x24x128xf32, #tpu.memory_space<vmem>>, vector<1x24x24x128xf32>
    %1 = vector.shape_cast %0 : vector<1x24x24x128xf32> to vector<24x24x128xf32>
    %2 = vector.shape_cast %1 : vector<24x24x128xf32> to vector<576x128xf32>
    %3 = vector.extract_strided_slice %2 {offsets = [23, 0], sizes = [432, 128], strides = [1, 1]} : vector<576x128xf32> to vector<432x128xf32>
    %c0_3 = arith.constant 0 : index
    %c0_4 = arith.constant 0 : index
    %c0_5 = arith.constant 0 : index
    %4 = vector.load %arg3[%c0_3, %c0_4, %c0_5] : memref<3x128x384xbf16, #tpu.memory_space<vmem>>, vector<1x128x384xbf16>
    %5 = vector.shape_cast %4 : vector<1x128x384xbf16> to vector<128x384xbf16>
    %6 = vector.extract_strided_slice %3 {offsets = [0, 0], sizes = [408, 128], strides = [1, 1]} : vector<432x128xf32> to vector<408x128xf32>
    %7 = arith.truncf %6 : vector<408x128xf32> to vector<408x128xbf16>
    %8 = vector.extract_strided_slice %5 {offsets = [0, 0], sizes = [128, 256], strides = [1, 1]} : vector<128x384xbf16> to vector<128x256xbf16>
    %cst = arith.constant dense<0.000000e+00> : vector<408x256xf32>
    %9 = tpu.matmul %7, %8, %cst {dimension_numbers = #tpu.dot_dimension_numbers<[1], [0], [0], [1], [0, 0, 1, 1], [], []>} : vector<408x128xbf16>, vector<128x256xbf16>, vector<408x256xf32> -> vector<408x256xf32>
    %10 = vector.extract_strided_slice %9 {offsets = [0, 0], sizes = [384, 128], strides = [1, 1]} : vector<408x256xf32> to vector<384x128xf32>
    %11 = vector.extract_strided_slice %9 {offsets = [24, 128], sizes = [384, 128], strides = [1, 1]} : vector<408x256xf32> to vector<384x128xf32>
    %12 = arith.addf %10, %11 : vector<384x128xf32>
    %13 = vector.extract_strided_slice %3 {offsets = [48, 0], sizes = [384, 128], strides = [1, 1]} : vector<432x128xf32> to vector<384x128xf32>
    %14 = arith.truncf %13 : vector<384x128xf32> to vector<384x128xbf16>
    %15 = vector.extract_strided_slice %5 {offsets = [0, 256], sizes = [128, 128], strides = [1, 1]} : vector<128x384xbf16> to vector<128x128xbf16>
    %cst_6 = arith.constant dense<0.000000e+00> : vector<384x128xf32>
    %16 = tpu.matmul %14, %15, %cst_6 {dimension_numbers = #tpu.dot_dimension_numbers<[1], [0], [0], [1], [0, 0, 1, 1], [], []>} : vector<384x128xbf16>, vector<128x128xbf16>, vector<384x128xf32> -> vector<384x128xf32>
    %17 = arith.addf %12, %16 : vector<384x128xf32>
    %18 = vector.extract_strided_slice %2 {offsets = [24, 0], sizes = [432, 128], strides = [1, 1]} : vector<576x128xf32> to vector<432x128xf32>
    %c1 = arith.constant 1 : index
    %c0_7 = arith.constant 0 : index
    %c0_8 = arith.constant 0 : index
    %19 = vector.load %arg3[%c1, %c0_7, %c0_8] : memref<3x128x384xbf16, #tpu.memory_space<vmem>>, vector<1x128x384xbf16>
    %20 = vector.shape_cast %19 : vector<1x128x384xbf16> to vector<128x384xbf16>
    %21 = vector.extract_strided_slice %18 {offsets = [0, 0], sizes = [408, 128], strides = [1, 1]} : vector<432x128xf32> to vector<408x128xf32>
    %22 = arith.truncf %21 : vector<408x128xf32> to vector<408x128xbf16>
    %23 = vector.extract_strided_slice %20 {offsets = [0, 0], sizes = [128, 256], strides = [1, 1]} : vector<128x384xbf16> to vector<128x256xbf16>
    %cst_9 = arith.constant dense<0.000000e+00> : vector<408x256xf32>
    %24 = tpu.matmul %22, %23, %cst_9 {dimension_numbers = #tpu.dot_dimension_numbers<[1], [0], [0], [1], [0, 0, 1, 1], [], []>} : vector<408x128xbf16>, vector<128x256xbf16>, vector<408x256xf32> -> vector<408x256xf32>
    %25 = vector.extract_strided_slice %24 {offsets = [0, 0], sizes = [384, 128], strides = [1, 1]} : vector<408x256xf32> to vector<384x128xf32>
    %26 = arith.addf %17, %25 : vector<384x128xf32>
    %27 = vector.extract_strided_slice %24 {offsets = [24, 128], sizes = [384, 128], strides = [1, 1]} : vector<408x256xf32> to vector<384x128xf32>
    %28 = arith.addf %26, %27 : vector<384x128xf32>
    %29 = vector.extract_strided_slice %18 {offsets = [48, 0], sizes = [384, 128], strides = [1, 1]} : vector<432x128xf32> to vector<384x128xf32>
    %30 = arith.truncf %29 : vector<384x128xf32> to vector<384x128xbf16>
    %31 = vector.extract_strided_slice %20 {offsets = [0, 256], sizes = [128, 128], strides = [1, 1]} : vector<128x384xbf16> to vector<128x128xbf16>
    %cst_10 = arith.constant dense<0.000000e+00> : vector<384x128xf32>
    %32 = tpu.matmul %30, %31, %cst_10 {dimension_numbers = #tpu.dot_dimension_numbers<[1], [0], [0], [1], [0, 0, 1, 1], [], []>} : vector<384x128xbf16>, vector<128x128xbf16>, vector<384x128xf32> -> vector<384x128xf32>
    %33 = arith.addf %28, %32 : vector<384x128xf32>
    %34 = vector.extract_strided_slice %2 {offsets = [25, 0], sizes = [432, 128], strides = [1, 1]} : vector<576x128xf32> to vector<432x128xf32>
    %c2 = arith.constant 2 : index
    %c0_11 = arith.constant 0 : index
    %c0_12 = arith.constant 0 : index
    %35 = vector.load %arg3[%c2, %c0_11, %c0_12] : memref<3x128x384xbf16, #tpu.memory_space<vmem>>, vector<1x128x384xbf16>
    %36 = vector.shape_cast %35 : vector<1x128x384xbf16> to vector<128x384xbf16>
    %37 = vector.extract_strided_slice %34 {offsets = [0, 0], sizes = [408, 128], strides = [1, 1]} : vector<432x128xf32> to vector<408x128xf32>
    %38 = arith.truncf %37 : vector<408x128xf32> to vector<408x128xbf16>
    %39 = vector.extract_strided_slice %36 {offsets = [0, 0], sizes = [128, 256], strides = [1, 1]} : vector<128x384xbf16> to vector<128x256xbf16>
    %cst_13 = arith.constant dense<0.000000e+00> : vector<408x256xf32>
    %40 = tpu.matmul %38, %39, %cst_13 {dimension_numbers = #tpu.dot_dimension_numbers<[1], [0], [0], [1], [0, 0, 1, 1], [], []>} : vector<408x128xbf16>, vector<128x256xbf16>, vector<408x256xf32> -> vector<408x256xf32>
    %41 = vector.extract_strided_slice %40 {offsets = [0, 0], sizes = [384, 128], strides = [1, 1]} : vector<408x256xf32> to vector<384x128xf32>
    %42 = arith.addf %33, %41 : vector<384x128xf32>
    %43 = vector.extract_strided_slice %40 {offsets = [24, 128], sizes = [384, 128], strides = [1, 1]} : vector<408x256xf32> to vector<384x128xf32>
    %44 = arith.addf %42, %43 : vector<384x128xf32>
    %45 = vector.extract_strided_slice %34 {offsets = [48, 0], sizes = [384, 128], strides = [1, 1]} : vector<432x128xf32> to vector<384x128xf32>
    %46 = arith.truncf %45 : vector<384x128xf32> to vector<384x128xbf16>
    %47 = vector.extract_strided_slice %36 {offsets = [0, 256], sizes = [128, 128], strides = [1, 1]} : vector<128x384xbf16> to vector<128x128xbf16>
    %cst_14 = arith.constant dense<0.000000e+00> : vector<384x128xf32>
    %48 = tpu.matmul %46, %47, %cst_14 {dimension_numbers = #tpu.dot_dimension_numbers<[1], [0], [0], [1], [0, 0, 1, 1], [], []>} : vector<384x128xbf16>, vector<128x128xbf16>, vector<384x128xf32> -> vector<384x128xf32>
    %49 = arith.addf %44, %48 : vector<384x128xf32>
    %c0_15 = arith.constant 0 : index
    %c0_16 = arith.constant 0 : index
    %c0_17 = arith.constant 0 : index
    %c0_18 = arith.constant 0 : index
    %50 = vector.load %arg2[%c0_15, %c0_16, %c0_17, %c0_18] : memref<1x24x24x128xf32, #tpu.memory_space<vmem>>, vector<1x24x24x128xf32>
    %51 = vector.shape_cast %50 : vector<1x24x24x128xf32> to vector<24x24x128xf32>
    %52 = vector.shape_cast %51 : vector<24x24x128xf32> to vector<576x128xf32>
    %53 = vector.extract_strided_slice %52 {offsets = [23, 0], sizes = [432, 128], strides = [1, 1]} : vector<576x128xf32> to vector<432x128xf32>
    %c0_19 = arith.constant 0 : index
    %c0_20 = arith.constant 0 : index
    %c0_21 = arith.constant 0 : index
    %54 = vector.load %arg4[%c0_19, %c0_20, %c0_21] : memref<3x128x384xbf16, #tpu.memory_space<vmem>>, vector<1x128x384xbf16>
    %55 = vector.shape_cast %54 : vector<1x128x384xbf16> to vector<128x384xbf16>
    %56 = vector.extract_strided_slice %53 {offsets = [0, 0], sizes = [408, 128], strides = [1, 1]} : vector<432x128xf32> to vector<408x128xf32>
    %57 = arith.truncf %56 : vector<408x128xf32> to vector<408x128xbf16>
    %58 = vector.extract_strided_slice %55 {offsets = [0, 0], sizes = [128, 256], strides = [1, 1]} : vector<128x384xbf16> to vector<128x256xbf16>
    %cst_22 = arith.constant dense<0.000000e+00> : vector<408x256xf32>
    %59 = tpu.matmul %57, %58, %cst_22 {dimension_numbers = #tpu.dot_dimension_numbers<[1], [0], [0], [1], [0, 0, 1, 1], [], []>} : vector<408x128xbf16>, vector<128x256xbf16>, vector<408x256xf32> -> vector<408x256xf32>
    %60 = vector.extract_strided_slice %59 {offsets = [0, 0], sizes = [384, 128], strides = [1, 1]} : vector<408x256xf32> to vector<384x128xf32>
    %61 = arith.addf %49, %60 : vector<384x128xf32>
    %62 = vector.extract_strided_slice %59 {offsets = [24, 128], sizes = [384, 128], strides = [1, 1]} : vector<408x256xf32> to vector<384x128xf32>
    %63 = arith.addf %61, %62 : vector<384x128xf32>
    %64 = vector.extract_strided_slice %53 {offsets = [48, 0], sizes = [384, 128], strides = [1, 1]} : vector<432x128xf32> to vector<384x128xf32>
    %65 = arith.truncf %64 : vector<384x128xf32> to vector<384x128xbf16>
    %66 = vector.extract_strided_slice %55 {offsets = [0, 256], sizes = [128, 128], strides = [1, 1]} : vector<128x384xbf16> to vector<128x128xbf16>
    %cst_23 = arith.constant dense<0.000000e+00> : vector<384x128xf32>
    %67 = tpu.matmul %65, %66, %cst_23 {dimension_numbers = #tpu.dot_dimension_numbers<[1], [0], [0], [1], [0, 0, 1, 1], [], []>} : vector<384x128xbf16>, vector<128x128xbf16>, vector<384x128xf32> -> vector<384x128xf32>
    %68 = arith.addf %63, %67 : vector<384x128xf32>
    %69 = vector.extract_strided_slice %52 {offsets = [24, 0], sizes = [432, 128], strides = [1, 1]} : vector<576x128xf32> to vector<432x128xf32>
    %c1_24 = arith.constant 1 : index
    %c0_25 = arith.constant 0 : index
    %c0_26 = arith.constant 0 : index
    %70 = vector.load %arg4[%c1_24, %c0_25, %c0_26] : memref<3x128x384xbf16, #tpu.memory_space<vmem>>, vector<1x128x384xbf16>
    %71 = vector.shape_cast %70 : vector<1x128x384xbf16> to vector<128x384xbf16>
    %72 = vector.extract_strided_slice %69 {offsets = [0, 0], sizes = [408, 128], strides = [1, 1]} : vector<432x128xf32> to vector<408x128xf32>
    %73 = arith.truncf %72 : vector<408x128xf32> to vector<408x128xbf16>
    %74 = vector.extract_strided_slice %71 {offsets = [0, 0], sizes = [128, 256], strides = [1, 1]} : vector<128x384xbf16> to vector<128x256xbf16>
    %cst_27 = arith.constant dense<0.000000e+00> : vector<408x256xf32>
    %75 = tpu.matmul %73, %74, %cst_27 {dimension_numbers = #tpu.dot_dimension_numbers<[1], [0], [0], [1], [0, 0, 1, 1], [], []>} : vector<408x128xbf16>, vector<128x256xbf16>, vector<408x256xf32> -> vector<408x256xf32>
    %76 = vector.extract_strided_slice %75 {offsets = [0, 0], sizes = [384, 128], strides = [1, 1]} : vector<408x256xf32> to vector<384x128xf32>
    %77 = arith.addf %68, %76 : vector<384x128xf32>
    %78 = vector.extract_strided_slice %75 {offsets = [24, 128], sizes = [384, 128], strides = [1, 1]} : vector<408x256xf32> to vector<384x128xf32>
    %79 = arith.addf %77, %78 : vector<384x128xf32>
    %80 = vector.extract_strided_slice %69 {offsets = [48, 0], sizes = [384, 128], strides = [1, 1]} : vector<432x128xf32> to vector<384x128xf32>
    %81 = arith.truncf %80 : vector<384x128xf32> to vector<384x128xbf16>
    %82 = vector.extract_strided_slice %71 {offsets = [0, 256], sizes = [128, 128], strides = [1, 1]} : vector<128x384xbf16> to vector<128x128xbf16>
    %cst_28 = arith.constant dense<0.000000e+00> : vector<384x128xf32>
    %83 = tpu.matmul %81, %82, %cst_28 {dimension_numbers = #tpu.dot_dimension_numbers<[1], [0], [0], [1], [0, 0, 1, 1], [], []>} : vector<384x128xbf16>, vector<128x128xbf16>, vector<384x128xf32> -> vector<384x128xf32>
    %84 = arith.addf %79, %83 : vector<384x128xf32>
    %85 = vector.extract_strided_slice %52 {offsets = [25, 0], sizes = [432, 128], strides = [1, 1]} : vector<576x128xf32> to vector<432x128xf32>
    %c2_29 = arith.constant 2 : index
    %c0_30 = arith.constant 0 : index
    %c0_31 = arith.constant 0 : index
    %86 = vector.load %arg4[%c2_29, %c0_30, %c0_31] : memref<3x128x384xbf16, #tpu.memory_space<vmem>>, vector<1x128x384xbf16>
    %87 = vector.shape_cast %86 : vector<1x128x384xbf16> to vector<128x384xbf16>
    %88 = vector.extract_strided_slice %85 {offsets = [0, 0], sizes = [408, 128], strides = [1, 1]} : vector<432x128xf32> to vector<408x128xf32>
    %89 = arith.truncf %88 : vector<408x128xf32> to vector<408x128xbf16>
    %90 = vector.extract_strided_slice %87 {offsets = [0, 0], sizes = [128, 256], strides = [1, 1]} : vector<128x384xbf16> to vector<128x256xbf16>
    %cst_32 = arith.constant dense<0.000000e+00> : vector<408x256xf32>
    %91 = tpu.matmul %89, %90, %cst_32 {dimension_numbers = #tpu.dot_dimension_numbers<[1], [0], [0], [1], [0, 0, 1, 1], [], []>} : vector<408x128xbf16>, vector<128x256xbf16>, vector<408x256xf32> -> vector<408x256xf32>
    %92 = vector.extract_strided_slice %91 {offsets = [0, 0], sizes = [384, 128], strides = [1, 1]} : vector<408x256xf32> to vector<384x128xf32>
    %93 = arith.addf %84, %92 : vector<384x128xf32>
    %94 = vector.extract_strided_slice %91 {offsets = [24, 128], sizes = [384, 128], strides = [1, 1]} : vector<408x256xf32> to vector<384x128xf32>
    %95 = arith.addf %93, %94 : vector<384x128xf32>
    %96 = vector.extract_strided_slice %85 {offsets = [48, 0], sizes = [384, 128], strides = [1, 1]} : vector<432x128xf32> to vector<384x128xf32>
    %97 = arith.truncf %96 : vector<384x128xf32> to vector<384x128xbf16>
    %98 = vector.extract_strided_slice %87 {offsets = [0, 256], sizes = [128, 128], strides = [1, 1]} : vector<128x384xbf16> to vector<128x128xbf16>
    %cst_33 = arith.constant dense<0.000000e+00> : vector<384x128xf32>
    %99 = tpu.matmul %97, %98, %cst_33 {dimension_numbers = #tpu.dot_dimension_numbers<[1], [0], [0], [1], [0, 0, 1, 1], [], []>} : vector<384x128xbf16>, vector<128x128xbf16>, vector<384x128xf32> -> vector<384x128xf32>
    %100 = arith.addf %95, %99 : vector<384x128xf32>
    %101 = vector.shape_cast %100 : vector<384x128xf32> to vector<16x24x128xf32>
    %102 = tpu.iota {dimensions = array<i32: 1>} : vector<1x24x1xi32>
    %c16_i32 = arith.constant 16 : i32
    %103 = vector.broadcast %c16_i32 : i32 to vector<1x24x1xi32>
    %104 = arith.cmpi slt, %102, %103 : vector<1x24x1xi32>
    %cst_34 = arith.constant 0.000000e+00 : f32
    %105 = vector.shape_cast %104 : vector<1x24x1xi1> to vector<1x24x1xi1>
    %106 = vector.broadcast %105 : vector<1x24x1xi1> to vector<16x24x128xi1>
    %107 = vector.broadcast %cst_34 : f32 to vector<16x24x128xf32>
    %108 = arith.select %106, %101, %107 : vector<16x24x128xi1>, vector<16x24x128xf32>
    %cst_35 = arith.constant 0.000000e+00 : f32
    %109 = vector.broadcast %cst_35 : f32 to vector<2x24x128xf32>
    %c0_36 = arith.constant 0 : index
    %c0_37 = arith.constant 0 : index
    %c0_38 = arith.constant 0 : index
    %c0_39 = arith.constant 0 : index
    %110 = vector.load %arg5[%c0_36, %c0_37, %c0_38, %c0_39] : memref<1x24x24x128xf32, #tpu.memory_space<vmem>>, vector<1x2x24x128xf32>
    %111 = vector.shape_cast %110 : vector<1x2x24x128xf32> to vector<2x24x128xf32>
    %112 = vector.shape_cast %109 : vector<2x24x128xf32> to vector<1x2x24x128xf32>
    tpu.vector_store %arg5[%c0_36, %c0_37, %c0_38, %c0_39], %112 {strides = array<i32>} : memref<1x24x24x128xf32, #tpu.memory_space<vmem>>, vector<1x2x24x128xf32>,
    %c0_40 = arith.constant 0 : index
    %c2_41 = arith.constant 2 : index
    %c0_42 = arith.constant 0 : index
    %c0_43 = arith.constant 0 : index
    %113 = vector.load %arg5[%c0_40, %c2_41, %c0_42, %c0_43] : memref<1x24x24x128xf32, #tpu.memory_space<vmem>>, vector<1x16x24x128xf32>
    %114 = vector.shape_cast %113 : vector<1x16x24x128xf32> to vector<16x24x128xf32>
    %115 = vector.shape_cast %108 : vector<16x24x128xf32> to vector<1x16x24x128xf32>
    tpu.vector_store %arg5[%c0_40, %c2_41, %c0_42, %c0_43], %115 {strides = array<i32>} : memref<1x24x24x128xf32, #tpu.memory_space<vmem>>, vector<1x16x24x128xf32>,
    %cst_44 = arith.constant 0.000000e+00 : f32
    %116 = vector.broadcast %cst_44 : f32 to vector<6x24x128xf32>
    %c0_45 = arith.constant 0 : index
    %c18 = arith.constant 18 : index
    %c0_46 = arith.constant 0 : index
    %c0_47 = arith.constant 0 : index
    %117 = vector.load %arg5[%c0_45, %c18, %c0_46, %c0_47] : memref<1x24x24x128xf32, #tpu.memory_space<vmem>>, vector<1x6x24x128xf32>
    %118 = vector.shape_cast %117 : vector<1x6x24x128xf32> to vector<6x24x128xf32>
    %119 = vector.shape_cast %116 : vector<6x24x128xf32> to vector<1x6x24x128xf32>
    tpu.vector_store %arg5[%c0_45, %c18, %c0_46, %c0_47], %119 {strides = array<i32>} : memref<1x24x24x128xf32, #tpu.memory_space<vmem>>, vector<1x6x24x128xf32>,
    %120 = vector.shape_cast %108 : vector<16x24x128xf32> to vector<384x128xf32>
    %cst_48 = arith.constant dense<0.000000e+00> : vector<128xf32>
    %121 = vector.multi_reduction <add>, %120, %cst_48 [0] : vector<384x128xf32> to vector<128xf32>
    %122 = vector.shape_cast %121 : vector<128xf32> to vector<1x128xf32>
    %123 = arith.mulf %120, %120 : vector<384x128xf32>
    %cst_49 = arith.constant dense<0.000000e+00> : vector<128xf32>
    %124 = vector.multi_reduction <add>, %123, %cst_49 [0] : vector<384x128xf32> to vector<128xf32>
    %125 = vector.shape_cast %124 : vector<128xf32> to vector<1x128xf32>
    %126 = tpu.concatenate %122, %125 in 0 : vector<1x128xf32>, vector<1x128xf32> -> vector<2x128xf32>
    %c0_50 = arith.constant 0 : index
    %c0_51 = arith.constant 0 : index
    %c0_52 = arith.constant 0 : index
    %127 = vector.load %arg6[%c0_50, %c0_51, %c0_52] : memref<1x2x128xf32, #tpu.memory_space<vmem>>, vector<1x2x128xf32>
    %128 = vector.shape_cast %127 : vector<1x2x128xf32> to vector<2x128xf32>
    %129 = vector.shape_cast %126 : vector<2x128xf32> to vector<1x2x128xf32>
    tpu.vector_store %arg6[%c0_50, %c0_51, %c0_52], %129 {strides = array<i32>} : memref<1x2x128xf32, #tpu.memory_space<vmem>>, vector<1x2x128xf32>,
    return
  }
  func.func @transform_0(%arg0: i32) -> (i32, i32, i32, i32) {
    %c0_i32 = arith.constant 0 : i32
    %c0_i32_0 = arith.constant 0 : i32
    %c0_i32_1 = arith.constant 0 : i32
    %c0_i32_2 = arith.constant 0 : i32
    return %arg0, %c0_i32, %c0_i32_0, %c0_i32_1 : i32, i32, i32, i32
  }
  func.func @transform_1(%arg0: i32) -> (i32, i32, i32, i32) {
    %c0_i32 = arith.constant 0 : i32
    %c0_i32_0 = arith.constant 0 : i32
    %c0_i32_1 = arith.constant 0 : i32
    %c0_i32_2 = arith.constant 0 : i32
    return %arg0, %c0_i32, %c0_i32_0, %c0_i32_1 : i32, i32, i32, i32
  }
  func.func @transform_2(%arg0: i32) -> (i32, i32, i32) {
    %c0_i32 = arith.constant 0 : i32
    %c0_i32_0 = arith.constant 0 : i32
    %c0_i32_1 = arith.constant 0 : i32
    %c0_i32_2 = arith.constant 0 : i32
    return %c0_i32, %c0_i32_0, %c0_i32_1 : i32, i32, i32
  }
  func.func @transform_3(%arg0: i32) -> (i32, i32, i32) {
    %c0_i32 = arith.constant 0 : i32
    %c0_i32_0 = arith.constant 0 : i32
    %c0_i32_1 = arith.constant 0 : i32
    %c0_i32_2 = arith.constant 0 : i32
    return %c0_i32, %c0_i32_0, %c0_i32_1 : i32, i32, i32
  }
  func.func @transform_4(%arg0: i32) -> (i32, i32, i32, i32) {
    %c0_i32 = arith.constant 0 : i32
    %c0_i32_0 = arith.constant 0 : i32
    %c0_i32_1 = arith.constant 0 : i32
    %c0_i32_2 = arith.constant 0 : i32
    return %arg0, %c0_i32, %c0_i32_0, %c0_i32_1 : i32, i32, i32, i32
  }
  func.func @transform_5(%arg0: i32) -> (i32, i32, i32) {
    %c0_i32 = arith.constant 0 : i32
    %c0_i32_0 = arith.constant 0 : i32
    %c0_i32_1 = arith.constant 0 : i32
    return %arg0, %c0_i32, %c0_i32_0 : i32, i32, i32
  }
}

module attributes {stable_mosaic.version = 11 : i64} {
  func.func @_bn_relu_kernel(%arg0: i32, %arg1: memref<768x128xf32, #tpu.memory_space<vmem>>, %arg2: memref<1x128xf32, #tpu.memory_space<vmem>>, %arg3: memref<1x128xf32, #tpu.memory_space<vmem>>, %arg4: memref<768x128xf32, #tpu.memory_space<vmem>>) attributes {dimension_semantics = [#tpu.dimension_semantics<parallel>], iteration_bounds = array<i64: 1>, scalar_prefetch = 0 : i64, scratch_operands = 0 : i64, tpu.core_type = #tpu.core_type<tc>, window_params = [{transform_indices = @transform_0, window_bounds = array<i64: 768, 128>}, {pipeline_mode = #tpu.pipeline_mode<synchronous>, transform_indices = @transform_1, window_bounds = array<i64: 1, 128>}, {pipeline_mode = #tpu.pipeline_mode<synchronous>, transform_indices = @transform_2, window_bounds = array<i64: 1, 128>}, {transform_indices = @transform_3, window_bounds = array<i64: 768, 128>}]} {
    %c0 = arith.constant 0 : index
    %c0_0 = arith.constant 0 : index
    %0 = vector.load %arg1[%c0, %c0_0] : memref<768x128xf32, #tpu.memory_space<vmem>>, vector<768x128xf32>
    %c0_1 = arith.constant 0 : index
    %c0_2 = arith.constant 0 : index
    %1 = vector.load %arg2[%c0_1, %c0_2] : memref<1x128xf32, #tpu.memory_space<vmem>>, vector<1x128xf32>
    %2 = vector.broadcast %1 : vector<1x128xf32> to vector<768x128xf32>
    %3 = arith.mulf %0, %2 : vector<768x128xf32>
    %c0_3 = arith.constant 0 : index
    %c0_4 = arith.constant 0 : index
    %4 = vector.load %arg3[%c0_3, %c0_4] : memref<1x128xf32, #tpu.memory_space<vmem>>, vector<1x128xf32>
    %5 = vector.broadcast %4 : vector<1x128xf32> to vector<768x128xf32>
    %6 = arith.addf %3, %5 : vector<768x128xf32>
    %cst = arith.constant 0.000000e+00 : f32
    %7 = vector.broadcast %cst : f32 to vector<768x128xf32>
    %8 = arith.maximumf %6, %7 : vector<768x128xf32>
    %c0_5 = arith.constant 0 : index
    %c0_6 = arith.constant 0 : index
    %9 = vector.load %arg4[%c0_5, %c0_6] : memref<768x128xf32, #tpu.memory_space<vmem>>, vector<768x128xf32>
    tpu.vector_store %arg4[%c0_5, %c0_6], %8 {strides = array<i32>} : memref<768x128xf32, #tpu.memory_space<vmem>>, vector<768x128xf32>,
    return
  }
  func.func @transform_0(%arg0: i32) -> (i32, i32) {
    %c0_i32 = arith.constant 0 : i32
    %c0_i32_0 = arith.constant 0 : i32
    return %arg0, %c0_i32 : i32, i32
  }
  func.func @transform_1(%arg0: i32) -> (i32, i32) {
    %c0_i32 = arith.constant 0 : i32
    %c0_i32_0 = arith.constant 0 : i32
    %c0_i32_1 = arith.constant 0 : i32
    return %c0_i32, %c0_i32_0 : i32, i32
  }
  func.func @transform_2(%arg0: i32) -> (i32, i32) {
    %c0_i32 = arith.constant 0 : i32
    %c0_i32_0 = arith.constant 0 : i32
    %c0_i32_1 = arith.constant 0 : i32
    return %c0_i32, %c0_i32_0 : i32, i32
  }
  func.func @transform_3(%arg0: i32) -> (i32, i32) {
    %c0_i32 = arith.constant 0 : i32
    %c0_i32_0 = arith.constant 0 : i32
    return %arg0, %c0_i32 : i32, i32
  }
}

module attributes {stable_mosaic.version = 11 : i64} {
  func.func @_conv2_kernel(%arg0: i32, %arg1: memref<1x24x24x128xf32, #tpu.memory_space<vmem>>, %arg2: memref<1x128xf32, #tpu.memory_space<vmem>>, %arg3: memref<1x128xf32, #tpu.memory_space<vmem>>, %arg4: memref<3x128x384xbf16, #tpu.memory_space<vmem>>, %arg5: memref<1x16x24x128xf32, #tpu.memory_space<vmem>>, %arg6: memref<1x2x128xf32, #tpu.memory_space<vmem>>) attributes {dimension_semantics = [#tpu.dimension_semantics<parallel>], iteration_bounds = array<i64: 2>, scalar_prefetch = 0 : i64, scratch_operands = 0 : i64, tpu.core_type = #tpu.core_type<tc>, window_params = [{transform_indices = @transform_0, window_bounds = array<i64: 1, 24, 24, 128>}, {pipeline_mode = #tpu.pipeline_mode<synchronous>, transform_indices = @transform_1, window_bounds = array<i64: 1, 128>}, {pipeline_mode = #tpu.pipeline_mode<synchronous>, transform_indices = @transform_2, window_bounds = array<i64: 1, 128>}, {pipeline_mode = #tpu.pipeline_mode<synchronous>, transform_indices = @transform_3, window_bounds = array<i64: 3, 128, 384>}, {transform_indices = @transform_4, window_bounds = array<i64: 1, 16, 24, 128>}, {transform_indices = @transform_5, window_bounds = array<i64: 1, 2, 128>}]} {
    %c0 = arith.constant 0 : index
    %c0_0 = arith.constant 0 : index
    %0 = vector.load %arg2[%c0, %c0_0] : memref<1x128xf32, #tpu.memory_space<vmem>>, vector<1x128xf32>
    %1 = vector.shape_cast %0 : vector<1x128xf32> to vector<1x1x128xf32>
    %c0_1 = arith.constant 0 : index
    %c0_2 = arith.constant 0 : index
    %2 = vector.load %arg3[%c0_1, %c0_2] : memref<1x128xf32, #tpu.memory_space<vmem>>, vector<1x128xf32>
    %3 = vector.shape_cast %2 : vector<1x128xf32> to vector<1x1x128xf32>
    %4 = tpu.iota {dimensions = array<i32: 1>} : vector<1x24x1xi32>
    %c16_i32 = arith.constant 16 : i32
    %5 = vector.broadcast %c16_i32 : i32 to vector<1x24x1xi32>
    %6 = arith.cmpi slt, %4, %5 : vector<1x24x1xi32>
    %c0_3 = arith.constant 0 : index
    %c2 = arith.constant 2 : index
    %c0_4 = arith.constant 0 : index
    %c0_5 = arith.constant 0 : index
    %7 = vector.load %arg1[%c0_3, %c2, %c0_4, %c0_5] : memref<1x24x24x128xf32, #tpu.memory_space<vmem>>, vector<1x16x24x128xf32>
    %8 = vector.shape_cast %7 : vector<1x16x24x128xf32> to vector<16x24x128xf32>
    %9 = vector.broadcast %1 : vector<1x1x128xf32> to vector<16x24x128xf32>
    %10 = arith.mulf %8, %9 : vector<16x24x128xf32>
    %11 = vector.broadcast %3 : vector<1x1x128xf32> to vector<16x24x128xf32>
    %12 = arith.addf %10, %11 : vector<16x24x128xf32>
    %cst = arith.constant 0.000000e+00 : f32
    %13 = vector.broadcast %cst : f32 to vector<16x24x128xf32>
    %14 = arith.maximumf %12, %13 : vector<16x24x128xf32>
    %cst_6 = arith.constant 0.000000e+00 : f32
    %15 = vector.shape_cast %6 : vector<1x24x1xi1> to vector<1x24x1xi1>
    %16 = vector.broadcast %15 : vector<1x24x1xi1> to vector<16x24x128xi1>
    %17 = vector.broadcast %cst_6 : f32 to vector<16x24x128xf32>
    %18 = arith.select %16, %14, %17 : vector<16x24x128xi1>, vector<16x24x128xf32>
    %cst_7 = arith.constant 0.000000e+00 : f32
    %19 = vector.broadcast %cst_7 : f32 to vector<2x24x128xf32>
    %cst_8 = arith.constant 0.000000e+00 : f32
    %20 = vector.broadcast %cst_8 : f32 to vector<6x24x128xf32>
    %21 = tpu.concatenate %19, %18, %20 in 0 : vector<2x24x128xf32>, vector<16x24x128xf32>, vector<6x24x128xf32> -> vector<24x24x128xf32>
    %22 = vector.shape_cast %21 : vector<24x24x128xf32> to vector<576x128xf32>
    %23 = vector.extract_strided_slice %22 {offsets = [23, 0], sizes = [432, 128], strides = [1, 1]} : vector<576x128xf32> to vector<432x128xf32>
    %c0_9 = arith.constant 0 : index
    %c0_10 = arith.constant 0 : index
    %c0_11 = arith.constant 0 : index
    %24 = vector.load %arg4[%c0_9, %c0_10, %c0_11] : memref<3x128x384xbf16, #tpu.memory_space<vmem>>, vector<1x128x384xbf16>
    %25 = vector.shape_cast %24 : vector<1x128x384xbf16> to vector<128x384xbf16>
    %26 = vector.extract_strided_slice %23 {offsets = [0, 0], sizes = [408, 128], strides = [1, 1]} : vector<432x128xf32> to vector<408x128xf32>
    %27 = arith.truncf %26 : vector<408x128xf32> to vector<408x128xbf16>
    %28 = vector.extract_strided_slice %25 {offsets = [0, 0], sizes = [128, 256], strides = [1, 1]} : vector<128x384xbf16> to vector<128x256xbf16>
    %cst_12 = arith.constant dense<0.000000e+00> : vector<408x256xf32>
    %29 = tpu.matmul %27, %28, %cst_12 {dimension_numbers = #tpu.dot_dimension_numbers<[1], [0], [0], [1], [0, 0, 1, 1], [], []>} : vector<408x128xbf16>, vector<128x256xbf16>, vector<408x256xf32> -> vector<408x256xf32>
    %30 = vector.extract_strided_slice %29 {offsets = [0, 0], sizes = [384, 128], strides = [1, 1]} : vector<408x256xf32> to vector<384x128xf32>
    %31 = vector.extract_strided_slice %29 {offsets = [24, 128], sizes = [384, 128], strides = [1, 1]} : vector<408x256xf32> to vector<384x128xf32>
    %32 = arith.addf %30, %31 : vector<384x128xf32>
    %33 = vector.extract_strided_slice %23 {offsets = [48, 0], sizes = [384, 128], strides = [1, 1]} : vector<432x128xf32> to vector<384x128xf32>
    %34 = arith.truncf %33 : vector<384x128xf32> to vector<384x128xbf16>
    %35 = vector.extract_strided_slice %25 {offsets = [0, 256], sizes = [128, 128], strides = [1, 1]} : vector<128x384xbf16> to vector<128x128xbf16>
    %cst_13 = arith.constant dense<0.000000e+00> : vector<384x128xf32>
    %36 = tpu.matmul %34, %35, %cst_13 {dimension_numbers = #tpu.dot_dimension_numbers<[1], [0], [0], [1], [0, 0, 1, 1], [], []>} : vector<384x128xbf16>, vector<128x128xbf16>, vector<384x128xf32> -> vector<384x128xf32>
    %37 = arith.addf %32, %36 : vector<384x128xf32>
    %38 = vector.extract_strided_slice %22 {offsets = [24, 0], sizes = [432, 128], strides = [1, 1]} : vector<576x128xf32> to vector<432x128xf32>
    %c1 = arith.constant 1 : index
    %c0_14 = arith.constant 0 : index
    %c0_15 = arith.constant 0 : index
    %39 = vector.load %arg4[%c1, %c0_14, %c0_15] : memref<3x128x384xbf16, #tpu.memory_space<vmem>>, vector<1x128x384xbf16>
    %40 = vector.shape_cast %39 : vector<1x128x384xbf16> to vector<128x384xbf16>
    %41 = vector.extract_strided_slice %38 {offsets = [0, 0], sizes = [408, 128], strides = [1, 1]} : vector<432x128xf32> to vector<408x128xf32>
    %42 = arith.truncf %41 : vector<408x128xf32> to vector<408x128xbf16>
    %43 = vector.extract_strided_slice %40 {offsets = [0, 0], sizes = [128, 256], strides = [1, 1]} : vector<128x384xbf16> to vector<128x256xbf16>
    %cst_16 = arith.constant dense<0.000000e+00> : vector<408x256xf32>
    %44 = tpu.matmul %42, %43, %cst_16 {dimension_numbers = #tpu.dot_dimension_numbers<[1], [0], [0], [1], [0, 0, 1, 1], [], []>} : vector<408x128xbf16>, vector<128x256xbf16>, vector<408x256xf32> -> vector<408x256xf32>
    %45 = vector.extract_strided_slice %44 {offsets = [0, 0], sizes = [384, 128], strides = [1, 1]} : vector<408x256xf32> to vector<384x128xf32>
    %46 = arith.addf %37, %45 : vector<384x128xf32>
    %47 = vector.extract_strided_slice %44 {offsets = [24, 128], sizes = [384, 128], strides = [1, 1]} : vector<408x256xf32> to vector<384x128xf32>
    %48 = arith.addf %46, %47 : vector<384x128xf32>
    %49 = vector.extract_strided_slice %38 {offsets = [48, 0], sizes = [384, 128], strides = [1, 1]} : vector<432x128xf32> to vector<384x128xf32>
    %50 = arith.truncf %49 : vector<384x128xf32> to vector<384x128xbf16>
    %51 = vector.extract_strided_slice %40 {offsets = [0, 256], sizes = [128, 128], strides = [1, 1]} : vector<128x384xbf16> to vector<128x128xbf16>
    %cst_17 = arith.constant dense<0.000000e+00> : vector<384x128xf32>
    %52 = tpu.matmul %50, %51, %cst_17 {dimension_numbers = #tpu.dot_dimension_numbers<[1], [0], [0], [1], [0, 0, 1, 1], [], []>} : vector<384x128xbf16>, vector<128x128xbf16>, vector<384x128xf32> -> vector<384x128xf32>
    %53 = arith.addf %48, %52 : vector<384x128xf32>
    %54 = vector.extract_strided_slice %22 {offsets = [25, 0], sizes = [432, 128], strides = [1, 1]} : vector<576x128xf32> to vector<432x128xf32>
    %c2_18 = arith.constant 2 : index
    %c0_19 = arith.constant 0 : index
    %c0_20 = arith.constant 0 : index
    %55 = vector.load %arg4[%c2_18, %c0_19, %c0_20] : memref<3x128x384xbf16, #tpu.memory_space<vmem>>, vector<1x128x384xbf16>
    %56 = vector.shape_cast %55 : vector<1x128x384xbf16> to vector<128x384xbf16>
    %57 = vector.extract_strided_slice %54 {offsets = [0, 0], sizes = [408, 128], strides = [1, 1]} : vector<432x128xf32> to vector<408x128xf32>
    %58 = arith.truncf %57 : vector<408x128xf32> to vector<408x128xbf16>
    %59 = vector.extract_strided_slice %56 {offsets = [0, 0], sizes = [128, 256], strides = [1, 1]} : vector<128x384xbf16> to vector<128x256xbf16>
    %cst_21 = arith.constant dense<0.000000e+00> : vector<408x256xf32>
    %60 = tpu.matmul %58, %59, %cst_21 {dimension_numbers = #tpu.dot_dimension_numbers<[1], [0], [0], [1], [0, 0, 1, 1], [], []>} : vector<408x128xbf16>, vector<128x256xbf16>, vector<408x256xf32> -> vector<408x256xf32>
    %61 = vector.extract_strided_slice %60 {offsets = [0, 0], sizes = [384, 128], strides = [1, 1]} : vector<408x256xf32> to vector<384x128xf32>
    %62 = arith.addf %53, %61 : vector<384x128xf32>
    %63 = vector.extract_strided_slice %60 {offsets = [24, 128], sizes = [384, 128], strides = [1, 1]} : vector<408x256xf32> to vector<384x128xf32>
    %64 = arith.addf %62, %63 : vector<384x128xf32>
    %65 = vector.extract_strided_slice %54 {offsets = [48, 0], sizes = [384, 128], strides = [1, 1]} : vector<432x128xf32> to vector<384x128xf32>
    %66 = arith.truncf %65 : vector<384x128xf32> to vector<384x128xbf16>
    %67 = vector.extract_strided_slice %56 {offsets = [0, 256], sizes = [128, 128], strides = [1, 1]} : vector<128x384xbf16> to vector<128x128xbf16>
    %cst_22 = arith.constant dense<0.000000e+00> : vector<384x128xf32>
    %68 = tpu.matmul %66, %67, %cst_22 {dimension_numbers = #tpu.dot_dimension_numbers<[1], [0], [0], [1], [0, 0, 1, 1], [], []>} : vector<384x128xbf16>, vector<128x128xbf16>, vector<384x128xf32> -> vector<384x128xf32>
    %69 = arith.addf %64, %68 : vector<384x128xf32>
    %70 = vector.shape_cast %69 : vector<384x128xf32> to vector<16x24x128xf32>
    %cst_23 = arith.constant 0.000000e+00 : f32
    %71 = vector.shape_cast %6 : vector<1x24x1xi1> to vector<1x24x1xi1>
    %72 = vector.broadcast %71 : vector<1x24x1xi1> to vector<16x24x128xi1>
    %73 = vector.broadcast %cst_23 : f32 to vector<16x24x128xf32>
    %74 = arith.select %72, %70, %73 : vector<16x24x128xi1>, vector<16x24x128xf32>
    %c0_24 = arith.constant 0 : index
    %c0_25 = arith.constant 0 : index
    %c0_26 = arith.constant 0 : index
    %c0_27 = arith.constant 0 : index
    %75 = vector.load %arg5[%c0_24, %c0_25, %c0_26, %c0_27] : memref<1x16x24x128xf32, #tpu.memory_space<vmem>>, vector<1x16x24x128xf32>
    %76 = vector.shape_cast %75 : vector<1x16x24x128xf32> to vector<16x24x128xf32>
    %77 = vector.shape_cast %74 : vector<16x24x128xf32> to vector<1x16x24x128xf32>
    tpu.vector_store %arg5[%c0_24, %c0_25, %c0_26, %c0_27], %77 {strides = array<i32>} : memref<1x16x24x128xf32, #tpu.memory_space<vmem>>, vector<1x16x24x128xf32>,
    %78 = vector.shape_cast %74 : vector<16x24x128xf32> to vector<384x128xf32>
    %cst_28 = arith.constant dense<0.000000e+00> : vector<128xf32>
    %79 = vector.multi_reduction <add>, %78, %cst_28 [0] : vector<384x128xf32> to vector<128xf32>
    %80 = vector.shape_cast %79 : vector<128xf32> to vector<1x128xf32>
    %81 = arith.mulf %78, %78 : vector<384x128xf32>
    %cst_29 = arith.constant dense<0.000000e+00> : vector<128xf32>
    %82 = vector.multi_reduction <add>, %81, %cst_29 [0] : vector<384x128xf32> to vector<128xf32>
    %83 = vector.shape_cast %82 : vector<128xf32> to vector<1x128xf32>
    %84 = tpu.concatenate %80, %83 in 0 : vector<1x128xf32>, vector<1x128xf32> -> vector<2x128xf32>
    %c0_30 = arith.constant 0 : index
    %c0_31 = arith.constant 0 : index
    %c0_32 = arith.constant 0 : index
    %85 = vector.load %arg6[%c0_30, %c0_31, %c0_32] : memref<1x2x128xf32, #tpu.memory_space<vmem>>, vector<1x2x128xf32>
    %86 = vector.shape_cast %85 : vector<1x2x128xf32> to vector<2x128xf32>
    %87 = vector.shape_cast %84 : vector<2x128xf32> to vector<1x2x128xf32>
    tpu.vector_store %arg6[%c0_30, %c0_31, %c0_32], %87 {strides = array<i32>} : memref<1x2x128xf32, #tpu.memory_space<vmem>>, vector<1x2x128xf32>,
    return
  }
  func.func @transform_0(%arg0: i32) -> (i32, i32, i32, i32) {
    %c0_i32 = arith.constant 0 : i32
    %c0_i32_0 = arith.constant 0 : i32
    %c0_i32_1 = arith.constant 0 : i32
    %c0_i32_2 = arith.constant 0 : i32
    return %arg0, %c0_i32, %c0_i32_0, %c0_i32_1 : i32, i32, i32, i32
  }
  func.func @transform_1(%arg0: i32) -> (i32, i32) {
    %c0_i32 = arith.constant 0 : i32
    %c0_i32_0 = arith.constant 0 : i32
    %c0_i32_1 = arith.constant 0 : i32
    return %c0_i32, %c0_i32_0 : i32, i32
  }
  func.func @transform_2(%arg0: i32) -> (i32, i32) {
    %c0_i32 = arith.constant 0 : i32
    %c0_i32_0 = arith.constant 0 : i32
    %c0_i32_1 = arith.constant 0 : i32
    return %c0_i32, %c0_i32_0 : i32, i32
  }
  func.func @transform_3(%arg0: i32) -> (i32, i32, i32) {
    %c0_i32 = arith.constant 0 : i32
    %c0_i32_0 = arith.constant 0 : i32
    %c0_i32_1 = arith.constant 0 : i32
    %c0_i32_2 = arith.constant 0 : i32
    return %c0_i32, %c0_i32_0, %c0_i32_1 : i32, i32, i32
  }
  func.func @transform_4(%arg0: i32) -> (i32, i32, i32, i32) {
    %c0_i32 = arith.constant 0 : i32
    %c0_i32_0 = arith.constant 0 : i32
    %c0_i32_1 = arith.constant 0 : i32
    %c0_i32_2 = arith.constant 0 : i32
    return %arg0, %c0_i32, %c0_i32_0, %c0_i32_1 : i32, i32, i32, i32
  }
  func.func @transform_5(%arg0: i32) -> (i32, i32, i32) {
    %c0_i32 = arith.constant 0 : i32
    %c0_i32_0 = arith.constant 0 : i32
    %c0_i32_1 = arith.constant 0 : i32
    return %arg0, %c0_i32, %c0_i32_0 : i32, i32, i32
  }
}

</mosaic_0001>

<bundles_post_ra>
// kernel: tile.8
= control target key start
LH: loop header
LB: loop body
LE: loop exit
PB: predicated region body
PF: predicated region fallthrough
CT: control target
= control target key end

     0   :  { %s22_s0 = inlined_call_operand.vmem [shape: f32[128], index: 0, kind: input, shape index: {}]   ;;  %s23_s1 = inlined_call_operand.vmem [shape: f32[4,128], index: 1, kind: output, shape index: {}]  }
   0x1   :  { %v4_v0 = vld [vmem:[%s22_s0] ss:$0 sm:$0xff] }
   0x2   :  { %5 = vst [vmem:[%s23_s1] sm:$0xf] %v4_v0 }

// kernel: up_forward.4
= control target key start
LH: loop header
LB: loop body
LE: loop exit
PB: predicated region body
PF: predicated region fallthrough
CT: control target
= control target key end

     0   :  { %s1247_s1 = inlined_call_operand.vmem [shape: bf16[128,512], index: 1, kind: input, shape index: {}]   ;;  %s1248_s0 = inlined_call_operand.vmem [shape: bf16[128,128], index: 0, kind: input, shape index: {}]   ;;  %s1249_s2 = inlined_call_operand.vmem [shape: f32[1,512], index: 2, kind: input, shape index: {}]   ;;  %s1250_s3 = inlined_call_operand.vmem [shape: f32[128,512], index: 3, kind: output, shape index: {}]  }
   0x1   :  { %v690_v0 = vld [vmem:[%s1247_s1 + $0xe0] sm:$0xf]  ;;  %v742_v1 = vld [vmem:[%s1247_s1 + $0xec] sm:$0xf0]  ;;  %v740_v2 = vld [vmem:[%s1247_s1 + $0xe4] sm:$0xf] }
   0x2   :  { %v691_v3 = vor.u32 %v742_v1, %v690_v0  ;;  %v692_v4 = vld [vmem:[%s1247_s1 + $0xf0] sm:$0xf0]  ;;  %v698_v5 = vld [vmem:[%s1247_s1 + $0xe8] sm:$0xf]  ;;  %v743_v6 = vld [vmem:[%s1247_s1 + $0xf4] sm:$0xf0] }
   0x3   :  { %v695_v7 = vor.u32 %v740_v2, %v692_v4  ;;  %v699_v8 = vor.u32 %v743_v6, %v698_v5  ;;  %v741_v9 = vld [vmem:[%s1247_s1 + $0xec] sm:$0xf]  ;;  %v700_v10 = vld [vmem:[%s1247_s1 + $0xf8] sm:$0xf0]  ;;  %v674_v11 = vld [vmem:[%s1247_s1 + $0xc0] sm:$0xf] }
   0x4   :  { %280 = vmatpush.bf16.msra.mxu0 %v691_v3  ;;  %v703_v12 = vor.u32 %v741_v9, %v700_v10  ;;  %v738_v13 = vld [vmem:[%s1247_s1 + $0xcc] sm:$0xf0]  ;;  %v736_v14 = vld [vmem:[%s1247_s1 + $0xc4] sm:$0xf]  ;;  %v676_v15 = vld [vmem:[%s1247_s1 + $0xd0] sm:$0xf0] }
   0x5   :  { %329 = vmatpush.bf16.msra.mxu1 %v695_v7  ;;  %378 = vmatpush.bf16.msra.mxu2 %v699_v8  ;;  %v675_v16 = vor.u32 %v738_v13, %v674_v11  ;;  %v679_v17 = vor.u32 %v736_v14, %v676_v15  ;;  %v682_v18 = vld [vmem:[%s1247_s1 + $0xc8] sm:$0xf]  ;;  %v739_v19 = vld [vmem:[%s1247_s1 + $0xd4] sm:$0xf0]  ;;  %v737_v20 = vld [vmem:[%s1247_s1 + $0xcc] sm:$0xf] }
   0x6   :  { %427 = vmatpush.bf16.msra.mxu3 %v703_v12  ;;  %v683_v21 = vor.u32 %v739_v19, %v682_v18  ;;  %v684_v22 = vld [vmem:[%s1247_s1 + $0xd8] sm:$0xf0]  ;;  %v658_v23 = vld [vmem:[%s1247_s1 + $0xa0] sm:$0xf]  ;;  %v734_v24 = vld [vmem:[%s1247_s1 + $0xac] sm:$0xf0] }
   0x7   :  { %v687_v25 = vor.u32 %v737_v20, %v684_v22  ;;  %v732_v26 = vld [vmem:[%s1247_s1 + $0xa4] sm:$0xf]  ;;  %v660_v27 = vld [vmem:[%s1247_s1 + $0xb0] sm:$0xf0]  ;;  %v666_v28 = vld [vmem:[%s1247_s1 + $0xa8] sm:$0xf]  ;;  %v659_v29 = vor.u32 %v734_v24, %v658_v23 }
   0x8   :  { %281 = vmatpush.bf16.msra.mxu0 %v675_v16  ;;  %v735_v30 = vld [vmem:[%s1247_s1 + $0xb4] sm:$0xf0]  ;;  %v733_v31 = vld [vmem:[%s1247_s1 + $0xac] sm:$0xf]  ;;  %v668_v32 = vld [vmem:[%s1247_s1 + $0xb8] sm:$0xf0]  ;;  %v663_v33 = vor.u32 %v732_v26, %v660_v27 }
   0x9   :  { %330 = vmatpush.bf16.msra.mxu1 %v679_v17  ;;  %379 = vmatpush.bf16.msra.mxu2 %v683_v21  ;;  %v667_v34 = vor.u32 %v735_v30, %v666_v28  ;;  %v642_v35 = vld [vmem:[%s1247_s1 + $0x80] sm:$0xf]  ;;  %v730_v36 = vld [vmem:[%s1247_s1 + $0x8c] sm:$0xf0]  ;;  %v728_v37 = vld [vmem:[%s1247_s1 + $0x84] sm:$0xf]  ;;  %v671_v38 = vor.u32 %v733_v31, %v668_v32 }
   0xa   :  { %428 = vmatpush.bf16.msra.mxu3 %v687_v25  ;;  %v644_v39 = vld [vmem:[%s1247_s1 + $0x90] sm:$0xf0]  ;;  %v650_v40 = vld [vmem:[%s1247_s1 + $0x88] sm:$0xf]  ;;  %v731_v41 = vld [vmem:[%s1247_s1 + $0x94] sm:$0xf0]  ;;  %v643_v44 = vor.u32 %v730_v36, %v642_v35 }
   0xb   :  { %v729_v42 = vld [vmem:[%s1247_s1 + $0x8c] sm:$0xf]  ;;  %v652_v43 = vld [vmem:[%s1247_s1 + $0x98] sm:$0xf0]  ;;  %v647_v45 = vor.u32 %v728_v37, %v644_v39  ;;  %v651_v46 = vor.u32 %v731_v41, %v650_v40  ;;  %v626_v47 = vld [vmem:[%s1247_s1 + $0x60] sm:$0xf] }
   0xc   :  { %282 = vmatpush.bf16.msra.mxu0 %v659_v29  ;;  %v726_v48 = vld [vmem:[%s1247_s1 + $0x6c] sm:$0xf0]  ;;  %v724_v49 = vld [vmem:[%s1247_s1 + $0x64] sm:$0xf]  ;;  %v655_v50 = vor.u32 %v729_v42, %v652_v43  ;;  %v628_v51 = vld [vmem:[%s1247_s1 + $0x70] sm:$0xf0] }
   0xd   :  { %331 = vmatpush.bf16.msra.mxu1 %v663_v33  ;;  %380 = vmatpush.bf16.msra.mxu2 %v667_v34  ;;  %v634_v52 = vld [vmem:[%s1247_s1 + $0x68] sm:$0xf]  ;;  %v727_v53 = vld [vmem:[%s1247_s1 + $0x74] sm:$0xf0]  ;;  %v725_v54 = vld [vmem:[%s1247_s1 + $0x6c] sm:$0xf]  ;;  %v627_v56 = vor.u32 %v726_v48, %v626_v47  ;;  %v631_v57 = vor.u32 %v724_v49, %v628_v51 }
   0xe   :  { %429 = vmatpush.bf16.msra.mxu3 %v671_v38  ;;  %v636_v55 = vld [vmem:[%s1247_s1 + $0x78] sm:$0xf0]  ;;  %v635_v58 = vor.u32 %v727_v53, %v634_v52  ;;  %v610_v59 = vld [vmem:[%s1247_s1 + $0x40] sm:$0xf]  ;;  %v722_v60 = vld [vmem:[%s1247_s1 + $0x4c] sm:$0xf0] }
   0xf   :  { %v720_v61 = vld [vmem:[%s1247_s1 + $0x44] sm:$0xf]  ;;  %v639_v62 = vor.u32 %v725_v54, %v636_v55  ;;  %v612_v63 = vld [vmem:[%s1247_s1 + $0x50] sm:$0xf0]  ;;  %v618_v0 = vld [vmem:[%s1247_s1 + $0x48] sm:$0xf]  ;;  %v611_v4 = vor.u32 %v722_v60, %v610_v59 }
  0x10   :  { %283 = vmatpush.bf16.msra.mxu0 %v643_v44  ;;  %v723_v1 = vld [vmem:[%s1247_s1 + $0x54] sm:$0xf0]  ;;  %v721_v2 = vld [vmem:[%s1247_s1 + $0x4c] sm:$0xf]  ;;  %v620_v3 = vld [vmem:[%s1247_s1 + $0x58] sm:$0xf0]  ;;  %v615_v5 = vor.u32 %v720_v61, %v612_v63 }
  0x11   :  { %332 = vmatpush.bf16.msra.mxu1 %v647_v45  ;;  %381 = vmatpush.bf16.msra.mxu2 %v651_v46  ;;  %v619_v6 = vor.u32 %v723_v1, %v618_v0  ;;  %v594_v7 = vld [vmem:[%s1247_s1 + $0x20] sm:$0xf]  ;;  %v718_v8 = vld [vmem:[%s1247_s1 + $0x2c] sm:$0xf0]  ;;  %v716_v9 = vld [vmem:[%s1247_s1 + $0x24] sm:$0xf]  ;;  %v623_v10 = vor.u32 %v721_v2, %v620_v3 }
  0x12   :  { %430 = vmatpush.bf16.msra.mxu3 %v655_v50  ;;  %v596_v11 = vld [vmem:[%s1247_s1 + $0x30] sm:$0xf0]  ;;  %v602_v12 = vld [vmem:[%s1247_s1 + $0x28] sm:$0xf]  ;;  %v719_v13 = vld [vmem:[%s1247_s1 + $0x34] sm:$0xf0]  ;;  %v595_v16 = vor.u32 %v718_v8, %v594_v7 }
  0x13   :  { %v717_v14 = vld [vmem:[%s1247_s1 + $0x2c] sm:$0xf]  ;;  %v604_v15 = vld [vmem:[%s1247_s1 + $0x38] sm:$0xf0]  ;;  %v599_v17 = vor.u32 %v716_v9, %v596_v11  ;;  %v603_v18 = vor.u32 %v719_v13, %v602_v12  ;;  %v578_v19 = vld [vmem:[%s1247_s1] sm:$0xf] }
  0x14   :  { %284 = vmatpush.bf16.msra.mxu0 %v627_v56  ;;  %v714_v20 = vld [vmem:[%s1247_s1 + $0xc] sm:$0xf0]  ;;  %v712_v21 = vld [vmem:[%s1247_s1 + $0x4] sm:$0xf]  ;;  %v607_v22 = vor.u32 %v717_v14, %v604_v15  ;;  %v580_v23 = vld [vmem:[%s1247_s1 + $0x10] sm:$0xf0] }
  0x15   :  { %333 = vmatpush.bf16.msra.mxu1 %v631_v57  ;;  %382 = vmatpush.bf16.msra.mxu2 %v635_v58  ;;  %v586_v24 = vld [vmem:[%s1247_s1 + $0x8] sm:$0xf]  ;;  %v715_v25 = vld [vmem:[%s1247_s1 + $0x14] sm:$0xf0]  ;;  %v713_v26 = vld [vmem:[%s1247_s1 + $0xc] sm:$0xf]  ;;  %v579_v28 = vor.u32 %v714_v20, %v578_v19  ;;  %v583_v29 = vor.u32 %v712_v21, %v580_v23 }
  0x16   :  { %431 = vmatpush.bf16.msra.mxu3 %v639_v62  ;;  %v588_v27 = vld [vmem:[%s1247_s1 + $0x18] sm:$0xf0]  ;;  %v587_v30 = vor.u32 %v715_v25, %v586_v24  ;;  %v704_v32 = vld [vmem:[%s1248_s0] sm:$0xff]  ;;  %v705_v33 = vld [vmem:[%s1248_s0 + $0x8] sm:$0xff] }
  0x17   :  { %v591_v31 = vor.u32 %v713_v26, %v588_v27  ;;  %v706_v34 = vld [vmem:[%s1248_s0 + $0x10] sm:$0xff]  ;;  %v707_v35 = vld [vmem:[%s1248_s0 + $0x18] sm:$0xff]  ;;  %v708_v36 = vld [vmem:[%s1248_s0 + $0x20] sm:$0xff] }
  0x18   :  { %285 = vmatpush.bf16.msra.mxu0 %v611_v4  ;;  %v709_v37 = vld [vmem:[%s1248_s0 + $0x28] sm:$0xff]  ;;  %v710_v38 = vld [vmem:[%s1248_s0 + $0x30] sm:$0xff]  ;;  %v711_v39 = vld [vmem:[%s1248_s0 + $0x38] sm:$0xff] }
  0x19   :  { %334 = vmatpush.bf16.msra.mxu1 %v615_v5  ;;  %383 = vmatpush.bf16.msra.mxu2 %v619_v6  ;;  %v62_v40 = vld [vmem:[%s1249_s2] sm:$0xf] }
  0x1a   :  { %432 = vmatpush.bf16.msra.mxu3 %v623_v10  ;;  %v983_v41 = vperm.slane %v62_v40, 0  ;;  %v985_v42 = vperm.slane %v62_v40, 1  ;;  %v995_v47 = vperm.slane %v62_v40, 2  ;;  %v997_v48 = vperm.slane %v62_v40, 3 }
  0x1c   :  { %286 = vmatpush.bf16.msra.mxu0 %v595_v16 }
  0x1d   :  { %335 = vmatpush.bf16.msra.mxu1 %v599_v17  ;;  %384 = vmatpush.bf16.msra.mxu2 %v603_v18 }
  0x1e   :  { %433 = vmatpush.bf16.msra.mxu3 %v607_v22 }
  0x20   :  { %287 = vmatpush.bf16.msra.mxu0 %v579_v28 }
  0x21   :  { %336 = vmatpush.bf16.msra.mxu1 %v583_v29  ;;  %385 = vmatpush.bf16.msra.mxu2 %v587_v30 }
  0x22   :  { %434 = vmatpush.bf16.msra.mxu3 %v591_v31 }
  0x23   :  { %288 = vmatmul.bf16.vlgmr.msra.gmra.mxu0 %v704_v32 }
  0x24   :  { %337 = vmatmul.bf16.vlgmr.msra.gmra.mxu1 %v704_v32  ;;  %386 = vmatmul.bf16.vlgmr.msra.gmra.mxu2 %v704_v32 }
  0x25   :  { %435 = vmatmul.bf16.vlgmr.msra.gmra.mxu3 %v704_v32 }
  0x33   :  { %293 = vmatmul.bf16.gmra.mxu0 %v705_v33 }
  0x34   :  { %342 = vmatmul.bf16.gmra.mxu1 %v705_v33  ;;  %391 = vmatmul.bf16.gmra.mxu2 %v705_v33 }
  0x35   :  { %440 = vmatmul.bf16.gmra.mxu3 %v705_v33 }
  0x43   :  { %298 = vmatmul.bf16.gmra.mxu0 %v706_v34 }
  0x44   :  { %347 = vmatmul.bf16.gmra.mxu1 %v706_v34  ;;  %396 = vmatmul.bf16.gmra.mxu2 %v706_v34 }
  0x45   :  { %445 = vmatmul.bf16.gmra.mxu3 %v706_v34 }
  0x53   :  { %303 = vmatmul.bf16.gmra.mxu0 %v707_v35 }
  0x54   :  { %352 = vmatmul.bf16.gmra.mxu1 %v707_v35  ;;  %401 = vmatmul.bf16.gmra.mxu2 %v707_v35 }
  0x55   :  { %450 = vmatmul.bf16.gmra.mxu3 %v707_v35 }
  0x63   :  { %308 = vmatmul.bf16.gmra.mxu0 %v708_v36 }
  0x64   :  { %357 = vmatmul.bf16.gmra.mxu1 %v708_v36  ;;  %406 = vmatmul.bf16.gmra.mxu2 %v708_v36 }
  0x65   :  { %455 = vmatmul.bf16.gmra.mxu3 %v708_v36 }
  0x73   :  { %313 = vmatmul.bf16.gmra.mxu0 %v709_v37 }
  0x74   :  { %362 = vmatmul.bf16.gmra.mxu1 %v709_v37  ;;  %411 = vmatmul.bf16.gmra.mxu2 %v709_v37 }
  0x75   :  { %460 = vmatmul.bf16.gmra.mxu3 %v709_v37 }
  0x83   :  { %318 = vmatmul.bf16.gmra.mxu0 %v710_v38 }
  0x84   :  { %367 = vmatmul.bf16.gmra.mxu1 %v710_v38  ;;  %416 = vmatmul.bf16.gmra.mxu2 %v710_v38 }
  0x85   :  { %465 = vmatmul.bf16.gmra.mxu3 %v710_v38 }
  0x93   :  { %323 = vmatmul.bf16.gmra.mxu0 %v711_v39 }
  0x94   :  { %372 = vmatmul.bf16.gmra.mxu1 %v711_v39  ;;  %421 = vmatmul.bf16.gmra.mxu2 %v711_v39 }
  0x95   :  { %470 = vmatmul.bf16.gmra.mxu3 %v711_v39 }
  0xa0   :  { %v289_v43 = vpop.f32.mrf.mxu0 }
  0xa1   :  { %v290_v44 = vadd.f32 %v289_v43, %v983_v41  ;;  %v338_v45 = vpop.f32.mrf.mxu1 }
  0xa2   :  { %v339_v46 = vadd.f32 %v338_v45, %v985_v42 }
  0xa3   :  { %476 = vst [vmem:[%s1250_s3] sm:$0xff] %v290_v44 }
  0xa4   :  { %477 = vst [vmem:[%s1250_s3 + $0x8] sm:$0xff] %v339_v46 }
  0xa7   :  { %v387_v49 = vpop.f32.mrf.mxu2 }
  0xa8   :  { %v388_v50 = vadd.f32 %v387_v49, %v995_v47  ;;  %v436_v51 = vpop.f32.mrf.mxu3  ;;  %v291_v52 = vpop.f32.mrf.mxu0 }
  0xa9   :  { %v437_v53 = vadd.f32 %v436_v51, %v997_v48  ;;  %v292_v54 = vadd.f32 %v291_v52, %v983_v41  ;;  %v340_v55 = vpop.f32.mrf.mxu1 }
  0xaa   :  { %478 = vst [vmem:[%s1250_s3 + $0x10] sm:$0xff] %v388_v50  ;;  %v341_v56 = vadd.f32 %v340_v55, %v985_v42 }
  0xab   :  { %479 = vst [vmem:[%s1250_s3 + $0x18] sm:$0xff] %v437_v53 }
  0xac   :  { %480 = vst [vmem:[%s1250_s3 + $0x20] sm:$0xff] %v292_v54 }
  0xad   :  { %481 = vst [vmem:[%s1250_s3 + $0x28] sm:$0xff] %v341_v56 }
  0xaf   :  { %v389_v57 = vpop.f32.mrf.mxu2 }
  0xb0   :  { %v390_v58 = vadd.f32 %v389_v57, %v995_v47  ;;  %v438_v59 = vpop.f32.mrf.mxu3  ;;  %v294_v60 = vpop.f32.mrf.mxu0 }
  0xb1   :  { %v439_v61 = vadd.f32 %v438_v59, %v997_v48  ;;  %v295_v62 = vadd.f32 %v294_v60, %v983_v41  ;;  %v343_v63 = vpop.f32.mrf.mxu1 }
  0xb2   :  { %482 = vst [vmem:[%s1250_s3 + $0x30] sm:$0xff] %v390_v58  ;;  %v344_v0 = vadd.f32 %v343_v63, %v985_v42 }
  0xb3   :  { %483 = vst [vmem:[%s1250_s3 + $0x38] sm:$0xff] %v439_v61 }
  0xb4   :  { %484 = vst [vmem:[%s1250_s3 + $0x40] sm:$0xff] %v295_v62 }
  0xb5   :  { %485 = vst [vmem:[%s1250_s3 + $0x48] sm:$0xff] %v344_v0 }
  0xb7   :  { %v392_v1 = vpop.f32.mrf.mxu2 }
  0xb8   :  { %v393_v2 = vadd.f32 %v392_v1, %v995_v47  ;;  %v441_v3 = vpop.f32.mrf.mxu3  ;;  %v296_v4 = vpop.f32.mrf.mxu0 }
  0xb9   :  { %v442_v5 = vadd.f32 %v441_v3, %v997_v48  ;;  %v297_v6 = vadd.f32 %v296_v4, %v983_v41  ;;  %v345_v7 = vpop.f32.mrf.mxu1 }
  0xba   :  { %486 = vst [vmem:[%s1250_s3 + $0x50] sm:$0xff] %v393_v2  ;;  %v346_v8 = vadd.f32 %v345_v7, %v985_v42 }
  0xbb   :  { %487 = vst [vmem:[%s1250_s3 + $0x58] sm:$0xff] %v442_v5 }
  0xbc   :  { %488 = vst [vmem:[%s1250_s3 + $0x60] sm:$0xff] %v297_v6 }
  0xbd   :  { %489 = vst [vmem:[%s1250_s3 + $0x68] sm:$0xff] %v346_v8 }
  0xbf   :  { %v394_v9 = vpop.f32.mrf.mxu2 }
  0xc0   :  { %v395_v10 = vadd.f32 %v394_v9, %v995_v47  ;;  %v443_v11 = vpop.f32.mrf.mxu3  ;;  %v299_v12 = vpop.f32.mrf.mxu0 }
  0xc1   :  { %v444_v13 = vadd.f32 %v443_v11, %v997_v48  ;;  %v300_v14 = vadd.f32 %v299_v12, %v983_v41  ;;  %v348_v15 = vpop.f32.mrf.mxu1 }
  0xc2   :  { %490 = vst [vmem:[%s1250_s3 + $0x70] sm:$0xff] %v395_v10  ;;  %v349_v16 = vadd.f32 %v348_v15, %v985_v42 }
  0xc3   :  { %491 = vst [vmem:[%s1250_s3 + $0x78] sm:$0xff] %v444_v13 }
  0xc4   :  { %492 = vst [vmem:[%s1250_s3 + $0x80] sm:$0xff] %v300_v14 }
  0xc5   :  { %493 = vst [vmem:[%s1250_s3 + $0x88] sm:$0xff] %v349_v16 }
  0xc7   :  { %v397_v17 = vpop.f32.mrf.mxu2 }
  0xc8   :  { %v398_v18 = vadd.f32 %v397_v17, %v995_v47  ;;  %v446_v19 = vpop.f32.mrf.mxu3  ;;  %v301_v20 = vpop.f32.mrf.mxu0 }
  0xc9   :  { %v447_v21 = vadd.f32 %v446_v19, %v997_v48  ;;  %v302_v22 = vadd.f32 %v301_v20, %v983_v41  ;;  %v350_v23 = vpop.f32.mrf.mxu1 }
  0xca   :  { %494 = vst [vmem:[%s1250_s3 + $0x90] sm:$0xff] %v398_v18  ;;  %v351_v24 = vadd.f32 %v350_v23, %v985_v42 }
  0xcb   :  { %495 = vst [vmem:[%s1250_s3 + $0x98] sm:$0xff] %v447_v21 }
  0xcc   :  { %496 = vst [vmem:[%s1250_s3 + $0xa0] sm:$0xff] %v302_v22 }
  0xcd   :  { %497 = vst [vmem:[%s1250_s3 + $0xa8] sm:$0xff] %v351_v24 }
  0xcf   :  { %v399_v25 = vpop.f32.mrf.mxu2 }
  0xd0   :  { %v400_v26 = vadd.f32 %v399_v25, %v995_v47  ;;  %v448_v27 = vpop.f32.mrf.mxu3  ;;  %v304_v28 = vpop.f32.mrf.mxu0 }
  0xd1   :  { %v449_v29 = vadd.f32 %v448_v27, %v997_v48  ;;  %v305_v30 = vadd.f32 %v304_v28, %v983_v41  ;;  %v353_v31 = vpop.f32.mrf.mxu1 }
  0xd2   :  { %498 = vst [vmem:[%s1250_s3 + $0xb0] sm:$0xff] %v400_v26  ;;  %v354_v32 = vadd.f32 %v353_v31, %v985_v42 }
  0xd3   :  { %499 = vst [vmem:[%s1250_s3 + $0xb8] sm:$0xff] %v449_v29 }
  0xd4   :  { %500 = vst [vmem:[%s1250_s3 + $0xc0] sm:$0xff] %v305_v30 }
  0xd5   :  { %501 = vst [vmem:[%s1250_s3 + $0xc8] sm:$0xff] %v354_v32 }
  0xd7   :  { %v402_v33 = vpop.f32.mrf.mxu2 }
  0xd8   :  { %v403_v34 = vadd.f32 %v402_v33, %v995_v47  ;;  %v451_v35 = vpop.f32.mrf.mxu3  ;;  %v306_v36 = vpop.f32.mrf.mxu0 }
  0xd9   :  { %v452_v37 = vadd.f32 %v451_v35, %v997_v48  ;;  %v307_v38 = vadd.f32 %v306_v36, %v983_v41  ;;  %v355_v39 = vpop.f32.mrf.mxu1 }
  0xda   :  { %502 = vst [vmem:[%s1250_s3 + $0xd0] sm:$0xff] %v403_v34  ;;  %v356_v40 = vadd.f32 %v355_v39, %v985_v42 }
  0xdb   :  { %503 = vst [vmem:[%s1250_s3 + $0xd8] sm:$0xff] %v452_v37 }
  0xdc   :  { %504 = vst [vmem:[%s1250_s3 + $0xe0] sm:$0xff] %v307_v38 }
  0xdd   :  { %505 = vst [vmem:[%s1250_s3 + $0xe8] sm:$0xff] %v356_v40 }
  0xdf   :  { %v404_v43 = vpop.f32.mrf.mxu2 }
  0xe0   :  { %v405_v44 = vadd.f32 %v404_v43, %v995_v47  ;;  %v453_v45 = vpop.f32.mrf.mxu3  ;;  %v309_v46 = vpop.f32.mrf.mxu0 }
  0xe1   :  { %v454_v49 = vadd.f32 %v453_v45, %v997_v48  ;;  %v310_v50 = vadd.f32 %v309_v46, %v983_v41  ;;  %v358_v51 = vpop.f32.mrf.mxu1 }
  0xe2   :  { %506 = vst [vmem:[%s1250_s3 + $0xf0] sm:$0xff] %v405_v44  ;;  %v359_v52 = vadd.f32 %v358_v51, %v985_v42 }
  0xe3   :  { %507 = vst [vmem:[%s1250_s3 + $0xf8] sm:$0xff] %v454_v49 }
  0xe4   :  { %508 = vst [vmem:[%s1250_s3 + $0x100] sm:$0xff] %v310_v50 }
  0xe5   :  { %509 = vst [vmem:[%s1250_s3 + $0x108] sm:$0xff] %v359_v52 }
  0xe7   :  { %v407_v53 = vpop.f32.mrf.mxu2 }
  0xe8   :  { %v408_v54 = vadd.f32 %v407_v53, %v995_v47  ;;  %v456_v55 = vpop.f32.mrf.mxu3  ;;  %v311_v56 = vpop.f32.mrf.mxu0 }
  0xe9   :  { %v457_v57 = vadd.f32 %v456_v55, %v997_v48  ;;  %v312_v58 = vadd.f32 %v311_v56, %v983_v41  ;;  %v360_v59 = vpop.f32.mrf.mxu1 }
  0xea   :  { %510 = vst [vmem:[%s1250_s3 + $0x110] sm:$0xff] %v408_v54  ;;  %v361_v60 = vadd.f32 %v360_v59, %v985_v42 }
  0xeb   :  { %511 = vst [vmem:[%s1250_s3 + $0x118] sm:$0xff] %v457_v57 }
  0xec   :  { %512 = vst [vmem:[%s1250_s3 + $0x120] sm:$0xff] %v312_v58 }
  0xed   :  { %513 = vst [vmem:[%s1250_s3 + $0x128] sm:$0xff] %v361_v60 }
  0xef   :  { %v409_v61 = vpop.f32.mrf.mxu2 }
  0xf0   :  { %v410_v62 = vadd.f32 %v409_v61, %v995_v47  ;;  %v458_v63 = vpop.f32.mrf.mxu3  ;;  %v314_v0 = vpop.f32.mrf.mxu0 }
  0xf1   :  { %v459_v1 = vadd.f32 %v458_v63, %v997_v48  ;;  %v315_v2 = vadd.f32 %v314_v0, %v983_v41  ;;  %v363_v3 = vpop.f32.mrf.mxu1 }
  0xf2   :  { %514 = vst [vmem:[%s1250_s3 + $0x130] sm:$0xff] %v410_v62  ;;  %v364_v4 = vadd.f32 %v363_v3, %v985_v42 }
  0xf3   :  { %515 = vst [vmem:[%s1250_s3 + $0x138] sm:$0xff] %v459_v1 }
  0xf4   :  { %516 = vst [vmem:[%s1250_s3 + $0x140] sm:$0xff] %v315_v2 }
  0xf5   :  { %517 = vst [vmem:[%s1250_s3 + $0x148] sm:$0xff] %v364_v4 }
  0xf7   :  { %v412_v5 = vpop.f32.mrf.mxu2 }
  0xf8   :  { %v413_v6 = vadd.f32 %v412_v5, %v995_v47  ;;  %v461_v7 = vpop.f32.mrf.mxu3  ;;  %v316_v8 = vpop.f32.mrf.mxu0 }
  0xf9   :  { %v462_v9 = vadd.f32 %v461_v7, %v997_v48  ;;  %v317_v10 = vadd.f32 %v316_v8, %v983_v41  ;;  %v365_v11 = vpop.f32.mrf.mxu1 }
  0xfa   :  { %518 = vst [vmem:[%s1250_s3 + $0x150] sm:$0xff] %v413_v6  ;;  %v366_v12 = vadd.f32 %v365_v11, %v985_v42 }
  0xfb   :  { %519 = vst [vmem:[%s1250_s3 + $0x158] sm:$0xff] %v462_v9 }
  0xfc   :  { %520 = vst [vmem:[%s1250_s3 + $0x160] sm:$0xff] %v317_v10 }
  0xfd   :  { %521 = vst [vmem:[%s1250_s3 + $0x168] sm:$0xff] %v366_v12 }
  0xff   :  { %v414_v13 = vpop.f32.mrf.mxu2 }
 0x100   :  { %v415_v14 = vadd.f32 %v414_v13, %v995_v47  ;;  %v463_v15 = vpop.f32.mrf.mxu3  ;;  %v319_v16 = vpop.f32.mrf.mxu0 }
 0x101   :  { %v464_v17 = vadd.f32 %v463_v15, %v997_v48  ;;  %v320_v18 = vadd.f32 %v319_v16, %v983_v41  ;;  %v368_v19 = vpop.f32.mrf.mxu1 }
 0x102   :  { %522 = vst [vmem:[%s1250_s3 + $0x170] sm:$0xff] %v415_v14  ;;  %v369_v20 = vadd.f32 %v368_v19, %v985_v42 }
 0x103   :  { %523 = vst [vmem:[%s1250_s3 + $0x178] sm:$0xff] %v464_v17 }
 0x104   :  { %524 = vst [vmem:[%s1250_s3 + $0x180] sm:$0xff] %v320_v18 }
 0x105   :  { %525 = vst [vmem:[%s1250_s3 + $0x188] sm:$0xff] %v369_v20 }
 0x107   :  { %v417_v21 = vpop.f32.mrf.mxu2 }
 0x108   :  { %v418_v22 = vadd.f32 %v417_v21, %v995_v47  ;;  %v466_v23 = vpop.f32.mrf.mxu3  ;;  %v321_v24 = vpop.f32.mrf.mxu0 }
 0x109   :  { %v467_v25 = vadd.f32 %v466_v23, %v997_v48  ;;  %v322_v26 = vadd.f32 %v321_v24, %v983_v41  ;;  %v370_v27 = vpop.f32.mrf.mxu1 }
 0x10a   :  { %526 = vst [vmem:[%s1250_s3 + $0x190] sm:$0xff] %v418_v22  ;;  %v371_v28 = vadd.f32 %v370_v27, %v985_v42 }
 0x10b   :  { %527 = vst [vmem:[%s1250_s3 + $0x198] sm:$0xff] %v467_v25 }
 0x10c   :  { %528 = vst [vmem:[%s1250_s3 + $0x1a0] sm:$0xff] %v322_v26 }
 0x10d   :  { %529 = vst [vmem:[%s1250_s3 + $0x1a8] sm:$0xff] %v371_v28 }
 0x10f   :  { %v419_v29 = vpop.f32.mrf.mxu2 }
 0x110   :  { %v420_v30 = vadd.f32 %v419_v29, %v995_v47  ;;  %v468_v31 = vpop.f32.mrf.mxu3  ;;  %v324_v32 = vpop.f32.mrf.mxu0 }
 0x111   :  { %v469_v33 = vadd.f32 %v468_v31, %v997_v48  ;;  %v325_v34 = vadd.f32 %v324_v32, %v983_v41  ;;  %v373_v35 = vpop.f32.mrf.mxu1 }
 0x112   :  { %530 = vst [vmem:[%s1250_s3 + $0x1b0] sm:$0xff] %v420_v30  ;;  %v374_v36 = vadd.f32 %v373_v35, %v985_v42 }
 0x113   :  { %531 = vst [vmem:[%s1250_s3 + $0x1b8] sm:$0xff] %v469_v33 }
 0x114   :  { %532 = vst [vmem:[%s1250_s3 + $0x1c0] sm:$0xff] %v325_v34 }
 0x115   :  { %533 = vst [vmem:[%s1250_s3 + $0x1c8] sm:$0xff] %v374_v36 }
 0x117   :  { %v422_v37 = vpop.f32.mrf.mxu2 }
 0x118   :  { %v423_v38 = vadd.f32 %v422_v37, %v995_v47  ;;  %v471_v39 = vpop.f32.mrf.mxu3  ;;  %v326_v40 = vpop.f32.mrf.mxu0 }
 0x119   :  { %v472_v43 = vadd.f32 %v471_v39, %v997_v48  ;;  %v327_v44 = vadd.f32 %v326_v40, %v983_v41  ;;  %v375_v45 = vpop.f32.mrf.mxu1 }
 0x11a   :  { %534 = vst [vmem:[%s1250_s3 + $0x1d0] sm:$0xff] %v423_v38  ;;  %v376_v46 = vadd.f32 %v375_v45, %v985_v42 }
 0x11b   :  { %535 = vst [vmem:[%s1250_s3 + $0x1d8] sm:$0xff] %v472_v43 }
 0x11c   :  { %536 = vst [vmem:[%s1250_s3 + $0x1e0] sm:$0xff] %v327_v44 }
 0x11d   :  { %537 = vst [vmem:[%s1250_s3 + $0x1e8] sm:$0xff] %v376_v46 }
 0x11f   :  { %v424_v41 = vpop.f32.mrf.mxu2 }
 0x120   :  { %v425_v49 = vadd.f32 %v424_v41, %v995_v47  ;;  %v473_v50 = vpop.f32.mrf.mxu3 }
 0x121   :  { %v474_v51 = vadd.f32 %v473_v50, %v997_v48 }
 0x122   :  { %538 = vst [vmem:[%s1250_s3 + $0x1f0] sm:$0xff] %v425_v49 }
 0x123   :  { %539 = vst [vmem:[%s1250_s3 + $0x1f8] sm:$0xff] %v474_v51 }

// kernel: up_forward.7
= control target key start
LH: loop header
LB: loop body
LE: loop exit
PB: predicated region body
PF: predicated region fallthrough
CT: control target
= control target key end

     0   :  { %s1306_s0 = inlined_call_operand.vmem [shape: f32[768,128], index: 0, kind: input, shape index: {}]   ;;  %s1307_s1 = inlined_call_operand.vmem [shape: f32[1,128], index: 1, kind: input, shape index: {}]   ;;  %s1308_s2 = inlined_call_operand.vmem [shape: f32[1,128], index: 2, kind: input, shape index: {}]   ;;  %s1309_s3 = inlined_call_operand.vmem [shape: f32[768,128], index: 3, kind: output, shape index: {}]  }
   0x1   :  { %v14_v0 = vld [vmem:[%s1306_s0] sm:$0xff]  ;;  %v15_v3 = vld [vmem:[%s1306_s0 + $0x8] sm:$0xff]  ;;  %v16_v6 = vld [vmem:[%s1306_s0 + $0x10] sm:$0xff] }
   0x2   :  { %v534_v1 = vld [vmem:[%s1307_s1] ss:$0 sm:$0xff]  ;;  %v17_v7 = vld [vmem:[%s1306_s0 + $0x18] sm:$0xff]  ;;  %v19_v12 = vld [vmem:[%s1306_s0 + $0x28] sm:$0xff] }
   0x3   :  { %v539_v2 = vld [vmem:[%s1308_s2] ss:$0 sm:$0xff]  ;;  %v114_v4 = vmul.f32 %v534_v1, %v14_v0  ;;  %v115_v5 = vmul.f32 %v534_v1, %v15_v3  ;;  %v116_v9 = vmul.f32 %v534_v1, %v16_v6  ;;  %v117_v10 = vmul.f32 %v534_v1, %v17_v7  ;;  %v20_v13 = vld [vmem:[%s1306_s0 + $0x30] sm:$0xff]  ;;  %v21_v14 = vld [vmem:[%s1306_s0 + $0x38] sm:$0xff] }
   0x4   :  { %v18_v8 = vld [vmem:[%s1306_s0 + $0x20] sm:$0xff]  ;;  %v119_v17 = vmul.f32 %v534_v1, %v19_v12  ;;  %v120_v18 = vmul.f32 %v534_v1, %v20_v13  ;;  %v121_v22 = vmul.f32 %v534_v1, %v21_v14  ;;  %v23_v24 = vld [vmem:[%s1306_s0 + $0x48] sm:$0xff]  ;;  %v24_v29 = vld [vmem:[%s1306_s0 + $0x50] sm:$0xff] }
   0x5   :  { %v118_v11 = vmul.f32 %v534_v1, %v18_v8  ;;  %v214_v15 = vadd.f32 %v539_v2, %v114_v4  ;;  %v215_v16 = vadd.f32 %v539_v2, %v115_v5  ;;  %v216_v19 = vadd.f32 %v539_v2, %v116_v9  ;;  %v22_v23 = vld [vmem:[%s1306_s0 + $0x40] sm:$0xff]  ;;  %v25_v30 = vld [vmem:[%s1306_s0 + $0x58] sm:$0xff]  ;;  %v27_v35 = vld [vmem:[%s1306_s0 + $0x68] sm:$0xff] }
   0x6   :  { %v217_v20 = vadd.f32 %v539_v2, %v117_v10  ;;  %v219_v27 = vadd.f32 %v539_v2, %v119_v17  ;;  %v220_v28 = vadd.f32 %v539_v2, %v120_v18  ;;  %v26_v31 = vld [vmem:[%s1306_s0 + $0x60] sm:$0xff]  ;;  %v221_v34 = vadd.f32 %v539_v2, %v121_v22  ;;  %v28_v36 = vld [vmem:[%s1306_s0 + $0x70] sm:$0xff]  ;;  %v29_v41 = vld [vmem:[%s1306_s0 + $0x78] sm:$0xff] }
   0x7   :  { %v218_v21 = vadd.f32 %v539_v2, %v118_v11  ;;  %v310_v25 = vmax.f32 %v214_v15, 0.0  ;;  %v311_v26 = vmax.f32 %v215_v16, 0.0  ;;  %v312_v32 = vmax.f32 %v216_v19, 0.0  ;;  %v30_v54 = vld [vmem:[%s1306_s0 + $0x80] sm:$0xff]  ;;  %v31_v55 = vld [vmem:[%s1306_s0 + $0x88] sm:$0xff]  ;;  %v32_v58 = vld [vmem:[%s1306_s0 + $0x90] sm:$0xff] }
   0x8   :  { %v313_v33 = vmax.f32 %v217_v20, 0.0  ;;  %v315_v38 = vmax.f32 %v219_v27, 0.0  ;;  %v122_v39 = vmul.f32 %v534_v1, %v22_v23  ;;  %v123_v40 = vmul.f32 %v534_v1, %v23_v24  ;;  %v33_v59 = vld [vmem:[%s1306_s0 + $0x98] sm:$0xff]  ;;  %v34_v62 = vld [vmem:[%s1306_s0 + $0xa0] sm:$0xff]  ;;  %v35_v5 = vld [vmem:[%s1306_s0 + $0xa8] sm:$0xff] }
   0x9   :  { %406 = vst [vmem:[%s1309_s3] sm:$0xff] %v310_v25  ;;  %v314_v37 = vmax.f32 %v218_v21, 0.0  ;;  %v316_v42 = vmax.f32 %v220_v28, 0.0  ;;  %v124_v43 = vmul.f32 %v534_v1, %v24_v29  ;;  %v125_v44 = vmul.f32 %v534_v1, %v25_v30  ;;  %v36_v10 = vld [vmem:[%s1306_s0 + $0xb0] sm:$0xff]  ;;  %v37_v14 = vld [vmem:[%s1306_s0 + $0xb8] sm:$0xff]  ;;  %v38_v18 = vld [vmem:[%s1306_s0 + $0xc0] sm:$0xff] }
   0xa   :  { %407 = vst [vmem:[%s1309_s3 + $0x8] sm:$0xff] %v311_v26  ;;  %v126_v45 = vmul.f32 %v534_v1, %v26_v31  ;;  %v222_v46 = vadd.f32 %v539_v2, %v122_v39  ;;  %v223_v47 = vadd.f32 %v539_v2, %v123_v40  ;;  %v127_v48 = vmul.f32 %v534_v1, %v27_v35  ;;  %v39_v22 = vld [vmem:[%s1306_s0 + $0xc8] sm:$0xff]  ;;  %v40_v26 = vld [vmem:[%s1306_s0 + $0xd0] sm:$0xff]  ;;  %v41_v30 = vld [vmem:[%s1306_s0 + $0xd8] sm:$0xff] }
   0xb   :  { %408 = vst [vmem:[%s1309_s3 + $0x10] sm:$0xff] %v312_v32  ;;  %v128_v49 = vmul.f32 %v534_v1, %v28_v36  ;;  %v317_v50 = vmax.f32 %v221_v34, 0.0  ;;  %v224_v51 = vadd.f32 %v539_v2, %v124_v43  ;;  %v225_v52 = vadd.f32 %v539_v2, %v125_v44  ;;  %v42_v34 = vld [vmem:[%s1306_s0 + $0xe0] sm:$0xff] }
   0xc   :  { %409 = vst [vmem:[%s1309_s3 + $0x18] sm:$0xff] %v313_v33  ;;  %v129_v53 = vmul.f32 %v534_v1, %v29_v41  ;;  %v318_v56 = vmax.f32 %v222_v46, 0.0  ;;  %v226_v57 = vadd.f32 %v539_v2, %v126_v45  ;;  %v319_v60 = vmax.f32 %v223_v47, 0.0  ;;  %v45_v46 = vld [vmem:[%s1306_s0 + $0xf8] sm:$0xff] }
   0xd   :  { %410 = vst [vmem:[%s1309_s3 + $0x20] sm:$0xff] %v314_v37  ;;  %v227_v61 = vadd.f32 %v539_v2, %v127_v48  ;;  %v320_v63 = vmax.f32 %v224_v51, 0.0  ;;  %v228_v0 = vadd.f32 %v539_v2, %v128_v49  ;;  %v130_v3 = vmul.f32 %v534_v1, %v30_v54  ;;  %v47_v54 = vld [vmem:[%s1306_s0 + $0x108] sm:$0xff] }
   0xe   :  { %411 = vst [vmem:[%s1309_s3 + $0x28] sm:$0xff] %v315_v38  ;;  %v131_v4 = vmul.f32 %v534_v1, %v31_v55  ;;  %v321_v6 = vmax.f32 %v225_v52, 0.0  ;;  %v229_v7 = vadd.f32 %v539_v2, %v129_v53  ;;  %v132_v8 = vmul.f32 %v534_v1, %v32_v58  ;;  %v43_v38 = vld [vmem:[%s1306_s0 + $0xe8] sm:$0xff]  ;;  %v48_v58 = vld [vmem:[%s1306_s0 + $0x110] sm:$0xff] }
   0xf   :  { %412 = vst [vmem:[%s1309_s3 + $0x30] sm:$0xff] %v316_v42  ;;  %v133_v9 = vmul.f32 %v534_v1, %v33_v59  ;;  %v322_v11 = vmax.f32 %v226_v57, 0.0  ;;  %v230_v12 = vadd.f32 %v539_v2, %v130_v3  ;;  %v134_v13 = vmul.f32 %v534_v1, %v34_v62  ;;  %v44_v42 = vld [vmem:[%s1306_s0 + $0xf0] sm:$0xff]  ;;  %v49_v62 = vld [vmem:[%s1306_s0 + $0x118] sm:$0xff] }
  0x10   :  { %413 = vst [vmem:[%s1309_s3 + $0x38] sm:$0xff] %v317_v50  ;;  %v323_v15 = vmax.f32 %v227_v61, 0.0  ;;  %v231_v16 = vadd.f32 %v539_v2, %v131_v4  ;;  %v135_v17 = vmul.f32 %v534_v1, %v35_v5  ;;  %v324_v19 = vmax.f32 %v228_v0, 0.0  ;;  %v46_v50 = vld [vmem:[%s1306_s0 + $0x100] sm:$0xff] }
  0x11   :  { %414 = vst [vmem:[%s1309_s3 + $0x40] sm:$0xff] %v318_v56  ;;  %v232_v20 = vadd.f32 %v539_v2, %v132_v8  ;;  %v136_v21 = vmul.f32 %v534_v1, %v36_v10  ;;  %v325_v23 = vmax.f32 %v229_v7, 0.0  ;;  %v233_v24 = vadd.f32 %v539_v2, %v133_v9  ;;  %v50_v4 = vld [vmem:[%s1306_s0 + $0x120] sm:$0xff]  ;;  %v51_v8 = vld [vmem:[%s1306_s0 + $0x128] sm:$0xff] }
  0x12   :  { %415 = vst [vmem:[%s1309_s3 + $0x48] sm:$0xff] %v319_v60  ;;  %v137_v25 = vmul.f32 %v534_v1, %v37_v14  ;;  %v326_v27 = vmax.f32 %v230_v12, 0.0  ;;  %v234_v28 = vadd.f32 %v539_v2, %v134_v13  ;;  %v138_v29 = vmul.f32 %v534_v1, %v38_v18  ;;  %v52_v12 = vld [vmem:[%s1306_s0 + $0x130] sm:$0xff] }
  0x13   :  { %416 = vst [vmem:[%s1309_s3 + $0x50] sm:$0xff] %v320_v63  ;;  %v327_v31 = vmax.f32 %v231_v16, 0.0  ;;  %v235_v32 = vadd.f32 %v539_v2, %v135_v17  ;;  %v139_v33 = vmul.f32 %v534_v1, %v39_v22  ;;  %v328_v35 = vmax.f32 %v232_v20, 0.0  ;;  %v53_v16 = vld [vmem:[%s1306_s0 + $0x138] sm:$0xff]  ;;  %v54_v20 = vld [vmem:[%s1306_s0 + $0x140] sm:$0xff] }
  0x14   :  { %417 = vst [vmem:[%s1309_s3 + $0x58] sm:$0xff] %v321_v6  ;;  %v236_v36 = vadd.f32 %v539_v2, %v136_v21  ;;  %v140_v37 = vmul.f32 %v534_v1, %v40_v26  ;;  %v329_v39 = vmax.f32 %v233_v24, 0.0  ;;  %v237_v40 = vadd.f32 %v539_v2, %v137_v25  ;;  %v55_v24 = vld [vmem:[%s1306_s0 + $0x148] sm:$0xff] }
  0x15   :  { %418 = vst [vmem:[%s1309_s3 + $0x60] sm:$0xff] %v322_v11  ;;  %v141_v41 = vmul.f32 %v534_v1, %v41_v30  ;;  %v330_v43 = vmax.f32 %v234_v28, 0.0  ;;  %v238_v44 = vadd.f32 %v539_v2, %v138_v29  ;;  %v142_v45 = vmul.f32 %v534_v1, %v42_v34  ;;  %v56_v28 = vld [vmem:[%s1306_s0 + $0x150] sm:$0xff] }
  0x16   :  { %419 = vst [vmem:[%s1309_s3 + $0x68] sm:$0xff] %v323_v15  ;;  %v331_v47 = vmax.f32 %v235_v32, 0.0  ;;  %v239_v48 = vadd.f32 %v539_v2, %v139_v33  ;;  %v143_v49 = vmul.f32 %v534_v1, %v43_v38  ;;  %v332_v51 = vmax.f32 %v236_v36, 0.0  ;;  %v57_v32 = vld [vmem:[%s1306_s0 + $0x158] sm:$0xff]  ;;  %v58_v36 = vld [vmem:[%s1306_s0 + $0x160] sm:$0xff] }
  0x17   :  { %420 = vst [vmem:[%s1309_s3 + $0x70] sm:$0xff] %v324_v19  ;;  %v240_v52 = vadd.f32 %v539_v2, %v140_v37  ;;  %v144_v53 = vmul.f32 %v534_v1, %v44_v42  ;;  %v333_v55 = vmax.f32 %v237_v40, 0.0  ;;  %v241_v56 = vadd.f32 %v539_v2, %v141_v41  ;;  %v59_v40 = vld [vmem:[%s1306_s0 + $0x168] sm:$0xff] }
  0x18   :  { %421 = vst [vmem:[%s1309_s3 + $0x78] sm:$0xff] %v325_v23  ;;  %v145_v57 = vmul.f32 %v534_v1, %v45_v46  ;;  %v334_v59 = vmax.f32 %v238_v44, 0.0  ;;  %v242_v60 = vadd.f32 %v539_v2, %v142_v45  ;;  %v146_v61 = vmul.f32 %v534_v1, %v46_v50  ;;  %v60_v44 = vld [vmem:[%s1306_s0 + $0x170] sm:$0xff] }
  0x19   :  { %422 = vst [vmem:[%s1309_s3 + $0x80] sm:$0xff] %v326_v27  ;;  %v335_v63 = vmax.f32 %v239_v48, 0.0  ;;  %v243_v0 = vadd.f32 %v539_v2, %v143_v49  ;;  %v147_v3 = vmul.f32 %v534_v1, %v47_v54  ;;  %v336_v5 = vmax.f32 %v240_v52, 0.0  ;;  %v61_v48 = vld [vmem:[%s1306_s0 + $0x178] sm:$0xff]  ;;  %v62_v52 = vld [vmem:[%s1306_s0 + $0x180] sm:$0xff] }
  0x1a   :  { %423 = vst [vmem:[%s1309_s3 + $0x88] sm:$0xff] %v327_v31  ;;  %v244_v6 = vadd.f32 %v539_v2, %v144_v53  ;;  %v148_v7 = vmul.f32 %v534_v1, %v48_v58  ;;  %v337_v9 = vmax.f32 %v241_v56, 0.0  ;;  %v245_v10 = vadd.f32 %v539_v2, %v145_v57  ;;  %v63_v56 = vld [vmem:[%s1306_s0 + $0x188] sm:$0xff] }
  0x1b   :  { %424 = vst [vmem:[%s1309_s3 + $0x90] sm:$0xff] %v328_v35  ;;  %v149_v11 = vmul.f32 %v534_v1, %v49_v62  ;;  %v338_v13 = vmax.f32 %v242_v60, 0.0  ;;  %v246_v14 = vadd.f32 %v539_v2, %v146_v61  ;;  %v150_v15 = vmul.f32 %v534_v1, %v50_v4  ;;  %v64_v60 = vld [vmem:[%s1306_s0 + $0x190] sm:$0xff] }
  0x1c   :  { %425 = vst [vmem:[%s1309_s3 + $0x98] sm:$0xff] %v329_v39  ;;  %v339_v17 = vmax.f32 %v243_v0, 0.0  ;;  %v247_v18 = vadd.f32 %v539_v2, %v147_v3  ;;  %v151_v19 = vmul.f32 %v534_v1, %v51_v8  ;;  %v340_v21 = vmax.f32 %v244_v6, 0.0  ;;  %v65_v0 = vld [vmem:[%s1306_s0 + $0x198] sm:$0xff]  ;;  %v66_v6 = vld [vmem:[%s1306_s0 + $0x1a0] sm:$0xff] }
  0x1d   :  { %426 = vst [vmem:[%s1309_s3 + $0xa0] sm:$0xff] %v330_v43  ;;  %v248_v22 = vadd.f32 %v539_v2, %v148_v7  ;;  %v152_v23 = vmul.f32 %v534_v1, %v52_v12  ;;  %v341_v25 = vmax.f32 %v245_v10, 0.0  ;;  %v249_v26 = vadd.f32 %v539_v2, %v149_v11  ;;  %v67_v10 = vld [vmem:[%s1306_s0 + $0x1a8] sm:$0xff] }
  0x1e   :  { %427 = vst [vmem:[%s1309_s3 + $0xa8] sm:$0xff] %v331_v47  ;;  %v153_v27 = vmul.f32 %v534_v1, %v53_v16  ;;  %v342_v29 = vmax.f32 %v246_v14, 0.0  ;;  %v250_v30 = vadd.f32 %v539_v2, %v150_v15  ;;  %v154_v31 = vmul.f32 %v534_v1, %v54_v20  ;;  %v68_v14 = vld [vmem:[%s1306_s0 + $0x1b0] sm:$0xff] }
  0x1f   :  { %428 = vst [vmem:[%s1309_s3 + $0xb0] sm:$0xff] %v332_v51  ;;  %v343_v33 = vmax.f32 %v247_v18, 0.0  ;;  %v251_v34 = vadd.f32 %v539_v2, %v151_v19  ;;  %v155_v35 = vmul.f32 %v534_v1, %v55_v24  ;;  %v344_v37 = vmax.f32 %v248_v22, 0.0  ;;  %v69_v18 = vld [vmem:[%s1306_s0 + $0x1b8] sm:$0xff]  ;;  %v70_v22 = vld [vmem:[%s1306_s0 + $0x1c0] sm:$0xff] }
  0x20   :  { %429 = vst [vmem:[%s1309_s3 + $0xb8] sm:$0xff] %v333_v55  ;;  %v252_v38 = vadd.f32 %v539_v2, %v152_v23  ;;  %v156_v39 = vmul.f32 %v534_v1, %v56_v28  ;;  %v345_v41 = vmax.f32 %v249_v26, 0.0  ;;  %v253_v42 = vadd.f32 %v539_v2, %v153_v27  ;;  %v71_v26 = vld [vmem:[%s1306_s0 + $0x1c8] sm:$0xff] }
  0x21   :  { %430 = vst [vmem:[%s1309_s3 + $0xc0] sm:$0xff] %v334_v59  ;;  %v157_v43 = vmul.f32 %v534_v1, %v57_v32  ;;  %v346_v45 = vmax.f32 %v250_v30, 0.0  ;;  %v254_v46 = vadd.f32 %v539_v2, %v154_v31  ;;  %v158_v47 = vmul.f32 %v534_v1, %v58_v36  ;;  %v72_v30 = vld [vmem:[%s1306_s0 + $0x1d0] sm:$0xff] }
  0x22   :  { %431 = vst [vmem:[%s1309_s3 + $0xc8] sm:$0xff] %v335_v63  ;;  %v347_v49 = vmax.f32 %v251_v34, 0.0  ;;  %v255_v50 = vadd.f32 %v539_v2, %v155_v35  ;;  %v159_v51 = vmul.f32 %v534_v1, %v59_v40  ;;  %v348_v53 = vmax.f32 %v252_v38, 0.0  ;;  %v73_v34 = vld [vmem:[%s1306_s0 + $0x1d8] sm:$0xff]  ;;  %v74_v38 = vld [vmem:[%s1306_s0 + $0x1e0] sm:$0xff] }
  0x23   :  { %432 = vst [vmem:[%s1309_s3 + $0xd0] sm:$0xff] %v336_v5  ;;  %v256_v54 = vadd.f32 %v539_v2, %v156_v39  ;;  %v160_v55 = vmul.f32 %v534_v1, %v60_v44  ;;  %v349_v57 = vmax.f32 %v253_v42, 0.0  ;;  %v257_v58 = vadd.f32 %v539_v2, %v157_v43  ;;  %v75_v42 = vld [vmem:[%s1306_s0 + $0x1e8] sm:$0xff] }
  0x24   :  { %433 = vst [vmem:[%s1309_s3 + $0xd8] sm:$0xff] %v337_v9  ;;  %v161_v59 = vmul.f32 %v534_v1, %v61_v48  ;;  %v350_v61 = vmax.f32 %v254_v46, 0.0  ;;  %v258_v62 = vadd.f32 %v539_v2, %v158_v47  ;;  %v162_v63 = vmul.f32 %v534_v1, %v62_v52  ;;  %v76_v46 = vld [vmem:[%s1306_s0 + $0x1f0] sm:$0xff] }
  0x25   :  { %434 = vst [vmem:[%s1309_s3 + $0xe0] sm:$0xff] %v338_v13  ;;  %v351_v3 = vmax.f32 %v255_v50, 0.0  ;;  %v259_v4 = vadd.f32 %v539_v2, %v159_v51  ;;  %v163_v5 = vmul.f32 %v534_v1, %v63_v56  ;;  %v352_v7 = vmax.f32 %v256_v54, 0.0  ;;  %v77_v50 = vld [vmem:[%s1306_s0 + $0x1f8] sm:$0xff]  ;;  %v78_v54 = vld [vmem:[%s1306_s0 + $0x200] sm:$0xff] }
  0x26   :  { %435 = vst [vmem:[%s1309_s3 + $0xe8] sm:$0xff] %v339_v17  ;;  %v260_v8 = vadd.f32 %v539_v2, %v160_v55  ;;  %v164_v9 = vmul.f32 %v534_v1, %v64_v60  ;;  %v353_v11 = vmax.f32 %v257_v58, 0.0  ;;  %v261_v12 = vadd.f32 %v539_v2, %v161_v59  ;;  %v79_v58 = vld [vmem:[%s1306_s0 + $0x208] sm:$0xff] }
  0x27   :  { %436 = vst [vmem:[%s1309_s3 + $0xf0] sm:$0xff] %v340_v21  ;;  %v165_v13 = vmul.f32 %v534_v1, %v65_v0  ;;  %v354_v15 = vmax.f32 %v258_v62, 0.0  ;;  %v262_v16 = vadd.f32 %v539_v2, %v162_v63  ;;  %v166_v17 = vmul.f32 %v534_v1, %v66_v6  ;;  %v80_v62 = vld [vmem:[%s1306_s0 + $0x210] sm:$0xff] }
  0x28   :  { %437 = vst [vmem:[%s1309_s3 + $0xf8] sm:$0xff] %v341_v25  ;;  %v355_v19 = vmax.f32 %v259_v4, 0.0  ;;  %v263_v20 = vadd.f32 %v539_v2, %v163_v5  ;;  %v167_v21 = vmul.f32 %v534_v1, %v67_v10  ;;  %v356_v23 = vmax.f32 %v260_v8, 0.0  ;;  %v81_v4 = vld [vmem:[%s1306_s0 + $0x218] sm:$0xff]  ;;  %v82_v8 = vld [vmem:[%s1306_s0 + $0x220] sm:$0xff] }
  0x29   :  { %438 = vst [vmem:[%s1309_s3 + $0x100] sm:$0xff] %v342_v29  ;;  %v264_v24 = vadd.f32 %v539_v2, %v164_v9  ;;  %v168_v25 = vmul.f32 %v534_v1, %v68_v14  ;;  %v357_v27 = vmax.f32 %v261_v12, 0.0  ;;  %v265_v28 = vadd.f32 %v539_v2, %v165_v13  ;;  %v83_v12 = vld [vmem:[%s1306_s0 + $0x228] sm:$0xff] }
  0x2a   :  { %439 = vst [vmem:[%s1309_s3 + $0x108] sm:$0xff] %v343_v33  ;;  %v169_v29 = vmul.f32 %v534_v1, %v69_v18  ;;  %v358_v31 = vmax.f32 %v262_v16, 0.0  ;;  %v266_v32 = vadd.f32 %v539_v2, %v166_v17  ;;  %v170_v33 = vmul.f32 %v534_v1, %v70_v22  ;;  %v84_v16 = vld [vmem:[%s1306_s0 + $0x230] sm:$0xff] }
  0x2b   :  { %440 = vst [vmem:[%s1309_s3 + $0x110] sm:$0xff] %v344_v37  ;;  %v359_v35 = vmax.f32 %v263_v20, 0.0  ;;  %v267_v36 = vadd.f32 %v539_v2, %v167_v21  ;;  %v171_v37 = vmul.f32 %v534_v1, %v71_v26  ;;  %v360_v39 = vmax.f32 %v264_v24, 0.0  ;;  %v85_v20 = vld [vmem:[%s1306_s0 + $0x238] sm:$0xff]  ;;  %v86_v24 = vld [vmem:[%s1306_s0 + $0x240] sm:$0xff] }
  0x2c   :  { %441 = vst [vmem:[%s1309_s3 + $0x118] sm:$0xff] %v345_v41  ;;  %v268_v40 = vadd.f32 %v539_v2, %v168_v25  ;;  %v172_v41 = vmul.f32 %v534_v1, %v72_v30  ;;  %v361_v43 = vmax.f32 %v265_v28, 0.0  ;;  %v269_v44 = vadd.f32 %v539_v2, %v169_v29  ;;  %v87_v28 = vld [vmem:[%s1306_s0 + $0x248] sm:$0xff] }
  0x2d   :  { %442 = vst [vmem:[%s1309_s3 + $0x120] sm:$0xff] %v346_v45  ;;  %v173_v45 = vmul.f32 %v534_v1, %v73_v34  ;;  %v362_v47 = vmax.f32 %v266_v32, 0.0  ;;  %v270_v48 = vadd.f32 %v539_v2, %v170_v33  ;;  %v363_v51 = vmax.f32 %v267_v36, 0.0  ;;  %v88_v32 = vld [vmem:[%s1306_s0 + $0x250] sm:$0xff]  ;;  %v89_v36 = vld [vmem:[%s1306_s0 + $0x258] sm:$0xff] }
  0x2e   :  { %443 = vst [vmem:[%s1309_s3 + $0x128] sm:$0xff] %v347_v49  ;;  %v174_v49 = vmul.f32 %v534_v1, %v74_v38  ;;  %v271_v52 = vadd.f32 %v539_v2, %v171_v37  ;;  %v364_v55 = vmax.f32 %v268_v40, 0.0  ;;  %v272_v56 = vadd.f32 %v539_v2, %v172_v41  ;;  %v90_v40 = vld [vmem:[%s1306_s0 + $0x260] sm:$0xff] }
  0x2f   :  { %444 = vst [vmem:[%s1309_s3 + $0x130] sm:$0xff] %v348_v53  ;;  %v175_v53 = vmul.f32 %v534_v1, %v75_v42  ;;  %v365_v59 = vmax.f32 %v269_v44, 0.0  ;;  %v273_v60 = vadd.f32 %v539_v2, %v173_v45  ;;  %v366_v63 = vmax.f32 %v270_v48, 0.0  ;;  %v91_v44 = vld [vmem:[%s1306_s0 + $0x268] sm:$0xff]  ;;  %v92_v48 = vld [vmem:[%s1306_s0 + $0x270] sm:$0xff] }
  0x30   :  { %445 = vst [vmem:[%s1309_s3 + $0x138] sm:$0xff] %v349_v57  ;;  %v176_v57 = vmul.f32 %v534_v1, %v76_v46  ;;  %v274_v0 = vadd.f32 %v539_v2, %v174_v49  ;;  %v367_v5 = vmax.f32 %v271_v52, 0.0  ;;  %v368_v9 = vmax.f32 %v272_v56, 0.0  ;;  %v93_v52 = vld [vmem:[%s1306_s0 + $0x278] sm:$0xff]  ;;  %v94_v56 = vld [vmem:[%s1306_s0 + $0x280] sm:$0xff] }
  0x31   :  { %446 = vst [vmem:[%s1309_s3 + $0x140] sm:$0xff] %v350_v61  ;;  %v177_v61 = vmul.f32 %v534_v1, %v77_v50  ;;  %v275_v6 = vadd.f32 %v539_v2, %v175_v53  ;;  %v369_v13 = vmax.f32 %v273_v60, 0.0  ;;  %v95_v60 = vld [vmem:[%s1306_s0 + $0x288] sm:$0xff] }
  0x32   :  { %447 = vst [vmem:[%s1309_s3 + $0x148] sm:$0xff] %v351_v3  ;;  %v178_v3 = vmul.f32 %v534_v1, %v78_v54  ;;  %v276_v10 = vadd.f32 %v539_v2, %v176_v57  ;;  %v370_v17 = vmax.f32 %v274_v0, 0.0  ;;  %v96_v0 = vld [vmem:[%s1306_s0 + $0x290] sm:$0xff] }
  0x33   :  { %448 = vst [vmem:[%s1309_s3 + $0x150] sm:$0xff] %v352_v7  ;;  %v179_v7 = vmul.f32 %v534_v1, %v79_v58  ;;  %v277_v14 = vadd.f32 %v539_v2, %v177_v61  ;;  %v371_v21 = vmax.f32 %v275_v6, 0.0  ;;  %v97_v6 = vld [vmem:[%s1306_s0 + $0x298] sm:$0xff] }
  0x34   :  { %449 = vst [vmem:[%s1309_s3 + $0x158] sm:$0xff] %v353_v11  ;;  %v180_v11 = vmul.f32 %v534_v1, %v80_v62  ;;  %v278_v18 = vadd.f32 %v539_v2, %v178_v3  ;;  %v372_v25 = vmax.f32 %v276_v10, 0.0  ;;  %v98_v10 = vld [vmem:[%s1306_s0 + $0x2a0] sm:$0xff] }
  0x35   :  { %450 = vst [vmem:[%s1309_s3 + $0x160] sm:$0xff] %v354_v15  ;;  %v181_v15 = vmul.f32 %v534_v1, %v81_v4  ;;  %v279_v22 = vadd.f32 %v539_v2, %v179_v7  ;;  %v373_v29 = vmax.f32 %v277_v14, 0.0  ;;  %v99_v14 = vld [vmem:[%s1306_s0 + $0x2a8] sm:$0xff] }
  0x36   :  { %451 = vst [vmem:[%s1309_s3 + $0x168] sm:$0xff] %v355_v19  ;;  %v182_v19 = vmul.f32 %v534_v1, %v82_v8  ;;  %v280_v26 = vadd.f32 %v539_v2, %v180_v11  ;;  %v374_v33 = vmax.f32 %v278_v18, 0.0  ;;  %v100_v18 = vld [vmem:[%s1306_s0 + $0x2b0] sm:$0xff] }
  0x37   :  { %452 = vst [vmem:[%s1309_s3 + $0x170] sm:$0xff] %v356_v23  ;;  %v183_v23 = vmul.f32 %v534_v1, %v83_v12  ;;  %v281_v30 = vadd.f32 %v539_v2, %v181_v15  ;;  %v375_v37 = vmax.f32 %v279_v22, 0.0  ;;  %v101_v22 = vld [vmem:[%s1306_s0 + $0x2b8] sm:$0xff] }
  0x38   :  { %453 = vst [vmem:[%s1309_s3 + $0x178] sm:$0xff] %v357_v27  ;;  %v184_v27 = vmul.f32 %v534_v1, %v84_v16  ;;  %v282_v34 = vadd.f32 %v539_v2, %v182_v19  ;;  %v376_v41 = vmax.f32 %v280_v26, 0.0  ;;  %v102_v26 = vld [vmem:[%s1306_s0 + $0x2c0] sm:$0xff] }
  0x39   :  { %454 = vst [vmem:[%s1309_s3 + $0x180] sm:$0xff] %v358_v31  ;;  %v185_v31 = vmul.f32 %v534_v1, %v85_v20  ;;  %v283_v38 = vadd.f32 %v539_v2, %v183_v23  ;;  %v377_v45 = vmax.f32 %v281_v30, 0.0  ;;  %v103_v30 = vld [vmem:[%s1306_s0 + $0x2c8] sm:$0xff] }
  0x3a   :  { %455 = vst [vmem:[%s1309_s3 + $0x188] sm:$0xff] %v359_v35  ;;  %v186_v35 = vmul.f32 %v534_v1, %v86_v24  ;;  %v284_v42 = vadd.f32 %v539_v2, %v184_v27  ;;  %v378_v49 = vmax.f32 %v282_v34, 0.0  ;;  %v104_v34 = vld [vmem:[%s1306_s0 + $0x2d0] sm:$0xff] }
  0x3b   :  { %456 = vst [vmem:[%s1309_s3 + $0x190] sm:$0xff] %v360_v39  ;;  %v187_v39 = vmul.f32 %v534_v1, %v87_v28  ;;  %v285_v46 = vadd.f32 %v539_v2, %v185_v31  ;;  %v379_v53 = vmax.f32 %v283_v38, 0.0  ;;  %v105_v38 = vld [vmem:[%s1306_s0 + $0x2d8] sm:$0xff] }
  0x3c   :  { %457 = vst [vmem:[%s1309_s3 + $0x198] sm:$0xff] %v361_v43  ;;  %v188_v43 = vmul.f32 %v534_v1, %v88_v32  ;;  %v286_v50 = vadd.f32 %v539_v2, %v186_v35  ;;  %v380_v57 = vmax.f32 %v284_v42, 0.0  ;;  %v106_v42 = vld [vmem:[%s1306_s0 + $0x2e0] sm:$0xff] }
  0x3d   :  { %458 = vst [vmem:[%s1309_s3 + $0x1a0] sm:$0xff] %v362_v47  ;;  %v189_v47 = vmul.f32 %v534_v1, %v89_v36  ;;  %v287_v54 = vadd.f32 %v539_v2, %v187_v39  ;;  %v381_v61 = vmax.f32 %v285_v46, 0.0  ;;  %v107_v46 = vld [vmem:[%s1306_s0 + $0x2e8] sm:$0xff] }
  0x3e   :  { %459 = vst [vmem:[%s1309_s3 + $0x1a8] sm:$0xff] %v363_v51  ;;  %v190_v51 = vmul.f32 %v534_v1, %v90_v40  ;;  %v288_v58 = vadd.f32 %v539_v2, %v188_v43  ;;  %v382_v3 = vmax.f32 %v286_v50, 0.0  ;;  %v108_v50 = vld [vmem:[%s1306_s0 + $0x2f0] sm:$0xff] }
  0x3f   :  { %460 = vst [vmem:[%s1309_s3 + $0x1b0] sm:$0xff] %v364_v55  ;;  %v191_v55 = vmul.f32 %v534_v1, %v91_v44  ;;  %v289_v62 = vadd.f32 %v539_v2, %v189_v47  ;;  %v383_v7 = vmax.f32 %v287_v54, 0.0  ;;  %v109_v54 = vld [vmem:[%s1306_s0 + $0x2f8] sm:$0xff] }
  0x40   :  { %461 = vst [vmem:[%s1309_s3 + $0x1b8] sm:$0xff] %v365_v59  ;;  %v192_v59 = vmul.f32 %v534_v1, %v92_v48  ;;  %v290_v4 = vadd.f32 %v539_v2, %v190_v51  ;;  %v384_v11 = vmax.f32 %v288_v58, 0.0 }
  0x41   :  { %462 = vst [vmem:[%s1309_s3 + $0x1c0] sm:$0xff] %v366_v63  ;;  %v193_v63 = vmul.f32 %v534_v1, %v93_v52  ;;  %v291_v8 = vadd.f32 %v539_v2, %v191_v55  ;;  %v385_v15 = vmax.f32 %v289_v62, 0.0 }
  0x42   :  { %463 = vst [vmem:[%s1309_s3 + $0x1c8] sm:$0xff] %v367_v5  ;;  %v194_v5 = vmul.f32 %v534_v1, %v94_v56  ;;  %v292_v12 = vadd.f32 %v539_v2, %v192_v59  ;;  %v386_v19 = vmax.f32 %v290_v4, 0.0 }
  0x43   :  { %464 = vst [vmem:[%s1309_s3 + $0x1d0] sm:$0xff] %v368_v9  ;;  %v195_v9 = vmul.f32 %v534_v1, %v95_v60  ;;  %v293_v16 = vadd.f32 %v539_v2, %v193_v63  ;;  %v387_v23 = vmax.f32 %v291_v8, 0.0  ;;  %v208_v60 = vmul.f32 %v534_v1, %v108_v50 }
  0x44   :  { %465 = vst [vmem:[%s1309_s3 + $0x1d8] sm:$0xff] %v369_v13  ;;  %v196_v13 = vmul.f32 %v534_v1, %v96_v0  ;;  %v294_v20 = vadd.f32 %v539_v2, %v194_v5  ;;  %v388_v27 = vmax.f32 %v292_v12, 0.0  ;;  %v209_v63 = vmul.f32 %v534_v1, %v109_v54 }
  0x45   :  { %466 = vst [vmem:[%s1309_s3 + $0x1e0] sm:$0xff] %v370_v17  ;;  %v197_v17 = vmul.f32 %v534_v1, %v97_v6  ;;  %v295_v24 = vadd.f32 %v539_v2, %v195_v9  ;;  %v389_v31 = vmax.f32 %v293_v16, 0.0 }
  0x46   :  { %467 = vst [vmem:[%s1309_s3 + $0x1e8] sm:$0xff] %v371_v21  ;;  %v198_v21 = vmul.f32 %v534_v1, %v98_v10  ;;  %v296_v28 = vadd.f32 %v539_v2, %v196_v13  ;;  %v390_v35 = vmax.f32 %v294_v20, 0.0  ;;  %v309_v8 = vadd.f32 %v539_v2, %v209_v63 }
  0x47   :  { %468 = vst [vmem:[%s1309_s3 + $0x1f0] sm:$0xff] %v372_v25  ;;  %v199_v25 = vmul.f32 %v534_v1, %v99_v14  ;;  %v297_v32 = vadd.f32 %v539_v2, %v197_v17  ;;  %v391_v39 = vmax.f32 %v295_v24, 0.0 }
  0x48   :  { %469 = vst [vmem:[%s1309_s3 + $0x1f8] sm:$0xff] %v373_v29  ;;  %v200_v29 = vmul.f32 %v534_v1, %v100_v18  ;;  %v298_v36 = vadd.f32 %v539_v2, %v198_v21  ;;  %v392_v43 = vmax.f32 %v296_v28, 0.0 }
  0x49   :  { %470 = vst [vmem:[%s1309_s3 + $0x200] sm:$0xff] %v374_v33  ;;  %v201_v33 = vmul.f32 %v534_v1, %v101_v22  ;;  %v299_v40 = vadd.f32 %v539_v2, %v199_v25  ;;  %v393_v47 = vmax.f32 %v297_v32, 0.0 }
  0x4a   :  { %471 = vst [vmem:[%s1309_s3 + $0x208] sm:$0xff] %v375_v37  ;;  %v202_v37 = vmul.f32 %v534_v1, %v102_v26  ;;  %v300_v44 = vadd.f32 %v539_v2, %v200_v29  ;;  %v394_v51 = vmax.f32 %v298_v36, 0.0 }
  0x4b   :  { %472 = vst [vmem:[%s1309_s3 + $0x210] sm:$0xff] %v376_v41  ;;  %v203_v41 = vmul.f32 %v534_v1, %v103_v30  ;;  %v301_v48 = vadd.f32 %v539_v2, %v201_v33  ;;  %v395_v55 = vmax.f32 %v299_v40, 0.0 }
  0x4c   :  { %473 = vst [vmem:[%s1309_s3 + $0x218] sm:$0xff] %v377_v45  ;;  %v204_v45 = vmul.f32 %v534_v1, %v104_v34  ;;  %v302_v52 = vadd.f32 %v539_v2, %v202_v37  ;;  %v396_v58 = vmax.f32 %v300_v44, 0.0 }
  0x4d   :  { %474 = vst [vmem:[%s1309_s3 + $0x220] sm:$0xff] %v378_v49  ;;  %v205_v49 = vmul.f32 %v534_v1, %v105_v38  ;;  %v303_v56 = vadd.f32 %v539_v2, %v203_v41 }
  0x4e   :  { %475 = vst [vmem:[%s1309_s3 + $0x228] sm:$0xff] %v379_v53  ;;  %v206_v53 = vmul.f32 %v534_v1, %v106_v42  ;;  %v304_v59 = vadd.f32 %v539_v2, %v204_v45  ;;  %v398_v0 = vmax.f32 %v302_v52, 0.0 }
  0x4f   :  { %476 = vst [vmem:[%s1309_s3 + $0x230] sm:$0xff] %v380_v57  ;;  %v207_v57 = vmul.f32 %v534_v1, %v107_v46  ;;  %v305_v62 = vadd.f32 %v539_v2, %v205_v49  ;;  %v399_v4 = vmax.f32 %v303_v56, 0.0  ;;  %v308_v1 = vadd.f32 %v539_v2, %v208_v60 }
  0x50   :  { %477 = vst [vmem:[%s1309_s3 + $0x238] sm:$0xff] %v381_v61  ;;  %v397_v61 = vmax.f32 %v301_v48, 0.0  ;;  %v400_v6 = vmax.f32 %v304_v59, 0.0 }
  0x51   :  { %478 = vst [vmem:[%s1309_s3 + $0x240] sm:$0xff] %v382_v3  ;;  %v306_v3 = vadd.f32 %v539_v2, %v206_v53  ;;  %v307_v5 = vadd.f32 %v539_v2, %v207_v57  ;;  %v405_v2 = vmax.f32 %v309_v8, 0.0 }
  0x52   :  { %479 = vst [vmem:[%s1309_s3 + $0x248] sm:$0xff] %v383_v7  ;;  %v401_v7 = vmax.f32 %v305_v62, 0.0 }
  0x53   :  { %480 = vst [vmem:[%s1309_s3 + $0x250] sm:$0xff] %v384_v11  ;;  %v402_v9 = vmax.f32 %v306_v3, 0.0  ;;  %v403_v10 = vmax.f32 %v307_v5, 0.0  ;;  %v404_v11 = vmax.f32 %v308_v1, 0.0 }
  0x54   :  { %481 = vst [vmem:[%s1309_s3 + $0x258] sm:$0xff] %v385_v15 }
  0x55   :  { %482 = vst [vmem:[%s1309_s3 + $0x260] sm:$0xff] %v386_v19 }
  0x56   :  { %483 = vst [vmem:[%s1309_s3 + $0x268] sm:$0xff] %v387_v23 }
  0x57   :  { %484 = vst [vmem:[%s1309_s3 + $0x270] sm:$0xff] %v388_v27 }
  0x58   :  { %485 = vst [vmem:[%s1309_s3 + $0x278] sm:$0xff] %v389_v31 }
  0x59   :  { %486 = vst [vmem:[%s1309_s3 + $0x280] sm:$0xff] %v390_v35 }
  0x5a   :  { %487 = vst [vmem:[%s1309_s3 + $0x288] sm:$0xff] %v391_v39 }
  0x5b   :  { %488 = vst [vmem:[%s1309_s3 + $0x290] sm:$0xff] %v392_v43 }
  0x5c   :  { %489 = vst [vmem:[%s1309_s3 + $0x298] sm:$0xff] %v393_v47 }
  0x5d   :  { %490 = vst [vmem:[%s1309_s3 + $0x2a0] sm:$0xff] %v394_v51 }
  0x5e   :  { %491 = vst [vmem:[%s1309_s3 + $0x2a8] sm:$0xff] %v395_v55 }
  0x5f   :  { %492 = vst [vmem:[%s1309_s3 + $0x2b0] sm:$0xff] %v396_v58 }
  0x60   :  { %493 = vst [vmem:[%s1309_s3 + $0x2b8] sm:$0xff] %v397_v61 }
  0x61   :  { %494 = vst [vmem:[%s1309_s3 + $0x2c0] sm:$0xff] %v398_v0 }
  0x62   :  { %495 = vst [vmem:[%s1309_s3 + $0x2c8] sm:$0xff] %v399_v4 }
  0x63   :  { %496 = vst [vmem:[%s1309_s3 + $0x2d0] sm:$0xff] %v400_v6 }
  0x64   :  { %497 = vst [vmem:[%s1309_s3 + $0x2d8] sm:$0xff] %v401_v7 }
  0x65   :  { %498 = vst [vmem:[%s1309_s3 + $0x2e0] sm:$0xff] %v402_v9 }
  0x66   :  { %499 = vst [vmem:[%s1309_s3 + $0x2e8] sm:$0xff] %v403_v10 }
  0x67   :  { %500 = vst [vmem:[%s1309_s3 + $0x2f0] sm:$0xff] %v404_v11 }
  0x68   :  { %501 = vst [vmem:[%s1309_s3 + $0x2f8] sm:$0xff] %v405_v2 }

// kernel: up_forward.6
= control target key start
LH: loop header
LB: loop body
LE: loop exit
PB: predicated region body
PF: predicated region fallthrough
CT: control target
= control target key end

     0   :  { %s4001_s18 = smov 0   ;;  %s5671_s0 = inlined_call_operand.vmem [shape: f32[2,24,24,128], index: 0, kind: input, shape index: {}]   ;;  %s5672_s1 = inlined_call_operand.vmem [shape: f32[1,128], index: 1, kind: input, shape index: {}]   ;;  %s5673_s2 = inlined_call_operand.vmem [shape: f32[1,128], index: 2, kind: input, shape index: {}]   ;;  %s5674_s3 = inlined_call_operand.vmem [shape: bf16[3,128,384], index: 3, kind: input, shape index: {}]   ;;  %s5675_s4 = inlined_call_operand.vmem [shape: f32[2,16,24,128], index: 4, kind: output, shape index: {0}]   ;;  %s5676_s5 = inlined_call_operand.vmem [shape: f32[2,2,128], index: 5, kind: output, shape index: {1}]  }
   0x1 LB: > { %s3438_s19 = sadd.s32 4294967295, %s3966_s18   ;;  %p3442_p0 = scmp.ge.s32.totalorder %s3966_s18, 1  ;;  %s3966_s18 = sphi %s4001_s18, %s16_s18  }
   0x2   : > { %p190_p1 = scmp.lt.s32.totalorder %s3966_s18, 3 }
   0x4   : > { %p191_p2 = pnand %p3442_p0, %p190_p1 }
   0x6   : > { %194 = sbr.rel (%p191_p2) target bundleno = 1094 (0x446), region = 36 }
   0xb   : > { %v3552_v0 = vld [vmem:[%s5674_s3 + $0xa8] sm:$0xf]  ;;  %v3870_v1 = vld [vmem:[%s5674_s3 + $0xb0] sm:$0xf0]  ;;  %v3544_v2 = vld [vmem:[%s5674_s3 + $0x90] sm:$0xf] }
   0xc   : > { %v3553_v3 = vor.u32 %v3870_v1, %v3552_v0  ;;  %v3867_v4 = vld [vmem:[%s5674_s3 + $0x98] sm:$0xf0]  ;;  %v3536_v6 = vld [vmem:[%s5674_s3 + $0x78] sm:$0xf]  ;;  %v3864_v7 = vld [vmem:[%s5674_s3 + $0x80] sm:$0xf0] }
   0xd   : > { %v3545_v5 = vor.u32 %v3867_v4, %v3544_v2  ;;  %v3528_v8 = vld [vmem:[%s5674_s3 + $0x60] sm:$0xf]  ;;  %v3861_v9 = vld [vmem:[%s5674_s3 + $0x68] sm:$0xf0]  ;;  %v3520_v10 = vld [vmem:[%s5674_s3 + $0x48] sm:$0xf]  ;;  %v3537_v17 = vor.u32 %v3864_v7, %v3536_v6 }
   0xe   : > { %887 = vmatpush.bf16.msra.mxu0 %v3553_v3  ;;  %3920 = vmatpush.bf16.msra.mxu1 %v3553_v3  ;;  %v3858_v11 = vld [vmem:[%s5674_s3 + $0x50] sm:$0xf0]  ;;  %p222_p3 = scmp.lt.s32.totalorder %s3438_s19, 1  ;;  %v3512_v12 = vld [vmem:[%s5674_s3 + $0x30] sm:$0xf]  ;;  %v5677_v19 = vmov 0   ;;  %v3529_v27 = vor.u32 %v3861_v9, %v3528_v8 }
   0xf   : > { %3921 = vmatpush.bf16.msra.mxu2 %v3553_v3  ;;  %3922 = vmatpush.bf16.msra.mxu3 %v3553_v3  ;;  %v3855_v13 = vld [vmem:[%s5674_s3 + $0x38] sm:$0xf0]  ;;  %v3504_v14 = vld [vmem:[%s5674_s3 + $0x18] sm:$0xf]  ;;  %v3852_v15 = vld [vmem:[%s5674_s3 + $0x20] sm:$0xf0]  ;;  %v4091_v28 = vor.u32 %v3858_v11, %v3520_v10 }
  0x10   : > { %v3496_v16 = vld [vmem:[%s5674_s3] sm:$0xf]  ;;  %v3849_v18 = vld [vmem:[%s5674_s3 + $0x8] sm:$0xf0]  ;;  %v559_v20 = vrot.slane %v5677_v19, 3  ;;  %v562_v21 = vrot.slane %v5677_v19, 4  ;;  %v4104_v31 = vor.u32 %v3855_v13, %v3512_v12  ;;  %v4106_v32 = vor.u32 %v3852_v15, %v3504_v14 }
  0x11   : > { %s5931_s19 = smov (!%p222_p3, %s3438_s19), 1  ;;  %v4068_v22 = vld [vmem:[%s5672_s1] ss:$0 sm:$0xff]  ;;  %v4073_v23 = vld [vmem:[%s5674_s3 + $0xb0] sm:$0xf]  ;;  %v4108_v33 = vor.u32 %v3849_v18, %v3496_v16  ;;  %v5697_v45 = vmov 0.0  }
  0x12   : > { %888 = vmatpush.bf16.msra.mxu0 %v3545_v5  ;;  %3923 = vmatpush.bf16.msra.mxu1 %v3545_v5  ;;  %v4078_v24 = vld [vmem:[%s5674_s3 + $0xb8] sm:$0xf0]  ;;  %s3944_s10 = smul.u32 576, %s5931_s19  ;;  %v4084_v25 = vld [vmem:[%s5674_s3 + $0x168] sm:$0xf]  ;;  %v4130_v37 = vor.u32 %v562_v21, %v559_v20  ;;  %s3445_s12 = sshll.u32 %s5931_s19, 1 }
  0x13   : > { %3924 = vmatpush.bf16.msra.mxu2 %v3545_v5  ;;  %3925 = vmatpush.bf16.msra.mxu3 %v3545_v5  ;;  %v4089_v26 = vld [vmem:[%s5674_s3 + $0x170] sm:$0xf0]  ;;  %s3945_s15 = smul.u32 384, %s5931_s19  ;;  %v4097_v29 = vld [vmem:[%s5674_s3 + $0x170] sm:$0xf]  ;;  %v3589_v41 = vor.u32 %v4078_v24, %v4073_v23  ;;  %vm3349_vm2 = vcmask 1040384  }
  0x14   : > { %v4102_v30 = vld [vmem:[%s5674_s3 + $0x178] sm:$0xf0]  ;;  %s4113_s24 = scalar_lea.vmem %s5671_s0, %s3944_s10  ;;  %v4118_v34 = vld [vmem:[%s5673_s2] ss:$0 sm:$0xff]  ;;  %v4123_v35 = vld [vmem:[%s5674_s3 + $0x98] sm:$0xf]  ;;  %v3681_v42 = vor.u32 %v4089_v26, %v4084_v25 }
  0x15   : > { %v4128_v36 = vld [vmem:[%s5674_s3 + $0xa0] sm:$0xf0]  ;;  %s4135_s8 = scalar_lea.vmem %s5675_s4, %s3945_s15  ;;  %v3461_v38 = vld [vmem:[%s4113_s24 + $0xa8] sm:$0xff]  ;;  %v3462_v39 = vld [vmem:[%s4113_s24 + $0xb0] sm:$0xff]  ;;  %v3717_v50 = vor.u32 %v4102_v30, %v4097_v29  ;;  %vm555_vm0 = vsmask.f32 4352 }
  0x16   : > { %889 = vmatpush.bf16.msra.mxu0 %v3537_v17  ;;  %3926 = vmatpush.bf16.msra.mxu1 %v3537_v17  ;;  %v3470_v40 = vld [vmem:[%s4113_s24 + $0xf0] sm:$0xff]  ;;  %v312_v43 = vmul.f32 %v4068_v22, %v3461_v38  ;;  %v313_v44 = vmul.f32 %v4068_v22, %v3462_v39  ;;  %3149 = vst [vmem:[%s4135_s8 + $0x10] sm:$0xff] %v5697_v45  ;;  %v3471_v46 = vld [vmem:[%s4113_s24 + $0xf8] sm:$0xff]  ;;  %v3473_v47 = vld [vmem:[%s4113_s24 + $0x108] sm:$0xff]  ;;  %vm2195_vm1 = vsmask.f32 7424 }
  0x17   : > { %3927 = vmatpush.bf16.msra.mxu2 %v3537_v17  ;;  %3928 = vmatpush.bf16.msra.mxu3 %v3537_v17  ;;  %v321_v48 = vmul.f32 %v4068_v22, %v3470_v40  ;;  %v3485_v49 = vld [vmem:[%s4113_s24 + $0x168] sm:$0xff]  ;;  %3152 = vst [vmem:[%s4135_s8 + $0x28] sm:$0xff] %v5697_v45  ;;  %v322_v51 = vmul.f32 %v4068_v22, %v3471_v46  ;;  %v3486_v53 = vld [vmem:[%s4113_s24 + $0x170] sm:$0xff]  ;;  %v3447_v63 = vld [vmem:[%s4113_s24 + $0x38] sm:$0xff] }
  0x18   : > { %v324_v52 = vmul.f32 %v4068_v22, %v3473_v47  ;;  %v336_v54 = vmul.f32 %v4068_v22, %v3485_v49  ;;  %v3585_v55 = vor.u32 %v4128_v36, %v4123_v35  ;;  %v4163_v56 = vadd.f32 %v4118_v34, %v312_v43  ;;  %3155 = vst [vmem:[%s4135_s8 + $0x40] sm:$0xff] %v5697_v45  ;;  %v3446_v59 = vld [vmem:[%s4113_s24 + $0x30] sm:$0xff]  ;;  %v3449_v19 = vld [vmem:[%s4113_s24 + $0x48] sm:$0xff] }
  0x19   : > { %v4166_v57 = vadd.f32 %v4118_v34, %v313_v44  ;;  %v4171_v58 = vadd.f32 %v4118_v34, %v321_v48  ;;  %3158 = vst [vmem:[%s4135_s8 + $0x58] sm:$0xff] %v5697_v45  ;;  %v4177_v60 = vadd.f32 %v4118_v34, %v322_v51  ;;  %v337_v62 = vmul.f32 %v4068_v22, %v3486_v53  ;;  %v3866_v23 = vld [vmem:[%s5674_s3 + $0x94] sm:$0xf] }
  0x1a   : > { %890 = vmatpush.bf16.msra.mxu0 %v3529_v27  ;;  %3929 = vmatpush.bf16.msra.mxu1 %v3529_v27  ;;  %v4180_v61 = vadd.f32 %v4118_v34, %v324_v52  ;;  %v5693_v0 = vmax.f32 %v4163_v56, 0.0  ;;  %3161 = vst [vmem:[%s4135_s8 + $0x70] sm:$0xff] %v5697_v45  ;;  %v4190_v3 = vadd.f32 %v4118_v34, %v336_v54 }
  0x1b   : > { %3930 = vmatpush.bf16.msra.mxu2 %v3529_v27  ;;  %3931 = vmatpush.bf16.msra.mxu3 %v3529_v27  ;;  %v5689_v1 = vmax.f32 %v4166_v57, 0.0  ;;  %v5685_v2 = vmax.f32 %v4171_v58, 0.0  ;;  %3164 = vst [vmem:[%s4135_s8 + $0x88] sm:$0xff] %v5697_v45  ;;  %v5684_v4 = vmax.f32 %v4177_v60, 0.0  ;;  %v4197_v6 = vadd.f32 %v4118_v34, %v337_v62 }
  0x1c   : > { %5753 = vst [vmem:[#allocation2_spill] sm:$0xff] %v4190_v3  ;;  %v5683_v5 = vmax.f32 %v4180_v61, 0.0  ;;  %v297_v7 = vmul.f32 %v4068_v22, %v3446_v59  ;;  %v538_v8 = vpack.c.bf16 %v5693_v0, %v5697_v45  ;;  %v298_v10 = vmul.f32 %v4068_v22, %v3447_v63  ;;  %v3464_v63 = vld [vmem:[%s4113_s24 + $0xc0] sm:$0xff] }
  0x1d   : > { %5754 = vst [vmem:[#allocation3_spill] sm:$0xff] %v4197_v6  ;;  %v539_v9 = vpack.c.bf16 0.0, %v5689_v1  ;;  %v543_v11 = vpack.c.bf16 %v5684_v4, %v5685_v2  ;;  %v5679_v13 = vmax.f32 %v4190_v3, 0.0  ;;  %v5678_v14 = vmax.f32 %v4197_v6, 0.0  ;;  %v3455_v3 = vld [vmem:[%s4113_s24 + $0x78] sm:$0xff] }
  0x1e   : > { %891 = vmatpush.bf16.msra.mxu0 %v4091_v28  ;;  %3932 = vmatpush.bf16.msra.mxu1 %v4091_v28  ;;  %3167 = vst [vmem:[%s4135_s8 + $0xa0] sm:$0xff] %v5697_v45  ;;  %v544_v12 = vpack.c.bf16 %v5683_v5, %v5697_v45  ;;  %v629_v15 = vshrl.u32 %v538_v8, 16  ;;  %v632_v16 = vshll.u32 %v538_v8, 16  ;;  %v4253_v59 = vadd.f32 %v4118_v34, %v297_v7 }
  0x1f   : > { %3933 = vmatpush.bf16.msra.mxu2 %v4091_v28  ;;  %3934 = vmatpush.bf16.msra.mxu3 %v4091_v28  ;;  %3170 = vst [vmem:[%s4135_s8 + $0xb8] sm:$0xff] %v5697_v45  ;;  %v638_v17 = vshrl.u32 %v539_v9, 16  ;;  %v641_v18 = vshll.u32 %v539_v9, 16  ;;  %v674_v20 = vshrl.u32 %v543_v11, 16  ;;  %v677_v21 = vshll.u32 %v543_v11, 16 }
  0x20   : > { %3173 = vst [vmem:[%s4135_s8 + $0xd0] sm:$0xff] %v5697_v45  ;;  %v683_v27 = vshrl.u32 %v544_v12, 16  ;;  %v686_v28 = vshll.u32 %v544_v12, 16  ;;  %v631_v38 = vrot.slane %v629_v15, 3  ;;  %v634_v39 = vrot.slane %v632_v16, 4  ;;  %v3465_v12 = vld [vmem:[%s4113_s24 + $0xc8] sm:$0xff] }
  0x21   : > { %3176 = vst [vmem:[%s4135_s8 + $0xe8] sm:$0xff] %v5697_v45  ;;  %v640_v40 = vrot.slane %v638_v17, 3  ;;  %v643_v43 = vrot.slane %v641_v18, 4  ;;  %v676_v44 = vrot.slane %v674_v20, 3  ;;  %v679_v46 = vrot.slane %v677_v21, 4  ;;  %v3474_v15 = vld [vmem:[%s4113_s24 + $0x110] sm:$0xff] }
  0x22   : > { %892 = vmatpush.bf16.msra.mxu0 %v4104_v31  ;;  %3935 = vmatpush.bf16.msra.mxu1 %v4104_v31  ;;  %3179 = vst [vmem:[%s4135_s8 + $0x100] sm:$0xff] %v5697_v45  ;;  %v685_v47 = vrot.slane %v683_v27, 3  ;;  %v688_v48 = vrot.slane %v686_v28, 4  ;;  %v4235_v49 = vor.u32 %v634_v39, %v631_v38  ;;  %v550_v52 = vpack.c.bf16 %v5679_v13, %v5697_v45  ;;  %v3488_v20 = vld [vmem:[%s4113_s24 + $0x180] sm:$0xff] }
  0x23   : > { %3936 = vmatpush.bf16.msra.mxu2 %v4104_v31  ;;  %3937 = vmatpush.bf16.msra.mxu3 %v4104_v31  ;;  %3182 = vst [vmem:[%s4135_s8 + $0x118] sm:$0xff] %v5697_v45  ;;  %v4237_v51 = vor.u32 %v643_v43, %v640_v40  ;;  %v551_v31 = vpack.c.bf16 0.0, %v5678_v14  ;;  %v4248_v53 = vor.u32 %v679_v46, %v676_v44  ;;  %v5696_v17 = vmax.f32 %v4253_v59, 0.0  ;;  %v3489_v44 = vld [vmem:[%s4113_s24 + $0x188] sm:$0xff]  ;;  %v3672_v46 = vld [vmem:[%s5674_s3 + $0x150] sm:$0xf] }
  0x24   : > { %3185 = vst [vmem:[%s4135_s8 + $0x130] sm:$0xff] %v5697_v45  ;;  %v4250_v54 = vor.u32 %v688_v48, %v685_v47  ;;  %v4256_v62 = vadd.f32 %v4118_v34, %v298_v10  ;;  %v737_v9 = vshrl.u32 %v550_v52, 16  ;;  %v740_v11 = vshll.u32 %v550_v52, 16  ;;  %v3891_v47 = vld [vmem:[%s5674_s3 + $0x158] sm:$0xf0] }
  0x25   : > { %3188 = vst [vmem:[%s4135_s8 + $0x148] sm:$0xff] %v5697_v45  ;;  %v4264_v8 = vsel %vm555_vm0, %v4235_v49, %v4237_v51  ;;  %v746_v7 = vshrl.u32 %v551_v31, 16  ;;  %v749_v16 = vshll.u32 %v551_v31, 16  ;;  %v315_v38 = vmul.f32 %v4068_v22, %v3464_v63  ;;  %v3869_v63 = vld [vmem:[%s5674_s3 + $0xac] sm:$0xf] }
  0x26   : > { %893 = vmatpush.bf16.msra.mxu0 %v4106_v32  ;;  %3938 = vmatpush.bf16.msra.mxu1 %v4106_v32  ;;  %3191 = vst [vmem:[%s4135_s8 + $0x160] sm:$0xff] %v5697_v45  ;;  %v4277_v10 = vsel %vm555_vm0, %v4248_v53, %v4250_v54  ;;  %v5695_v18 = vmax.f32 %v4256_v62, 0.0  ;;  %v739_v21 = vrot.slane %v737_v9, 3  ;;  %v742_v27 = vrot.slane %v740_v11, 4  ;;  %v3554_v9 = vld [vmem:[%s5674_s3 + $0xb4] sm:$0xf0] }
  0x27   : > { %3939 = vmatpush.bf16.msra.mxu2 %v4106_v32  ;;  %3940 = vmatpush.bf16.msra.mxu3 %v4106_v32  ;;  %3194 = vst [vmem:[%s4135_s8 + $0x178] sm:$0xff] %v5697_v45  ;;  %v748_v28 = vrot.slane %v746_v7, 3  ;;  %v751_v39 = vrot.slane %v749_v16, 4  ;;  %v316_v40 = vmul.f32 %v4068_v22, %v3465_v12  ;;  %v325_v43 = vmul.f32 %v4068_v22, %v3474_v15  ;;  %v3712_v11 = vld [vmem:[%s5674_s3 + $0x158] sm:$0xf] }
  0x28   : > { %v531_v32 = vpack.c.bf16 %v5695_v18, %v5696_v17  ;;  %v4298_v48 = vor.u32 %v742_v27, %v739_v21  ;;  %v4301_v52 = vadd.f32 %v4118_v34, %v315_v38  ;;  %v339_v31 = vmul.f32 %v4068_v22, %v3488_v20  ;;  %v3892_v20 = vld [vmem:[%s5674_s3 + $0x160] sm:$0xf0]  ;;  %v3664_v21 = vld [vmem:[%s5674_s3 + $0x138] sm:$0xf] }
  0x29   : > { %v4315_v7 = vor.u32 %v751_v39, %v748_v28  ;;  %v4318_v16 = vadd.f32 %v4118_v34, %v316_v40  ;;  %v4334_v27 = vadd.f32 %v4118_v34, %v325_v43  ;;  %v340_v28 = vmul.f32 %v4068_v22, %v3489_v44  ;;  %v3888_v39 = vld [vmem:[%s5674_s3 + $0x140] sm:$0xf0] }
  0x2a   : > { %894 = vmatpush.bf16.msra.mxu0 %v4108_v33  ;;  %3941 = vmatpush.bf16.msra.mxu1 %v4108_v33  ;;  %v566_v12 = vshrl.u32 %v531_v32, 16  ;;  %v569_v15 = vshll.u32 %v531_v32, 16  ;;  %v4338_v38 = vadd.f32 %v4118_v34, %v339_v31  ;;  %v3673_v44 = vor.u32 %v3891_v47, %v3672_v46  ;;  %v3580_v31 = vld [vmem:[%s5674_s3 + $0x80] sm:$0xf] }
  0x2b   : > { %3942 = vmatpush.bf16.msra.mxu2 %v4108_v33  ;;  %3943 = vmatpush.bf16.msra.mxu3 %v4108_v33  ;;  %v5688_v33 = vmax.f32 %v4301_v52, 0.0  ;;  %v4351_v24 = vsel %vm555_vm0, %v4298_v48, %v4315_v7  ;;  %v5682_v32 = vmax.f32 %v4334_v27, 0.0  ;;  %v4361_v40 = vadd.f32 %v4118_v34, %v340_v28 }
  0x2c   : > { %5755 = vst [vmem:[#allocation4_spill] sm:$0xff] %v4338_v38  ;;  %v568_v25 = vrot.slane %v566_v12, 3  ;;  %v571_v26 = vrot.slane %v569_v15, 4  ;;  %v5681_v43 = vmax.f32 %v4338_v38, 0.0  ;;  %v3865_v12 = vld [vmem:[%s5674_s3 + $0x88] sm:$0xf0]  ;;  %v3557_v47 = vor.u32 %v3869_v63, %v3554_v9 }
  0x2d   : > { %895 = vmatmul.bf16.vlgmr.msra.gmra.mxu0 %v4130_v37  ;;  %940 = vmatmul.bf16.vlgmr.msra.gmra.mxu1 %v4264_v8  ;;  %5756 = vst [vmem:[#allocation5_spill] sm:$0xff] %v4351_v24  ;;  %v3713_v28 = vor.u32 %v3892_v20, %v3712_v11  ;;  %v545_v14 = vpack.c.bf16 0.0, %v5682_v32  ;;  %v5680_v29 = vmax.f32 %v4361_v40, 0.0  ;;  %v3665_v30 = vor.u32 %v3888_v39, %v3664_v21  ;;  %v3477_v39 = vld [vmem:[%s4113_s24 + $0x128] sm:$0xff] }
  0x2e   : > { %965 = vmatmul.bf16.vlgmr.msra.gmra.mxu2 %v4277_v10  ;;  %1000 = vmatmul.bf16.vlgmr.msra.gmra.mxu3 %v4351_v24  ;;  %5757 = vst [vmem:[#allocation6_spill] sm:$0xff] %v4361_v40  ;;  %v4373_v15 = vor.u32 %v571_v26, %v568_v25  ;;  %v3467_v25 = vld [vmem:[%s4113_s24 + $0xd8] sm:$0xff]  ;;  %v3476_v26 = vld [vmem:[%s4113_s24 + $0x120] sm:$0xff]  ;;  %v3581_v35 = vor.u32 %v3865_v12, %v3580_v31 }
  0x2f   : > { %1255 = vmatpush.bf16.msrb.mxu2 %v3589_v41  ;;  %1570 = vmatpush.bf16.msrb.mxu3 %v3681_v42  ;;  %v5687_v41 = vmax.f32 %v4318_v16, 0.0  ;;  %v3546_v42 = vld [vmem:[%s5674_s3 + $0x9c] sm:$0xf0]  ;;  %v692_v36 = vshrl.u32 %v545_v14, 16  ;;  %v552_v20 = vpack.c.bf16 %v5680_v29, %v5681_v43  ;;  %v300_v21 = vmul.f32 %v4068_v22, %v3449_v19  ;;  %v3648_v29 = vld [vmem:[%s5674_s3 + $0x108] sm:$0xf] }
  0x30   : > { %1985 = vmatpush.bf16.msrb.mxu0 %v3717_v50  ;;  %v3549_v50 = vor.u32 %v3866_v23, %v3546_v42  ;;  %v4391_v63 = vsel %vm555_vm0, %v4130_v37, %v4373_v15  ;;  %1022 = vmatpush.bf16.msrb.mxu1 %v3557_v47  ;;  %v3882_v43 = vld [vmem:[%s5674_s3 + $0x110] sm:$0xf0] }
  0x31   : > { %v540_v46 = vpack.c.bf16 %v5687_v41, %v5688_v33  ;;  %v694_v47 = vrot.slane %v692_v36, 3  ;;  %v755_v12 = vshrl.u32 %v552_v20, 16  ;;  %v4404_v19 = vadd.f32 %v4118_v34, %v300_v21  ;;  %v3450_v33 = vld [vmem:[%s4113_s24 + $0x50] sm:$0xff] }
  0x33   : > { %1256 = vmatpush.bf16.msrb.mxu2 %v3585_v55  ;;  %1571 = vmatpush.bf16.msrb.mxu3 %v3673_v44  ;;  %v647_v9 = vshrl.u32 %v540_v46, 16  ;;  %v650_v11 = vshll.u32 %v540_v46, 16  ;;  %v695_v55 = vshll.u32 %v545_v14, 16  ;;  %v318_v44 = vmul.f32 %v4068_v22, %v3467_v25  ;;  %v3491_v25 = vld [vmem:[%s4113_s24 + $0x198] sm:$0xff] }
  0x34   : > { %1986 = vmatpush.bf16.msrb.mxu0 %v3713_v28  ;;  %v327_v46 = vmul.f32 %v4068_v22, %v3476_v26  ;;  %v758_v14 = vshll.u32 %v552_v20, 16  ;;  %1023 = vmatpush.bf16.msrb.mxu1 %v3549_v50  ;;  %v328_v28 = vmul.f32 %v4068_v22, %v3477_v39  ;;  %v3656_v26 = vld [vmem:[%s5674_s3 + $0x120] sm:$0xf]  ;;  %v757_v50 = vrot.slane %v755_v12, 3  ;;  %v3538_v20 = vld [vmem:[%s5674_s3 + $0x84] sm:$0xf0] }
  0x35   : > { %v649_v23 = vrot.slane %v647_v9, 3  ;;  %v652_v42 = vrot.slane %v650_v11, 4  ;;  %v697_v31 = vrot.slane %v695_v55, 4  ;;  %v4407_v9 = vadd.f32 %v4118_v34, %v318_v44  ;;  %v3863_v55 = vld [vmem:[%s5674_s3 + $0x7c] sm:$0xf] }
  0x36   : > { %v4420_v36 = vadd.f32 %v4118_v34, %v327_v46  ;;  %v5694_v39 = vmax.f32 %v4404_v19, 0.0  ;;  %v3576_v44 = vld [vmem:[%s5674_s3 + $0x68] sm:$0xf]  ;;  %v3862_v46 = vld [vmem:[%s5674_s3 + $0x70] sm:$0xf0]  ;;  %v342_v12 = vmul.f32 %v4068_v22, %v3491_v25  ;;  %v3541_v4 = vor.u32 %v3863_v55, %v3538_v20  ;;  %v3468_v20 = vld [vmem:[%s4113_s24 + $0xe0] sm:$0xff] }
  0x37   : > { %1572 = vmatpush.bf16.msrb.mxu3 %v3665_v30  ;;  %1257 = vmatpush.bf16.msrb.mxu2 %v3581_v35  ;;  %v4401_v13 = vor.u32 %v652_v42, %v649_v23  ;;  %v3885_v30 = vld [vmem:[%s5674_s3 + $0x128] sm:$0xf0]  ;;  %v4417_v11 = vor.u32 %v697_v31, %v694_v47  ;;  %v760_v35 = vrot.slane %v758_v14, 4  ;;  %v5686_v23 = vmax.f32 %v4407_v9, 0.0  ;;  %v3708_v14 = vld [vmem:[%s5674_s3 + $0x140] sm:$0xf] }
  0x38   : > { %v4436_v42 = vadd.f32 %v4118_v34, %v328_v28  ;;  %v5692_v31 = vmax.f32 %v4420_v36, 0.0  ;;  %v3889_v28 = vld [vmem:[%s5674_s3 + $0x148] sm:$0xf0]  ;;  %v3657_v25 = vor.u32 %v3885_v30, %v3656_v26  ;;  %v4478_v5 = vadd.f32 %v4118_v34, %v342_v12  ;;  %1024 = vmatpush.bf16.msrb.mxu1 %v3541_v4 }
  0x39   : > { %v4431_v21 = vsel %vm555_vm0, %v4237_v51, %v4401_v13  ;;  %v4447_v51 = vsel %vm555_vm0, %v4250_v54, %v4417_v11  ;;  %v4449_v47 = vor.u32 %v760_v35, %v757_v50  ;;  %v532_v54 = vpack.c.bf16 %v5694_v39, %v5697_v45 }
  0x3a   : > { %v541_v50 = vpack.c.bf16 %v5686_v23, %v5697_v45  ;;  %v5691_v35 = vmax.f32 %v4436_v42, 0.0  ;;  %5759 = vst [vmem:[#allocation8_spill] sm:$0xff] %v4478_v5  ;;  %v3577_v2 = vor.u32 %v3862_v46, %v3576_v44  ;;  %v3709_v12 = vor.u32 %v3889_v28, %v3708_v14 }
  0x3b   : > { %v4475_v32 = vsel %vm555_vm0, %v4315_v7, %v4449_v47  ;;  %v575_v26 = vshrl.u32 %v532_v54, 16  ;;  %v578_v30 = vshll.u32 %v532_v54, 16  ;;  %1573 = vmatpush.bf16.msrb.mxu3 %v3657_v25  ;;  %v5690_v7 = vmax.f32 %v4478_v5, 0.0 }
  0x3c   : > { %5758 = vst [vmem:[#allocation7_spill] sm:$0xff] %v4475_v32  ;;  %v656_v23 = vshrl.u32 %v541_v50, 16  ;;  %v659_v41 = vshll.u32 %v541_v50, 16  ;;  %v546_v1 = vpack.c.bf16 %v5691_v35, %v5692_v31  ;;  %1258 = vmatpush.bf16.msrb.mxu2 %v3577_v2  ;;  %v3649_v55 = vor.u32 %v3882_v43, %v3648_v29  ;;  %v3479_v43 = vld [vmem:[%s4113_s24 + $0x138] sm:$0xff]  ;;  %v3492_v29 = vld [vmem:[%s4113_s24 + $0x1a0] sm:$0xff]  ;;  %1987 = vmatpush.bf16.msrb.mxu0 %v3709_v12 }
  0x3d   : > { %900 = vmatmul.bf16.gmra.mxu0 %v4391_v63  ;;  %945 = vmatmul.bf16.gmra.mxu1 %v4431_v21  ;;  %v577_v44 = vrot.slane %v575_v26, 3  ;;  %v580_v46 = vrot.slane %v578_v30, 4  ;;  %v553_v4 = vpack.c.bf16 %v5690_v7, %v5697_v45  ;;  %v301_v2 = vmul.f32 %v4068_v22, %v3450_v33  ;;  %v3860_v26 = vld [vmem:[%s5674_s3 + $0x64] sm:$0xf]  ;;  %v3572_v33 = vld [vmem:[%s5674_s3 + $0x50] sm:$0xf] }
  0x3e   : > { %970 = vmatmul.bf16.gmra.mxu2 %v4447_v51  ;;  %1005 = vmatmul.bf16.gmra.mxu3 %v4475_v32  ;;  %v701_v54 = vshrl.u32 %v546_v1, 16  ;;  %v704_v50 = vshll.u32 %v546_v1, 16  ;;  %v658_v14 = vrot.slane %v656_v23, 3  ;;  %v661_v28 = vrot.slane %v659_v41, 4  ;;  %v3530_v1 = vld [vmem:[%s5674_s3 + $0x6c] sm:$0xf0] }
  0x3f   : > { %1574 = vmatpush.bf16.msrb.mxu3 %v3649_v55  ;;  %v319_v25 = vmul.f32 %v4068_v22, %v3468_v20  ;;  %v764_v30 = vshrl.u32 %v553_v4, 16  ;;  %v767_v7 = vshll.u32 %v553_v4, 16  ;;  %v3859_v41 = vld [vmem:[%s5674_s3 + $0x58] sm:$0xf0]  ;;  %v4511_v55 = vadd.f32 %v4118_v34, %v301_v2  ;;  %v3640_v4 = vld [vmem:[%s5674_s3 + $0xf0] sm:$0xf] }
  0x40   : > { %v703_v23 = vrot.slane %v701_v54, 3  ;;  %v706_v12 = vrot.slane %v704_v50, 4  ;;  %v3879_v35 = vld [vmem:[%s5674_s3 + $0xf8] sm:$0xf0]  ;;  %v330_v39 = vmul.f32 %v4068_v22, %v3479_v43  ;;  %v3857_v54 = vld [vmem:[%s5674_s3 + $0x4c] sm:$0xf]  ;;  %v343_v18 = vmul.f32 %v4068_v22, %v3492_v29 }
  0x41   : > { %v4514_v20 = vadd.f32 %v4118_v34, %v319_v25  ;;  %v766_v31 = vrot.slane %v764_v30, 3  ;;  %v769_v0 = vrot.slane %v767_v7, 4  ;;  %v3522_v50 = vld [vmem:[%s5674_s3 + $0x54] sm:$0xf0]  ;;  %v5702_v2 = vmax.f32 %v4511_v55, 0.0 }
  0x42   : > { %v3533_v17 = vor.u32 %v3860_v26, %v3530_v1  ;;  %v3704_v7 = vld [vmem:[%s5674_s3 + $0x128] sm:$0xf]  ;;  %v3886_v43 = vld [vmem:[%s5674_s3 + $0x130] sm:$0xf0]  ;;  %v4538_v30 = vor.u32 %v580_v46, %v577_v44  ;;  %v4541_v45 = vadd.f32 %v4118_v34, %v330_v39  ;;  %v3573_v5 = vor.u32 %v3859_v41, %v3572_v33 }
  0x43   : > { %v533_v25 = vpack.c.bf16 0.0, %v5702_v2  ;;  %v5760_v29 = vmax.f32 %v4514_v20, 0.0  ;;  %v4548_v1 = vadd.f32 %v4118_v34, %v343_v18  ;;  %v3641_v40 = vor.u32 %v3879_v35, %v3640_v4  ;;  %v3453_v4 = vld [vmem:[%s4113_s24 + $0x68] sm:$0xff] }
  0x44   : > { %1025 = vmatpush.bf16.msrb.mxu1 %v3533_v17  ;;  %v4550_v38 = vor.u32 %v661_v28, %v658_v14  ;;  %v5704_v44 = vmax.f32 %v4541_v45, 0.0  ;;  %1259 = vmatpush.bf16.msrb.mxu2 %v3573_v5  ;;  %v3525_v39 = vor.u32 %v3857_v54, %v3522_v50  ;;  %v3705_v46 = vor.u32 %v3886_v43, %v3704_v7  ;;  %v3452_v5 = vld [vmem:[%s4113_s24 + $0x60] sm:$0xff] }
  0x45   : > { %v542_v26 = vpack.c.bf16 0.0, %v5760_v29  ;;  %5761 = vst [vmem:[#allocation9_spill] sm:$0xff] %v4548_v1  ;;  %v4553_v33 = vor.u32 %v706_v12, %v703_v23  ;;  %v4555_v41 = vor.u32 %v769_v0, %v766_v31  ;;  %1575 = vmatpush.bf16.msrb.mxu3 %v3641_v40  ;;  %v584_v29 = vshrl.u32 %v533_v25, 16 }
  0x46   : > { %v587_v2 = vshll.u32 %v533_v25, 16  ;;  %v5703_v18 = vmax.f32 %v4548_v1, 0.0  ;;  %1988 = vmatpush.bf16.msrb.mxu0 %v3705_v46  ;;  %v5762_v14 = vmov 0.0   ;;  %v4566_v0 = vsel %vm555_vm0, %v4373_v15, %v4538_v30  ;;  %v3480_v25 = vld [vmem:[%s4113_s24 + $0x140] sm:$0xff] }
  0x47   : > { %v665_v17 = vshrl.u32 %v542_v26, 16  ;;  %v668_v35 = vshll.u32 %v542_v26, 16  ;;  %v547_v28 = vpack.c.bf16 %v5704_v44, %v5762_v14  ;;  %v4571_v40 = vsel %vm555_vm0, %v4401_v13, %v4550_v38  ;;  %v3876_v46 = vld [vmem:[%s5674_s3 + $0xe0] sm:$0xf0] }
  0x48   : > { %1026 = vmatpush.bf16.msrb.mxu1 %v3525_v39  ;;  %v554_v31 = vpack.c.bf16 0.0, %v5703_v18  ;;  %v4578_v23 = vsel %vm555_vm0, %v4417_v11, %v4553_v33  ;;  %v4583_v12 = vsel %vm555_vm0, %v4449_v47, %v4555_v41  ;;  %v586_v15 = vrot.slane %v584_v29, 3 }
  0x49   : > { %5763 = vst [vmem:[#allocation10_spill] sm:$0xff] %v4583_v12  ;;  %v589_v54 = vrot.slane %v587_v2, 4  ;;  %v303_v50 = vmul.f32 %v4068_v22, %v3452_v5  ;;  %v304_v13 = vmul.f32 %v4068_v22, %v3453_v4  ;;  %v667_v7 = vrot.slane %v665_v17, 3  ;;  %v3632_v2 = vld [vmem:[%s5674_s3 + $0xd8] sm:$0xf] }
  0x4a   : > { %v670_v43 = vrot.slane %v668_v35, 4  ;;  %v710_v11 = vshrl.u32 %v547_v28, 16  ;;  %v713_v26 = vshll.u32 %v547_v28, 16  ;;  %v773_v47 = vshrl.u32 %v554_v31, 16  ;;  %v3854_v35 = vld [vmem:[%s5674_s3 + $0x34] sm:$0xf] }
  0x4b   : > { %v776_v39 = vshll.u32 %v554_v31, 16  ;;  %v331_v29 = vmul.f32 %v4068_v22, %v3480_v25  ;;  %v3633_v17 = vor.u32 %v3876_v46, %v3632_v2  ;;  %v3514_v28 = vld [vmem:[%s5674_s3 + $0x3c] sm:$0xf0]  ;;  %v3568_v5 = vld [vmem:[%s5674_s3 + $0x38] sm:$0xf]  ;;  %v4618_v18 = vadd.f32 %v4118_v34, %v303_v50 }
  0x4c   : > { %v3517_v4 = vor.u32 %v3854_v35, %v3514_v28  ;;  %v3856_v31 = vld [vmem:[%s5674_s3 + $0x40] sm:$0xf0]  ;;  %v3851_v25 = vld [vmem:[%s5674_s3 + $0x1c] sm:$0xf]  ;;  %v3506_v2 = vld [vmem:[%s5674_s3 + $0x24] sm:$0xf0]  ;;  %v4621_v44 = vadd.f32 %v4118_v34, %v304_v13 }
  0x4d   : > { %905 = vmatmul.bf16.gmra.mxu0 %v4566_v0  ;;  %950 = vmatmul.bf16.gmra.mxu1 %v4571_v40  ;;  %v712_v46 = vrot.slane %v710_v11, 3  ;;  %v3569_v35 = vor.u32 %v3856_v31, %v3568_v5  ;;  %v3624_v28 = vld [vmem:[%s5674_s3 + $0xc0] sm:$0xf]  ;;  %v715_v1 = vrot.slane %v713_v26, 4  ;;  %v778_v32 = vrot.slane %v776_v39, 4 }
  0x4e   : > { %975 = vmatmul.bf16.gmra.mxu2 %v4578_v23  ;;  %1010 = vmatmul.bf16.gmra.mxu3 %v4583_v12  ;;  %v775_v12 = vrot.slane %v773_v47, 3  ;;  %v3509_v6 = vor.u32 %v3851_v25, %v3506_v2  ;;  %v3873_v11 = vld [vmem:[%s5674_s3 + $0xc8] sm:$0xf0]  ;;  %v4630_v50 = vadd.f32 %v4118_v34, %v331_v29  ;;  %v3498_v26 = vld [vmem:[%s5674_s3 + $0xc] sm:$0xf0]  ;;  %v590_v29 = vor.u32 %v589_v54, %v586_v15 }
  0x4f   : > { %1576 = vmatpush.bf16.msrb.mxu3 %v3633_v17  ;;  %1027 = vmatpush.bf16.msrb.mxu1 %v3517_v4  ;;  %v3625_v13 = vor.u32 %v3873_v11, %v3624_v28  ;;  %v3848_v17 = vld [vmem:[%s5674_s3 + $0x4] sm:$0xf]  ;;  %v3700_v47 = vld [vmem:[%s5674_s3 + $0x110] sm:$0xf]  ;;  %v3883_v39 = vld [vmem:[%s5674_s3 + $0x118] sm:$0xf0]  ;;  %v671_v4 = vor.u32 %v670_v43, %v667_v7  ;;  %v306_v7 = vmul.f32 %v4068_v22, %v3455_v3 }
  0x50   : > { %1260 = vmatpush.bf16.msrb.mxu2 %v3569_v35  ;;  %v3701_v5 = vor.u32 %v3883_v39, %v3700_v47  ;;  %v5714_v31 = vmax.f32 %v4618_v18, 0.0  ;;  %v5713_v25 = vmax.f32 %v4621_v44, 0.0  ;;  %v3501_v2 = vor.u32 %v3848_v17, %v3498_v26  ;;  %v3853_v3 = vld [vmem:[%s5674_s3 + $0x28] sm:$0xf0] }
  0x51   : > { %v716_v35 = vor.u32 %v715_v1, %v712_v46  ;;  %v4646_v28 = vor.u32 %v778_v32, %v775_v12  ;;  %v5712_v11 = vmax.f32 %v4630_v50, 0.0  ;;  %v4652_v15 = vsel %vm555_vm0, %v4538_v30, %v590_v29  ;;  %v3482_v32 = vld [vmem:[%s4113_s24 + $0x150] sm:$0xff]  ;;  %v3483_v1 = vld [vmem:[%s4113_s24 + $0x158] sm:$0xff]  ;;  %v3917_v39 = vld [vmem:[%s5674_s3 + $0x22c] sm:$0xf] }
  0x52   : > { %1989 = vmatpush.bf16.msrb.mxu0 %v3701_v5  ;;  %v4656_v54 = vsel %vm555_vm0, %v4550_v38, %v671_v4  ;;  %v333_v43 = vmul.f32 %v4068_v22, %v3482_v32  ;;  %v334_v46 = vmul.f32 %v4068_v22, %v3483_v1  ;;  %v3810_v5 = vld [vmem:[%s5674_s3 + $0x234] sm:$0xf0] }
  0x53   : > { %1577 = vmatpush.bf16.msrb.mxu3 %v3625_v13  ;;  %1028 = vmatpush.bf16.msrb.mxu1 %v3509_v6  ;;  %5764 = vst [vmem:[#allocation11_spill] sm:$0xff] %v4646_v28  ;;  %v534_v6 = vpack.c.bf16 %v5713_v25, %v5714_v31  ;;  %v4666_v12 = vsel %vm555_vm0, %v4553_v33, %v716_v35  ;;  %v548_v38 = vpack.c.bf16 0.0, %v5712_v11  ;;  %v3564_v13 = vld [vmem:[%s5674_s3 + $0x20] sm:$0xf] }
  0x54   : > { %v4671_v30 = vsel %vm555_vm0, %v4555_v41, %v4646_v28  ;;  %v3565_v47 = vor.u32 %v3853_v3, %v3564_v13  ;;  %v4698_v32 = vadd.f32 %v4118_v34, %v333_v43  ;;  %v4701_v1 = vadd.f32 %v4118_v34, %v334_v46 }
  0x55   : > { %5765 = vst [vmem:[#allocation12_spill] sm:$0xff] %v4671_v30  ;;  %v593_v33 = vshrl.u32 %v534_v6, 16  ;;  %v596_v41 = vshll.u32 %v534_v6, 16  ;;  %v719_v17 = vshrl.u32 %v548_v38, 16  ;;  %v722_v26 = vshll.u32 %v548_v38, 16 }
  0x56   : > { %v3813_v6 = vor.u32 %v3917_v39, %v3810_v5  ;;  %5766 = vst [vmem:[#allocation13_spill] sm:$0xff] %v4701_v1  ;;  %1261 = vmatpush.bf16.msrb.mxu2 %v3565_v47  ;;  %v5716_v31 = vmax.f32 %v4698_v32, 0.0 }
  0x57   : > { %1029 = vmatpush.bf16.msrb.mxu1 %v3501_v2  ;;  %v4695_v2 = vadd.f32 %v4118_v34, %v306_v7  ;;  %v595_v38 = vrot.slane %v593_v33, 3  ;;  %v598_v13 = vrot.slane %v596_v41, 4  ;;  %v721_v3 = vrot.slane %v719_v17, 3  ;;  %v3456_v17 = vld [vmem:[%s4113_s24 + $0x80] sm:$0xff] }
  0x58   : > { %2639 = vmatpush.bf16.msra.mxu3 %v3813_v6  ;;  %v724_v11 = vrot.slane %v722_v26, 4  ;;  %v5715_v7 = vmax.f32 %v4701_v1, 0.0  ;;  %v4718_v41 = vsel %vm555_vm0, %v671_v4, %v4248_v53  ;;  %v3696_v53 = vld [vmem:[%s5674_s3 + $0xf8] sm:$0xf]  ;;  %v3560_v4 = vld [vmem:[%s5674_s3 + $0x8] sm:$0xf] }
  0x59   : > { %v5717_v25 = vmax.f32 %v4695_v2, 0.0  ;;  %v599_v39 = vor.u32 %v598_v13, %v595_v38  ;;  %v307_v13 = vmul.f32 %v4068_v22, %v3456_v17 }
  0x5a   : > { %v725_v5 = vor.u32 %v724_v11, %v721_v3  ;;  %v549_v46 = vpack.c.bf16 %v5715_v7, %v5716_v31  ;;  %v3850_v3 = vld [vmem:[%s5674_s3 + $0x10] sm:$0xf0] }
  0x5b   : > { %v535_v43 = vpack.c.bf16 %v5717_v25, %v5762_v14  ;;  %v4714_v33 = vsel %vm555_vm0, %v590_v29, %v599_v39  ;;  %v3880_v29 = vld [vmem:[%s5674_s3 + $0x100] sm:$0xf0]  ;;  %v3561_v17 = vor.u32 %v3850_v3, %v3560_v4  ;;  %v4748_v31 = vadd.f32 %v4118_v34, %v307_v13 }
  0x5c   : > { %v4722_v26 = vsel %vm555_vm0, %v716_v35, %v725_v5  ;;  %v728_v6 = vshrl.u32 %v549_v46, 16  ;;  %v731_v38 = vshll.u32 %v549_v46, 16  ;;  %v3697_v35 = vor.u32 %v3880_v29, %v3696_v53  ;;  %v3918_v46 = vld [vmem:[%s5674_s3 + $0x230] sm:$0xf0] }
  0x5d   : > { %910 = vmatmul.bf16.gmra.mxu0 %v4652_v15  ;;  %955 = vmatmul.bf16.gmra.mxu1 %v4656_v54  ;;  %v602_v11 = vshrl.u32 %v535_v43, 16  ;;  %v605_v47 = vshll.u32 %v535_v43, 16  ;;  %v3808_v43 = vld [vmem:[%s5674_s3 + $0x228] sm:$0xf] }
  0x5e   : > { %980 = vmatmul.bf16.gmra.mxu2 %v4666_v12  ;;  %1015 = vmatmul.bf16.gmra.mxu3 %v4671_v30  ;;  %v3809_v7 = vor.u32 %v3918_v46, %v3808_v43  ;;  %v730_v25 = vrot.slane %v728_v6, 3  ;;  %v5729_v30 = vmax.f32 %v4748_v31, 0.0  ;;  %v3682_v6 = vld [vmem:[%s5674_s3 + $0x174] sm:$0xf0]  ;;  %v3877_v46 = vld [vmem:[%s5674_s3 + $0xe8] sm:$0xf0] }
  0x5f   : > { %1990 = vmatpush.bf16.msrb.mxu0 %v3697_v35  ;;  %v604_v53 = vrot.slane %v602_v11, 3  ;;  %v607_v29 = vrot.slane %v605_v47, 4  ;;  %1262 = vmatpush.bf16.msrb.mxu2 %v3561_v17  ;;  %v3458_v35 = vld [vmem:[%s4113_s24 + $0x90] sm:$0xff]  ;;  %v3459_v11 = vld [vmem:[%s4113_s24 + $0x98] sm:$0xff] }
  0x60   : > { %2504 = vmatpush.bf16.msra.mxu1 %v3809_v7  ;;  %v536_v4 = vpack.c.bf16 0.0, %v5729_v30  ;;  %v3840_v30 = vld [vmem:[%s5674_s3 + $0x218] sm:$0xf] }
  0x61   : > { %v608_v24 = vor.u32 %v607_v29, %v604_v53 }
  0x62   : > { %v611_v7 = vshrl.u32 %v536_v4, 16  ;;  %v614_v47 = vshll.u32 %v536_v4, 16 }
  0x63   : > { %v4754_v3 = vsel %vm555_vm0, %v599_v39, %v608_v24  ;;  %v310_v39 = vmul.f32 %v4068_v22, %v3459_v11 }
  0x64   : > { %v616_v53 = vrot.slane %v614_v47, 4 }
  0x65   : > { %v4783_v4 = vadd.f32 %v4118_v34, %v310_v39 }
  0x6d   : > { %915 = vmatmul.bf16.gmra.mxu0 %v4714_v33  ;;  %960 = vmatmul.bf16.gmra.mxu1 %v4718_v41 }
  0x6e   : > { %985 = vmatmul.bf16.gmra.mxu2 %v4722_v26  ;;  %1018 = vmatmul.bf16.gmra.mxu3 %v4646_v28  ;;  %v733_v28 = vrot.slane %v731_v38, 4  ;;  %v3692_v38 = vld [vmem:[%s5674_s3 + $0xe0] sm:$0xf] }
  0x6f   : > { %v3693_v17 = vor.u32 %v3877_v46, %v3692_v38  ;;  %v5767_v38 = vmax.f32 %v4253_v59, 0.0 }
  0x70   : > { %v734_v1 = vor.u32 %v733_v28, %v730_v25  ;;  %v5725_v25 = vmov 0.0|0.0   ;;  %v309_v28 = vmul.f32 %v4068_v22, %v3458_v35  ;;  %v613_v22 = vrot.slane %v611_v7, 3 }
  0x71   : > { %1991 = vmatpush.bf16.msrb.mxu0 %v3693_v17  ;;  %v4793_v7 = vpack.c.bf16 %v5767_v38, %v5762_v14  ;;  %v3688_v14 = vld [vmem:[%s5674_s3 + $0xc8] sm:$0xf] }
  0x72   : > { %v4757_v13 = vsel %vm555_vm0, %v725_v5, %v734_v1  ;;  %v3893_v5 = vld [vmem:[%s5674_s3 + $0x16c] sm:$0xf]  ;;  %v4780_v29 = vadd.f32 %v4118_v34, %v309_v28  ;;  %v617_v35 = vor.u32 %v616_v53, %v613_v22  ;;  %v4801_v47 = vsel %vm555_vm0, %v734_v1, %v4298_v48  ;;  %v3874_v28 = vld [vmem:[%s5674_s3 + $0xd0] sm:$0xf0] }
  0x73   : > { %v3685_v43 = vor.u32 %v3893_v5, %v3682_v6  ;;  %v5727_v5 = vmax.f32 %v4783_v4, 0.0  ;;  %5768 = vst [vmem:[#allocation14_spill] sm:$0xff] %v4793_v7  ;;  %v3689_v39 = vor.u32 %v3874_v28, %v3688_v14  ;;  %v5769_v53 = vmax.f32 %v4256_v62, 0.0  ;;  %v3844_v62 = vld [vmem:[%s5674_s3 + $0x230] sm:$0xf] }
  0x74   : > { %v5728_v11 = vmax.f32 %v4780_v29, 0.0  ;;  %v4788_v6 = vsel %vm555_vm0, %v608_v24, %v617_v35 }
  0x75   : > { %1705 = vmatpush.bf16.msra.mxu2 %v3685_v43  ;;  %v3802_v43 = vld [vmem:[%s5674_s3 + $0x21c] sm:$0xf0]  ;;  %1992 = vmatpush.bf16.msrb.mxu0 %v3689_v39  ;;  %v4824_v38 = vpack.c.bf16 0.0, %v5769_v53  ;;  %v5772_v39 = vmax.f32 %v4511_v55, 0.0 }
  0x76   : > { %v537_v34 = vpack.c.bf16 %v5727_v5, %v5728_v11 }
  0x77   : > { %5770 = vst [vmem:[#allocation15_spill] sm:$0xff] %v4824_v38 }
  0x78   : > { %v620_v59 = vshrl.u32 %v537_v34, 16  ;;  %v623_v24 = vshll.u32 %v537_v34, 16  ;;  %v3800_v34 = vld [vmem:[%s5674_s3 + $0x210] sm:$0xf] }
  0x7a   : > { %v622_v48 = vrot.slane %v620_v59, 3  ;;  %v625_v1 = vrot.slane %v623_v24, 4 }
  0x7c   : > { %v626_v17 = vor.u32 %v625_v1, %v622_v48  ;;  %v5771_v1 = vmax.f32 %v4404_v19, 0.0  ;;  %v3674_v19 = vld [vmem:[%s5674_s3 + $0x15c] sm:$0xf0] }
  0x7d   : > { %920 = vmatmul.bf16.gmra.mxu0 %v4754_v3  ;;  %1030 = vmatmul.bf16.vlgmr.msrb.gmra.mxu1 %v4130_v37 }
  0x7e   : > { %990 = vmatmul.bf16.gmra.mxu2 %v4757_v13  ;;  %1578 = vmatmul.bf16.vlgmr.msrb.gmra.mxu3 %v5725_v25  ;;  %v4820_v22 = vsel %vm555_vm0, %v617_v35, %v626_v17  ;;  %v3915_v35 = vld [vmem:[%s5674_s3 + $0x218] sm:$0xf0]  ;;  %v4848_v48 = vsel %vm555_vm0, %v626_v17, %v4235_v49  ;;  %v3890_v49 = vld [vmem:[%s5674_s3 + $0x154] sm:$0xf] }
  0x7f   : > { %v3801_v59 = vor.u32 %v3915_v35, %v3800_v34  ;;  %v3677_v55 = vor.u32 %v3890_v49, %v3674_v19 }
  0x81   : > { %2505 = vmatpush.bf16.msra.mxu1 %v3801_v59  ;;  %1706 = vmatpush.bf16.msra.mxu2 %v3677_v55  ;;  %v4877_v59 = vld [vmem:[%s4135_s8 + $0x10] sm:$0xff] }
  0x8d   : > { %925 = vmatmul.bf16.gmra.mxu0 %v4788_v6  ;;  %1033 = vmatmul.bf16.gmra.mxu1 %v4391_v63  ;;  %v3914_v63 = vld [vmem:[%s5674_s3 + $0x214] sm:$0xf] }
  0x8e   : > { %995 = vmatmul.bf16.gmra.mxu2 %v4801_v47  ;;  %1583 = vmatmul.bf16.gmra.mxu3 %v4793_v7  ;;  %v3805_v46 = vor.u32 %v3914_v63, %v3802_v43  ;;  %v4854_v63 = vpack.c.bf16 %v5772_v39, %v5771_v1 }
  0x90   : > { %2640 = vmatpush.bf16.msra.mxu3 %v3805_v46  ;;  %5773 = vst [vmem:[#allocation16_spill] sm:$0xff] %v4854_v63 }
  0x9d   : > { %930 = vmatmul.bf16.gmra.mxu0 %v4820_v22  ;;  %1037 = vmatmul.bf16.gmra.mxu1 %v4566_v0  ;;  %v3919_v0 = vld [vmem:[%s5674_s3 + $0x238] sm:$0xf0] }
  0x9e   : > { %1263 = vmatmul.bf16.vlgmr.msrb.gmra.mxu2 %v4652_v15  ;;  %1588 = vmatmul.bf16.gmra.mxu3 %v4824_v38  ;;  %v3845_v24 = vor.u32 %v3919_v0, %v3844_v62  ;;  %v5776_v0 = vmax.f32 %v4618_v18, 0.0 }
  0xa0   : > { %2922 = vmatpush.bf16.msra.mxu0 %v3845_v24  ;;  %v4882_v24 = vpack.c.bf16 %v5776_v0, %v4877_v59  ;;  %v3911_v0 = vld [vmem:[%s5674_s3 + $0x1fc] sm:$0xf] }
  0xa2   : > { %5777 = vst [vmem:[#allocation19_spill] sm:$0xff] %v4882_v24 }
  0xaa   : > { %v4842_v14 = vpop.f32.mrf.mxu0  ;;  %v4844_v28 = vpop.f32.mrf.mxu1 }
  0xad   : > { %935 = vmatmul.bf16.gmra.mxu0 %v4848_v48  ;;  %1042 = vmatmul.bf16.gmra.mxu1 %v4652_v15 }
  0xae   : > { %1268 = vmatmul.bf16.gmra.mxu2 %v4714_v33  ;;  %1593 = vmatmul.bf16.gmra.mxu3 %v4854_v63 }
  0xb1   : > { %v4866_v43 = vpop.f32.mrf.mxu2  ;;  %v4868_v46 = vpop.f32.mrf.mxu3 }
  0xb2   : > { %5774 = vst [vmem:[#allocation17_spill] sm:$0xff] %v4868_v46  ;;  %v4870_v17 = vpop.f32.mrf.mxu0  ;;  %v4872_v15 = vpop.f32.mrf.mxu1  ;;  %v5785_v46 = vmax.f32 %v4748_v31, 0.0 }
  0xb9   : > { %v968_v53 = vpop.f32.mrf.mxu2  ;;  %v4874_v34 = vpop.f32.mrf.mxu3 }
  0xba   : > { %5775 = vst [vmem:[#allocation18_spill] sm:$0xff] %v4874_v34  ;;  %v901_v35 = vpop.f32.mrf.mxu0  ;;  %v946_v62 = vpop.f32.mrf.mxu1  ;;  %v5784_v34 = vmax.f32 %v4695_v2, 0.0  ;;  %v3666_v2 = vld [vmem:[%s5674_s3 + $0x144] sm:$0xf0] }
  0xbb   : > { %v5780_v35 = vmax.f32 %v4621_v44, 0.0 }
  0xbd   : > { %1047 = vmatmul.bf16.gmra.mxu1 %v4714_v33  ;;  %1993 = vmatmul.bf16.vlgmr.msrb.gmra.mxu0 %v4854_v63  ;;  %v4904_v62 = vpack.c.bf16 0.0, %v5780_v35 }
  0xbe   : > { %1273 = vmatmul.bf16.gmra.mxu2 %v4754_v3  ;;  %1598 = vmatmul.bf16.gmra.mxu3 %v4882_v24 }
  0xbf   : > { %5781 = vst [vmem:[#allocation22_spill] sm:$0xff] %v4904_v62 }
  0xc1   : > { %v4888_v1 = vpop.f32.mrf.mxu2  ;;  %v1006_v39 = vpop.f32.mrf.mxu3 }
  0xc2   : > { %v4890_v49 = vpop.f32.mrf.mxu0  ;;  %v4892_v19 = vpop.f32.mrf.mxu1  ;;  %v3794_v39 = vld [vmem:[%s5674_s3 + $0x204] sm:$0xf0] }
  0xc3   : > { %v3797_v25 = vor.u32 %v3911_v0, %v3794_v39  ;;  %v3792_v0 = vld [vmem:[%s5674_s3 + $0x1f8] sm:$0xf] }
  0xc5   : > { %2641 = vmatpush.bf16.msra.mxu3 %v3797_v25  ;;  %v3912_v25 = vld [vmem:[%s5674_s3 + $0x200] sm:$0xf0] }
  0xc9   : > { %v4894_v55 = vpop.f32.mrf.mxu2  ;;  %v4896_v18 = vpop.f32.mrf.mxu3 }
  0xca   : > { %5778 = vst [vmem:[#allocation20_spill] sm:$0xff] %v4894_v55  ;;  %v4898_v53 = vpop.f32.mrf.mxu0  ;;  %v4900_v33 = vpop.f32.mrf.mxu1  ;;  %v5800_v55 = vmax.f32 %v4318_v16, 0.0  ;;  %v3905_v16 = vld [vmem:[%s5674_s3 + $0x1cc] sm:$0xf] }
  0xcb   : > { %5779 = vst [vmem:[#allocation21_spill] sm:$0xff] %v4896_v18 }
  0xcc   : > { %v5046_v7 = vpack.c.bf16 0.0, %v5800_v55  ;;  %v3778_v55 = vld [vmem:[%s5674_s3 + $0x1d4] sm:$0xf0] }
  0xcd   : > { %1052 = vmatmul.bf16.gmra.mxu1 %v4754_v3  ;;  %1998 = vmatmul.bf16.gmra.mxu0 %v4882_v24  ;;  %v3916_v3 = vld [vmem:[%s5674_s3 + $0x220] sm:$0xf0]  ;;  %v4940_v24 = vpack.c.bf16 %v5785_v46, %v5784_v34 }
  0xce   : > { %1278 = vmatmul.bf16.gmra.mxu2 %v4788_v6  ;;  %1603 = vmatmul.bf16.gmra.mxu3 %v4904_v62  ;;  %v3841_v39 = vor.u32 %v3916_v3, %v3840_v30  ;;  %v3887_v30 = vld [vmem:[%s5674_s3 + $0x13c] sm:$0xf] }
  0xcf   : > { %5786 = vst [vmem:[#allocation25_spill] sm:$0xff] %v4940_v24  ;;  %v3669_v3 = vor.u32 %v3887_v30, %v3666_v2 }
  0xd0   : > { %2923 = vmatpush.bf16.msra.mxu0 %v3841_v39 }
  0xd1   : > { %v976_v44 = vpop.f32.mrf.mxu2  ;;  %v4916_v35 = vpop.f32.mrf.mxu3  ;;  %1707 = vmatpush.bf16.msra.mxu2 %v3669_v3 }
  0xd2   : > { %5782 = vst [vmem:[#allocation23_spill] sm:$0xff] %v4916_v35  ;;  %v908_v5 = vpop.f32.mrf.mxu0  ;;  %v953_v11 = vpop.f32.mrf.mxu1  ;;  %v3793_v44 = vor.u32 %v3912_v25, %v3792_v0 }
  0xd4   : > { %2506 = vmatpush.bf16.msra.mxu1 %v3793_v44 }
  0xd9   : > { %v4930_v11 = vpop.f32.mrf.mxu2  ;;  %v1013_v5 = vpop.f32.mrf.mxu3 }
  0xda   : > { %5783 = vst [vmem:[#allocation24_spill] sm:$0xff] %v4930_v11  ;;  %v4932_v35 = vpop.f32.mrf.mxu0  ;;  %v4934_v18 = vpop.f32.mrf.mxu1  ;;  %v5788_v5 = vmax.f32 %v4780_v29, 0.0 }
  0xdd   : > { %1057 = vmatmul.bf16.gmra.mxu1 %v4788_v6  ;;  %2003 = vmatmul.bf16.gmra.mxu0 %v4904_v62  ;;  %v4961_v62 = vpack.c.bf16 %v5788_v5, %v4877_v59  ;;  %v3908_v5 = vld [vmem:[%s5674_s3 + $0x1e4] sm:$0xf] }
  0xde   : > { %1283 = vmatmul.bf16.gmra.mxu2 %v4820_v22  ;;  %1608 = vmatmul.bf16.gmra.mxu3 %v4940_v24 }
  0xdf   : > { %5789 = vst [vmem:[#allocation27_spill] sm:$0xff] %v4961_v62 }
  0xe1   : > { %v4952_v31 = vpop.f32.mrf.mxu2  ;;  %v1016_v46 = vpop.f32.mrf.mxu3 }
  0xe2   : > { %5787 = vst [vmem:[#allocation26_spill] sm:$0xff] %v4952_v31  ;;  %v4954_v6 = vpop.f32.mrf.mxu0  ;;  %v4956_v34 = vpop.f32.mrf.mxu1 }
  0xe9   : > { %v983_v0 = vpop.f32.mrf.mxu2  ;;  %v1017_v39 = vpop.f32.mrf.mxu3 }
  0xea   : > { %v916_v25 = vpop.f32.mrf.mxu0  ;;  %v961_v44 = vpop.f32.mrf.mxu1 }
  0xed   : > { %1062 = vmatmul.bf16.gmra.mxu1 %v4820_v22  ;;  %2008 = vmatmul.bf16.gmra.mxu0 %v4940_v24  ;;  %v5792_v22 = vmax.f32 %v4783_v4, 0.0  ;;  %v3913_v24 = vld [vmem:[%s5674_s3 + $0x208] sm:$0xf0] }
  0xee   : > { %1288 = vmatmul.bf16.gmra.mxu2 %v4848_v48  ;;  %1613 = vmatmul.bf16.gmra.mxu3 %v4961_v62 }
  0xef   : > { %v4979_v44 = vpack.c.bf16 0.0, %v5792_v22 }
  0xf1   : > { %v4967_v30 = vpop.f32.mrf.mxu2  ;;  %v1019_v2 = vpop.f32.mrf.mxu3  ;;  %5793 = vst [vmem:[#allocation30_spill] sm:$0xff] %v4979_v44 }
  0xf2   : > { %5790 = vst [vmem:[#allocation28_spill] sm:$0xff] %v4967_v30  ;;  %v4969_v3 = vpop.f32.mrf.mxu0  ;;  %v4971_v46 = vpop.f32.mrf.mxu1  ;;  %v3786_v2 = vld [vmem:[%s5674_s3 + $0x1ec] sm:$0xf0] }
  0xf9   : > { %v4973_v0 = vpop.f32.mrf.mxu2  ;;  %v1020_v29 = vpop.f32.mrf.mxu3 }
  0xfa   : > { %5791 = vst [vmem:[#allocation29_spill] sm:$0xff] %v4973_v0  ;;  %v4975_v39 = vpop.f32.mrf.mxu0  ;;  %v1031_v25 = vpop.f32.mrf.mxu1  ;;  %v3789_v29 = vor.u32 %v3908_v5, %v3786_v2  ;;  %v5795_v2 = vmax.f32 %v4163_v56, 0.0  ;;  %v3884_v56 = vld [vmem:[%s5674_s3 + $0x124] sm:$0xf] }
  0xfc   : > { %2642 = vmatpush.bf16.msra.mxu3 %v3789_v29  ;;  %v5796_v29 = vmax.f32 %v4166_v57, 0.0  ;;  %v3658_v57 = vld [vmem:[%s5674_s3 + $0x12c] sm:$0xf0] }
  0xfd   : > { %1067 = vmatmul.bf16.gmra.mxu1 %v4848_v48  ;;  %2013 = vmatmul.bf16.gmra.mxu0 %v4961_v62  ;;  %v3836_v62 = vld [vmem:[%s5674_s3 + $0x200] sm:$0xf] }
  0xfe   : > { %1293 = vmatmul.bf16.gmra.mxu2 %v4264_v8  ;;  %1618 = vmatmul.bf16.gmra.mxu3 %v4979_v44  ;;  %v3837_v0 = vor.u32 %v3913_v24, %v3836_v62  ;;  %v3909_v24 = vld [vmem:[%s5674_s3 + $0x1e8] sm:$0xf0] }
 0x100   : > { %2924 = vmatpush.bf16.msra.mxu0 %v3837_v0  ;;  %v3661_v0 = vor.u32 %v3884_v56, %v3658_v57 }
 0x101   : > { %v991_v4 = vpop.f32.mrf.mxu2  ;;  %v1579_v25 = vpop.f32.mrf.mxu3 }
 0x102   : > { %v923_v22 = vpop.f32.mrf.mxu0  ;;  %v1032_v48 = vpop.f32.mrf.mxu1  ;;  %v5005_v4 = vpack.c.bf16 %v5796_v29, %v5795_v2  ;;  %1708 = vmatpush.bf16.msra.mxu2 %v3661_v0 }
 0x103   : > { %v3784_v22 = vld [vmem:[%s5674_s3 + $0x1e0] sm:$0xf] }
 0x104   : > { %5797 = vst [vmem:[#allocation32_spill] sm:$0xff] %v5005_v4  ;;  %v3785_v62 = vor.u32 %v3909_v24, %v3784_v22 }
 0x106   : > { %2507 = vmatpush.bf16.msra.mxu1 %v3785_v62 }
 0x109   : > { %v4997_v30 = vpop.f32.mrf.mxu2  ;;  %v1581_v31 = vpop.f32.mrf.mxu3 }
 0x10a   : > { %5794 = vst [vmem:[#allocation31_spill] sm:$0xff] %v4997_v30  ;;  %v4999_v63 = vpop.f32.mrf.mxu0  ;;  %v1034_v5 = vpop.f32.mrf.mxu1  ;;  %v5799_v30 = vmax.f32 %v4301_v52, 0.0 }
 0x10c   : > { %v5030_v11 = vpack.c.bf16 %v5799_v30, %v4877_v59 }
 0x10d   : > { %1072 = vmatmul.bf16.gmra.mxu1 %v4264_v8  ;;  %2018 = vmatmul.bf16.gmra.mxu0 %v4979_v44 }
 0x10e   : > { %1298 = vmatmul.bf16.gmra.mxu2 %v4431_v21  ;;  %1623 = vmatmul.bf16.gmra.mxu3 %v5005_v4 }
 0x111   : > { %v5023_v48 = vpop.f32.mrf.mxu2  ;;  %v1584_v5 = vpop.f32.mrf.mxu3 }
 0x112   : > { %5798 = vst [vmem:[#allocation33_spill] sm:$0xff] %v5023_v48  ;;  %v5025_v8 = vpop.f32.mrf.mxu0  ;;  %v1035_v2 = vpop.f32.mrf.mxu1 }
 0x113   : > { %v1157_v62 = vadd.f32 %v1035_v2, %v4842_v14 }
 0x119   : > { %v998_v29 = vpop.f32.mrf.mxu2  ;;  %v1586_v22 = vpop.f32.mrf.mxu3 }
 0x11a   : > { %v931_v24 = vpop.f32.mrf.mxu0  ;;  %v1038_v44 = vpop.f32.mrf.mxu1 }
 0x11b   : > { %v1158_v52 = vadd.f32 %v1038_v44, %v4870_v17 }
 0x11d   : > { %1077 = vmatmul.bf16.gmra.mxu1 %v4431_v21  ;;  %2023 = vmatmul.bf16.gmra.mxu0 %v5005_v4 }
 0x11e   : > { %1303 = vmatmul.bf16.gmra.mxu2 %v4571_v40  ;;  %1628 = vmatmul.bf16.gmra.mxu3 %v5030_v11 }
 0x121   : > { %v1264_v56 = vpop.f32.mrf.mxu2  ;;  %v1589_v57 = vpop.f32.mrf.mxu3 }
 0x122   : > { %v1384_v0 = vadd.f32 %v1264_v56, %v1157_v62  ;;  %v5037_v5 = vpop.f32.mrf.mxu0  ;;  %v1040_v29 = vpop.f32.mrf.mxu1 }
 0x124   : > { %v5039_v24 = vadd.f32 %v1579_v25, %v1384_v0 }
 0x129   : > { %v1266_v30 = vpop.f32.mrf.mxu2  ;;  %v1591_v21 = vpop.f32.mrf.mxu3 }
 0x12a   : > { %v1385_v48 = vadd.f32 %v1266_v30, %v1158_v52  ;;  %v5042_v4 = vpop.f32.mrf.mxu0  ;;  %v1043_v38 = vpop.f32.mrf.mxu1 }
 0x12b   : > { %v1160_v56 = vadd.f32 %v1043_v38, %v4890_v49  ;;  %v3881_v38 = vld [vmem:[%s5674_s3 + $0x10c] sm:$0xf] }
 0x12c   : > { %v5048_v14 = vadd.f32 %v1581_v31, %v1385_v48  ;;  %v3781_v31 = vor.u32 %v3905_v16, %v3778_v55  ;;  %v3910_v48 = vld [vmem:[%s5674_s3 + $0x1f0] sm:$0xf0] }
 0x12d   : > { %1082 = vmatmul.bf16.gmra.mxu1 %v4571_v40  ;;  %2028 = vmatmul.bf16.gmra.mxu0 %v5030_v11  ;;  %v3832_v40 = vld [vmem:[%s5674_s3 + $0x1e8] sm:$0xf] }
 0x12e   : > { %1308 = vmatmul.bf16.gmra.mxu2 %v4656_v54  ;;  %1633 = vmatmul.bf16.gmra.mxu3 %v5046_v7  ;;  %v3833_v62 = vor.u32 %v3910_v48, %v3832_v40 }
 0x12f   : > { %2643 = vmatpush.bf16.msra.mxu3 %v3781_v31 }
 0x130   : > { %2925 = vmatpush.bf16.msra.mxu0 %v3833_v62 }
 0x131   : > { %v1269_v17 = vpop.f32.mrf.mxu2  ;;  %v1594_v44 = vpop.f32.mrf.mxu3 }
 0x132   : > { %v938_v25 = vpop.f32.mrf.mxu0  ;;  %v1045_v2 = vpop.f32.mrf.mxu1  ;;  %v5801_v17 = vmax.f32 %v4407_v9, 0.0  ;;  %v3650_v9 = vld [vmem:[%s5674_s3 + $0x114] sm:$0xf0] }
 0x133   : > { %v5802_v25 = vmax.f32 %v4514_v20, 0.0  ;;  %v3776_v20 = vld [vmem:[%s5674_s3 + $0x1c8] sm:$0xf]  ;;  %v3653_v49 = vor.u32 %v3881_v38, %v3650_v9  ;;  %v5804_v9 = vmax.f32 %v4171_v58, 0.0 }
 0x135   : > { %v5073_v16 = vpack.c.bf16 %v5802_v25, %v5801_v17  ;;  %1709 = vmatpush.bf16.msra.mxu2 %v3653_v49 }
 0x139   : > { %v1271_v0 = vpop.f32.mrf.mxu2  ;;  %v1596_v29 = vpop.f32.mrf.mxu3 }
 0x13a   : > { %v1387_v52 = vadd.f32 %v1271_v0, %v1160_v56  ;;  %v1048_v30 = vpop.f32.mrf.mxu1  ;;  %v5067_v21 = vpop.f32.mrf.mxu0 }
 0x13c   : > { %v5075_v55 = vadd.f32 %v1586_v22, %v1387_v52  ;;  %v1161_v22 = vadd.f32 %v1045_v2, %v4898_v53 }
 0x13d   : > { %1087 = vmatmul.bf16.gmra.mxu1 %v4656_v54  ;;  %2033 = vmatmul.bf16.gmra.mxu0 %v5046_v7  ;;  %v3906_v54 = vld [vmem:[%s5674_s3 + $0x1d0] sm:$0xf0] }
 0x13e   : > { %5803 = vst [vmem:[#allocation34_spill] sm:$0xff] %v5075_v55  ;;  %1313 = vmatmul.bf16.gmra.mxu2 %v4718_v41  ;;  %1638 = vmatmul.bf16.gmra.mxu3 %v5073_v16  ;;  %v3777_v40 = vor.u32 %v3906_v54, %v3776_v20  ;;  %v5101_v55 = vpack.c.bf16 %v5804_v9, %v4877_v59 }
 0x140   : > { %2508 = vmatpush.bf16.msra.mxu1 %v3777_v40 }
 0x141   : > { %v1274_v31 = vpop.f32.mrf.mxu2  ;;  %v1599_v48 = vpop.f32.mrf.mxu3 }
 0x142   : > { %v1388_v62 = vadd.f32 %v1274_v31, %v1161_v22  ;;  %v1050_v56 = vpop.f32.mrf.mxu1  ;;  %v5094_v0 = vpop.f32.mrf.mxu0 }
 0x143   : > { %v1163_v53 = vadd.f32 %v1050_v56, %v4932_v35 }
 0x144   : > { %v5096_v52 = vadd.f32 %v1589_v57, %v1388_v62 }
 0x149   : > { %v1276_v30 = vpop.f32.mrf.mxu2  ;;  %v1601_v17 = vpop.f32.mrf.mxu3 }
 0x14a   : > { %v1053_v25 = vpop.f32.mrf.mxu1  ;;  %v1999_v38 = vpop.f32.mrf.mxu0  ;;  %v5805_v30 = vmax.f32 %v4177_v60, 0.0  ;;  %v3828_v60 = vld [vmem:[%s5674_s3 + $0x1d0] sm:$0xf] }
 0x14b   : > { %v1164_v58 = vadd.f32 %v1053_v25, %v4954_v6 }
 0x14c   : > { %v5117_v38 = vpack.c.bf16 0.0, %v5805_v30  ;;  %v5806_v30 = vmax.f32 %v4180_v61, 0.0  ;;  %v3642_v61 = vld [vmem:[%s5674_s3 + $0xfc] sm:$0xf0] }
 0x14d   : > { %1092 = vmatmul.bf16.gmra.mxu1 %v4718_v41  ;;  %2038 = vmatmul.bf16.gmra.mxu0 %v5073_v16 }
 0x14e   : > { %1318 = vmatmul.bf16.gmra.mxu2 %v4277_v10  ;;  %1643 = vmatmul.bf16.gmra.mxu3 %v5101_v55 }
 0x151   : > { %v1279_v57 = vpop.f32.mrf.mxu2  ;;  %v1604_v2 = vpop.f32.mrf.mxu3 }
 0x152   : > { %v1390_v20 = vadd.f32 %v1279_v57, %v1163_v53  ;;  %v1055_v49 = vpop.f32.mrf.mxu1  ;;  %v5108_v54 = vpop.f32.mrf.mxu0  ;;  %v3770_v53 = vld [vmem:[%s5674_s3 + $0x1bc] sm:$0xf0] }
 0x154   : > { %v5110_v22 = vadd.f32 %v1594_v44, %v1390_v20 }
 0x159   : > { %v1281_v40 = vpop.f32.mrf.mxu2  ;;  %v1606_v41 = vpop.f32.mrf.mxu3 }
 0x15a   : > { %v1391_v31 = vadd.f32 %v1281_v40, %v1164_v58  ;;  %v1058_v48 = vpop.f32.mrf.mxu1  ;;  %v5113_v62 = vpop.f32.mrf.mxu0 }
 0x15b   : > { %v1166_v20 = vadd.f32 %v1058_v48, %v4969_v3  ;;  %v3878_v3 = vld [vmem:[%s5674_s3 + $0xf4] sm:$0xf] }
 0x15c   : > { %v5119_v35 = vadd.f32 %v1596_v29, %v1391_v31  ;;  %v3907_v29 = vld [vmem:[%s5674_s3 + $0x1d8] sm:$0xf0] }
 0x15d   : > { %1097 = vmatmul.bf16.gmra.mxu1 %v4277_v10  ;;  %2043 = vmatmul.bf16.gmra.mxu0 %v5101_v55  ;;  %v3902_v10 = vld [vmem:[%s5674_s3 + $0x1b4] sm:$0xf]  ;;  %v3829_v9 = vor.u32 %v3907_v29, %v3828_v60 }
 0x15e   : > { %1323 = vmatmul.bf16.gmra.mxu2 %v4447_v51  ;;  %1648 = vmatmul.bf16.gmra.mxu3 %v5117_v38  ;;  %v3773_v57 = vor.u32 %v3902_v10, %v3770_v53  ;;  %v3768_v53 = vld [vmem:[%s5674_s3 + $0x1b0] sm:$0xf] }
 0x15f   : > { %2926 = vmatpush.bf16.msra.mxu0 %v3829_v9 }
 0x160   : > { %2644 = vmatpush.bf16.msra.mxu3 %v3773_v57  ;;  %v3903_v57 = vld [vmem:[%s5674_s3 + $0x1b8] sm:$0xf0] }
 0x161   : > { %v1284_v6 = vpop.f32.mrf.mxu2  ;;  %v1609_v44 = vpop.f32.mrf.mxu3 }
 0x162   : > { %v1060_v56 = vpop.f32.mrf.mxu1  ;;  %v2006_v25 = vpop.f32.mrf.mxu0  ;;  %v5807_v6 = vmax.f32 %v4334_v27, 0.0  ;;  %v3645_v27 = vor.u32 %v3878_v3, %v3642_v61 }
 0x164   : > { %v5144_v25 = vpack.c.bf16 %v5807_v6, %v5806_v30  ;;  %1710 = vmatpush.bf16.msra.mxu2 %v3645_v27  ;;  %v5808_v30 = vmax.f32 %v4420_v36, 0.0 }
 0x166   : > { %v5172_v6 = vpack.c.bf16 %v5808_v30, %v4877_v59 }
 0x169   : > { %v1286_v49 = vpop.f32.mrf.mxu2  ;;  %v1611_v58 = vpop.f32.mrf.mxu3 }
 0x16a   : > { %v1393_v40 = vadd.f32 %v1286_v49, %v1166_v20  ;;  %v1063_v41 = vpop.f32.mrf.mxu1  ;;  %v5138_v31 = vpop.f32.mrf.mxu0  ;;  %v3769_v49 = vor.u32 %v3903_v57, %v3768_v53 }
 0x16c   : > { %v5146_v60 = vadd.f32 %v1601_v17, %v1393_v40  ;;  %v1167_v17 = vadd.f32 %v1060_v56, %v4975_v39  ;;  %2509 = vmatpush.bf16.msra.mxu1 %v3769_v49 }
 0x16d   : > { %1102 = vmatmul.bf16.gmra.mxu1 %v4447_v51  ;;  %2048 = vmatmul.bf16.gmra.mxu0 %v5117_v38 }
 0x16e   : > { %1328 = vmatmul.bf16.gmra.mxu2 %v4578_v23  ;;  %1653 = vmatmul.bf16.gmra.mxu3 %v5144_v25 }
 0x171   : > { %v1289_v48 = vpop.f32.mrf.mxu2  ;;  %v1614_v29 = vpop.f32.mrf.mxu3 }
 0x172   : > { %v1394_v51 = vadd.f32 %v1289_v48, %v1167_v17  ;;  %v1065_v10 = vpop.f32.mrf.mxu1  ;;  %v5159_v9 = vpop.f32.mrf.mxu0 }
 0x174   : > { %v5167_v20 = vadd.f32 %v1604_v2, %v1394_v51  ;;  %v1169_v2 = vadd.f32 %v1065_v10, %v4999_v63 }
 0x179   : > { %v1291_v39 = vpop.f32.mrf.mxu2  ;;  %v1616_v56 = vpop.f32.mrf.mxu3 }
 0x17a   : > { %v1068_v40 = vpop.f32.mrf.mxu1  ;;  %v2014_v41 = vpop.f32.mrf.mxu0  ;;  %v5809_v39 = vmax.f32 %v4436_v42, 0.0  ;;  %v3824_v42 = vld [vmem:[%s5674_s3 + $0x1b8] sm:$0xf] }
 0x17b   : > { %v1170_v36 = vadd.f32 %v1068_v40, %v5025_v8 }
 0x17c   : > { %v5188_v41 = vpack.c.bf16 0.0, %v5809_v39  ;;  %v3899_v39 = vld [vmem:[%s5674_s3 + $0x19c] sm:$0xf] }
 0x17d   : > { %1107 = vmatmul.bf16.gmra.mxu1 %v4578_v23  ;;  %2053 = vmatmul.bf16.gmra.mxu0 %v5144_v25 }
 0x17e   : > { %1333 = vmatmul.bf16.gmra.mxu2 %v4666_v12  ;;  %1658 = vmatmul.bf16.gmra.mxu3 %v5172_v6 }
 0x181   : > { %v1294_v3 = vpop.f32.mrf.mxu2  ;;  %v1619_v61 = vpop.f32.mrf.mxu3 }
 0x182   : > { %v1396_v27 = vadd.f32 %v1294_v3, %v1169_v2  ;;  %v1070_v17 = vpop.f32.mrf.mxu1  ;;  %v5179_v48 = vpop.f32.mrf.mxu0 }
 0x184   : > { %v5181_v29 = vadd.f32 %v1609_v44, %v1396_v27 }
 0x189   : > { %v1296_v51 = vpop.f32.mrf.mxu2  ;;  %v1621_v23 = vpop.f32.mrf.mxu3 }
 0x18a   : > { %v1397_v53 = vadd.f32 %v1296_v51, %v1170_v36  ;;  %v1073_v57 = vpop.f32.mrf.mxu1  ;;  %v5184_v49 = vpop.f32.mrf.mxu0  ;;  %v5810_v51 = vmax.f32 %v4541_v45, 0.0  ;;  %v5811_v23 = vmax.f32 %v4630_v50, 0.0  ;;  %v3875_v45 = vld [vmem:[%s5674_s3 + $0xdc] sm:$0xf]  ;;  %v3634_v50 = vld [vmem:[%s5674_s3 + $0xe4] sm:$0xf0] }
 0x18c   : > { %v5190_v63 = vadd.f32 %v1611_v58, %v1397_v53  ;;  %v3904_v58 = vld [vmem:[%s5674_s3 + $0x1c0] sm:$0xf0]  ;;  %v5209_v53 = vpack.c.bf16 %v5811_v23, %v5810_v51 }
 0x18d   : > { %1112 = vmatmul.bf16.gmra.mxu1 %v4666_v12  ;;  %2058 = vmatmul.bf16.gmra.mxu0 %v5172_v6  ;;  %v3825_v30 = vor.u32 %v3904_v58, %v3824_v42  ;;  %v1172_v12 = vadd.f32 %v1073_v57, %v5037_v5  ;;  %v3762_v5 = vld [vmem:[%s5674_s3 + $0x1a4] sm:$0xf0] }
 0x18e   : > { %1338 = vmatmul.bf16.gmra.mxu2 %v4722_v26  ;;  %1663 = vmatmul.bf16.gmra.mxu3 %v5188_v41  ;;  %v3765_v57 = vor.u32 %v3899_v39, %v3762_v5  ;;  %v5813_v5 = vmax.f32 %v4698_v32, 0.0 }
 0x18f   : > { %2927 = vmatpush.bf16.msra.mxu0 %v3825_v30 }
 0x190   : > { %2645 = vmatpush.bf16.msra.mxu3 %v3765_v57  ;;  %v5243_v57 = vpack.c.bf16 %v5813_v5, %v4877_v59 }
 0x191   : > { %v1299_v8 = vpop.f32.mrf.mxu2  ;;  %v1624_v44 = vpop.f32.mrf.mxu3 }
 0x192   : > { %v1075_v10 = vpop.f32.mrf.mxu1  ;;  %v2021_v40 = vpop.f32.mrf.mxu0 }
 0x193   : > { %v3637_v40 = vor.u32 %v3875_v45, %v3634_v50 }
 0x195   : > { %1711 = vmatpush.bf16.msra.mxu2 %v3637_v40 }
 0x199   : > { %v1301_v2 = vpop.f32.mrf.mxu2  ;;  %v1626_v3 = vpop.f32.mrf.mxu3 }
 0x19a   : > { %v1399_v27 = vadd.f32 %v1301_v2, %v1172_v12  ;;  %v1078_v17 = vpop.f32.mrf.mxu1  ;;  %v5203_v36 = vpop.f32.mrf.mxu0  ;;  %v3760_v2 = vld [vmem:[%s5674_s3 + $0x198] sm:$0xf] }
 0x19c   : > { %v5217_v8 = vadd.f32 %v1616_v56, %v1399_v27  ;;  %v1173_v56 = vadd.f32 %v1075_v10, %v5042_v4  ;;  %v3900_v27 = vld [vmem:[%s5674_s3 + $0x1a0] sm:$0xf0] }
 0x19d   : > { %1117 = vmatmul.bf16.gmra.mxu1 %v4722_v26  ;;  %2063 = vmatmul.bf16.gmra.mxu0 %v5188_v41  ;;  %v3761_v51 = vor.u32 %v3900_v27, %v3760_v2 }
 0x19e   : > { %1343 = vmatmul.bf16.gmra.mxu2 %v4757_v13  ;;  %1668 = vmatmul.bf16.gmra.mxu3 %v5209_v53 }
 0x19f   : > { %2510 = vmatpush.bf16.msra.mxu1 %v3761_v51 }
 0x1a1   : > { %v1304_v42 = vpop.f32.mrf.mxu2  ;;  %v1629_v26 = vpop.f32.mrf.mxu3 }
 0x1a2   : > { %v1400_v58 = vadd.f32 %v1304_v42, %v1173_v56  ;;  %v1080_v30 = vpop.f32.mrf.mxu1  ;;  %v5230_v12 = vpop.f32.mrf.mxu0 }
 0x1a4   : > { %v5238_v17 = vadd.f32 %v1619_v61, %v1400_v58  ;;  %v1175_v61 = vadd.f32 %v1080_v30, %v4844_v28 }
 0x1a6   : > { %5812 = vst [vmem:[#allocation35_spill] sm:$0xff] %v5238_v17 }
 0x1a9   : > { %v1306_v4 = vpop.f32.mrf.mxu2  ;;  %v1631_v10 = vpop.f32.mrf.mxu3 }
 0x1aa   : > { %v1083_v23 = vpop.f32.mrf.mxu1  ;;  %v2029_v39 = vpop.f32.mrf.mxu0  ;;  %v5816_v4 = vld [vmem:[#allocation13_spill] sm:$0xff] }
 0x1ab   : > { %v1176_v32 = vadd.f32 %v1083_v23, %v4872_v15  ;;  %v5817_v39 = vmax.f32 %v5816_v4, 0.0  ;;  %v5821_v4 = vld [vmem:[#allocation2_spill] sm:$0xff] }
 0x1ad   : > { %1122 = vmatmul.bf16.gmra.mxu1 %v4757_v13  ;;  %2068 = vmatmul.bf16.gmra.mxu0 %v5209_v53  ;;  %v5259_v5 = vpack.c.bf16 0.0, %v5817_v39  ;;  %v5822_v39 = vmax.f32 %v5821_v4, 0.0 }
 0x1ae   : > { %1348 = vmatmul.bf16.gmra.mxu2 %v4801_v47  ;;  %1673 = vmatmul.bf16.gmra.mxu3 %v5243_v57 }
 0x1b1   : > { %v1309_v45 = vpop.f32.mrf.mxu2  ;;  %v1634_v50 = vpop.f32.mrf.mxu3 }
 0x1b2   : > { %v1402_v40 = vadd.f32 %v1309_v45, %v1175_v61  ;;  %v1085_v56 = vpop.f32.mrf.mxu1  ;;  %v5250_v42 = vpop.f32.mrf.mxu0  ;;  %v3820_v45 = vld [vmem:[%s5674_s3 + $0x1a0] sm:$0xf] }
 0x1b4   : > { %v5252_v26 = vadd.f32 %v1624_v44, %v1402_v40  ;;  %v5819_v44 = vld [vmem:[#allocation5_spill] sm:$0xff] }
 0x1b6   : > { %5814 = vst [vmem:[#allocation36_spill] sm:$0xff] %v5252_v26 }
 0x1b9   : > { %v1311_v58 = vpop.f32.mrf.mxu2  ;;  %v1636_v13 = vpop.f32.mrf.mxu3 }
 0x1ba   : > { %v1403_v2 = vadd.f32 %v1311_v58, %v1176_v32  ;;  %v1088_v27 = vpop.f32.mrf.mxu1  ;;  %v5255_v51 = vpop.f32.mrf.mxu0 }
 0x1bb   : > { %5815 = vst [vmem:[#allocation37_spill] sm:$0xff] %v5255_v51 }
 0x1bc   : > { %v5261_v28 = vadd.f32 %v1626_v3, %v1403_v2  ;;  %v3901_v3 = vld [vmem:[%s5674_s3 + $0x1a8] sm:$0xf0] }
 0x1bd   : > { %1127 = vmatmul.bf16.gmra.mxu1 %v4801_v47  ;;  %2073 = vmatmul.bf16.gmra.mxu0 %v5243_v57  ;;  %v3821_v40 = vor.u32 %v3901_v3, %v3820_v45  ;;  %v1178_v47 = vadd.f32 %v1088_v27, %v4892_v19  ;;  %v5826_v45 = vld [vmem:[#allocation7_spill] sm:$0xff]  ;;  %v3872_v19 = vld [vmem:[%s5674_s3 + $0xc4] sm:$0xf]  ;;  %v3626_v27 = vld [vmem:[%s5674_s3 + $0xcc] sm:$0xf0] }
 0x1be   : > { %5818 = vst [vmem:[#allocation13_spill] sm:$0xff] %v5261_v28  ;;  %1353 = vmatmul.bf16.gmra.mxu2 %v5819_v44  ;;  %1678 = vmatmul.bf16.gmra.mxu3 %v5259_v5  ;;  %v3629_v3 = vor.u32 %v3872_v19, %v3626_v27 }
 0x1bf   : > { %2928 = vmatpush.bf16.msra.mxu0 %v3821_v40 }
 0x1c0   : > { %1712 = vmatpush.bf16.msra.mxu2 %v3629_v3 }
 0x1c1   : > { %v1314_v15 = vpop.f32.mrf.mxu2  ;;  %v1639_v30 = vpop.f32.mrf.mxu3 }
 0x1c2   : > { %v1090_v23 = vpop.f32.mrf.mxu1  ;;  %v2036_v61 = vpop.f32.mrf.mxu0  ;;  %v5823_v15 = vld [vmem:[#allocation3_spill] sm:$0xff] }
 0x1c3   : > { %v5824_v61 = vmax.f32 %v5823_v15, 0.0  ;;  %v1179_v40 = vadd.f32 %v1090_v23, %v4900_v33  ;;  %v3752_v33 = vld [vmem:[%s5674_s3 + $0x180] sm:$0xf]  ;;  %v3897_v23 = vld [vmem:[%s5674_s3 + $0x188] sm:$0xf0] }
 0x1c5   : > { %v5280_v28 = vpack.c.bf16 %v5824_v61, %v5822_v39 }
 0x1c9   : > { %v1316_v56 = vpop.f32.mrf.mxu2  ;;  %v1641_v32 = vpop.f32.mrf.mxu3 }
 0x1ca   : > { %v1405_v58 = vadd.f32 %v1316_v56, %v1178_v47  ;;  %v1093_v13 = vpop.f32.mrf.mxu1  ;;  %v5274_v2 = vpop.f32.mrf.mxu0 }
 0x1cb   : > { %5820 = vst [vmem:[#allocation5_spill] sm:$0xff] %v5274_v2  ;;  %v5828_v2 = vld [vmem:[#allocation4_spill] sm:$0xff] }
 0x1cc   : > { %v5282_v26 = vadd.f32 %v1631_v10, %v1405_v58  ;;  %v3896_v10 = vld [vmem:[%s5674_s3 + $0x184] sm:$0xf]  ;;  %v5829_v51 = vmax.f32 %v5828_v2, 0.0 }
 0x1cd   : > { %1132 = vmatmul.bf16.gmra.mxu1 %v5819_v44  ;;  %2078 = vmatmul.bf16.gmra.mxu0 %v5259_v5  ;;  %v3754_v44 = vld [vmem:[%s5674_s3 + $0x18c] sm:$0xf0] }
 0x1ce   : > { %5825 = vst [vmem:[#allocation2_spill] sm:$0xff] %v5282_v26  ;;  %1358 = vmatmul.bf16.gmra.mxu2 %v5826_v45  ;;  %1683 = vmatmul.bf16.gmra.mxu3 %v5280_v28  ;;  %v3757_v47 = vor.u32 %v3896_v10, %v3754_v44  ;;  %v5308_v17 = vpack.c.bf16 %v5829_v51, %v4877_v59 }
 0x1cf   : > { %v3753_v10 = vor.u32 %v3897_v23, %v3752_v33  ;;  %v5833_v33 = vld [vmem:[#allocation6_spill] sm:$0xff] }
 0x1d0   : > { %2646 = vmatpush.bf16.msra.mxu3 %v3757_v47  ;;  %v5834_v23 = vmax.f32 %v5833_v33, 0.0  ;;  %v5838_v33 = vld [vmem:[#allocation8_spill] sm:$0xff] }
 0x1d1   : > { %v1319_v56 = vpop.f32.mrf.mxu2  ;;  %v1644_v58 = vpop.f32.mrf.mxu3  ;;  %2511 = vmatpush.bf16.msra.mxu1 %v3753_v10 }
 0x1d2   : > { %v1406_v13 = vadd.f32 %v1319_v56, %v1179_v40  ;;  %v1095_v4 = vpop.f32.mrf.mxu1  ;;  %v5301_v39 = vpop.f32.mrf.mxu0  ;;  %v5330_v10 = vpack.c.bf16 0.0, %v5834_v23  ;;  %v5839_v23 = vmax.f32 %v5838_v33, 0.0 }
 0x1d3   : > { %v1181_v59 = vadd.f32 %v1095_v4, %v4934_v18 }
 0x1d4   : > { %v5303_v15 = vadd.f32 %v1634_v50, %v1406_v13  ;;  %v5830_v50 = vld [vmem:[#allocation10_spill] sm:$0xff] }
 0x1d6   : > { %5827 = vst [vmem:[#allocation3_spill] sm:$0xff] %v5303_v15 }
 0x1d9   : > { %v1321_v61 = vpop.f32.mrf.mxu2  ;;  %v1646_v26 = vpop.f32.mrf.mxu3 }
 0x1da   : > { %v1098_v19 = vpop.f32.mrf.mxu1  ;;  %v2044_v27 = vpop.f32.mrf.mxu0 }
 0x1db   : > { %v1182_v56 = vadd.f32 %v1098_v19, %v4956_v34 }
 0x1dd   : > { %1137 = vmatmul.bf16.gmra.mxu1 %v5826_v45  ;;  %2083 = vmatmul.bf16.gmra.mxu0 %v5280_v28 }
 0x1de   : > { %1363 = vmatmul.bf16.gmra.mxu2 %v5830_v50  ;;  %1688 = vmatmul.bf16.gmra.mxu3 %v5308_v17 }
 0x1e1   : > { %v1324_v51 = vpop.f32.mrf.mxu2  ;;  %v1649_v2 = vpop.f32.mrf.mxu3 }
 0x1e2   : > { %v1408_v3 = vadd.f32 %v1324_v51, %v1181_v59  ;;  %v1100_v44 = vpop.f32.mrf.mxu1  ;;  %v5321_v40 = vpop.f32.mrf.mxu0  ;;  %v3816_v51 = vld [vmem:[%s5674_s3 + $0x188] sm:$0xf] }
 0x1e4   : > { %v5323_v47 = vadd.f32 %v1639_v30, %v1408_v3  ;;  %v5836_v30 = vld [vmem:[#allocation12_spill] sm:$0xff] }
 0x1e6   : > { %5831 = vst [vmem:[#allocation7_spill] sm:$0xff] %v5323_v47  ;;  %v5843_v47 = vld [vmem:[#allocation11_spill] sm:$0xff] }
 0x1e9   : > { %v1326_v45 = vpop.f32.mrf.mxu2  ;;  %v1651_v58 = vpop.f32.mrf.mxu3 }
 0x1ea   : > { %v1409_v13 = vadd.f32 %v1326_v45, %v1182_v56  ;;  %v1103_v61 = vpop.f32.mrf.mxu1  ;;  %v5326_v27 = vpop.f32.mrf.mxu0 }
 0x1eb   : > { %5832 = vst [vmem:[#allocation4_spill] sm:$0xff] %v5326_v27  ;;  %v1205_v27 = vsel %vm555_vm0, %v5843_v47, %v4130_v37 }
 0x1ec   : > { %v5332_v18 = vadd.f32 %v1641_v32, %v1409_v13  ;;  %v3898_v32 = vld [vmem:[%s5674_s3 + $0x190] sm:$0xf0] }
 0x1ed   : > { %1142 = vmatmul.bf16.gmra.mxu1 %v5830_v50  ;;  %2088 = vmatmul.bf16.gmra.mxu0 %v5308_v17  ;;  %v3817_v3 = vor.u32 %v3898_v32, %v3816_v51  ;;  %v1184_v50 = vadd.f32 %v1103_v61, %v4971_v46 }
 0x1ee   : > { %5835 = vst [vmem:[#allocation10_spill] sm:$0xff] %v5332_v18  ;;  %1368 = vmatmul.bf16.gmra.mxu2 %v5836_v30  ;;  %1693 = vmatmul.bf16.gmra.mxu3 %v5330_v10 }
 0x1ef   : > { %2929 = vmatpush.bf16.msra.mxu0 %v3817_v3 }
 0x1f1   : > { %v1329_v34 = vpop.f32.mrf.mxu2  ;;  %v1654_v4 = vpop.f32.mrf.mxu3 }
 0x1f2   : > { %v1105_v19 = vpop.f32.mrf.mxu1  ;;  %v2051_v59 = vpop.f32.mrf.mxu0  ;;  %v5840_v34 = vld [vmem:[#allocation9_spill] sm:$0xff] }
 0x1f3   : > { %v5841_v59 = vmax.f32 %v5840_v34, 0.0  ;;  %v1185_v46 = vadd.f32 %v1105_v19, %v4866_v43 }
 0x1f5   : > { %v5351_v18 = vpack.c.bf16 %v5841_v59, %v5839_v23 }
 0x1f7   : > { %5842 = vst [vmem:[#allocation12_spill] sm:$0xff] %v5351_v18 }
 0x1f9   : > { %v1331_v44 = vpop.f32.mrf.mxu2  ;;  %v1656_v56 = vpop.f32.mrf.mxu3 }
 0x1fa   : > { %v1411_v45 = vadd.f32 %v1331_v44, %v1184_v50  ;;  %v1108_v58 = vpop.f32.mrf.mxu1  ;;  %v5345_v13 = vpop.f32.mrf.mxu0 }
 0x1fb   : > { %5837 = vst [vmem:[#allocation6_spill] sm:$0xff] %v5345_v13 }
 0x1fc   : > { %v5356_v51 = vadd.f32 %v1646_v26, %v1411_v45 }
 0x1fd   : > { %1147 = vmatmul.bf16.gmra.mxu1 %v5836_v30  ;;  %2093 = vmatmul.bf16.gmra.mxu0 %v5330_v10 }
 0x1fe   : > { %5844 = vst [vmem:[#allocation8_spill] sm:$0xff] %v5356_v51  ;;  %1373 = vmatmul.bf16.gmra.mxu2 %v1205_v27  ;;  %1698 = vmatmul.bf16.gmra.mxu3 %v5351_v18  ;;  %v5847_v27 = vmov 0.0|0.0  }
 0x201   : > { %v1334_v61 = vpop.f32.mrf.mxu2  ;;  %v1659_v32 = vpop.f32.mrf.mxu3 }
 0x202   : > { %v1412_v3 = vadd.f32 %v1334_v61, %v1185_v46  ;;  %v1110_v50 = vpop.f32.mrf.mxu1  ;;  %v5362_v44 = vpop.f32.mrf.mxu0  ;;  %v5849_v46 = vld [vmem:[#allocation14_spill] sm:$0xff] }
 0x203   : > { %5845 = vst [vmem:[#allocation9_spill] sm:$0xff] %v5362_v44  ;;  %v1187_v43 = vadd.f32 %v1110_v50, %v4888_v1  ;;  %v2199_v61 = vshll.u32 %v5849_v46, 16 }
 0x204   : > { %v5364_v58 = vadd.f32 %v1649_v2, %v1412_v3  ;;  %v5851_v3 = vmov 0  }
 0x206   : > { %5846 = vst [vmem:[#allocation11_spill] sm:$0xff] %v5364_v58 }
 0x209   : > { %v1336_v33 = vpop.f32.mrf.mxu2  ;;  %v1661_v26 = vpop.f32.mrf.mxu3 }
 0x20a   : > { %v1113_v45 = vpop.f32.mrf.mxu1  ;;  %v2059_v23 = vpop.f32.mrf.mxu0  ;;  %v5377_v33 = vrot.slane %v5851_v3, 1 }
 0x20b   : > { %v5853_v23 = vld [vmem:[#allocation20_spill] sm:$0xff] }
 0x20c   : > { %5852 = vst [vmem:[#allocation39_spill] sm:$0xff] %v5377_v33 }
 0x20d   : > { %2098 = vmatmul.bf16.gmra.mxu0 %v5351_v18  ;;  %1152 = vmatmul.bf16.gmra.mxu1 %v5843_v47  ;;  %v2201_v47 = vrot.slane %v2199_v61, 1 }
 0x20e   : > { %1378 = vmatmul.bf16.gmra.mxu2 %v4130_v37  ;;  %1701 = vmatmul.bf16.gmra.mxu3 %v5847_v27  ;;  %v1188_v37 = vadd.f32 %v1113_v45, %v5853_v23 }
 0x211   : > { %v1339_v30 = vpop.f32.mrf.mxu2  ;;  %v1664_v19 = vpop.f32.mrf.mxu3 }
 0x212   : > { %v1414_v34 = vadd.f32 %v1339_v30, %v1187_v43  ;;  %v1115_v59 = vpop.f32.mrf.mxu1  ;;  %v5371_v2 = vpop.f32.mrf.mxu0  ;;  %v2202_v43 = vsel %vm2195_vm1, %v5377_v33, %v2201_v47 }
 0x213   : > { %5848 = vst [vmem:[#allocation38_spill] sm:$0xff] %v5371_v2 }
 0x214   : > { %v5374_v32 = vadd.f32 %v1654_v4, %v1414_v34 }
 0x216   : > { %5850 = vst [vmem:[#allocation14_spill] sm:$0xff] %v5374_v32 }
 0x219   : > { %v1341_v58 = vpop.f32.mrf.mxu2  ;;  %v1666_v51 = vpop.f32.mrf.mxu3 }
 0x21a   : > { %v1415_v1 = vadd.f32 %v1341_v58, %v1188_v37  ;;  %v1118_v50 = vpop.f32.mrf.mxu1  ;;  %v5380_v44 = vpop.f32.mrf.mxu0  ;;  %v2203_v51 = vshrl.u32 %v5849_v46, 16  ;;  %v5856_v58 = vld [vmem:[#allocation15_spill] sm:$0xff]  ;;  %v5857_v37 = vld [vmem:[#allocation24_spill] sm:$0xff] }
 0x21b   : > { %5854 = vst [vmem:[#allocation20_spill] sm:$0xff] %v5380_v44  ;;  %v2207_v61 = vshll.u32 %v5856_v58, 16  ;;  %v1190_v32 = vadd.f32 %v1118_v50, %v5857_v37 }
 0x21c   : > { %v5384_v30 = vadd.f32 %v1656_v56, %v1415_v1  ;;  %v2205_v3 = vor.u32 %v2203_v51, %v2201_v47  ;;  %v5860_v47 = vld [vmem:[#allocation16_spill] sm:$0xff]  ;;  %v5861_v51 = vld [vmem:[#allocation26_spill] sm:$0xff] }
 0x21d   : > { %2103 = vmatmul.bf16.gmra.mxu0 %v5847_v27  ;;  %2512 = vmatmul.bf16.vlgmr.msra.gmra.mxu1 %v2202_v43  ;;  %v2209_v23 = vrot.slane %v2207_v61, 1 }
 0x21e   : > { %5855 = vst [vmem:[#allocation40_spill] sm:$0xff] %v5384_v30  ;;  %1713 = vmatmul.bf16.vlgmr.msra.gmra.mxu2 %v5847_v27  ;;  %2647 = vmatmul.bf16.vlgmr.msra.gmra.mxu3 %v2202_v43 }
 0x21f   : > { %v2210_v43 = vsel %vm2195_vm1, %v2205_v3, %v2209_v23 }
 0x221   : > { %v1344_v4 = vpop.f32.mrf.mxu2  ;;  %v1669_v45 = vpop.f32.mrf.mxu3 }
 0x222   : > { %v1120_v34 = vpop.f32.mrf.mxu1  ;;  %v2066_v59 = vpop.f32.mrf.mxu0 }
 0x223   : > { %v2215_v59 = vshll.u32 %v5860_v47, 16  ;;  %v1191_v50 = vadd.f32 %v1120_v34, %v5861_v51 }
 0x229   : > { %v1346_v56 = vpop.f32.mrf.mxu2  ;;  %v1671_v1 = vpop.f32.mrf.mxu3 }
 0x22a   : > { %v1417_v30 = vadd.f32 %v1346_v56, %v1190_v32  ;;  %v1123_v44 = vpop.f32.mrf.mxu1  ;;  %v5391_v2 = vpop.f32.mrf.mxu0 }
 0x22b   : > { %5858 = vst [vmem:[#allocation15_spill] sm:$0xff] %v5391_v2  ;;  %v2217_v2 = vrot.slane %v2215_v59, 1  ;;  %v5865_v59 = vld [vmem:[#allocation28_spill] sm:$0xff] }
 0x22c   : > { %v5394_v4 = vadd.f32 %v1661_v26, %v1417_v30  ;;  %v2219_v26 = vshrl.u32 %v5860_v47, 16  ;;  %v5863_v30 = vld [vmem:[#allocation19_spill] sm:$0xff] }
 0x22d   : > { %2108 = vmatmul.bf16.gmra.mxu0 %v5847_v27  ;;  %2517 = vmatmul.bf16.gmra.mxu1 %v2210_v43  ;;  %v2223_v3 = vshll.u32 %v5863_v30, 16 }
 0x22e   : > { %5859 = vst [vmem:[#allocation24_spill] sm:$0xff] %v5394_v4  ;;  %1716 = vmatmul.bf16.gmra.mxu2 %v5849_v46  ;;  %2650 = vmatmul.bf16.gmra.mxu3 %v2210_v43  ;;  %v2211_v4 = vshrl.u32 %v5856_v58, 16  ;;  %v2221_v46 = vor.u32 %v2219_v26, %v2217_v2 }
 0x22f   : > { %v2225_v43 = vrot.slane %v2223_v3, 1 }
 0x230   : > { %v2213_v33 = vor.u32 %v2211_v4, %v2209_v23  ;;  %v5867_v4 = vld [vmem:[#allocation22_spill] sm:$0xff] }
 0x231   : > { %v1349_v61 = vpop.f32.mrf.mxu2  ;;  %v1674_v37 = vpop.f32.mrf.mxu3 }
 0x232   : > { %v1418_v32 = vadd.f32 %v1349_v61, %v1191_v50  ;;  %v1125_v44 = vpop.f32.mrf.mxu1  ;;  %v5400_v56 = vpop.f32.mrf.mxu0  ;;  %v2226_v50 = vsel %vm2195_vm1, %v2221_v46, %v2225_v43  ;;  %v2218_v61 = vsel %vm2195_vm1, %v2213_v33, %v2217_v2 }
 0x233   : > { %5862 = vst [vmem:[#allocation16_spill] sm:$0xff] %v5400_v56  ;;  %v1193_v56 = vadd.f32 %v1125_v44, %v5865_v59 }
 0x234   : > { %v5405_v27 = vadd.f32 %v1664_v19, %v1418_v32 }
 0x236   : > { %5864 = vst [vmem:[#allocation26_spill] sm:$0xff] %v5405_v27  ;;  %v5869_v27 = vld [vmem:[#allocation29_spill] sm:$0xff] }
 0x239   : > { %v1351_v13 = vpop.f32.mrf.mxu2  ;;  %v1676_v34 = vpop.f32.mrf.mxu3 }
 0x23a   : > { %v1128_v51 = vpop.f32.mrf.mxu1  ;;  %v2074_v37 = vpop.f32.mrf.mxu0  ;;  %v2227_v13 = vshrl.u32 %v5863_v30, 16 }
 0x23b   : > { %v2231_v37 = vshll.u32 %v5867_v4, 16  ;;  %v1194_v18 = vadd.f32 %v1128_v51, %v5869_v27  ;;  %v2235_v27 = vshrl.u32 %v5867_v4, 16  ;;  %v5872_v51 = vld [vmem:[#allocation25_spill] sm:$0xff] }
 0x23c   : > { %v2229_v2 = vor.u32 %v2227_v13, %v2225_v43 }
 0x23d   : > { %2930 = vmatmul.bf16.vlgmr.msra.gmra.mxu0 %v2226_v50  ;;  %2522 = vmatmul.bf16.gmra.mxu1 %v2218_v61  ;;  %v2233_v33 = vrot.slane %v2231_v37, 1 }
 0x23e   : > { %1720 = vmatmul.bf16.gmra.mxu2 %v5856_v58  ;;  %2654 = vmatmul.bf16.gmra.mxu3 %v2218_v61 }
 0x23f   : > { %v2237_v13 = vor.u32 %v2235_v27, %v2233_v33 }
 0x241   : > { %v1354_v19 = vpop.f32.mrf.mxu2  ;;  %v1679_v32 = vpop.f32.mrf.mxu3 }
 0x242   : > { %v1420_v26 = vadd.f32 %v1354_v19, %v1193_v56  ;;  %v1130_v3 = vpop.f32.mrf.mxu1  ;;  %v5411_v23 = vpop.f32.mrf.mxu0  ;;  %v2234_v56 = vsel %vm2195_vm1, %v2229_v2, %v2233_v33 }
 0x243   : > { %5866 = vst [vmem:[#allocation19_spill] sm:$0xff] %v5411_v23 }
 0x244   : > { %v5415_v46 = vadd.f32 %v1669_v45, %v1420_v26 }
 0x246   : > { %5868 = vst [vmem:[#allocation28_spill] sm:$0xff] %v5415_v46 }
 0x249   : > { %v1356_v58 = vpop.f32.mrf.mxu2  ;;  %v1681_v61 = vpop.f32.mrf.mxu3 }
 0x24a   : > { %v1421_v15 = vadd.f32 %v1356_v58, %v1194_v18  ;;  %v1133_v44 = vpop.f32.mrf.mxu1  ;;  %v5418_v59 = vpop.f32.mrf.mxu0  ;;  %v2239_v18 = vshll.u32 %v5872_v51, 16  ;;  %v5873_v58 = vld [vmem:[#allocation31_spill] sm:$0xff] }
 0x24b   : > { %5870 = vst [vmem:[#allocation22_spill] sm:$0xff] %v5418_v59  ;;  %v1196_v61 = vadd.f32 %v1133_v44, %v5873_v58 }
 0x24c   : > { %v5421_v19 = vadd.f32 %v1671_v1, %v1421_v15  ;;  %v2241_v37 = vrot.slane %v2239_v18, 1 }
 0x24d   : > { %2935 = vmatmul.bf16.gmra.mxu0 %v2234_v56  ;;  %2527 = vmatmul.bf16.gmra.mxu1 %v2226_v50 }
 0x24e   : > { %5871 = vst [vmem:[#allocation29_spill] sm:$0xff] %v5421_v19  ;;  %1725 = vmatmul.bf16.gmra.mxu2 %v5860_v47  ;;  %2659 = vmatmul.bf16.gmra.mxu3 %v2226_v50  ;;  %v2242_v47 = vsel %vm2195_vm1, %v2237_v13, %v2241_v37 }
 0x251   : > { %v1359_v45 = vpop.f32.mrf.mxu2  ;;  %v1684_v43 = vpop.f32.mrf.mxu3 }
 0x252   : > { %v1135_v26 = vpop.f32.mrf.mxu1  ;;  %v2081_v3 = vpop.f32.mrf.mxu0  ;;  %v5876_v45 = vld [vmem:[#allocation33_spill] sm:$0xff] }
 0x253   : > { %v1197_v33 = vadd.f32 %v1135_v26, %v5876_v45  ;;  %v5880_v45 = vld [vmem:[#allocation17_spill] sm:$0xff] }
 0x259   : > { %v1361_v2 = vpop.f32.mrf.mxu2  ;;  %v1686_v15 = vpop.f32.mrf.mxu3 }
 0x25a   : > { %v1423_v1 = vadd.f32 %v1361_v2, %v1196_v61  ;;  %v1138_v19 = vpop.f32.mrf.mxu1  ;;  %v5427_v46 = vpop.f32.mrf.mxu0  ;;  %v5878_v61 = vld [vmem:[#allocation27_spill] sm:$0xff] }
 0x25b   : > { %5874 = vst [vmem:[#allocation25_spill] sm:$0xff] %v5427_v46  ;;  %v2243_v19 = vshrl.u32 %v5872_v51, 16  ;;  %v2247_v2 = vshll.u32 %v5878_v61, 16 }
 0x25c   : > { %v5430_v50 = vadd.f32 %v1676_v34, %v1423_v1 }
 0x25d   : > { %2940 = vmatmul.bf16.gmra.mxu0 %v2242_v47  ;;  %2532 = vmatmul.bf16.gmra.mxu1 %v2234_v56  ;;  %v2245_v34 = vor.u32 %v2243_v19, %v2241_v37  ;;  %v2249_v1 = vrot.slane %v2247_v2, 1  ;;  %v2251_v37 = vshrl.u32 %v5878_v61, 16 }
 0x25e   : > { %5875 = vst [vmem:[#allocation31_spill] sm:$0xff] %v5430_v50  ;;  %1730 = vmatmul.bf16.gmra.mxu2 %v5863_v30  ;;  %2664 = vmatmul.bf16.gmra.mxu3 %v2234_v56 }
 0x25f   : > { %v2250_v26 = vsel %vm2195_vm1, %v2245_v34, %v2249_v1  ;;  %v2253_v34 = vor.u32 %v2251_v37, %v2249_v1 }
 0x261   : > { %v1364_v3 = vpop.f32.mrf.mxu2  ;;  %v1689_v27 = vpop.f32.mrf.mxu3 }
 0x262   : > { %v1424_v44 = vadd.f32 %v1364_v3, %v1197_v33  ;;  %v1140_v18 = vpop.f32.mrf.mxu1  ;;  %v5434_v58 = vpop.f32.mrf.mxu0 }
 0x263   : > { %5877 = vst [vmem:[#allocation33_spill] sm:$0xff] %v5434_v58  ;;  %v1199_v33 = vadd.f32 %v1140_v18, %v5880_v45 }
 0x264   : > { %v5438_v13 = vadd.f32 %v1679_v32, %v1424_v44 }
 0x266   : > { %5879 = vst [vmem:[#allocation27_spill] sm:$0xff] %v5438_v13  ;;  %v5882_v13 = vld [vmem:[#allocation18_spill] sm:$0xff] }
 0x269   : > { %v1366_v50 = vpop.f32.mrf.mxu2  ;;  %v1691_v46 = vpop.f32.mrf.mxu3 }
 0x26a   : > { %v1143_v30 = vpop.f32.mrf.mxu1  ;;  %v2089_v56 = vpop.f32.mrf.mxu0  ;;  %v5881_v50 = vld [vmem:[#allocation30_spill] sm:$0xff] }
 0x26b   : > { %v2255_v19 = vshll.u32 %v5881_v50, 16  ;;  %v1200_v59 = vadd.f32 %v1143_v30, %v5882_v13  ;;  %v2259_v13 = vshrl.u32 %v5881_v50, 16  ;;  %v5884_v30 = vld [vmem:[#allocation32_spill] sm:$0xff] }
 0x26d   : > { %2945 = vmatmul.bf16.gmra.mxu0 %v2250_v26  ;;  %2537 = vmatmul.bf16.gmra.mxu1 %v2242_v47  ;;  %v2257_v56 = vrot.slane %v2255_v19, 1 }
 0x26e   : > { %1735 = vmatmul.bf16.gmra.mxu2 %v5867_v4  ;;  %2669 = vmatmul.bf16.gmra.mxu3 %v2242_v47 }
 0x26f   : > { %v2261_v37 = vor.u32 %v2259_v13, %v2257_v56 }
 0x271   : > { %v1369_v3 = vpop.f32.mrf.mxu2  ;;  %v1694_v27 = vpop.f32.mrf.mxu3 }
 0x272   : > { %v1426_v58 = vadd.f32 %v1369_v3, %v1199_v33  ;;  %v1145_v32 = vpop.f32.mrf.mxu1  ;;  %v5443_v44 = vpop.f32.mrf.mxu0  ;;  %v2258_v33 = vsel %vm2195_vm1, %v2253_v34, %v2257_v56 }
 0x274   : > { %v5447_v2 = vadd.f32 %v1684_v43, %v1426_v58 }
 0x279   : > { %v1371_v4 = vpop.f32.mrf.mxu2  ;;  %v1696_v47 = vpop.f32.mrf.mxu3 }
 0x27a   : > { %v1427_v23 = vadd.f32 %v1371_v4, %v1200_v59  ;;  %v1148_v18 = vpop.f32.mrf.mxu1  ;;  %v5450_v45 = vpop.f32.mrf.mxu0  ;;  %v2263_v59 = vshll.u32 %v5884_v30, 16  ;;  %v5885_v4 = vld [vmem:[#allocation21_spill] sm:$0xff] }
 0x27b   : > { %v1202_v47 = vadd.f32 %v1148_v18, %v5885_v4 }
 0x27c   : > { %v5453_v3 = vadd.f32 %v1686_v15, %v1427_v23  ;;  %v2265_v19 = vrot.slane %v2263_v59, 1 }
 0x27d   : > { %2950 = vmatmul.bf16.gmra.mxu0 %v2258_v33  ;;  %2542 = vmatmul.bf16.gmra.mxu1 %v2250_v26 }
 0x27e   : > { %5883 = vst [vmem:[#allocation17_spill] sm:$0xff] %v5453_v3  ;;  %1740 = vmatmul.bf16.gmra.mxu2 %v5872_v51  ;;  %2674 = vmatmul.bf16.gmra.mxu3 %v2250_v26  ;;  %v2266_v51 = vsel %vm2195_vm1, %v2261_v37, %v2265_v19  ;;  %v2271_v37 = vshll.u32 %v5030_v11, 16 }
 0x281   : > { %v1374_v43 = vpop.f32.mrf.mxu2  ;;  %v1699_v58 = vpop.f32.mrf.mxu3 }
 0x282   : > { %v1150_v1 = vpop.f32.mrf.mxu1  ;;  %v2096_v32 = vpop.f32.mrf.mxu0  ;;  %v5887_v58 = vld [vmem:[#allocation23_spill] sm:$0xff] }
 0x283   : > { %v1203_v56 = vadd.f32 %v1150_v1, %v5887_v58 }
 0x289   : > { %v1376_v34 = vpop.f32.mrf.mxu2  ;;  %v1700_v23 = vpop.f32.mrf.mxu3 }
 0x28a   : > { %v1429_v15 = vadd.f32 %v1376_v34, %v1202_v47  ;;  %v5459_v3 = vpop.f32.mrf.mxu0  ;;  %v1153_v26 = vpop.f32.mrf.mxu1  ;;  %v2267_v47 = vshrl.u32 %v5884_v30, 16  ;;  %v2273_v23 = vrot.slane %v2271_v37, 1 }
 0x28c   : > { %v5462_v43 = vadd.f32 %v1691_v46, %v1429_v15  ;;  %v2269_v46 = vor.u32 %v2267_v47, %v2265_v19  ;;  %v2279_v19 = vshll.u32 %v5046_v7, 16 }
 0x28d   : > { %2955 = vmatmul.bf16.gmra.mxu0 %v2266_v51  ;;  %2547 = vmatmul.bf16.gmra.mxu1 %v2258_v33 }
 0x28e   : > { %5886 = vst [vmem:[#allocation30_spill] sm:$0xff] %v5462_v43  ;;  %1745 = vmatmul.bf16.gmra.mxu2 %v5878_v61  ;;  %2679 = vmatmul.bf16.gmra.mxu3 %v2258_v33  ;;  %v2274_v33 = vsel %vm2195_vm1, %v2269_v46, %v2273_v23 }
 0x291   : > { %v1379_v32 = vpop.f32.mrf.mxu2  ;;  %v1702_v13 = vpop.f32.mrf.mxu3 }
 0x292   : > { %v1430_v18 = vadd.f32 %v1379_v32, %v1203_v56  ;;  %v5466_v59 = vpop.f32.mrf.mxu0  ;;  %v1155_v4 = vpop.f32.mrf.mxu1 }
 0x293   : > { %v2281_v4 = vrot.slane %v2279_v19, 1 }
 0x294   : > { %v5470_v34 = vadd.f32 %v1694_v27, %v1430_v18  ;;  %v2275_v27 = vshrl.u32 %v5030_v11, 16 }
 0x296   : > { %5888 = vst [vmem:[#allocation18_spill] sm:$0xff] %v5470_v34  ;;  %v2277_v18 = vor.u32 %v2275_v27, %v2273_v23  ;;  %v2287_v23 = vshll.u32 %v5073_v16, 16 }
 0x298   : > { %v2289_v19 = vrot.slane %v2287_v23, 1 }
 0x299   : > { %v1381_v15 = vpop.f32.mrf.mxu2  ;;  %v1703_v26 = vpop.f32.mrf.mxu3 }
 0x29a   : > { %v2104_v61 = vpop.f32.mrf.mxu0  ;;  %v2513_v1 = vpop.f32.mrf.mxu1  ;;  %v2282_v15 = vsel %vm2195_vm1, %v2277_v18, %v2281_v4 }
 0x29d   : > { %2960 = vmatmul.bf16.gmra.mxu0 %v2274_v33  ;;  %2552 = vmatmul.bf16.gmra.mxu1 %v2266_v51 }
 0x29e   : > { %1750 = vmatmul.bf16.gmra.mxu2 %v5881_v50  ;;  %2684 = vmatmul.bf16.gmra.mxu3 %v2266_v51 }
 0x2a1   : > { %v1714_v58 = vpop.f32.mrf.mxu2  ;;  %v2648_v56 = vpop.f32.mrf.mxu3 }
 0x2a2   : > { %v5474_v32 = vpop.f32.mrf.mxu0  ;;  %v2515_v13 = vpop.f32.mrf.mxu1  ;;  %v2283_v56 = vshrl.u32 %v5046_v7, 16 }
 0x2a3   : > { %5889 = vst [vmem:[#allocation32_spill] sm:$0xff] %v5474_v32 }
 0x2a4   : > { %v2285_v27 = vor.u32 %v2283_v56, %v2281_v4 }
 0x2a9   : > { %v1715_v47 = vpop.f32.mrf.mxu2  ;;  %v2649_v37 = vpop.f32.mrf.mxu3 }
 0x2aa   : > { %v5478_v46 = vpop.f32.mrf.mxu0  ;;  %v2518_v26 = vpop.f32.mrf.mxu1 }
 0x2ab   : > { %5890 = vst [vmem:[#allocation21_spill] sm:$0xff] %v5478_v46  ;;  %v2290_v46 = vsel %vm2195_vm1, %v2285_v27, %v2289_v19  ;;  %v2291_v27 = vshrl.u32 %v5073_v16, 16 }
 0x2ad   : > { %2965 = vmatmul.bf16.gmra.mxu0 %v2282_v15  ;;  %2557 = vmatmul.bf16.gmra.mxu1 %v2274_v33 }
 0x2ae   : > { %1755 = vmatmul.bf16.gmra.mxu2 %v5884_v30  ;;  %2689 = vmatmul.bf16.gmra.mxu3 %v2274_v33 }
 0x2b1   : > { %v1717_v50 = vpop.f32.mrf.mxu2  ;;  %v2651_v51 = vpop.f32.mrf.mxu3 }
 0x2b2   : > { %v2111_v61 = vpop.f32.mrf.mxu0  ;;  %v2520_v58 = vpop.f32.mrf.mxu1 }
 0x2b9   : > { %v1718_v47 = vpop.f32.mrf.mxu2  ;;  %v2652_v37 = vpop.f32.mrf.mxu3 }
 0x2ba   : > { %v1888_v18 = vadd.f32 %v5039_v24, %v1718_v47  ;;  %v2931_v26 = vpop.f32.mrf.mxu0  ;;  %v5486_v34 = vpop.f32.mrf.mxu1  ;;  %v2295_v47 = vshll.u32 %v5101_v55, 16 }
 0x2bc   : > { %v2114_v30 = vadd.f32 %v5067_v21, %v1888_v18  ;;  %v2293_v18 = vor.u32 %v2291_v27, %v2289_v19  ;;  %v5891_v19 = vld [vmem:[#allocation34_spill] sm:$0xff]  ;;  %v2299_v27 = vshrl.u32 %v5101_v55, 16 }
 0x2bd   : > { %2970 = vmatmul.bf16.gmra.mxu0 %v2290_v46  ;;  %2562 = vmatmul.bf16.gmra.mxu1 %v2282_v15 }
 0x2be   : > { %v2774_v33 = vadd.f32 %v2513_v1, %v2114_v30  ;;  %1760 = vmatmul.bf16.gmra.mxu2 %v5030_v11  ;;  %2694 = vmatmul.bf16.gmra.mxu3 %v2282_v15  ;;  %v2297_v11 = vrot.slane %v2295_v47, 1  ;;  %v2303_v47 = vshll.u32 %v5117_v38, 16 }
 0x2c0   : > { %v2822_v4 = vadd.f32 %v2774_v33, %v2652_v37 }
 0x2c1   : > { %v1721_v50 = vpop.f32.mrf.mxu2  ;;  %v2655_v51 = vpop.f32.mrf.mxu3 }
 0x2c2   : > { %v3051_v61 = vadd.f32 %v2931_v26, %v2822_v4  ;;  %v1889_v24 = vadd.f32 %v5048_v14, %v1721_v50  ;;  %v2933_v56 = vpop.f32.mrf.mxu0  ;;  %v2525_v23 = vpop.f32.mrf.mxu1  ;;  %v2298_v14 = vsel %vm2195_vm1, %v2293_v18, %v2297_v11 }
 0x2c4   : > { %3147 = vst [vmem:[%s4135_s8] sm:$0xff] %v3051_v61  ;;  %v2115_v21 = vadd.f32 %v5094_v0, %v1889_v24  ;;  %v3248_v50 = vmul.f32 %v3051_v61, %v3051_v61 }
 0x2c6   : > { %v2775_v1 = vadd.f32 %v2515_v13, %v2115_v21 }
 0x2c8   : > { %v2823_v15 = vadd.f32 %v2775_v1, %v2655_v51  ;;  %v2301_v1 = vor.u32 %v2299_v27, %v2297_v11 }
 0x2c9   : > { %v1723_v37 = vpop.f32.mrf.mxu2  ;;  %v2657_v30 = vpop.f32.mrf.mxu3 }
 0x2ca   : > { %v3052_v33 = vadd.f32 %v2933_v56, %v2823_v15  ;;  %v2936_v26 = vpop.f32.mrf.mxu0  ;;  %v2528_v4 = vpop.f32.mrf.mxu1 }
 0x2cc   : > { %3148 = vst [vmem:[%s4135_s8 + $0x8] sm:$0xff] %v3052_v33  ;;  %v3195_v23 = vadd.f32 %v3052_v33, %v3051_v61  ;;  %v3249_v32 = vmul.f32 %v3052_v33, %v3052_v33 }
 0x2cd   : > { %2975 = vmatmul.bf16.gmra.mxu0 %v2298_v14  ;;  %2567 = vmatmul.bf16.gmra.mxu1 %v2290_v46 }
 0x2ce   : > { %v3296_v43 = vadd.f32 %v3249_v32, %v3248_v50  ;;  %1765 = vmatmul.bf16.gmra.mxu2 %v5046_v7  ;;  %2699 = vmatmul.bf16.gmra.mxu3 %v2290_v46  ;;  %v2305_v32 = vrot.slane %v2303_v47, 1  ;;  %v2311_v47 = vshll.u32 %v5144_v25, 16 }
 0x2d0   : > { %v2306_v33 = vsel %vm2195_vm1, %v2301_v1, %v2305_v32  ;;  %v2313_v1 = vrot.slane %v2311_v47, 1 }
 0x2d1   : > { %v1726_v0 = vpop.f32.mrf.mxu2  ;;  %v2660_v13 = vpop.f32.mrf.mxu3 }
 0x2d2   : > { %v1891_v51 = vadd.f32 %v5891_v19, %v1726_v0  ;;  %v2938_v24 = vpop.f32.mrf.mxu0  ;;  %v5499_v56 = vpop.f32.mrf.mxu1 }
 0x2d4   : > { %v2117_v61 = vadd.f32 %v5108_v54, %v1891_v51 }
 0x2d6   : > { %v2777_v21 = vadd.f32 %v2520_v58, %v2117_v61 }
 0x2d8   : > { %v2825_v18 = vadd.f32 %v2777_v21, %v2660_v13 }
 0x2d9   : > { %v1728_v7 = vpop.f32.mrf.mxu2  ;;  %v2662_v46 = vpop.f32.mrf.mxu3 }
 0x2da   : > { %v3054_v15 = vadd.f32 %v2938_v24, %v2825_v18  ;;  %v1892_v37 = vadd.f32 %v5096_v52, %v1728_v7  ;;  %v2941_v30 = vpop.f32.mrf.mxu0  ;;  %v2533_v26 = vpop.f32.mrf.mxu1 }
 0x2dc   : > { %3150 = vst [vmem:[%s4135_s8 + $0x18] sm:$0xff] %v3054_v15  ;;  %v3197_v50 = vadd.f32 %v3195_v23, %v3054_v15  ;;  %v3251_v0 = vmul.f32 %v3054_v15, %v3054_v15  ;;  %v2118_v19 = vadd.f32 %v5113_v62, %v1892_v37  ;;  %v2307_v23 = vshrl.u32 %v5117_v38, 16 }
 0x2dd   : > { %2980 = vmatmul.bf16.gmra.mxu0 %v2306_v33  ;;  %2572 = vmatmul.bf16.gmra.mxu1 %v2298_v14 }
 0x2de   : > { %v3298_v54 = vadd.f32 %v3296_v43, %v3251_v0  ;;  %v2778_v58 = vadd.f32 %v5486_v34, %v2118_v19  ;;  %1770 = vmatmul.bf16.gmra.mxu2 %v5073_v16  ;;  %2704 = vmatmul.bf16.gmra.mxu3 %v2298_v14  ;;  %v2309_v43 = vor.u32 %v2307_v23, %v2305_v32 }
 0x2e0   : > { %v2826_v11 = vadd.f32 %v2778_v58, %v2662_v46  ;;  %v2314_v7 = vsel %vm2195_vm1, %v2309_v43, %v2313_v1  ;;  %v2319_v58 = vshll.u32 %v5172_v6, 16 }
 0x2e1   : > { %v1731_v52 = vpop.f32.mrf.mxu2  ;;  %v2665_v13 = vpop.f32.mrf.mxu3 }
 0x2e2   : > { %v3055_v51 = vadd.f32 %v2941_v30, %v2826_v11  ;;  %v2943_v24 = vpop.f32.mrf.mxu0  ;;  %v2535_v27 = vpop.f32.mrf.mxu1  ;;  %v2321_v13 = vrot.slane %v2319_v58, 1 }
 0x2e4   : > { %3151 = vst [vmem:[%s4135_s8 + $0x20] sm:$0xff] %v3055_v51  ;;  %v3198_v62 = vadd.f32 %v3197_v50, %v3055_v51  ;;  %v3252_v61 = vmul.f32 %v3055_v51, %v3055_v51 }
 0x2e6   : > { %v3299_v21 = vadd.f32 %v3298_v54, %v3252_v61  ;;  %v2315_v54 = vshrl.u32 %v5144_v25, 16 }
 0x2e8   : > { %v2317_v52 = vor.u32 %v2315_v54, %v2313_v1 }
 0x2e9   : > { %v1733_v34 = vpop.f32.mrf.mxu2  ;;  %v2667_v18 = vpop.f32.mrf.mxu3 }
 0x2ea   : > { %v1894_v16 = vadd.f32 %v5110_v22, %v1733_v34  ;;  %v2946_v14 = vpop.f32.mrf.mxu0  ;;  %v5515_v46 = vpop.f32.mrf.mxu1  ;;  %v2322_v61 = vsel %vm2195_vm1, %v2317_v52, %v2321_v13 }
 0x2ec   : > { %v2120_v15 = vadd.f32 %v5138_v31, %v1894_v16 }
 0x2ed   : > { %2985 = vmatmul.bf16.gmra.mxu0 %v2314_v7  ;;  %2577 = vmatmul.bf16.gmra.mxu1 %v2306_v33 }
 0x2ee   : > { %v2780_v37 = vadd.f32 %v2528_v4, %v2120_v15  ;;  %1775 = vmatmul.bf16.gmra.mxu2 %v5101_v55  ;;  %2709 = vmatmul.bf16.gmra.mxu3 %v2306_v33  ;;  %v2327_v15 = vshll.u32 %v5188_v41, 16 }
 0x2f0   : > { %v2828_v32 = vadd.f32 %v2780_v37, %v2667_v18 }
 0x2f1   : > { %v1736_v30 = vpop.f32.mrf.mxu2  ;;  %v2670_v26 = vpop.f32.mrf.mxu3 }
 0x2f2   : > { %v3057_v50 = vadd.f32 %v2946_v14, %v2828_v32  ;;  %v1895_v22 = vadd.f32 %v5119_v35, %v1736_v30  ;;  %v2948_v0 = vpop.f32.mrf.mxu0  ;;  %v2540_v19 = vpop.f32.mrf.mxu1  ;;  %v2323_v14 = vshrl.u32 %v5172_v6, 16 }
 0x2f4   : > { %3153 = vst [vmem:[%s4135_s8 + $0x30] sm:$0xff] %v3057_v50  ;;  %v3200_v31 = vadd.f32 %v3198_v62, %v3057_v50  ;;  %v3254_v11 = vmul.f32 %v3057_v50, %v3057_v50  ;;  %v2121_v4 = vadd.f32 %v5159_v9, %v1895_v22  ;;  %v2325_v30 = vor.u32 %v2323_v14, %v2321_v13 }
 0x2f6   : > { %v3301_v55 = vadd.f32 %v3299_v21, %v3254_v11  ;;  %v2781_v33 = vadd.f32 %v5499_v56, %v2121_v4 }
 0x2f8   : > { %v2829_v51 = vadd.f32 %v2781_v33, %v2670_v26  ;;  %v2329_v26 = vrot.slane %v2327_v15, 1 }
 0x2f9   : > { %v1738_v24 = vpop.f32.mrf.mxu2  ;;  %v2672_v35 = vpop.f32.mrf.mxu3 }
 0x2fa   : > { %v3058_v23 = vadd.f32 %v2948_v0, %v2829_v51  ;;  %v2951_v47 = vpop.f32.mrf.mxu0  ;;  %v2543_v43 = vpop.f32.mrf.mxu1  ;;  %v2330_v19 = vsel %vm2195_vm1, %v2325_v30, %v2329_v26  ;;  %v2331_v51 = vshrl.u32 %v5188_v41, 16  ;;  %v2335_v24 = vshll.u32 %v5209_v53, 16 }
 0x2fc   : > { %3154 = vst [vmem:[%s4135_s8 + $0x38] sm:$0xff] %v3058_v23  ;;  %v3201_v34 = vadd.f32 %v3200_v31, %v3058_v23  ;;  %v3255_v18 = vmul.f32 %v3058_v23, %v3058_v23  ;;  %v2333_v47 = vor.u32 %v2331_v51, %v2329_v26  ;;  %v2339_v26 = vshrl.u32 %v5209_v53, 16 }
 0x2fd   : > { %2990 = vmatmul.bf16.gmra.mxu0 %v2322_v61  ;;  %2582 = vmatmul.bf16.gmra.mxu1 %v2314_v7  ;;  %v2351_v51 = vshll.u32 %v5259_v5, 16 }
 0x2fe   : > { %v3302_v62 = vadd.f32 %v3301_v55, %v3255_v18  ;;  %1780 = vmatmul.bf16.gmra.mxu2 %v5117_v38  ;;  %2714 = vmatmul.bf16.gmra.mxu3 %v2314_v7 }
 0x301   : > { %v1741_v9 = vpop.f32.mrf.mxu2  ;;  %v2675_v56 = vpop.f32.mrf.mxu3 }
 0x302   : > { %v1897_v21 = vadd.f32 %v5146_v60, %v1741_v9  ;;  %v2953_v1 = vpop.f32.mrf.mxu0  ;;  %v5529_v16 = vpop.f32.mrf.mxu1 }
 0x304   : > { %v2123_v37 = vadd.f32 %v5179_v48, %v1897_v21 }
 0x306   : > { %v2783_v32 = vadd.f32 %v2535_v27, %v2123_v37 }
 0x308   : > { %v2831_v50 = vadd.f32 %v2783_v32, %v2675_v56 }
 0x309   : > { %v1743_v38 = vpop.f32.mrf.mxu2  ;;  %v2677_v7 = vpop.f32.mrf.mxu3 }
 0x30a   : > { %v3060_v22 = vadd.f32 %v2953_v1, %v2831_v50  ;;  %v1898_v0 = vadd.f32 %v5167_v20, %v1743_v38  ;;  %v2956_v60 = vpop.f32.mrf.mxu0  ;;  %v2548_v54 = vpop.f32.mrf.mxu1  ;;  %v2343_v50 = vshll.u32 %v5243_v57, 16 }
 0x30c   : > { %3156 = vst [vmem:[%s4135_s8 + $0x48] sm:$0xff] %v3060_v22  ;;  %v3203_v58 = vadd.f32 %v3201_v34, %v3060_v22  ;;  %v3257_v31 = vmul.f32 %v3060_v22, %v3060_v22  ;;  %v2124_v11 = vadd.f32 %v5184_v49, %v1898_v0  ;;  %v2337_v34 = vrot.slane %v2335_v24, 1 }
 0x30d   : > { %2995 = vmatmul.bf16.gmra.mxu0 %v2330_v19  ;;  %2587 = vmatmul.bf16.gmra.mxu1 %v2322_v61  ;;  %v2345_v0 = vrot.slane %v2343_v50, 1  ;;  %v2355_v50 = vshrl.u32 %v5259_v5, 16 }
 0x30e   : > { %v3304_v48 = vadd.f32 %v3302_v62, %v3257_v31  ;;  %v2784_v27 = vadd.f32 %v5515_v46, %v2124_v11  ;;  %1785 = vmatmul.bf16.gmra.mxu2 %v5144_v25  ;;  %2719 = vmatmul.bf16.gmra.mxu3 %v2322_v61  ;;  %v2338_v62 = vsel %vm2195_vm1, %v2333_v47, %v2337_v34 }
 0x30f   : > { %v2341_v22 = vor.u32 %v2339_v26, %v2337_v34 }
 0x310   : > { %v2832_v4 = vadd.f32 %v2784_v27, %v2677_v7 }
 0x311   : > { %v1746_v20 = vpop.f32.mrf.mxu2  ;;  %v2680_v55 = vpop.f32.mrf.mxu3  ;;  %v2346_v31 = vsel %vm2195_vm1, %v2341_v22, %v2345_v0 }
 0x312   : > { %v3061_v33 = vadd.f32 %v2956_v60, %v2832_v4  ;;  %v2958_v52 = vpop.f32.mrf.mxu0  ;;  %v2550_v13 = vpop.f32.mrf.mxu1 }
 0x313   : > { %v2347_v52 = vshrl.u32 %v5243_v57, 16 }
 0x314   : > { %3157 = vst [vmem:[%s4135_s8 + $0x50] sm:$0xff] %v3061_v33  ;;  %v3204_v49 = vadd.f32 %v3203_v58, %v3061_v33  ;;  %v3258_v35 = vmul.f32 %v3061_v33, %v3061_v33 }
 0x316   : > { %v3305_v23 = vadd.f32 %v3304_v48, %v3258_v35  ;;  %v2349_v35 = vor.u32 %v2347_v52, %v2345_v0 }
 0x319   : > { %v1748_v46 = vpop.f32.mrf.mxu2  ;;  %v2682_v18 = vpop.f32.mrf.mxu3 }
 0x31a   : > { %v1900_v25 = vadd.f32 %v5181_v29, %v1748_v46  ;;  %v2961_v61 = vpop.f32.mrf.mxu0  ;;  %v5545_v9 = vpop.f32.mrf.mxu1 }
 0x31c   : > { %v2126_v56 = vadd.f32 %v5203_v36, %v1900_v25 }
 0x31d   : > { %3000 = vmatmul.bf16.gmra.mxu0 %v2338_v62  ;;  %2592 = vmatmul.bf16.gmra.mxu1 %v2330_v19 }
 0x31e   : > { %v2786_v21 = vadd.f32 %v2543_v43, %v2126_v56  ;;  %1790 = vmatmul.bf16.gmra.mxu2 %v5172_v6  ;;  %2724 = vmatmul.bf16.gmra.mxu3 %v2330_v19 }
 0x320   : > { %v2834_v1 = vadd.f32 %v2786_v21, %v2682_v18  ;;  %v5892_v18 = vld [vmem:[#allocation35_spill] sm:$0xff] }
 0x321   : > { %v1751_v14 = vpop.f32.mrf.mxu2  ;;  %v2685_v15 = vpop.f32.mrf.mxu3 }
 0x322   : > { %v3063_v37 = vadd.f32 %v2961_v61, %v2834_v1  ;;  %v1901_v29 = vadd.f32 %v5190_v63, %v1751_v14  ;;  %v2963_v32 = vpop.f32.mrf.mxu0  ;;  %v2555_v30 = vpop.f32.mrf.mxu1  ;;  %v5893_v1 = vld [vmem:[#allocation37_spill] sm:$0xff] }
 0x324   : > { %3159 = vst [vmem:[%s4135_s8 + $0x60] sm:$0xff] %v3063_v37  ;;  %v3206_v36 = vadd.f32 %v3204_v49, %v3063_v37  ;;  %v3260_v38 = vmul.f32 %v3063_v37, %v3063_v37  ;;  %v2127_v43 = vadd.f32 %v5230_v12, %v1901_v29 }
 0x326   : > { %v3307_v6 = vadd.f32 %v3305_v23, %v3260_v38  ;;  %v2787_v7 = vadd.f32 %v5529_v16, %v2127_v43  ;;  %v2353_v23 = vrot.slane %v2351_v51, 1 }
 0x328   : > { %v2835_v60 = vadd.f32 %v2787_v7, %v2685_v15  ;;  %v2354_v61 = vsel %vm2195_vm1, %v2349_v35, %v2353_v23  ;;  %v2357_v7 = vor.u32 %v2355_v50, %v2353_v23 }
 0x329   : > { %v1753_v19 = vpop.f32.mrf.mxu2  ;;  %v2687_v63 = vpop.f32.mrf.mxu3 }
 0x32a   : > { %v3064_v54 = vadd.f32 %v2963_v32, %v2835_v60  ;;  %v2966_v58 = vpop.f32.mrf.mxu0  ;;  %v2558_v11 = vpop.f32.mrf.mxu1 }
 0x32b   : > { %v5895_v58 = vld [vmem:[#allocation5_spill] sm:$0xff] }
 0x32c   : > { %3160 = vst [vmem:[%s4135_s8 + $0x68] sm:$0xff] %v3064_v54  ;;  %v3207_v48 = vadd.f32 %v3206_v36, %v3064_v54  ;;  %v3261_v27 = vmul.f32 %v3064_v54, %v3064_v54  ;;  %v2359_v36 = vshll.u32 %v5280_v28, 16 }
 0x32d   : > { %3005 = vmatmul.bf16.gmra.mxu0 %v2346_v31  ;;  %2597 = vmatmul.bf16.gmra.mxu1 %v2338_v62 }
 0x32e   : > { %v3308_v4 = vadd.f32 %v3307_v6, %v3261_v27  ;;  %1795 = vmatmul.bf16.gmra.mxu2 %v5188_v41  ;;  %2729 = vmatmul.bf16.gmra.mxu3 %v2338_v62  ;;  %v2361_v22 = vrot.slane %v2359_v36, 1 }
 0x330   : > { %v2362_v63 = vsel %vm2195_vm1, %v2357_v7, %v2361_v22 }
 0x331   : > { %v1756_v12 = vpop.f32.mrf.mxu2  ;;  %v2690_v16 = vpop.f32.mrf.mxu3 }
 0x332   : > { %v1903_v20 = vadd.f32 %v5217_v8, %v1756_v12  ;;  %v2968_v55 = vpop.f32.mrf.mxu0  ;;  %v5559_v33 = vpop.f32.mrf.mxu1 }
 0x334   : > { %v2129_v24 = vadd.f32 %v5250_v42, %v1903_v20  ;;  %v5896_v20 = vld [vmem:[#allocation13_spill] sm:$0xff] }
 0x336   : > { %v2789_v49 = vadd.f32 %v2550_v13, %v2129_v24  ;;  %v2363_v24 = vshrl.u32 %v5280_v28, 16 }
 0x338   : > { %v2837_v47 = vadd.f32 %v2789_v49, %v2690_v16  ;;  %v2367_v49 = vshll.u32 %v5308_v17, 16 }
 0x339   : > { %v1758_v41 = vpop.f32.mrf.mxu2  ;;  %v2692_v34 = vpop.f32.mrf.mxu3 }
 0x33a   : > { %v3066_v46 = vadd.f32 %v2968_v55, %v2837_v47  ;;  %v1904_v25 = vadd.f32 %v5892_v18, %v1758_v41  ;;  %v2971_v8 = vpop.f32.mrf.mxu0  ;;  %v2563_v62 = vpop.f32.mrf.mxu1  ;;  %v2365_v41 = vor.u32 %v2363_v24, %v2361_v22  ;;  %v5898_v22 = vld [vmem:[#allocation3_spill] sm:$0xff] }
 0x33c   : > { %3162 = vst [vmem:[%s4135_s8 + $0x78] sm:$0xff] %v3066_v46  ;;  %v3209_v56 = vadd.f32 %v3207_v48, %v3066_v46  ;;  %v3263_v21 = vmul.f32 %v3066_v46, %v3066_v46  ;;  %v2130_v14 = vadd.f32 %v5893_v1, %v1904_v25 }
 0x33d   : > { %3010 = vmatmul.bf16.gmra.mxu0 %v2354_v61  ;;  %2602 = vmatmul.bf16.gmra.mxu1 %v2346_v31 }
 0x33e   : > { %v3310_v42 = vadd.f32 %v3308_v4, %v3263_v21  ;;  %v2790_v13 = vadd.f32 %v5545_v9, %v2130_v14  ;;  %1800 = vmatmul.bf16.gmra.mxu2 %v5209_v53  ;;  %2734 = vmatmul.bf16.gmra.mxu3 %v2346_v31  ;;  %v5894_v53 = vld [vmem:[#allocation36_spill] sm:$0xff] }
 0x340   : > { %v2838_v15 = vadd.f32 %v2790_v13, %v2692_v34  ;;  %v2369_v34 = vrot.slane %v2367_v49, 1 }
 0x341   : > { %v1761_v37 = vpop.f32.mrf.mxu2  ;;  %v2695_v29 = vpop.f32.mrf.mxu3 }
 0x342   : > { %v3067_v32 = vadd.f32 %v2971_v8, %v2838_v15  ;;  %v2973_v30 = vpop.f32.mrf.mxu0  ;;  %v2565_v26 = vpop.f32.mrf.mxu1  ;;  %v2370_v62 = vsel %vm2195_vm1, %v2365_v41, %v2369_v34  ;;  %v2371_v29 = vshrl.u32 %v5308_v17, 16 }
 0x344   : > { %3163 = vst [vmem:[%s4135_s8 + $0x80] sm:$0xff] %v3067_v32  ;;  %v3210_v38 = vadd.f32 %v3209_v56, %v3067_v32  ;;  %v3264_v43 = vmul.f32 %v3067_v32, %v3067_v32  ;;  %v2375_v32 = vshll.u32 %v5330_v10, 16  ;;  %v2373_v36 = vor.u32 %v2371_v29, %v2369_v34 }
 0x346   : > { %v3311_v6 = vadd.f32 %v3310_v42, %v3264_v43  ;;  %v5897_v42 = vld [vmem:[#allocation2_spill] sm:$0xff] }
 0x349   : > { %v1763_v9 = vpop.f32.mrf.mxu2  ;;  %v2697_v0 = vpop.f32.mrf.mxu3 }
 0x34a   : > { %v1906_v60 = vadd.f32 %v5894_v53, %v1763_v9  ;;  %v2976_v19 = vpop.f32.mrf.mxu0  ;;  %v5575_v54 = vpop.f32.mrf.mxu1 }
 0x34c   : > { %v2132_v31 = vadd.f32 %v5895_v58, %v1906_v60  ;;  %v5899_v58 = vld [vmem:[#allocation4_spill] sm:$0xff] }
 0x34d   : > { %3015 = vmatmul.bf16.gmra.mxu0 %v2362_v63  ;;  %2607 = vmatmul.bf16.gmra.mxu1 %v2354_v61 }
 0x34e   : > { %v2792_v48 = vadd.f32 %v2558_v11, %v2132_v31  ;;  %1805 = vmatmul.bf16.gmra.mxu2 %v5243_v57  ;;  %2739 = vmatmul.bf16.gmra.mxu3 %v2354_v61 }
 0x350   : > { %v2840_v27 = vadd.f32 %v2792_v48, %v2697_v0 }
 0x351   : > { %v1766_v4 = vpop.f32.mrf.mxu2  ;;  %v2700_v12 = vpop.f32.mrf.mxu3 }
 0x352   : > { %v3069_v16 = vadd.f32 %v2976_v19, %v2840_v27  ;;  %v1907_v55 = vadd.f32 %v5896_v20, %v1766_v4  ;;  %v2978_v52 = vpop.f32.mrf.mxu0  ;;  %v2570_v51 = vpop.f32.mrf.mxu1 }
 0x354   : > { %3165 = vst [vmem:[%s4135_s8 + $0x90] sm:$0xff] %v3069_v16  ;;  %v3212_v35 = vadd.f32 %v3210_v38, %v3069_v16  ;;  %v3266_v23 = vmul.f32 %v3069_v16, %v3069_v16  ;;  %v2133_v11 = vadd.f32 %v5301_v39, %v1907_v55  ;;  %v2377_v38 = vrot.slane %v2375_v32, 1  ;;  %v5904_v32 = vld [vmem:[#allocation9_spill] sm:$0xff] }
 0x355   : > { %v2379_v55 = vshrl.u32 %v5330_v10, 16 }
 0x356   : > { %v3313_v57 = vadd.f32 %v3311_v6, %v3266_v23  ;;  %v2793_v47 = vadd.f32 %v5559_v33, %v2133_v11  ;;  %v2378_v53 = vsel %vm2195_vm1, %v2373_v36, %v2377_v38 }
 0x357   : > { %v2381_v23 = vor.u32 %v2379_v55, %v2377_v38 }
 0x358   : > { %v2841_v46 = vadd.f32 %v2793_v47, %v2700_v12 }
 0x359   : > { %v1768_v18 = vpop.f32.mrf.mxu2  ;;  %v2702_v25 = vpop.f32.mrf.mxu3 }
 0x35a   : > { %v3070_v8 = vadd.f32 %v2978_v52, %v2841_v46  ;;  %v2981_v61 = vpop.f32.mrf.mxu0  ;;  %v2573_v56 = vpop.f32.mrf.mxu1  ;;  %v5900_v52 = vld [vmem:[#allocation12_spill] sm:$0xff]  ;;  %v5902_v18 = vld [vmem:[#allocation6_spill] sm:$0xff] }
 0x35b   : > { %v2383_v51 = vshll.u32 %v5900_v52, 16 }
 0x35c   : > { %3166 = vst [vmem:[%s4135_s8 + $0x98] sm:$0xff] %v3070_v8  ;;  %v3213_v21 = vadd.f32 %v3212_v35, %v3070_v8  ;;  %v3267_v1 = vmul.f32 %v3070_v8, %v3070_v8 }
 0x35d   : > { %3020 = vmatmul.bf16.gmra.mxu0 %v2370_v62  ;;  %2612 = vmatmul.bf16.gmra.mxu1 %v2362_v63  ;;  %v2385_v11 = vrot.slane %v2383_v51, 1  ;;  %v5908_v51 = vld [vmem:[#allocation11_spill] sm:$0xff] }
 0x35e   : > { %v3314_v14 = vadd.f32 %v3313_v57, %v3267_v1  ;;  %1810 = vmatmul.bf16.gmra.mxu2 %v5259_v5  ;;  %2744 = vmatmul.bf16.gmra.mxu3 %v2362_v63 }
 0x35f   : > { %v2386_v34 = vsel %vm2195_vm1, %v2381_v23, %v2385_v11 }
 0x361   : > { %v1771_v39 = vpop.f32.mrf.mxu2  ;;  %v2705_v33 = vpop.f32.mrf.mxu3 }
 0x362   : > { %v1909_v13 = vadd.f32 %v5897_v42, %v1771_v39  ;;  %v2983_v15 = vpop.f32.mrf.mxu0  ;;  %v5589_v37 = vpop.f32.mrf.mxu1 }
 0x364   : > { %v2135_v30 = vadd.f32 %v5321_v40, %v1909_v13  ;;  %v2387_v13 = vshrl.u32 %v5900_v52, 16 }
 0x366   : > { %v2795_v50 = vadd.f32 %v2565_v26, %v2135_v30 }
 0x368   : > { %v2843_v43 = vadd.f32 %v2795_v50, %v2705_v33  ;;  %v2389_v50 = vor.u32 %v2387_v13, %v2385_v11  ;;  %v5909_v11 = vld [vmem:[#allocation20_spill] sm:$0xff] }
 0x369   : > { %v1773_v5 = vpop.f32.mrf.mxu2  ;;  %v2707_v6 = vpop.f32.mrf.mxu3 }
 0x36a   : > { %v3072_v7 = vadd.f32 %v2983_v15, %v2843_v43  ;;  %v1910_v9 = vadd.f32 %v5898_v22, %v1773_v5  ;;  %v2986_v0 = vpop.f32.mrf.mxu0  ;;  %v2578_v60 = vpop.f32.mrf.mxu1 }
 0x36c   : > { %3168 = vst [vmem:[%s4135_s8 + $0xa8] sm:$0xff] %v3072_v7  ;;  %v3215_v19 = vadd.f32 %v3213_v21, %v3072_v7  ;;  %v3269_v63 = vmul.f32 %v3072_v7, %v3072_v7  ;;  %v2136_v31 = vadd.f32 %v5899_v58, %v1910_v9  ;;  %v5905_v7 = vld [vmem:[#allocation39_spill] sm:$0xff] }
 0x36d   : > { %3025 = vmatmul.bf16.gmra.mxu0 %v2378_v53  ;;  %2617 = vmatmul.bf16.gmra.mxu1 %v2370_v62  ;;  %v2394_v22 = vsel %vm2195_vm1, %v2389_v50, %v5905_v7 }
 0x36e   : > { %v3316_v40 = vadd.f32 %v3314_v14, %v3269_v63  ;;  %v2796_v26 = vadd.f32 %v5575_v54, %v2136_v31  ;;  %1815 = vmatmul.bf16.gmra.mxu2 %v5280_v28  ;;  %2749 = vmatmul.bf16.gmra.mxu3 %v2370_v62  ;;  %v5901_v28 = vld [vmem:[#allocation7_spill] sm:$0xff]  ;;  %v5903_v14 = vld [vmem:[#allocation10_spill] sm:$0xff]  ;;  %v5906_v63 = vld [vmem:[#allocation8_spill] sm:$0xff] }
 0x370   : > { %v2844_v48 = vadd.f32 %v2796_v26, %v2707_v6  ;;  %v5907_v26 = vld [vmem:[#allocation38_spill] sm:$0xff] }
 0x371   : > { %v1776_v27 = vpop.f32.mrf.mxu2  ;;  %v2710_v4 = vpop.f32.mrf.mxu3 }
 0x372   : > { %v3073_v12 = vadd.f32 %v2986_v0, %v2844_v48  ;;  %v2988_v16 = vpop.f32.mrf.mxu0  ;;  %v2580_v20 = vpop.f32.mrf.mxu1 }
 0x374   : > { %3169 = vst [vmem:[%s4135_s8 + $0xb0] sm:$0xff] %v3073_v12  ;;  %v3216_v24 = vadd.f32 %v3215_v19, %v3073_v12  ;;  %v3270_v49 = vmul.f32 %v3073_v12, %v3073_v12 }
 0x376   : > { %v3317_v35 = vadd.f32 %v3316_v40, %v3270_v49 }
 0x379   : > { %v1778_v54 = vpop.f32.mrf.mxu2  ;;  %v2712_v57 = vpop.f32.mrf.mxu3 }
 0x37a   : > { %v1912_v47 = vadd.f32 %v5901_v28, %v1778_v54  ;;  %v2991_v41 = vpop.f32.mrf.mxu0  ;;  %v2583_v46 = vpop.f32.mrf.mxu1 }
 0x37c   : > { %v2138_v25 = vadd.f32 %v5902_v18, %v1912_v47 }
 0x37d   : > { %3030 = vmatmul.bf16.gmra.mxu0 %v2386_v34  ;;  %2622 = vmatmul.bf16.gmra.mxu1 %v2378_v53 }
 0x37e   : > { %v2798_v8 = vadd.f32 %v2573_v56, %v2138_v25  ;;  %1820 = vmatmul.bf16.gmra.mxu2 %v5308_v17  ;;  %2754 = vmatmul.bf16.gmra.mxu3 %v2378_v53 }
 0x380   : > { %v2846_v61 = vadd.f32 %v2798_v8, %v2712_v57 }
 0x381   : > { %v1781_v62 = vpop.f32.mrf.mxu2  ;;  %v2715_v21 = vpop.f32.mrf.mxu3 }
 0x382   : > { %v3075_v1 = vadd.f32 %v2991_v41, %v2846_v61  ;;  %v1913_v39 = vadd.f32 %v5903_v14, %v1781_v62  ;;  %v2993_v33 = vpop.f32.mrf.mxu0  ;;  %v2585_v42 = vpop.f32.mrf.mxu1  ;;  %v5910_v14 = vld [vmem:[#allocation14_spill] sm:$0xff] }
 0x383   : > { %v5911_v42 = vld [vmem:[#allocation15_spill] sm:$0xff] }
 0x384   : > { %3171 = vst [vmem:[%s4135_s8 + $0xc0] sm:$0xff] %v3075_v1  ;;  %v3218_v15 = vadd.f32 %v3216_v24, %v3075_v1  ;;  %v3272_v29 = vmul.f32 %v3075_v1, %v3075_v1  ;;  %v2139_v30 = vadd.f32 %v5904_v32, %v1913_v39 }
 0x386   : > { %v3319_v56 = vadd.f32 %v3317_v35, %v3272_v29  ;;  %v2799_v17 = vadd.f32 %v5589_v37, %v2139_v30 }
 0x388   : > { %v2847_v36 = vadd.f32 %v2799_v17, %v2715_v21  ;;  %v5913_v17 = vld [vmem:[#allocation40_spill] sm:$0xff] }
 0x389   : > { %v1783_v38 = vpop.f32.mrf.mxu2  ;;  %v2717_v43 = vpop.f32.mrf.mxu3 }
 0x38a   : > { %v3076_v5 = vadd.f32 %v2993_v33, %v2847_v36  ;;  %v2996_v6 = vpop.f32.mrf.mxu0  ;;  %v2588_v9 = vpop.f32.mrf.mxu1 }
 0x38b   : > { %v5914_v6 = vld [vmem:[#allocation16_spill] sm:$0xff] }
 0x38c   : > { %3172 = vst [vmem:[%s4135_s8 + $0xc8] sm:$0xff] %v3076_v5  ;;  %v3219_v0 = vadd.f32 %v3218_v15, %v3076_v5  ;;  %v3273_v53 = vmul.f32 %v3076_v5, %v3076_v5  ;;  %v5912_v15 = vmov 0.0|0.0  }
 0x38d   : > { %3035 = vmatmul.bf16.gmra.mxu0 %v2394_v22  ;;  %2627 = vmatmul.bf16.gmra.mxu1 %v2386_v34 }
 0x38e   : > { %v3320_v60 = vadd.f32 %v3319_v56, %v3273_v53  ;;  %1825 = vmatmul.bf16.gmra.mxu2 %v5330_v10  ;;  %2759 = vmatmul.bf16.gmra.mxu3 %v2386_v34 }
 0x391   : > { %v1786_v37 = vpop.f32.mrf.mxu2  ;;  %v2720_v19 = vpop.f32.mrf.mxu3 }
 0x392   : > { %v1915_v58 = vadd.f32 %v5906_v63, %v1786_v37  ;;  %v2998_v31 = vpop.f32.mrf.mxu0  ;;  %v2590_v40 = vpop.f32.mrf.mxu1 }
 0x394   : > { %v2141_v48 = vadd.f32 %v5907_v26, %v1915_v58 }
 0x396   : > { %v2801_v27 = vadd.f32 %v2580_v20, %v2141_v48 }
 0x398   : > { %v2849_v4 = vadd.f32 %v2801_v27, %v2720_v19 }
 0x399   : > { %v1788_v12 = vpop.f32.mrf.mxu2  ;;  %v2722_v16 = vpop.f32.mrf.mxu3 }
 0x39a   : > { %v3078_v55 = vadd.f32 %v2998_v31, %v2849_v4  ;;  %v1916_v24 = vadd.f32 %v5908_v51, %v1788_v12  ;;  %v3001_v49 = vpop.f32.mrf.mxu0  ;;  %v2593_v35 = vpop.f32.mrf.mxu1  ;;  %v5915_v4 = vld [vmem:[#allocation24_spill] sm:$0xff]  ;;  %v5916_v51 = vld [vmem:[#allocation19_spill] sm:$0xff] }
 0x39c   : > { %3174 = vst [vmem:[%s4135_s8 + $0xd8] sm:$0xff] %v3078_v55  ;;  %v3221_v10 = vadd.f32 %v3219_v0, %v3078_v55  ;;  %v3275_v23 = vmul.f32 %v3078_v55, %v3078_v55  ;;  %v2142_v54 = vadd.f32 %v5909_v11, %v1916_v24  ;;  %v5917_v11 = vld [vmem:[#allocation26_spill] sm:$0xff] }
 0x39d   : > { %3040 = vmatmul.bf16.gmra.mxu0 %v5905_v7  ;;  %2632 = vmatmul.bf16.gmra.mxu1 %v2394_v22 }
 0x39e   : > { %v3322_v57 = vadd.f32 %v3320_v60, %v3275_v23  ;;  %v2802_v28 = vadd.f32 %v2583_v46, %v2142_v54  ;;  %1830 = vmatmul.bf16.gmra.mxu2 %v5900_v52  ;;  %2764 = vmatmul.bf16.gmra.mxu3 %v2394_v22 }
 0x3a0   : > { %v2850_v20 = vadd.f32 %v2802_v28, %v2722_v16 }
 0x3a1   : > { %v1791_v47 = vpop.f32.mrf.mxu2  ;;  %v2725_v41 = vpop.f32.mrf.mxu3 }
 0x3a2   : > { %v3079_v34 = vadd.f32 %v3001_v49, %v2850_v20  ;;  %v3003_v18 = vpop.f32.mrf.mxu0  ;;  %v2595_v25 = vpop.f32.mrf.mxu1  ;;  %v5918_v41 = vld [vmem:[#allocation22_spill] sm:$0xff] }
 0x3a4   : > { %3175 = vst [vmem:[%s4135_s8 + $0xe0] sm:$0xff] %v3079_v34  ;;  %v3222_v8 = vadd.f32 %v3221_v10, %v3079_v34  ;;  %v3276_v61 = vmul.f32 %v3079_v34, %v3079_v34 }
 0x3a6   : > { %v3323_v62 = vadd.f32 %v3322_v57, %v3276_v61 }
 0x3a9   : > { %v1793_v21 = vpop.f32.mrf.mxu2  ;;  %v2727_v1 = vpop.f32.mrf.mxu3 }
 0x3aa   : > { %v1918_v39 = vadd.f32 %v5910_v14, %v1793_v21  ;;  %v3006_v33 = vpop.f32.mrf.mxu0  ;;  %v2598_v46 = vpop.f32.mrf.mxu1 }
 0x3ac   : > { %v2144_v52 = vadd.f32 %v5911_v42, %v1918_v39 }
 0x3ad   : > { %3045 = vmatmul.bf16.gmra.mxu0 %v5905_v7  ;;  %2635 = vmatmul.bf16.gmra.mxu1 %v5905_v7 }
 0x3ae   : > { %v2804_v13 = vadd.f32 %v2588_v9, %v2144_v52  ;;  %1835 = vmatmul.bf16.gmra.mxu2 %v5912_v15  ;;  %2769 = vmatmul.bf16.gmra.mxu3 %v5905_v7  ;;  %v5919_v15 = vld [vmem:[#allocation28_spill] sm:$0xff] }
 0x3b0   : > { %v2852_v29 = vadd.f32 %v2804_v13, %v2727_v1 }
 0x3b1   : > { %v1796_v32 = vpop.f32.mrf.mxu2  ;;  %v2730_v30 = vpop.f32.mrf.mxu3 }
 0x3b2   : > { %v3081_v56 = vadd.f32 %v3006_v33, %v2852_v29  ;;  %v1919_v50 = vadd.f32 %v5913_v17, %v1796_v32  ;;  %v3008_v36 = vpop.f32.mrf.mxu0  ;;  %v2600_v38 = vpop.f32.mrf.mxu1 }
 0x3b4   : > { %3177 = vst [vmem:[%s4135_s8 + $0xf0] sm:$0xff] %v3081_v56  ;;  %v3224_v43 = vadd.f32 %v3222_v8, %v3081_v56  ;;  %v3278_v5 = vmul.f32 %v3081_v56, %v3081_v56  ;;  %v2145_v22 = vadd.f32 %v5914_v6, %v1919_v50  ;;  %v5920_v56 = vld [vmem:[#allocation25_spill] sm:$0xff] }
 0x3b6   : > { %v3325_v0 = vadd.f32 %v3323_v62, %v3278_v5  ;;  %v2805_v9 = vadd.f32 %v2590_v40, %v2145_v22  ;;  %v5921_v5 = vld [vmem:[#allocation29_spill] sm:$0xff] }
 0x3b8   : > { %v2853_v53 = vadd.f32 %v2805_v9, %v2730_v30 }
 0x3b9   : > { %v1798_v60 = vpop.f32.mrf.mxu2  ;;  %v2732_v37 = vpop.f32.mrf.mxu3 }
 0x3ba   : > { %v3082_v7 = vadd.f32 %v3008_v36, %v2853_v53  ;;  %v3011_v19 = vpop.f32.mrf.mxu0  ;;  %v2603_v63 = vpop.f32.mrf.mxu1  ;;  %v5922_v60 = vld [vmem:[#allocation33_spill] sm:$0xff] }
 0x3bc   : > { %3178 = vst [vmem:[%s4135_s8 + $0xf8] sm:$0xff] %v3082_v7  ;;  %v3225_v58 = vadd.f32 %v3224_v43, %v3082_v7  ;;  %v3279_v31 = vmul.f32 %v3082_v7, %v3082_v7 }
 0x3be   : > { %v3326_v26 = vadd.f32 %v3325_v0, %v3279_v31 }
 0x3c1   : > { %v1801_v48 = vpop.f32.mrf.mxu2  ;;  %v2735_v27 = vpop.f32.mrf.mxu3 }
 0x3c2   : > { %v1921_v12 = vadd.f32 %v5915_v4, %v1801_v48  ;;  %v3013_v16 = vpop.f32.mrf.mxu0  ;;  %v2605_v55 = vpop.f32.mrf.mxu1 }
 0x3c4   : > { %v2147_v24 = vadd.f32 %v5916_v51, %v1921_v12 }
 0x3c6   : > { %v2807_v40 = vadd.f32 %v2595_v25, %v2147_v24 }
 0x3c8   : > { %v2855_v49 = vadd.f32 %v2807_v40, %v2735_v27  ;;  %v5923_v40 = vld [vmem:[#allocation31_spill] sm:$0xff] }
 0x3c9   : > { %v1803_v35 = vpop.f32.mrf.mxu2  ;;  %v2737_v10 = vpop.f32.mrf.mxu3 }
 0x3ca   : > { %v3084_v23 = vadd.f32 %v3013_v16, %v2855_v49  ;;  %v1922_v54 = vadd.f32 %v5917_v11, %v1803_v35  ;;  %v3016_v57 = vpop.f32.mrf.mxu0  ;;  %v2608_v28 = vpop.f32.mrf.mxu1 }
 0x3cc   : > { %3180 = vst [vmem:[%s4135_s8 + $0x108] sm:$0xff] %v3084_v23  ;;  %v3227_v20 = vadd.f32 %v3225_v58, %v3084_v23  ;;  %v3281_v47 = vmul.f32 %v3084_v23, %v3084_v23  ;;  %v2148_v34 = vadd.f32 %v5918_v41, %v1922_v54 }
 0x3ce   : > { %v3328_v18 = vadd.f32 %v3326_v26, %v3281_v47  ;;  %v2808_v8 = vadd.f32 %v2598_v46, %v2148_v34 }
 0x3d0   : > { %v2856_v61 = vadd.f32 %v2808_v8, %v2737_v10 }
 0x3d1   : > { %v1806_v62 = vpop.f32.mrf.mxu2  ;;  %v2740_v21 = vpop.f32.mrf.mxu3 }
 0x3d2   : > { %v3085_v25 = vadd.f32 %v3016_v57, %v2856_v61  ;;  %v3018_v1 = vpop.f32.mrf.mxu0  ;;  %v2610_v14 = vpop.f32.mrf.mxu1 }
 0x3d4   : > { %3181 = vst [vmem:[%s4135_s8 + $0x110] sm:$0xff] %v3085_v25  ;;  %v3228_v39 = vadd.f32 %v3227_v20, %v3085_v25  ;;  %v3282_v33 = vmul.f32 %v3085_v25, %v3085_v25  ;;  %v5924_v20 = vld [vmem:[#allocation27_spill] sm:$0xff] }
 0x3d6   : > { %v3329_v42 = vadd.f32 %v3328_v18, %v3282_v33 }
 0x3d9   : > { %v1808_v52 = vpop.f32.mrf.mxu2  ;;  %v2742_v13 = vpop.f32.mrf.mxu3 }
 0x3da   : > { %v1924_v29 = vadd.f32 %v5919_v15, %v1808_v52  ;;  %v3021_v32 = vpop.f32.mrf.mxu0  ;;  %v2613_v30 = vpop.f32.mrf.mxu1 }
 0x3dc   : > { %v2150_v17 = vadd.f32 %v5920_v56, %v1924_v29 }
 0x3de   : > { %v2810_v46 = vadd.f32 %v2603_v63, %v2150_v17 }
 0x3e0   : > { %v2858_v50 = vadd.f32 %v2810_v46, %v2742_v13 }
 0x3e1   : > { %v1811_v36 = vpop.f32.mrf.mxu2  ;;  %v2745_v38 = vpop.f32.mrf.mxu3 }
 0x3e2   : > { %v3087_v43 = vadd.f32 %v3021_v32, %v2858_v50  ;;  %v1925_v6 = vadd.f32 %v5921_v5, %v1811_v36  ;;  %v3023_v22 = vpop.f32.mrf.mxu0  ;;  %v2615_v0 = vpop.f32.mrf.mxu1 }
 0x3e4   : > { %3183 = vst [vmem:[%s4135_s8 + $0x120] sm:$0xff] %v3087_v43  ;;  %v3230_v9 = vadd.f32 %v3228_v39, %v3087_v43  ;;  %v3284_v53 = vmul.f32 %v3087_v43, %v3087_v43  ;;  %v2151_v37 = vadd.f32 %v5922_v60, %v1925_v6  ;;  %v5925_v43 = vld [vmem:[#allocation17_spill] sm:$0xff] }
 0x3e6   : > { %v3331_v7 = vadd.f32 %v3329_v42, %v3284_v53  ;;  %v2811_v19 = vadd.f32 %v2605_v55, %v2151_v37 }
 0x3e8   : > { %v2859_v58 = vadd.f32 %v2811_v19, %v2745_v38 }
 0x3e9   : > { %v1813_v31 = vpop.f32.mrf.mxu2  ;;  %v2747_v26 = vpop.f32.mrf.mxu3 }
 0x3ea   : > { %v3088_v63 = vadd.f32 %v3023_v22, %v2859_v58  ;;  %v3026_v48 = vpop.f32.mrf.mxu0  ;;  %v2618_v27 = vpop.f32.mrf.mxu1 }
 0x3ec   : > { %3184 = vst [vmem:[%s4135_s8 + $0x128] sm:$0xff] %v3088_v63  ;;  %v3231_v4 = vadd.f32 %v3230_v9, %v3088_v63  ;;  %v3285_v12 = vmul.f32 %v3088_v63, %v3088_v63 }
 0x3ee   : > { %v3332_v16 = vadd.f32 %v3331_v7, %v3285_v12  ;;  %v5926_v12 = vld [vmem:[#allocation30_spill] sm:$0xff] }
 0x3f1   : > { %v1816_v51 = vpop.f32.mrf.mxu2  ;;  %v2750_v24 = vpop.f32.mrf.mxu3 }
 0x3f2   : > { %v1927_v49 = vadd.f32 %v5923_v40, %v1816_v51  ;;  %v3028_v35 = vpop.f32.mrf.mxu0  ;;  %v2620_v10 = vpop.f32.mrf.mxu1 }
 0x3f4   : > { %v2153_v23 = vadd.f32 %v5443_v44, %v1927_v49 }
 0x3f6   : > { %v2813_v55 = vadd.f32 %v2610_v14, %v2153_v23 }
 0x3f8   : > { %v2861_v11 = vadd.f32 %v2813_v55, %v2750_v24 }
 0x3f9   : > { %v1818_v54 = vpop.f32.mrf.mxu2  ;;  %v2752_v57 = vpop.f32.mrf.mxu3 }
 0x3fa   : > { %v3090_v28 = vadd.f32 %v3028_v35, %v2861_v11  ;;  %v1928_v47 = vadd.f32 %v5924_v20, %v1818_v54  ;;  %v3031_v41 = vpop.f32.mrf.mxu0  ;;  %v2623_v34 = vpop.f32.mrf.mxu1  ;;  %v5928_v11 = vld [vmem:[#allocation18_spill] sm:$0xff] }
 0x3fc   : > { %3186 = vst [vmem:[%s4135_s8 + $0x138] sm:$0xff] %v3090_v28  ;;  %v3233_v18 = vadd.f32 %v3231_v4, %v3090_v28  ;;  %v3287_v8 = vmul.f32 %v3090_v28, %v3090_v28  ;;  %v2154_v61 = vadd.f32 %v5450_v45, %v1928_v47 }
 0x3fe   : > { %v3334_v62 = vadd.f32 %v3332_v16, %v3287_v8  ;;  %v2814_v21 = vadd.f32 %v2613_v30, %v2154_v61 }
 0x400   : > { %v2862_v25 = vadd.f32 %v2814_v21, %v2752_v57 }
 0x401   : > { %v1821_v1 = vpop.f32.mrf.mxu2  ;;  %v2755_v44 = vpop.f32.mrf.mxu3 }
 0x402   : > { %v3091_v14 = vadd.f32 %v3031_v41, %v2862_v25  ;;  %v3033_v39 = vpop.f32.mrf.mxu0  ;;  %v2625_v33 = vpop.f32.mrf.mxu1  ;;  %v5929_v41 = vld [vmem:[#allocation21_spill] sm:$0xff] }
 0x404   : > { %3187 = vst [vmem:[%s4135_s8 + $0x140] sm:$0xff] %v3091_v14  ;;  %v3234_v42 = vadd.f32 %v3233_v18, %v3091_v14  ;;  %v3288_v52 = vmul.f32 %v3091_v14, %v3091_v14 }
 0x406   : > { %v3335_v13 = vadd.f32 %v3334_v62, %v3288_v52 }
 0x409   : > { %v1823_v15 = vpop.f32.mrf.mxu2  ;;  %v2757_v29 = vpop.f32.mrf.mxu3 }
 0x40a   : > { %v1930_v32 = vadd.f32 %v5447_v2, %v1823_v15  ;;  %v3036_v56 = vpop.f32.mrf.mxu0  ;;  %v2628_v17 = vpop.f32.mrf.mxu1 }
 0x40c   : > { %v2156_v45 = vadd.f32 %v5459_v3, %v1930_v32 }
 0x40e   : > { %v2816_v30 = vadd.f32 %v2618_v27, %v2156_v45 }
 0x410   : > { %v2864_v46 = vadd.f32 %v2816_v30, %v2757_v29 }
 0x411   : > { %v1826_v50 = vpop.f32.mrf.mxu2  ;;  %v2760_v36 = vpop.f32.mrf.mxu3 }
 0x412   : > { %v3093_v38 = vadd.f32 %v3036_v56, %v2864_v46  ;;  %v1931_v5 = vadd.f32 %v5925_v43, %v1826_v50  ;;  %v3038_v6 = vpop.f32.mrf.mxu0  ;;  %v2630_v22 = vpop.f32.mrf.mxu1 }
 0x414   : > { %3189 = vst [vmem:[%s4135_s8 + $0x150] sm:$0xff] %v3093_v38  ;;  %v3236_v0 = vadd.f32 %v3234_v42, %v3093_v38  ;;  %v3290_v9 = vmul.f32 %v3093_v38, %v3093_v38  ;;  %v2157_v53 = vadd.f32 %v5466_v59, %v1931_v5  ;;  %v5927_v59 = vld [vmem:[#allocation32_spill] sm:$0xff] }
 0x416   : > { %v3337_v2 = vadd.f32 %v3335_v13, %v3290_v9  ;;  %v2817_v60 = vadd.f32 %v2620_v10, %v2157_v53 }
 0x418   : > { %v2865_v37 = vadd.f32 %v2817_v60, %v2760_v36 }
 0x419   : > { %v1828_v7 = vpop.f32.mrf.mxu2  ;;  %v2762_v3 = vpop.f32.mrf.mxu3 }
 0x41a   : > { %v3094_v19 = vadd.f32 %v3038_v6, %v2865_v37  ;;  %v3041_v58 = vpop.f32.mrf.mxu0  ;;  %v2633_v31 = vpop.f32.mrf.mxu1 }
 0x41c   : > { %3190 = vst [vmem:[%s4135_s8 + $0x158] sm:$0xff] %v3094_v19  ;;  %v3237_v26 = vadd.f32 %v3236_v0, %v3094_v19  ;;  %v3291_v63 = vmul.f32 %v3094_v19, %v3094_v19 }
 0x41e   : > { %v3338_v48 = vadd.f32 %v3337_v2, %v3291_v63 }
 0x421   : > { %v1831_v27 = vpop.f32.mrf.mxu2  ;;  %v2765_v4 = vpop.f32.mrf.mxu3 }
 0x422   : > { %v1933_v16 = vadd.f32 %v5926_v12, %v1831_v27  ;;  %v3043_v51 = vpop.f32.mrf.mxu0  ;;  %v2634_v24 = vpop.f32.mrf.mxu1 }
 0x424   : > { %v2159_v40 = vadd.f32 %v5927_v59, %v1933_v16 }
 0x426   : > { %v2819_v49 = vadd.f32 %v2625_v33, %v2159_v40 }
 0x428   : > { %v2867_v35 = vadd.f32 %v2819_v49, %v2765_v4 }
 0x429   : > { %v1833_v10 = vpop.f32.mrf.mxu2  ;;  %v2767_v23 = vpop.f32.mrf.mxu3 }
 0x42a   : > { %v3096_v55 = vadd.f32 %v3043_v51, %v2867_v35  ;;  %v1934_v54 = vadd.f32 %v5928_v11, %v1833_v10  ;;  %v3046_v57 = vpop.f32.mrf.mxu0  ;;  %v2636_v28 = vpop.f32.mrf.mxu1 }
 0x42c   : > { %3192 = vst [vmem:[%s4135_s8 + $0x168] sm:$0xff] %v3096_v55  ;;  %v3239_v20 = vadd.f32 %v3237_v26, %v3096_v55  ;;  %v3293_v47 = vmul.f32 %v3096_v55, %v3096_v55  ;;  %v2160_v34 = vadd.f32 %v5929_v41, %v1934_v54 }
 0x42e   : > { %v3340_v18 = vadd.f32 %v3338_v48, %v3293_v47  ;;  %v2820_v8 = vadd.f32 %v2628_v17, %v2160_v34 }
 0x430   : > { %v2868_v61 = vadd.f32 %v2820_v8, %v2767_v23 }
 0x431   : > { %v1836_v62 = vpop.f32.mrf.mxu2  ;;  %v2770_v21 = vpop.f32.mrf.mxu3 }
 0x432   : > { %v3097_v25 = vadd.f32 %v3046_v57, %v2868_v61  ;;  %v3048_v1 = vpop.f32.mrf.mxu0  ;;  %v2637_v44 = vpop.f32.mrf.mxu1 }
 0x434   : > { %3193 = vst [vmem:[%s4135_s8 + $0x170] sm:$0xff] %v3097_v25  ;;  %v3240_v14 = vadd.f32 %v3239_v20, %v3097_v25  ;;  %v3294_v39 = vmul.f32 %v3097_v25, %v3097_v25  ;;  %s235_s8 = scalar_lea.vmem %s5676_s5, %s3445_s12 }
 0x436   : > { %v3242_v33 = vrot.slane %v3240_v14, 4  ;;  %v3341_v42 = vadd.f32 %v3340_v18, %v3294_v39 }
 0x438   : > { %v3243_v52 = vadd.f32 %v3242_v33, %v3240_v14  ;;  %v3343_v13 = vrot.slane %v3341_v42, 4 }
 0x439   : > { %v1838_v15 = vpop.f32.mrf.mxu2  ;;  %v2772_v29 = vpop.f32.mrf.mxu3 }
 0x43a   : > { %v3244_v32 = vrot.slane %v3243_v52, 2  ;;  %v3344_v56 = vadd.f32 %v3343_v13, %v3341_v42 }
 0x43c   : > { %v3245_v45 = vadd.f32 %v3244_v32, %v3243_v52  ;;  %v3345_v17 = vrot.slane %v3344_v56, 2 }
 0x43e   : > { %v3246_v30 = vrot.slane %v3245_v45, 1  ;;  %v3346_v46 = vadd.f32 %v3345_v17, %v3344_v56 }
 0x440   : > { %v3347_v50 = vrot.slane %v3346_v46, 1  ;;  %v3247_v36 = vadd.f32 %v3246_v30, %v3245_v45 }
 0x442   : > { %v3348_v38 = vadd.f32 %v3347_v50, %v3346_v46 }
 0x444   : > { %v3350_v43 = vsel %vm3349_vm2, %v3247_v36, %v3348_v38 }
 0x445   : > { %3351 = vst [vmem:[%s235_s8] sm:$0x3] %v3350_v43 }
 0x446 PF: > { %s16_s18 = sadd.s32 1, %s3966_s18  }
 0x447   : > { %p13_p4 = scmp.ge.s32.totalorder %s16_s18, 4  }
 0x449   :  { %15 = sbr.rel (!%p13_p4) target bundleno = 1 (0x1), region = 81 }

// kernel: up_forward.5
= control target key start
LH: loop header
LB: loop body
LE: loop exit
PB: predicated region body
PF: predicated region fallthrough
CT: control target
= control target key end

     0   :  { %s7142_s18 = smov 0   ;;  %s10454_s0 = inlined_call_operand.vmem [shape: f32[2,24,24,128], index: 0, kind: input, shape index: {}]   ;;  %s10455_s1 = inlined_call_operand.vmem [shape: f32[2,24,24,128], index: 1, kind: input, shape index: {}]   ;;  %s10456_s2 = inlined_call_operand.vmem [shape: bf16[3,128,384], index: 2, kind: input, shape index: {}]   ;;  %s10457_s3 = inlined_call_operand.vmem [shape: bf16[3,128,384], index: 3, kind: input, shape index: {}]   ;;  %s10458_s4 = inlined_call_operand.vmem [shape: f32[2,24,24,128], index: 4, kind: output, shape index: {0}]   ;;  %s10459_s5 = inlined_call_operand.vmem [shape: f32[2,2,128], index: 5, kind: output, shape index: {1}]  }
   0x1 LB: > { %s6102_s19 = sadd.s32 4294967295, %s7109_s18   ;;  %p6106_p0 = scmp.ge.s32.totalorder %s7109_s18, 1  ;;  %s7109_s18 = sphi %s7142_s18, %s16_s18  }
   0x2   : > { %p200_p1 = scmp.lt.s32.totalorder %s7109_s18, 3 }
   0x4   : > { %p201_p2 = pnand %p6106_p0, %p200_p1 }
   0x6   : > { %204 = sbr.rel (%p201_p2) target bundleno = 2008 (0x7d8), region = 36 }
   0xb   : > { %v6169_v0 = vld [vmem:[%s10456_s2 + $0xa8] sm:$0xf]  ;;  %v6905_v1 = vld [vmem:[%s10456_s2 + $0xb0] sm:$0xf0]  ;;  %v6904_v2 = vld [vmem:[%s10456_s2 + $0xac] sm:$0xf] }
   0xc   : > { %v6170_v3 = vor.u32 %v6905_v1, %v6169_v0  ;;  %v6171_v4 = vld [vmem:[%s10456_s2 + $0xb4] sm:$0xf0]  ;;  %v6297_v5 = vld [vmem:[%s10456_s2 + $0x168] sm:$0xf]  ;;  %v6929_v6 = vld [vmem:[%s10456_s2 + $0x170] sm:$0xf0] }
   0xd   : > { %v6174_v7 = vor.u32 %v6904_v2, %v6171_v4  ;;  %v7168_v8 = vor.u32 %v6929_v6, %v6297_v5  ;;  %v6161_v9 = vld [vmem:[%s10456_s2 + $0x90] sm:$0xf]  ;;  %v6902_v10 = vld [vmem:[%s10456_s2 + $0x98] sm:$0xf0]  ;;  %v6901_v11 = vld [vmem:[%s10456_s2 + $0x94] sm:$0xf] }
   0xe   : > { %7027 = vmatpush.bf16.msra.mxu2 %v6170_v3  ;;  %710 = vmatpush.bf16.msra.mxu0 %v6170_v3  ;;  %v6162_v12 = vor.u32 %v6902_v10, %v6161_v9  ;;  %v6163_v13 = vld [vmem:[%s10456_s2 + $0x9c] sm:$0xf0]  ;;  %v6289_v14 = vld [vmem:[%s10456_s2 + $0x150] sm:$0xf]  ;;  %v6926_v15 = vld [vmem:[%s10456_s2 + $0x158] sm:$0xf0] }
   0xf   : > { %845 = vmatpush.bf16.msra.mxu1 %v6174_v7  ;;  %7035 = vmatpush.bf16.msra.mxu3 %v7168_v8  ;;  %v6166_v16 = vor.u32 %v6901_v11, %v6163_v13  ;;  %v7189_v17 = vor.u32 %v6926_v15, %v6289_v14  ;;  %v6153_v18 = vld [vmem:[%s10456_s2 + $0x78] sm:$0xf]  ;;  %v6899_v19 = vld [vmem:[%s10456_s2 + $0x80] sm:$0xf0]  ;;  %v6898_v20 = vld [vmem:[%s10456_s2 + $0x7c] sm:$0xf] }
  0x10   : > { %v6155_v21 = vld [vmem:[%s10456_s2 + $0x84] sm:$0xf0]  ;;  %v6281_v22 = vld [vmem:[%s10456_s2 + $0x138] sm:$0xf]  ;;  %v6923_v23 = vld [vmem:[%s10456_s2 + $0x140] sm:$0xf0]  ;;  %v6154_v24 = vor.u32 %v6899_v19, %v6153_v18 }
  0x11   : > { %v6158_v25 = vor.u32 %v6898_v20, %v6155_v21  ;;  %v7210_v26 = vor.u32 %v6923_v23, %v6281_v22  ;;  %v6145_v27 = vld [vmem:[%s10456_s2 + $0x60] sm:$0xf]  ;;  %v6896_v28 = vld [vmem:[%s10456_s2 + $0x68] sm:$0xf0]  ;;  %v6895_v29 = vld [vmem:[%s10456_s2 + $0x64] sm:$0xf] }
  0x12   : > { %7028 = vmatpush.bf16.msra.mxu2 %v6162_v12  ;;  %711 = vmatpush.bf16.msra.mxu0 %v6162_v12  ;;  %v6147_v30 = vld [vmem:[%s10456_s2 + $0x6c] sm:$0xf0]  ;;  %v6273_v31 = vld [vmem:[%s10456_s2 + $0x120] sm:$0xf]  ;;  %v6920_v32 = vld [vmem:[%s10456_s2 + $0x128] sm:$0xf0]  ;;  %v6146_v33 = vor.u32 %v6896_v28, %v6145_v27 }
  0x13   : > { %846 = vmatpush.bf16.msra.mxu1 %v6166_v16  ;;  %7036 = vmatpush.bf16.msra.mxu3 %v7189_v17  ;;  %v6150_v34 = vor.u32 %v6895_v29, %v6147_v30  ;;  %v7231_v35 = vor.u32 %v6920_v32, %v6273_v31  ;;  %v6137_v36 = vld [vmem:[%s10456_s2 + $0x48] sm:$0xf]  ;;  %v6893_v37 = vld [vmem:[%s10456_s2 + $0x50] sm:$0xf0]  ;;  %v6892_v38 = vld [vmem:[%s10456_s2 + $0x4c] sm:$0xf] }
  0x14   : > { %v6139_v39 = vld [vmem:[%s10456_s2 + $0x54] sm:$0xf0]  ;;  %v6265_v40 = vld [vmem:[%s10456_s2 + $0x108] sm:$0xf]  ;;  %v6917_v41 = vld [vmem:[%s10456_s2 + $0x110] sm:$0xf0]  ;;  %v6138_v43 = vor.u32 %v6893_v37, %v6137_v36 }
  0x15   : > { %v6129_v42 = vld [vmem:[%s10456_s2 + $0x30] sm:$0xf]  ;;  %v6890_v44 = vld [vmem:[%s10456_s2 + $0x38] sm:$0xf0]  ;;  %v6889_v45 = vld [vmem:[%s10456_s2 + $0x34] sm:$0xf]  ;;  %v6142_v47 = vor.u32 %v6892_v38, %v6139_v39  ;;  %v7264_v48 = vor.u32 %v6917_v41, %v6265_v40 }
  0x16   : > { %7029 = vmatpush.bf16.msra.mxu2 %v6154_v24  ;;  %712 = vmatpush.bf16.msra.mxu0 %v6154_v24  ;;  %v6131_v46 = vld [vmem:[%s10456_s2 + $0x3c] sm:$0xf0]  ;;  %v6257_v49 = vld [vmem:[%s10456_s2 + $0xf0] sm:$0xf]  ;;  %v6914_v50 = vld [vmem:[%s10456_s2 + $0xf8] sm:$0xf0]  ;;  %v6130_v58 = vor.u32 %v6890_v44, %v6129_v42 }
  0x17   : > { %847 = vmatpush.bf16.msra.mxu1 %v6158_v25  ;;  %7037 = vmatpush.bf16.msra.mxu3 %v7210_v26  ;;  %p237_p3 = scmp.lt.s32.totalorder %s6102_s19, 1  ;;  %v6121_v51 = vld [vmem:[%s10456_s2 + $0x18] sm:$0xf]  ;;  %v6887_v52 = vld [vmem:[%s10456_s2 + $0x20] sm:$0xf0]  ;;  %v6134_v62 = vor.u32 %v6889_v45, %v6131_v46  ;;  %v7315_v63 = vor.u32 %v6914_v50, %v6257_v49  ;;  %vm6001_vm2 = vcmask 1040384  }
  0x18   : > { %v7283_v53 = vld [vmem:[%s10456_s2 + $0x1c] sm:$0xf]  ;;  %v6123_v54 = vld [vmem:[%s10456_s2 + $0x24] sm:$0xf0]  ;;  %v6249_v55 = vld [vmem:[%s10456_s2 + $0xd8] sm:$0xf]  ;;  %v6122_v5 = vor.u32 %v6887_v52, %v6121_v51 }
  0x19   : > { %v6911_v56 = vld [vmem:[%s10456_s2 + $0xe0] sm:$0xf0]  ;;  %v6113_v57 = vld [vmem:[%s10456_s2] sm:$0xf]  ;;  %s11057_s19 = smov (!%p237_p3, %s6102_s19), 1  ;;  %v6126_v6 = vor.u32 %v7283_v53, %v6123_v54 }
  0x1a   : > { %7030 = vmatpush.bf16.msra.mxu2 %v6146_v33  ;;  %713 = vmatpush.bf16.msra.mxu0 %v6146_v33  ;;  %v6884_v59 = vld [vmem:[%s10456_s2 + $0x8] sm:$0xf0]  ;;  %v7307_v60 = vld [vmem:[%s10456_s2 + $0x4] sm:$0xf]  ;;  %v7312_v61 = vld [vmem:[%s10456_s2 + $0xc] sm:$0xf0]  ;;  %v7363_v11 = vor.u32 %v6911_v56, %v6249_v55 }
  0x1b   : > { %848 = vmatpush.bf16.msra.mxu1 %v6150_v34  ;;  %7038 = vmatpush.bf16.msra.mxu3 %v7231_v35  ;;  %v6241_v0 = vld [vmem:[%s10456_s2 + $0xc0] sm:$0xf]  ;;  %v6908_v1 = vld [vmem:[%s10456_s2 + $0xc8] sm:$0xf0]  ;;  %s7324_s24 = smul.u32 576, %s11057_s19  ;;  %v6114_v12 = vor.u32 %v6884_v59, %v6113_v57  ;;  %v6118_v13 = vor.u32 %v7307_v60, %v7312_v61 }
  0x1c   : > { %v7329_v2 = vld [vmem:[%s10456_s2 + $0xb0] sm:$0xf]  ;;  %v7334_v3 = vld [vmem:[%s10456_s2 + $0xb8] sm:$0xf0]  ;;  %v7339_v4 = vld [vmem:[%s10456_s2 + $0x22c] sm:$0xf]  ;;  %v7377_v18 = vor.u32 %v6908_v1, %v6241_v0 }
  0x1d   : > { %s7346_s8 = scalar_lea.vmem %s10454_s0, %s7324_s24  ;;  %v7351_v7 = vld [vmem:[%s10456_s2 + $0x234] sm:$0xf0]  ;;  %v7356_v9 = vld [vmem:[%s10456_s2 + $0x170] sm:$0xf]  ;;  %v7361_v10 = vld [vmem:[%s10456_s2 + $0x178] sm:$0xf0]  ;;  %v6206_v23 = vor.u32 %v7334_v3, %v7329_v2  ;;  %s8756_s9 = scalar_lea.vmem %s10455_s1, %s7324_s24 }
  0x1e   : > { %7031 = vmatpush.bf16.msra.mxu2 %v6138_v43  ;;  %714 = vmatpush.bf16.msra.mxu0 %v6138_v43  ;;  %v7368_v14 = vld [vmem:[%s7346_s8 + $0xf0] sm:$0xff]  ;;  %v7371_v15 = vld [vmem:[%s7346_s8 + $0xf8] sm:$0xff]  ;;  %v7374_v16 = vld [vmem:[%s7346_s8 + $0x100] sm:$0xff]  ;;  %vm370_vm0 = vsmask.f32 4352  ;;  %v6430_v29 = vor.u32 %v7339_v4, %v7351_v7  ;;  %v6334_v30 = vor.u32 %v7361_v10, %v7356_v9  ;;  %s10184_s7 = scalar_lea.vmem %s10458_s4, %s7324_s24  ;;  %s6110_s24 = sshll.u32 %s11057_s19, 1 }
  0x1f   : > { %849 = vmatpush.bf16.msra.mxu1 %v6142_v47  ;;  %7039 = vmatpush.bf16.msra.mxu3 %v7264_v48  ;;  %v7380_v19 = vld [vmem:[%s7346_s8 + $0x108] sm:$0xff]  ;;  %v358_v20 = vpack.c.bf16 %v7371_v15, %v7368_v14  ;;  %v256_v21 = vld [vmem:[%s7346_s8 + $0x10] sm:$0xff]  ;;  %v257_v22 = vld [vmem:[%s7346_s8 + $0x18] sm:$0xff]  ;;  %vm2040_vm1 = vsmask.f32 7424  ;;  %s255_s11 = scalar_lea.vmem %s10459_s5, %s6110_s24 }
  0x20   : > { %v359_v24 = vpack.c.bf16 %v7380_v19, %v7374_v16  ;;  %v258_v25 = vld [vmem:[%s7346_s8 + $0x20] sm:$0xff]  ;;  %v259_v27 = vld [vmem:[%s7346_s8 + $0x28] sm:$0xff]  ;;  %v344_v28 = vpack.c.bf16 %v257_v22, %v256_v21  ;;  %v7399_v40 = vld [vmem:[%s7346_s8 + $0xb8] sm:$0xff] }
  0x21   : > { %v497_v31 = vshrl.u32 %v358_v20, 16  ;;  %v500_v32 = vshll.u32 %v358_v20, 16  ;;  %v345_v33 = vpack.c.bf16 %v259_v27, %v258_v25  ;;  %v7396_v34 = vpack.c.bf16 %v258_v25, %v257_v22  ;;  %v7402_v41 = vld [vmem:[%s7346_s8 + $0xc0] sm:$0xff]  ;;  %v7406_v46 = vld [vmem:[%s7346_s8 + $0x110] sm:$0xff]  ;;  %v7409_v47 = vld [vmem:[%s7346_s8 + $0x118] sm:$0xff] }
  0x22   : > { %7032 = vmatpush.bf16.msra.mxu2 %v6130_v58  ;;  %715 = vmatpush.bf16.msra.mxu0 %v6130_v58  ;;  %v506_v36 = vshrl.u32 %v359_v24, 16  ;;  %v509_v37 = vshll.u32 %v359_v24, 16  ;;  %v372_v38 = vshrl.u32 %v344_v28, 16  ;;  %v375_v39 = vshll.u32 %v344_v28, 16  ;;  %v260_v53 = vld [vmem:[%s7346_s8 + $0x30] sm:$0xff]  ;;  %v261_v54 = vld [vmem:[%s7346_s8 + $0x38] sm:$0xff] }
  0x23   : > { %850 = vmatpush.bf16.msra.mxu1 %v6134_v62  ;;  %7040 = vmatpush.bf16.msra.mxu3 %v7315_v63  ;;  %v499_v42 = vrot.slane %v497_v31, 3  ;;  %v502_v43 = vrot.slane %v500_v32, 4  ;;  %v380_v44 = vshrl.u32 %v345_v33, 16  ;;  %v383_v45 = vshll.u32 %v345_v33, 16  ;;  %v6201_v59 = vld [vmem:[%s10456_s2 + $0x98] sm:$0xf] }
  0x24   : > { %v508_v49 = vrot.slane %v506_v36, 3  ;;  %v511_v50 = vrot.slane %v509_v37, 4  ;;  %v374_v51 = vrot.slane %v372_v38, 3  ;;  %v377_v52 = vrot.slane %v375_v39, 4  ;;  %v6903_v60 = vld [vmem:[%s10456_s2 + $0xa0] sm:$0xf0] }
  0x25   : > { %v7413_v55 = vor.u32 %v502_v43, %v499_v42  ;;  %v382_v56 = vrot.slane %v380_v44, 3  ;;  %v385_v57 = vrot.slane %v383_v45, 4  ;;  %v7417_v58 = vpack.c.bf16 %v7402_v41, %v7399_v40  ;;  %v262_v7 = vld [vmem:[%s7346_s8 + $0x40] sm:$0xff]  ;;  %v264_v22 = vld [vmem:[%s7346_s8 + $0x50] sm:$0xff]  ;;  %v7459_v37 = vld [vmem:[%s7346_s8 + $0xc8] sm:$0xff] }
  0x26   : > { %7033 = vmatpush.bf16.msra.mxu2 %v6122_v5  ;;  %716 = vmatpush.bf16.msra.mxu0 %v6122_v5  ;;  %v512_v61 = vor.u32 %v511_v50, %v508_v49  ;;  %v378_v62 = vor.u32 %v377_v52, %v374_v51  ;;  %v360_v0 = vpack.c.bf16 %v7409_v47, %v7406_v46  ;;  %v6419_v24 = vld [vmem:[%s10456_s2 + $0x21c] sm:$0xf0]  ;;  %v7462_v39 = vld [vmem:[%s7346_s8 + $0xd0] sm:$0xff]  ;;  %v7468_v43 = vld [vmem:[%s7346_s8 + $0x128] sm:$0xff] }
  0x27   : > { %851 = vmatpush.bf16.msra.mxu1 %v6126_v6  ;;  %7041 = vmatpush.bf16.msra.mxu3 %v7363_v11  ;;  %10581 = vst [vmem:[#allocation2_spill] sm:$0xff] %v7417_v58  ;;  %v386_v1 = vor.u32 %v385_v57, %v382_v56  ;;  %v346_v2 = vpack.c.bf16 %v261_v54, %v260_v53  ;;  %v7465_v42 = vld [vmem:[%s7346_s8 + $0x120] sm:$0xff] }
  0x28   : > { %v7428_v3 = vpack.c.bf16 %v260_v53, %v259_v27  ;;  %v7432_v4 = vsel %vm370_vm0, %v7413_v55, %v512_v61  ;;  %v6202_v5 = vor.u32 %v6903_v60, %v6201_v59  ;;  %v515_v9 = vshrl.u32 %v360_v0, 16  ;;  %v6329_v27 = vld [vmem:[%s10456_s2 + $0x158] sm:$0xf]  ;;  %v6197_v52 = vld [vmem:[%s10456_s2 + $0x80] sm:$0xf] }
  0x29   : > { %v387_v6 = vsel %vm370_vm0, %v378_v62, %v386_v1  ;;  %v518_v10 = vshll.u32 %v360_v0, 16  ;;  %v7439_v20 = vpack.c.bf16 %v262_v7, %v261_v54  ;;  %v392_v21 = vshll.u32 %v346_v2, 16  ;;  %v6900_v53 = vld [vmem:[%s10456_s2 + $0x88] sm:$0xf0]  ;;  %v7493_v0 = vld [vmem:[%s7346_s8 + $0x130] sm:$0xff] }
  0x2a   : > { %7034 = vmatpush.bf16.msra.mxu2 %v6114_v12  ;;  %717 = vmatpush.bf16.msra.mxu0 %v6114_v12  ;;  %v389_v12 = vshrl.u32 %v346_v2, 16  ;;  %v517_v28 = vrot.slane %v515_v9, 3  ;;  %v361_v45 = vpack.c.bf16 %v7468_v43, %v7465_v42  ;;  %v6198_v56 = vor.u32 %v6900_v53, %v6197_v52  ;;  %v7557_v52 = vld [vmem:[%s7346_s8 + $0x68] sm:$0xff] }
  0x2b   : > { %852 = vmatpush.bf16.msra.mxu1 %v6118_v13  ;;  %7042 = vmatpush.bf16.msra.mxu3 %v7377_v18  ;;  %v263_v13 = vld [vmem:[%s7346_s8 + $0x48] sm:$0xff]  ;;  %v394_v32 = vrot.slane %v392_v21, 4 }
  0x2c   : > { %v7449_v25 = vpack.c.bf16 %v264_v22, %v263_v13  ;;  %v391_v31 = vrot.slane %v389_v12, 3  ;;  %v347_v50 = vpack.c.bf16 %v263_v13, %v262_v7  ;;  %v527_v51 = vshll.u32 %v361_v45, 16  ;;  %v7505_v7 = vld [vmem:[%s7346_s8 + $0x58] sm:$0xff] }
  0x2d   : > { %788 = vmatmul.bf16.vlgmr.msra.gmra.mxu2 %v7432_v4  ;;  %718 = vmatmul.bf16.vlgmr.msra.gmra.mxu0 %v387_v6  ;;  %v7522_v13 = vpack.c.bf16 %v7374_v16, %v7371_v15  ;;  %v6325_v16 = vld [vmem:[%s10456_s2 + $0x140] sm:$0xf] }
  0x2e   : > { %1098 = vmatpush.bf16.msrb.mxu2 %v6206_v23  ;;  %1830 = vmatpush.bf16.msrb.mxu0 %v6334_v30  ;;  %v6949_v23 = vld [vmem:[%s10456_s2 + $0x214] sm:$0xf]  ;;  %v395_v38 = vor.u32 %v394_v32, %v391_v31  ;;  %v401_v54 = vshll.u32 %v347_v50, 16  ;;  %v529_v59 = vrot.slane %v527_v51, 4  ;;  %v7554_v51 = vld [vmem:[%s7346_s8 + $0x60] sm:$0xff] }
  0x2f   : > { %2489 = vmatpush.bf16.msrb.mxu3 %v6430_v29  ;;  %853 = vmatmul.bf16.vlgmr.msra.gmra.mxu1 %v387_v6  ;;  %v520_v29 = vrot.slane %v518_v10, 4  ;;  %v6422_v30 = vor.u32 %v6949_v23, %v6419_v24  ;;  %v7502_v6 = vld [vmem:[%s7346_s8 + $0xe0] sm:$0xff]  ;;  %v348_v10 = vpack.c.bf16 %v7505_v7, %v264_v22  ;;  %10584 = vst [vmem:[#allocation5_spill] sm:$0xff] %v7522_v13  ;;  %v6946_v22 = vld [vmem:[%s10456_s2 + $0x1fc] sm:$0xf] }
  0x30   : > { %1472 = vmatmul.bf16.vlgmr.msra.gmra.mxu3 %v7417_v58  ;;  %1414 = vmatpush.bf16.msrb.mxu1 %v7168_v8  ;;  %v6927_v8 = vld [vmem:[%s10456_s2 + $0x160] sm:$0xf0]  ;;  %v396_v49 = vsel %vm370_vm0, %v386_v1, %v395_v38  ;;  %v7496_v1 = vld [vmem:[%s7346_s8 + $0x138] sm:$0xff] }
  0x31   : > { %v6330_v33 = vor.u32 %v6927_v8, %v6329_v27  ;;  %v521_v36 = vor.u32 %v520_v29, %v517_v28  ;;  %v407_v23 = vshrl.u32 %v348_v10, 16  ;;  %v410_v24 = vshll.u32 %v348_v10, 16  ;;  %v6924_v27 = vld [vmem:[%s10456_s2 + $0x148] sm:$0xf0]  ;;  %v6193_v8 = vld [vmem:[%s10456_s2 + $0x68] sm:$0xf] }
  0x32   : > { %1099 = vmatpush.bf16.msrb.mxu2 %v6202_v5  ;;  %v7499_v5 = vld [vmem:[%s7346_s8 + $0xd8] sm:$0xff]  ;;  %v6326_v28 = vor.u32 %v6924_v27, %v6325_v16  ;;  %v6897_v29 = vld [vmem:[%s10456_s2 + $0x70] sm:$0xf0] }
  0x33   : > { %2490 = vmatpush.bf16.msrb.mxu3 %v6422_v30  ;;  %1831 = vmatpush.bf16.msrb.mxu0 %v6330_v33  ;;  %v7472_v44 = vsel %vm370_vm0, %v512_v61, %v521_v36  ;;  %v403_v61 = vrot.slane %v401_v54, 4  ;;  %v6194_v30 = vor.u32 %v6897_v29, %v6193_v8  ;;  %v409_v33 = vrot.slane %v407_v23, 3  ;;  %v7591_v23 = vld [vmem:[%s7346_s8 + $0x78] sm:$0xff] }
  0x34   : > { %1415 = vmatpush.bf16.msrb.mxu1 %v7189_v17  ;;  %v7476_v17 = vpack.c.bf16 %v7462_v39, %v7459_v37 }
  0x36   : > { %10582 = vst [vmem:[#allocation3_spill] sm:$0xff] %v7476_v17  ;;  %1100 = vmatpush.bf16.msrb.mxu2 %v6198_v56 }
  0x37   : > { %1832 = vmatpush.bf16.msrb.mxu0 %v6326_v28 }
  0x38   : > { %1416 = vmatpush.bf16.msrb.mxu1 %v7210_v26  ;;  %v524_v26 = vshrl.u32 %v361_v45, 16 }
  0x3a   : > { %v526_v57 = vrot.slane %v524_v26, 3  ;;  %1101 = vmatpush.bf16.msrb.mxu2 %v6194_v30  ;;  %v7551_v26 = vld [vmem:[%s7346_s8 + $0x148] sm:$0xff]  ;;  %v6189_v30 = vld [vmem:[%s10456_s2 + $0x50] sm:$0xf] }
  0x3c   : > { %1417 = vmatpush.bf16.msrb.mxu1 %v7231_v35  ;;  %v398_v35 = vshrl.u32 %v347_v50, 16  ;;  %v530_v62 = vor.u32 %v529_v59, %v526_v57  ;;  %v7548_v50 = vld [vmem:[%s7346_s8 + $0x140] sm:$0xff]  ;;  %v349_v57 = vpack.c.bf16 %v7557_v52, %v7554_v51  ;;  %v7575_v59 = vpack.c.bf16 %v7406_v46, %v7380_v19  ;;  %v7582_v19 = vld [vmem:[%s7346_s8 + $0x150] sm:$0xff] }
  0x3d   : > { %793 = vmatmul.bf16.gmra.mxu2 %v7472_v44  ;;  %723 = vmatmul.bf16.gmra.mxu0 %v396_v49  ;;  %v363_v54 = vpack.c.bf16 %v7551_v26, %v7548_v50 }
  0x3e   : > { %v400_v60 = vrot.slane %v398_v35, 3  ;;  %v7511_v9 = vsel %vm370_vm0, %v521_v36, %v530_v62  ;;  %v412_v36 = vrot.slane %v410_v24, 4  ;;  %10586 = vst [vmem:[#allocation7_spill] sm:$0xff] %v7575_v59 }
  0x3f   : > { %856 = vmatmul.bf16.gmra.mxu1 %v396_v49  ;;  %v7545_v49 = vld [vmem:[%s7346_s8 + $0xe8] sm:$0xff] }
  0x40   : > { %1477 = vmatmul.bf16.gmra.mxu3 %v7476_v17  ;;  %1418 = vmatpush.bf16.msrb.mxu1 %v7264_v48  ;;  %v404_v2 = vor.u32 %v403_v61, %v400_v60  ;;  %v362_v48 = vpack.c.bf16 %v7496_v1, %v7493_v0  ;;  %v413_v45 = vor.u32 %v412_v36, %v409_v33  ;;  %v545_v60 = vshll.u32 %v363_v54, 16  ;;  %v6921_v36 = vld [vmem:[%s10456_s2 + $0x130] sm:$0xf0]  ;;  %v7709_v17 = vld [vmem:[%s7346_s8 + $0xa8] sm:$0xff] }
  0x41   : > { %v7564_v35 = vpack.c.bf16 %v7368_v14, %v7545_v49  ;;  %v542_v14 = vshrl.u32 %v363_v54, 16  ;;  %v416_v61 = vshrl.u32 %v349_v57, 16  ;;  %10591 = vst [vmem:[#allocation12_spill] sm:$0xff] %v7709_v17 }
  0x42   : > { %v405_v12 = vsel %vm370_vm0, %v395_v38, %v404_v2  ;;  %v536_v21 = vshll.u32 %v362_v48, 16  ;;  %v7569_v56 = vsel %vm370_vm0, %v404_v2, %v413_v45 }
  0x43   : > { %10585 = vst [vmem:[#allocation6_spill] sm:$0xff] %v7564_v35  ;;  %v544_v2 = vrot.slane %v542_v14, 3  ;;  %v418_v10 = vrot.slane %v416_v61, 3 }
  0x44   : > { %1419 = vmatpush.bf16.msrb.mxu1 %v7315_v63  ;;  %v7515_v63 = vpack.c.bf16 %v7502_v6, %v7499_v5  ;;  %v538_v32 = vrot.slane %v536_v21, 4  ;;  %v7588_v21 = vld [vmem:[%s7346_s8 + $0x70] sm:$0xff] }
  0x46   : > { %10583 = vst [vmem:[#allocation4_spill] sm:$0xff] %v7515_v63 }
  0x48   : > { %1420 = vmatpush.bf16.msrb.mxu1 %v7363_v11  ;;  %v533_v11 = vshrl.u32 %v362_v48, 16  ;;  %v547_v48 = vrot.slane %v545_v60, 4 }
  0x4a   : > { %v535_v31 = vrot.slane %v533_v11, 3  ;;  %v548_v46 = vor.u32 %v547_v48, %v544_v2  ;;  %v7585_v11 = vld [vmem:[%s7346_s8 + $0x158] sm:$0xff]  ;;  %v7626_v48 = vld [vmem:[%s7346_s8 + $0x160] sm:$0xff] }
  0x4c   : > { %1421 = vmatpush.bf16.msrb.mxu1 %v7377_v18  ;;  %v6411_v18 = vld [vmem:[%s10456_s2 + $0x204] sm:$0xf0]  ;;  %v539_v38 = vor.u32 %v538_v32, %v535_v31  ;;  %v6894_v31 = vld [vmem:[%s10456_s2 + $0x58] sm:$0xf0] }
  0x4d   : > { %798 = vmatmul.bf16.gmra.mxu2 %v7511_v9  ;;  %728 = vmatmul.bf16.gmra.mxu0 %v405_v12  ;;  %v6414_v15 = vor.u32 %v6946_v22, %v6411_v18  ;;  %v364_v22 = vpack.c.bf16 %v7585_v11, %v7582_v19  ;;  %v350_v18 = vpack.c.bf16 %v7591_v23, %v7588_v21  ;;  %v6321_v32 = vld [vmem:[%s10456_s2 + $0x128] sm:$0xf] }
  0x4e   : > { %v7560_v53 = vsel %vm370_vm0, %v530_v62, %v539_v38  ;;  %v419_v62 = vshll.u32 %v349_v57, 16  ;;  %v6190_v33 = vor.u32 %v6894_v31, %v6189_v30  ;;  %v6322_v54 = vor.u32 %v6921_v36, %v6321_v32  ;;  %v6317_v36 = vld [vmem:[%s10456_s2 + $0x110] sm:$0xf] }
  0x4f   : > { %860 = vmatmul.bf16.gmra.mxu1 %v405_v12  ;;  %2491 = vmatpush.bf16.msrb.mxu3 %v6414_v15  ;;  %v7598_v15 = vsel %vm370_vm0, %v539_v38, %v548_v46  ;;  %v551_v27 = vshrl.u32 %v364_v22, 16  ;;  %v554_v8 = vshll.u32 %v364_v22, 16  ;;  %v425_v28 = vshrl.u32 %v350_v18, 16  ;;  %v6943_v38 = vld [vmem:[%s10456_s2 + $0x1e4] sm:$0xf] }
  0x50   : > { %1482 = vmatmul.bf16.gmra.mxu3 %v7515_v63  ;;  %v421_v12 = vrot.slane %v419_v62, 4  ;;  %v428_v29 = vshll.u32 %v350_v18, 16  ;;  %1102 = vmatpush.bf16.msrb.mxu2 %v6190_v33  ;;  %v7632_v22 = vld [vmem:[%s7346_s8 + $0x80] sm:$0xff]  ;;  %v7635_v18 = vld [vmem:[%s7346_s8 + $0x88] sm:$0xff]  ;;  %v6185_v33 = vld [vmem:[%s10456_s2 + $0x38] sm:$0xf] }
  0x51   : > { %v553_v14 = vrot.slane %v551_v27, 3  ;;  %v556_v60 = vrot.slane %v554_v8, 4  ;;  %1833 = vmatpush.bf16.msrb.mxu0 %v6322_v54  ;;  %v427_v61 = vrot.slane %v425_v28, 3  ;;  %v351_v8 = vpack.c.bf16 %v7635_v18, %v7632_v22  ;;  %v7706_v63 = vld [vmem:[%s7346_s8 + $0xa0] sm:$0xff] }
  0x52   : > { %v422_v24 = vor.u32 %v421_v12, %v418_v10  ;;  %v430_v62 = vrot.slane %v428_v29, 4  ;;  %v7629_v12 = vld [vmem:[%s7346_s8 + $0x168] sm:$0xff]  ;;  %10590 = vst [vmem:[#allocation11_spill] sm:$0xff] %v7706_v63 }
  0x53   : > { %v557_v2 = vor.u32 %v556_v60, %v553_v14  ;;  %v365_v27 = vpack.c.bf16 %v7629_v12, %v7626_v48  ;;  %v434_v32 = vshrl.u32 %v351_v8, 16 }
  0x54   : > { %v7601_v16 = vsel %vm370_vm0, %v413_v45, %v422_v24  ;;  %v6403_v45 = vld [vmem:[%s10456_s2 + $0x1ec] sm:$0xf0]  ;;  %v431_v10 = vor.u32 %v430_v62, %v427_v61 }
  0x55   : > { %v6406_v57 = vor.u32 %v6943_v38, %v6403_v45  ;;  %v7638_v30 = vsel %vm370_vm0, %v548_v46, %v557_v2  ;;  %v560_v29 = vshrl.u32 %v365_v27, 16  ;;  %v563_v31 = vshll.u32 %v365_v27, 16  ;;  %v6918_v45 = vld [vmem:[%s10456_s2 + $0x118] sm:$0xf0] }
  0x56   : > { %10587 = vst [vmem:[#allocation8_spill] sm:$0xff] %v7638_v30  ;;  %v7645_v28 = vsel %vm370_vm0, %v422_v24, %v431_v10  ;;  %v437_v46 = vshll.u32 %v351_v8, 16  ;;  %v6891_v24 = vld [vmem:[%s10456_s2 + $0x40] sm:$0xf0]  ;;  %v6318_v54 = vor.u32 %v6918_v45, %v6317_v36  ;;  %v436_v60 = vrot.slane %v434_v32, 3  ;;  %v7664_v8 = vld [vmem:[%s7346_s8 + $0x170] sm:$0xff] }
  0x57   : > { %2492 = vmatpush.bf16.msrb.mxu3 %v6406_v57  ;;  %v6186_v38 = vor.u32 %v6891_v24, %v6185_v33  ;;  %v562_v57 = vrot.slane %v560_v29, 3  ;;  %v565_v14 = vrot.slane %v563_v31, 4  ;;  %v7673_v33 = vld [vmem:[%s7346_s8 + $0x98] sm:$0xff]  ;;  %v7680_v29 = vpack.c.bf16 %v7465_v42, %v7409_v47  ;;  %v6940_v42 = vld [vmem:[%s10456_s2 + $0x1cc] sm:$0xf] }
  0x58   : > { %v439_v61 = vrot.slane %v437_v46, 4  ;;  %1834 = vmatpush.bf16.msrb.mxu0 %v6318_v54 }
  0x59   : > { %1103 = vmatpush.bf16.msrb.mxu2 %v6186_v38  ;;  %v566_v62 = vor.u32 %v565_v14, %v562_v57  ;;  %10589 = vst [vmem:[#allocation10_spill] sm:$0xff] %v7680_v29 }
  0x5a   : > { %v440_v27 = vor.u32 %v439_v61, %v436_v60 }
  0x5b   : > { %v7676_v24 = vsel %vm370_vm0, %v557_v2, %v566_v62 }
  0x5c   : > { %10588 = vst [vmem:[#allocation9_spill] sm:$0xff] %v7676_v24  ;;  %v7685_v32 = vsel %vm370_vm0, %v431_v10, %v440_v27  ;;  %v6395_v10 = vld [vmem:[%s10456_s2 + $0x1d4] sm:$0xf0] }
  0x5d   : > { %803 = vmatmul.bf16.gmra.mxu2 %v7560_v53  ;;  %733 = vmatmul.bf16.gmra.mxu0 %v7569_v56  ;;  %v6398_v45 = vor.u32 %v6940_v42, %v6395_v10  ;;  %v353_v42 = vpack.c.bf16 %v7709_v17, %v7706_v63  ;;  %v7742_v17 = vld [vmem:[%s7346_s8 + $0x190] sm:$0xff] }
  0x5f   : > { %865 = vmatmul.bf16.gmra.mxu1 %v7569_v56  ;;  %2493 = vmatpush.bf16.msrb.mxu3 %v6398_v45 }
  0x60   : > { %1487 = vmatmul.bf16.gmra.mxu3 %v7564_v35  ;;  %v7703_v35 = vld [vmem:[%s7346_s8 + $0x188] sm:$0xff] }
  0x6d   : > { %808 = vmatmul.bf16.gmra.mxu2 %v7598_v15  ;;  %738 = vmatmul.bf16.gmra.mxu0 %v7601_v16 }
  0x6f   : > { %870 = vmatmul.bf16.gmra.mxu1 %v7601_v16 }
  0x70   : > { %1492 = vmatmul.bf16.gmra.mxu3 %v7522_v13  ;;  %v7670_v13 = vld [vmem:[%s7346_s8 + $0x90] sm:$0xff] }
  0x71   : > { %v352_v46 = vpack.c.bf16 %v7673_v33, %v7670_v13 }
  0x73   : > { %v443_v36 = vshrl.u32 %v352_v46, 16  ;;  %v446_v38 = vshll.u32 %v352_v46, 16  ;;  %v7716_v46 = vpack.c.bf16 %v7493_v0, %v7468_v43  ;;  %v6181_v43 = vld [vmem:[%s10456_s2 + $0x20] sm:$0xf]  ;;  %v6888_v0 = vld [vmem:[%s10456_s2 + $0x28] sm:$0xf0] }
  0x75   : > { %v445_v14 = vrot.slane %v443_v36, 3  ;;  %v448_v60 = vrot.slane %v446_v38, 4  ;;  %10593 = vst [vmem:[#allocation14_spill] sm:$0xff] %v7716_v46  ;;  %v455_v36 = vshll.u32 %v353_v42, 16  ;;  %v6182_v38 = vor.u32 %v6888_v0, %v6181_v43 }
  0x76   : > { %v7755_v43 = vpack.c.bf16 %v7548_v50, %v7496_v1  ;;  %v6937_v50 = vld [vmem:[%s10456_s2 + $0x1b4] sm:$0xf] }
  0x77   : > { %1104 = vmatpush.bf16.msrb.mxu2 %v6182_v38 }
  0x78   : > { %10596 = vst [vmem:[#allocation17_spill] sm:$0xff] %v7755_v43 }
  0x7d   : > { %813 = vmatmul.bf16.gmra.mxu2 %v7638_v30  ;;  %743 = vmatmul.bf16.gmra.mxu0 %v7645_v28 }
  0x7f   : > { %875 = vmatmul.bf16.gmra.mxu1 %v7645_v28 }
  0x80   : > { %1497 = vmatmul.bf16.gmra.mxu3 %v7575_v59  ;;  %v7667_v59 = vld [vmem:[%s7346_s8 + $0x178] sm:$0xff] }
  0x81   : > { %v366_v31 = vpack.c.bf16 %v7667_v59, %v7664_v8 }
  0x83   : > { %v569_v2 = vshrl.u32 %v366_v31, 16  ;;  %v572_v47 = vshll.u32 %v366_v31, 16  ;;  %v449_v31 = vor.u32 %v448_v60, %v445_v14  ;;  %v457_v14 = vrot.slane %v455_v36, 4  ;;  %v6313_v60 = vld [vmem:[%s10456_s2 + $0xf8] sm:$0xf] }
  0x85   : > { %v571_v54 = vrot.slane %v569_v2, 3  ;;  %v574_v57 = vrot.slane %v572_v47, 4  ;;  %v7721_v47 = vsel %vm370_vm0, %v440_v27, %v449_v31  ;;  %v452_v27 = vshrl.u32 %v353_v42, 16  ;;  %v7745_v42 = vld [vmem:[%s7346_s8 + $0x198] sm:$0xff] }
  0x86   : > { %v368_v0 = vpack.c.bf16 %v7745_v42, %v7742_v17 }
  0x87   : > { %v575_v61 = vor.u32 %v574_v57, %v571_v54  ;;  %v454_v57 = vrot.slane %v452_v27, 3 }
  0x88   : > { %v590_v1 = vshll.u32 %v368_v0, 16 }
  0x89   : > { %v7712_v58 = vsel %vm370_vm0, %v566_v62, %v575_v61 }
  0x8a   : > { %10592 = vst [vmem:[#allocation13_spill] sm:$0xff] %v7712_v58 }
  0x8d   : > { %818 = vmatmul.bf16.gmra.mxu2 %v7676_v24  ;;  %748 = vmatmul.bf16.gmra.mxu0 %v7685_v32  ;;  %v458_v24 = vor.u32 %v457_v14, %v454_v57 }
  0x8f   : > { %880 = vmatmul.bf16.gmra.mxu1 %v7685_v32  ;;  %v7760_v36 = vsel %vm370_vm0, %v449_v31, %v458_v24  ;;  %v6387_v31 = vld [vmem:[%s10456_s2 + $0x1bc] sm:$0xf0] }
  0x90   : > { %1502 = vmatmul.bf16.gmra.mxu3 %v7680_v29  ;;  %v7700_v29 = vld [vmem:[%s7346_s8 + $0x180] sm:$0xff] }
  0x91   : > { %v367_v2 = vpack.c.bf16 %v7703_v35, %v7700_v29 }
  0x93   : > { %v578_v62 = vshrl.u32 %v367_v2, 16  ;;  %v581_v10 = vshll.u32 %v367_v2, 16  ;;  %v6915_v2 = vld [vmem:[%s10456_s2 + $0x100] sm:$0xf0] }
  0x95   : > { %v580_v45 = vrot.slane %v578_v62, 3  ;;  %v583_v54 = vrot.slane %v581_v10, 4  ;;  %v7748_v62 = vld [vmem:[%s7346_s8 + $0xb0] sm:$0xff] }
  0x96   : > { %10594 = vst [vmem:[#allocation15_spill] sm:$0xff] %v7748_v62  ;;  %v354_v38 = vpack.c.bf16 %v7399_v40, %v7748_v62 }
  0x98   : > { %v461_v40 = vshrl.u32 %v354_v38, 16 }
  0x9d   : > { %823 = vmatmul.bf16.gmra.mxu2 %v7712_v58  ;;  %753 = vmatmul.bf16.gmra.mxu0 %v7721_v47  ;;  %v584_v58 = vor.u32 %v583_v54, %v580_v45  ;;  %v464_v45 = vshll.u32 %v354_v38, 16  ;;  %v6390_v54 = vor.u32 %v6937_v50, %v6387_v31  ;;  %v6885_v38 = vld [vmem:[%s10456_s2 + $0x10] sm:$0xf0] }
  0x9f   : > { %885 = vmatmul.bf16.gmra.mxu1 %v7721_v47  ;;  %v7751_v10 = vsel %vm370_vm0, %v575_v61, %v584_v58  ;;  %v587_v61 = vshrl.u32 %v368_v0, 16  ;;  %2494 = vmatpush.bf16.msrb.mxu3 %v6390_v54  ;;  %v7795_v54 = vpack.c.bf16 %v7582_v19, %v7551_v26 }
  0xa0   : > { %1507 = vmatmul.bf16.gmra.mxu3 %v7716_v46  ;;  %v6314_v46 = vor.u32 %v6915_v2, %v6313_v60  ;;  %10595 = vst [vmem:[#allocation16_spill] sm:$0xff] %v7751_v10  ;;  %v592_v2 = vrot.slane %v590_v1, 4 }
  0xa1   : > { %v589_v60 = vrot.slane %v587_v61, 3  ;;  %v7786_v61 = vld [vmem:[%s7346_s8 + $0x1a8] sm:$0xff]  ;;  %10600 = vst [vmem:[#allocation21_spill] sm:$0xff] %v7795_v54 }
  0xa2   : > { %1835 = vmatpush.bf16.msrb.mxu0 %v6314_v46 }
  0xa3   : > { %v593_v62 = vor.u32 %v592_v2, %v589_v60  ;;  %v355_v2 = vpack.c.bf16 %v7459_v37, %v7402_v41  ;;  %v6309_v41 = vld [vmem:[%s10456_s2 + $0xe0] sm:$0xf]  ;;  %v6912_v37 = vld [vmem:[%s10456_s2 + $0xe8] sm:$0xf0] }
  0xa5   : > { %v470_v19 = vshrl.u32 %v355_v2, 16 }
  0xaa   : > { %v719_v46 = vpop.f32.mrf.mxu0 }
  0xac   : > { %v854_v27 = vpop.f32.mrf.mxu1 }
  0xad   : > { %828 = vmatmul.bf16.gmra.mxu2 %v7751_v10  ;;  %758 = vmatmul.bf16.gmra.mxu0 %v7760_v36  ;;  %v463_v27 = vrot.slane %v461_v40, 3  ;;  %v6177_v10 = vld [vmem:[%s10456_s2 + $0x8] sm:$0xf] }
  0xae   : > { %v6178_v31 = vor.u32 %v6885_v38, %v6177_v10 }
  0xaf   : > { %890 = vmatmul.bf16.gmra.mxu1 %v7760_v36 }
  0xb0   : > { %1512 = vmatmul.bf16.gmra.mxu3 %v7755_v43  ;;  %v7774_v57 = vpop.f32.mrf.mxu2  ;;  %v466_v43 = vrot.slane %v464_v45, 4  ;;  %1105 = vmatpush.bf16.msrb.mxu2 %v6178_v31  ;;  %v7791_v45 = vsel %vm370_vm0, %v584_v58, %v593_v62 }
  0xb1   : > { %10597 = vst [vmem:[#allocation18_spill] sm:$0xff] %v7774_v57 }
  0xb2   : > { %v721_v50 = vpop.f32.mrf.mxu0  ;;  %v467_v57 = vor.u32 %v466_v43, %v463_v27  ;;  %10599 = vst [vmem:[#allocation20_spill] sm:$0xff] %v7791_v45  ;;  %v473_v27 = vshll.u32 %v355_v2, 16 }
  0xb3   : > { %v1473_v14 = vpop.f32.mrf.mxu3 }
  0xb4   : > { %v855_v0 = vpop.f32.mrf.mxu1  ;;  %v7783_v14 = vld [vmem:[%s7346_s8 + $0x1a0] sm:$0xff]  ;;  %v7800_v43 = vsel %vm370_vm0, %v458_v24, %v467_v57 }
  0xb5   : > { %v369_v10 = vpack.c.bf16 %v7786_v61, %v7783_v14 }
  0xb7   : > { %v596_v58 = vshrl.u32 %v369_v10, 16  ;;  %v599_v26 = vshll.u32 %v369_v10, 16 }
  0xb8   : > { %v791_v1 = vpop.f32.mrf.mxu2 }
  0xb9   : > { %v598_v31 = vrot.slane %v596_v58, 3  ;;  %v601_v1 = vrot.slane %v599_v26, 4  ;;  %v7830_v58 = vpack.c.bf16 %v7626_v48, %v7585_v11  ;;  %v6928_v11 = vld [vmem:[%s10456_s2 + $0x16c] sm:$0xf]  ;;  %v6299_v48 = vld [vmem:[%s10456_s2 + $0x174] sm:$0xf0] }
  0xba   : > { %v724_v0 = vpop.f32.mrf.mxu0 }
  0xbb   : > { %v7788_v40 = vpop.f32.mrf.mxu3  ;;  %v472_v0 = vrot.slane %v470_v19, 3  ;;  %v356_v19 = vpack.c.bf16 %v7499_v5, %v7462_v39  ;;  %v6934_v39 = vld [vmem:[%s10456_s2 + $0x19c] sm:$0xf] }
  0xbc   : > { %10598 = vst [vmem:[#allocation19_spill] sm:$0xff] %v7788_v40  ;;  %v857_v60 = vpop.f32.mrf.mxu1  ;;  %v475_v40 = vrot.slane %v473_v27, 4 }
  0xbd   : > { %833 = vmatmul.bf16.gmra.mxu2 %v7791_v45  ;;  %763 = vmatmul.bf16.gmra.mxu0 %v7800_v43  ;;  %v6310_v60 = vor.u32 %v6912_v37, %v6309_v41  ;;  %v479_v5 = vshrl.u32 %v356_v19, 16 }
  0xbf   : > { %895 = vmatmul.bf16.gmra.mxu1 %v7800_v43  ;;  %1836 = vmatpush.bf16.msrb.mxu0 %v6310_v60 }
  0xc0   : > { %1517 = vmatmul.bf16.gmra.mxu3 %v7795_v54  ;;  %v7808_v38 = vpop.f32.mrf.mxu2 }
  0xc1   : > { %10601 = vst [vmem:[#allocation22_spill] sm:$0xff] %v7808_v38  ;;  %v7820_v38 = vor.u32 %v601_v1, %v598_v31  ;;  %v481_v1 = vrot.slane %v479_v5, 3 }
  0xc2   : > { %v726_v2 = vpop.f32.mrf.mxu0 }
  0xc3   : > { %v7810_v24 = vpop.f32.mrf.mxu3  ;;  %v7826_v63 = vsel %vm370_vm0, %v593_v62, %v7820_v38  ;;  %v6302_v62 = vor.u32 %v6928_v11, %v6299_v48 }
  0xc4   : > { %10602 = vst [vmem:[#allocation23_spill] sm:$0xff] %v7810_v24  ;;  %v858_v10 = vpop.f32.mrf.mxu1  ;;  %v476_v24 = vor.u32 %v475_v40, %v472_v0 }
  0xc5   : > { %v7818_v54 = vadd.f32 %v858_v10, %v719_v46  ;;  %1549 = vmatpush.bf16.msra.mxu2 %v6302_v62 }
  0xc6   : > { %v7833_v46 = vsel %vm370_vm0, %v467_v57, %v476_v24  ;;  %v6379_v57 = vld [vmem:[%s10456_s2 + $0x1a4] sm:$0xf0] }
  0xc7   : > { %v6382_v41 = vor.u32 %v6934_v39, %v6379_v57  ;;  %v357_v39 = vpack.c.bf16 %v7545_v49, %v7502_v6 }
  0xc8   : > { %v7822_v45 = vpop.f32.mrf.mxu2 }
  0xc9   : > { %10603 = vst [vmem:[#allocation24_spill] sm:$0xff] %v7822_v45  ;;  %2495 = vmatpush.bf16.msrb.mxu3 %v6382_v41  ;;  %v488_v6 = vshrl.u32 %v357_v39, 16  ;;  %v491_v49 = vshll.u32 %v357_v39, 16 }
  0xca   : > { %v729_v40 = vpop.f32.mrf.mxu0 }
  0xcb   : > { %v1480_v30 = vpop.f32.mrf.mxu3  ;;  %v493_v41 = vrot.slane %v491_v49, 4 }
  0xcc   : > { %v861_v26 = vpop.f32.mrf.mxu1  ;;  %v482_v30 = vshll.u32 %v356_v19, 16  ;;  %v7863_v19 = vpack.c.bf16 %v7664_v8, %v7629_v12  ;;  %v6305_v12 = vld [vmem:[%s10456_s2 + $0xc8] sm:$0xf]  ;;  %v6909_v8 = vld [vmem:[%s10456_s2 + $0xd0] sm:$0xf0] }
  0xcd   : > { %v7837_v27 = vadd.f32 %v861_v26, %v721_v50  ;;  %838 = vmatmul.bf16.gmra.mxu2 %v7826_v63  ;;  %768 = vmatmul.bf16.gmra.mxu0 %v7833_v46 }
  0xce   : > { %v484_v60 = vrot.slane %v482_v30, 4 }
  0xcf   : > { %900 = vmatmul.bf16.gmra.mxu1 %v7833_v46 }
  0xd0   : > { %1522 = vmatmul.bf16.gmra.mxu3 %v7830_v58  ;;  %v799_v50 = vpop.f32.mrf.mxu2  ;;  %v485_v0 = vor.u32 %v484_v60, %v481_v1 }
  0xd1   : > { %v490_v50 = vrot.slane %v488_v6, 3 }
  0xd2   : > { %v731_v10 = vpop.f32.mrf.mxu0  ;;  %v7866_v48 = vsel %vm370_vm0, %v476_v24, %v485_v0  ;;  %v6306_v24 = vor.u32 %v6909_v8, %v6305_v12 }
  0xd3   : > { %v7855_v37 = vpop.f32.mrf.mxu3  ;;  %v494_v60 = vor.u32 %v493_v41, %v490_v50  ;;  %v6461_v50 = vld [vmem:[%s10456_s2 + $0x230] sm:$0xf]  ;;  %v6954_v41 = vld [vmem:[%s10456_s2 + $0x238] sm:$0xf0] }
  0xd4   : > { %10604 = vst [vmem:[#allocation25_spill] sm:$0xff] %v7855_v37  ;;  %v863_v31 = vpop.f32.mrf.mxu1  ;;  %1837 = vmatpush.bf16.msrb.mxu0 %v6306_v24 }
  0xd5   : > { %v7893_v12 = vsel %vm370_vm0, %v485_v0, %v494_v60 }
  0xd8   : > { %v7857_v26 = vpop.f32.mrf.mxu2 }
  0xd9   : > { %10605 = vst [vmem:[#allocation26_spill] sm:$0xff] %v7857_v26 }
  0xda   : > { %v734_v5 = vpop.f32.mrf.mxu0 }
  0xdb   : > { %v7859_v45 = vpop.f32.mrf.mxu3 }
  0xdc   : > { %10606 = vst [vmem:[#allocation27_spill] sm:$0xff] %v7859_v45  ;;  %v866_v11 = vpop.f32.mrf.mxu1  ;;  %v7890_v45 = vpack.c.bf16 %v7700_v29, %v7667_v59  ;;  %v6371_v59 = vld [vmem:[%s10456_s2 + $0x18c] sm:$0xf0] }
  0xdd   : > { %v7870_v62 = vadd.f32 %v866_v11, %v726_v2  ;;  %841 = vmatmul.bf16.gmra.mxu2 %v7820_v38  ;;  %773 = vmatmul.bf16.gmra.mxu0 %v7866_v48 }
  0xdf   : > { %905 = vmatmul.bf16.gmra.mxu1 %v7866_v48 }
  0xe0   : > { %1527 = vmatmul.bf16.gmra.mxu3 %v7863_v19  ;;  %v7882_v2 = vpop.f32.mrf.mxu2 }
  0xe1   : > { %10607 = vst [vmem:[#allocation28_spill] sm:$0xff] %v7882_v2 }
  0xe2   : > { %v736_v1 = vpop.f32.mrf.mxu0 }
  0xe3   : > { %v1488_v30 = vpop.f32.mrf.mxu3 }
  0xe4   : > { %v868_v57 = vpop.f32.mrf.mxu1 }
  0xe5   : > { %v7884_v31 = vadd.f32 %v868_v57, %v729_v40  ;;  %v6931_v40 = vld [vmem:[%s10456_s2 + $0x184] sm:$0xf] }
  0xe6   : > { %v6374_v29 = vor.u32 %v6931_v40, %v6371_v59 }
  0xe8   : > { %v806_v10 = vpop.f32.mrf.mxu2  ;;  %2496 = vmatpush.bf16.msrb.mxu3 %v6374_v29 }
  0xe9   : > { %v7921_v10 = vpack.c.bf16 %v7742_v17, %v7703_v35  ;;  %v6925_v17 = vld [vmem:[%s10456_s2 + $0x154] sm:$0xf]  ;;  %v6291_v35 = vld [vmem:[%s10456_s2 + $0x15c] sm:$0xf0] }
  0xea   : > { %v739_v8 = vpop.f32.mrf.mxu0 }
  0xeb   : > { %v7886_v11 = vpop.f32.mrf.mxu3  ;;  %10612 = vst [vmem:[#allocation33_spill] sm:$0xff] %v7921_v10 }
  0xec   : > { %10608 = vst [vmem:[#allocation29_spill] sm:$0xff] %v7886_v11  ;;  %v871_v39 = vpop.f32.mrf.mxu1 }
  0xed   : > { %1106 = vmatmul.bf16.vlgmr.msrb.gmra.mxu2 %v7569_v56  ;;  %778 = vmatmul.bf16.gmra.mxu0 %v7893_v12  ;;  %v6462_v39 = vor.u32 %v6954_v41, %v6461_v50  ;;  %v7947_v50 = vpack.c.bf16 %v7783_v14, %v7745_v42 }
  0xef   : > { %910 = vmatmul.bf16.gmra.mxu1 %v7893_v12  ;;  %2784 = vmatpush.bf16.msra.mxu0 %v6462_v39 }
  0xf0   : > { %1532 = vmatmul.bf16.gmra.mxu3 %v7890_v45  ;;  %v7905_v0 = vpop.f32.mrf.mxu2 }
  0xf1   : > { %10609 = vst [vmem:[#allocation30_spill] sm:$0xff] %v7905_v0 }
  0xf2   : > { %v741_v24 = vpop.f32.mrf.mxu0 }
  0xf3   : > { %v7907_v6 = vpop.f32.mrf.mxu3 }
  0xf4   : > { %10610 = vst [vmem:[#allocation31_spill] sm:$0xff] %v7907_v6  ;;  %v873_v56 = vpop.f32.mrf.mxu1 }
  0xf5   : > { %v7909_v49 = vadd.f32 %v873_v56, %v734_v5  ;;  %v7925_v5 = vsel %vm370_vm0, %v494_v60, %v7413_v55  ;;  %v6294_v55 = vor.u32 %v6925_v17, %v6291_v35  ;;  %v6557_v17 = vld [vmem:[%s10457_s3 + $0xb0] sm:$0xf]  ;;  %v6978_v35 = vld [vmem:[%s10457_s3 + $0xb8] sm:$0xf0] }
  0xf6   : > { %v6558_v42 = vor.u32 %v6978_v35, %v6557_v17 }
  0xf7   : > { %1550 = vmatpush.bf16.msra.mxu2 %v6294_v55 }
  0xf8   : > { %v7911_v30 = vpop.f32.mrf.mxu2  ;;  %3850 = vmatpush.bf16.msra.mxu3 %v6558_v42  ;;  %v2042_v42 = vshrl.u32 %v7396_v34, 16 }
  0xf9   : > { %10611 = vst [vmem:[#allocation32_spill] sm:$0xff] %v7911_v30 }
  0xfa   : > { %v744_v59 = vpop.f32.mrf.mxu0 }
  0xfb   : > { %v1495_v57 = vpop.f32.mrf.mxu3 }
  0xfc   : > { %v876_v8 = vpop.f32.mrf.mxu1 }
  0xfd   : > { %v7927_v40 = vadd.f32 %v876_v8, %v736_v1  ;;  %1111 = vmatmul.bf16.gmra.mxu2 %v7601_v16  ;;  %783 = vmatmul.bf16.gmra.mxu0 %v7925_v5 }
  0xff   : > { %915 = vmatmul.bf16.gmra.mxu1 %v7925_v5 }
 0x100   : > { %1537 = vmatmul.bf16.gmra.mxu3 %v7921_v10  ;;  %v814_v1 = vpop.f32.mrf.mxu2 }
 0x102   : > { %v746_v29 = vpop.f32.mrf.mxu0 }
 0x103   : > { %v7939_v60 = vpop.f32.mrf.mxu3 }
 0x104   : > { %10613 = vst [vmem:[#allocation34_spill] sm:$0xff] %v7939_v60  ;;  %v878_v16 = vpop.f32.mrf.mxu1  ;;  %v7973_v60 = vpack.c.bf16 %v7554_v51, %v7505_v7  ;;  %v2049_v51 = vshll.u32 %v7428_v3, 16 }
 0x108   : > { %v7941_v56 = vpop.f32.mrf.mxu2 }
 0x109   : > { %10614 = vst [vmem:[#allocation35_spill] sm:$0xff] %v7941_v56 }
 0x10a   : > { %v749_v8 = vpop.f32.mrf.mxu0 }
 0x10b   : > { %v7943_v57 = vpop.f32.mrf.mxu3 }
 0x10c   : > { %10615 = vst [vmem:[#allocation36_spill] sm:$0xff] %v7943_v57  ;;  %v881_v41 = vpop.f32.mrf.mxu1 }
 0x10d   : > { %v7949_v39 = vadd.f32 %v881_v41, %v741_v24  ;;  %1116 = vmatmul.bf16.gmra.mxu2 %v7645_v28  ;;  %1838 = vmatmul.bf16.vlgmr.msrb.gmra.mxu0 %v7449_v25  ;;  %v7969_v41 = vpack.c.bf16 %v7786_v61, %v7786_v61 }
 0x10f   : > { %920 = vmatmul.bf16.gmra.mxu1 %v7432_v4  ;;  %10618 = vst [vmem:[#allocation39_spill] sm:$0xff] %v7969_v41 }
 0x110   : > { %1542 = vmatmul.bf16.gmra.mxu3 %v7947_v50  ;;  %v7961_v14 = vpop.f32.mrf.mxu2 }
 0x111   : > { %10616 = vst [vmem:[#allocation37_spill] sm:$0xff] %v7961_v14 }
 0x112   : > { %v751_v1 = vpop.f32.mrf.mxu0 }
 0x113   : > { %v1503_v24 = vpop.f32.mrf.mxu3 }
 0x114   : > { %v883_v28 = vpop.f32.mrf.mxu1 }
 0x115   : > { %v7963_v55 = vadd.f32 %v883_v28, %v744_v59  ;;  %v2044_v59 = vshll.u32 %v7396_v34, 16 }
 0x117   : > { %v2046_v7 = vrot.slane %v2044_v59, 1 }
 0x118   : > { %v821_v16 = vpop.f32.mrf.mxu2 }
 0x119   : > { %v2047_v28 = vor.u32 %v2046_v7, %v2042_v42  ;;  %v2051_v16 = vrot.slane %v2049_v51, 1  ;;  %v2057_v7 = vshll.u32 %v7439_v20, 16 }
 0x11a   : > { %v754_v17 = vpop.f32.mrf.mxu0 }
 0x11b   : > { %v7965_v29 = vpop.f32.mrf.mxu3 }
 0x11c   : > { %10617 = vst [vmem:[#allocation38_spill] sm:$0xff] %v7965_v29  ;;  %v886_v57 = vpop.f32.mrf.mxu1 }
 0x11d   : > { %1121 = vmatmul.bf16.gmra.mxu2 %v7685_v32  ;;  %1843 = vmatmul.bf16.gmra.mxu0 %v7973_v60 }
 0x11f   : > { %925 = vmatmul.bf16.gmra.mxu1 %v7472_v44 }
 0x120   : > { %1545 = vmatmul.bf16.gmra.mxu3 %v7969_v41  ;;  %v7980_v35 = vpop.f32.mrf.mxu2  ;;  %v6457_v41 = vld [vmem:[%s10456_s2 + $0x218] sm:$0xf] }
 0x121   : > { %10619 = vst [vmem:[#allocation40_spill] sm:$0xff] %v7980_v35 }
 0x122   : > { %v756_v32 = vpop.f32.mrf.mxu0 }
 0x123   : > { %v7982_v61 = vpop.f32.mrf.mxu3 }
 0x124   : > { %10620 = vst [vmem:[#allocation41_spill] sm:$0xff] %v7982_v61  ;;  %v888_v57 = vpop.f32.mrf.mxu1  ;;  %v6951_v61 = vld [vmem:[%s10456_s2 + $0x220] sm:$0xf0] }
 0x125   : > { %v7986_v24 = vadd.f32 %v888_v57, %v749_v8  ;;  %v6458_v59 = vor.u32 %v6951_v61, %v6457_v41  ;;  %v7997_v8 = vsel %vm2040_vm1, %v2047_v28, %v2051_v16  ;;  %v8001_v57 = vpack.c.bf16 %v7588_v21, %v7557_v52  ;;  %v6922_v41 = vld [vmem:[%s10456_s2 + $0x13c] sm:$0xf]  ;;  %v6283_v61 = vld [vmem:[%s10456_s2 + $0x144] sm:$0xf0] }
 0x126   : > { %10622 = vst [vmem:[#allocation43_spill] sm:$0xff] %v7997_v8  ;;  %v6286_v52 = vor.u32 %v6922_v41, %v6283_v61  ;;  %v8028_v41 = vpack.c.bf16 %v7632_v22, %v7591_v23  ;;  %v6975_v23 = vld [vmem:[%s10457_s3 + $0xa0] sm:$0xf0] }
 0x127   : > { %2785 = vmatpush.bf16.msra.mxu0 %v6458_v59  ;;  %v2059_v59 = vrot.slane %v2057_v7, 1 }
 0x128   : > { %v7988_v17 = vpop.f32.mrf.mxu2  ;;  %1551 = vmatpush.bf16.msra.mxu2 %v6286_v52 }
 0x129   : > { %10621 = vst [vmem:[#allocation42_spill] sm:$0xff] %v7988_v17 }
 0x12b   : > { %v1510_v29 = vpop.f32.mrf.mxu3 }
 0x12c   : > { %v891_v6 = vpop.f32.mrf.mxu1  ;;  %v759_v29 = vpop.f32.mrf.mxu0 }
 0x12d   : > { %v8003_v42 = vadd.f32 %v891_v6, %v751_v1  ;;  %1126 = vmatmul.bf16.gmra.mxu2 %v7721_v47  ;;  %1848 = vmatmul.bf16.gmra.mxu0 %v8001_v57  ;;  %v2053_v1 = vshrl.u32 %v7428_v3, 16 }
 0x12f   : > { %930 = vmatmul.bf16.gmra.mxu1 %v7511_v9  ;;  %v2055_v28 = vor.u32 %v2053_v1, %v2051_v16 }
 0x130   : > { %2497 = vmatmul.bf16.vlgmr.msrb.gmra.mxu3 %v7997_v8  ;;  %v829_v21 = vpop.f32.mrf.mxu2 }
 0x131   : > { %v8024_v35 = vsel %vm2040_vm1, %v2055_v28, %v2059_v59 }
 0x132   : > { %10626 = vst [vmem:[#allocation47_spill] sm:$0xff] %v8024_v35 }
 0x133   : > { %v8015_v6 = vpop.f32.mrf.mxu3 }
 0x134   : > { %10623 = vst [vmem:[#allocation44_spill] sm:$0xff] %v8015_v6  ;;  %v893_v47 = vpop.f32.mrf.mxu1  ;;  %v761_v51 = vpop.f32.mrf.mxu0 }
 0x135   : > { %v6553_v47 = vld [vmem:[%s10457_s3 + $0x98] sm:$0xf] }
 0x136   : > { %v6554_v22 = vor.u32 %v6975_v23, %v6553_v47  ;;  %v8055_v47 = vpack.c.bf16 %v7670_v13, %v7635_v18 }
 0x138   : > { %v8019_v11 = vpop.f32.mrf.mxu2  ;;  %3851 = vmatpush.bf16.msra.mxu3 %v6554_v22  ;;  %v2069_v22 = vshrl.u32 %v7449_v25, 16 }
 0x139   : > { %10624 = vst [vmem:[#allocation45_spill] sm:$0xff] %v8019_v11 }
 0x13b   : > { %v8021_v37 = vpop.f32.mrf.mxu3 }
 0x13c   : > { %10625 = vst [vmem:[#allocation46_spill] sm:$0xff] %v8021_v37  ;;  %v896_v17 = vpop.f32.mrf.mxu1  ;;  %v764_v52 = vpop.f32.mrf.mxu0 }
 0x13d   : > { %v8030_v61 = vadd.f32 %v896_v17, %v756_v32  ;;  %1131 = vmatmul.bf16.gmra.mxu2 %v7760_v36  ;;  %1853 = vmatmul.bf16.gmra.mxu0 %v8028_v41  ;;  %v2061_v36 = vshrl.u32 %v7439_v20, 16  ;;  %v2065_v17 = vshll.u32 %v7449_v25, 16 }
 0x13f   : > { %935 = vmatmul.bf16.gmra.mxu1 %v7560_v53  ;;  %v2063_v51 = vor.u32 %v2061_v36, %v2059_v59  ;;  %v2067_v28 = vrot.slane %v2065_v17, 1 }
 0x140   : > { %2500 = vmatmul.bf16.gmra.mxu3 %v8024_v35  ;;  %v8036_v16 = vpop.f32.mrf.mxu2 }
 0x141   : > { %10627 = vst [vmem:[#allocation48_spill] sm:$0xff] %v8036_v16  ;;  %v8051_v16 = vsel %vm2040_vm1, %v2063_v51, %v2067_v28  ;;  %v2071_v18 = vor.u32 %v2069_v22, %v2067_v28 }
 0x142   : > { %10629 = vst [vmem:[#allocation50_spill] sm:$0xff] %v8051_v16 }
 0x143   : > { %v1518_v21 = vpop.f32.mrf.mxu3 }
 0x144   : > { %v898_v32 = vpop.f32.mrf.mxu1  ;;  %v766_v7 = vpop.f32.mrf.mxu0 }
 0x145   : > { %v8046_v1 = vadd.f32 %v898_v32, %v759_v29  ;;  %v2073_v32 = vshll.u32 %v7973_v60, 16 }
 0x147   : > { %v2075_v17 = vrot.slane %v2073_v32, 1  ;;  %v10633_v32 = vld [vmem:[#allocation8_spill] sm:$0xff] }
 0x148   : > { %v836_v21 = vpop.f32.mrf.mxu2 }
 0x149   : > { %v6453_v21 = vld [vmem:[%s10456_s2 + $0x200] sm:$0xf] }
 0x14b   : > { %v8048_v37 = vpop.f32.mrf.mxu3 }
 0x14c   : > { %10628 = vst [vmem:[#allocation49_spill] sm:$0xff] %v8048_v37  ;;  %v901_v6 = vpop.f32.mrf.mxu1  ;;  %v769_v23 = vpop.f32.mrf.mxu0  ;;  %v8074_v37 = vsel %vm2040_vm1, %v2071_v18, %v2075_v17  ;;  %v6275_v18 = vld [vmem:[%s10456_s2 + $0x12c] sm:$0xf0] }
 0x14d   : > { %1136 = vmatmul.bf16.gmra.mxu2 %v7800_v43  ;;  %1858 = vmatmul.bf16.gmra.mxu0 %v8055_v47  ;;  %v6948_v23 = vld [vmem:[%s10456_s2 + $0x208] sm:$0xf0]  ;;  %10631 = vst [vmem:[#allocation52_spill] sm:$0xff] %v8074_v37 }
 0x14f   : > { %940 = vmatmul.bf16.gmra.mxu1 %v7598_v15 }
 0x150   : > { %2504 = vmatmul.bf16.gmra.mxu3 %v8051_v16  ;;  %v839_v29 = vpop.f32.mrf.mxu2 }
 0x151   : > { %v6454_v29 = vor.u32 %v6948_v23, %v6453_v21  ;;  %v2081_v21 = vshll.u32 %v8001_v57, 16 }
 0x153   : > { %v8061_v59 = vpop.f32.mrf.mxu3  ;;  %2786 = vmatpush.bf16.msra.mxu0 %v6454_v29 }
 0x154   : > { %10630 = vst [vmem:[#allocation51_spill] sm:$0xff] %v8061_v59  ;;  %v903_v6 = vpop.f32.mrf.mxu1  ;;  %v771_v13 = vpop.f32.mrf.mxu0 }
 0x155   : > { %v8065_v36 = vadd.f32 %v903_v6, %v764_v52  ;;  %v10632_v52 = vld [vmem:[#allocation11_spill] sm:$0xff] }
 0x156   : > { %v8078_v6 = vpack.c.bf16 %v10632_v52, %v7673_v33  ;;  %v2083_v52 = vrot.slane %v2081_v21, 1 }
 0x158   : > { %v840_v43 = vpop.f32.mrf.mxu2 }
 0x159   : > { %v6919_v43 = vld [vmem:[%s10456_s2 + $0x124] sm:$0xf] }
 0x15a   : > { %v6278_v33 = vor.u32 %v6919_v43, %v6275_v18  ;;  %v10637_v43 = vld [vmem:[#allocation12_spill] sm:$0xff]  ;;  %v10638_v18 = vld [vmem:[#allocation15_spill] sm:$0xff] }
 0x15b   : > { %v1525_v51 = vpop.f32.mrf.mxu3 }
 0x15c   : > { %v906_v59 = vpop.f32.mrf.mxu1  ;;  %v774_v22 = vpop.f32.mrf.mxu0  ;;  %1552 = vmatpush.bf16.msra.mxu2 %v6278_v33  ;;  %v2077_v51 = vshrl.u32 %v7973_v60, 16 }
 0x15d   : > { %v8080_v28 = vadd.f32 %v906_v59, %v766_v7  ;;  %1141 = vmatmul.bf16.gmra.mxu2 %v7833_v46  ;;  %1863 = vmatmul.bf16.gmra.mxu0 %v8078_v6 }
 0x15e   : > { %v2079_v29 = vor.u32 %v2077_v51, %v2075_v17 }
 0x15f   : > { %945 = vmatmul.bf16.gmra.mxu1 %v10633_v32 }
 0x160   : > { %2509 = vmatmul.bf16.gmra.mxu3 %v8074_v37  ;;  %v842_v7 = vpop.f32.mrf.mxu2  ;;  %v8099_v30 = vsel %vm2040_vm1, %v2079_v29, %v2083_v52 }
 0x161   : > { %10636 = vst [vmem:[#allocation53_spill] sm:$0xff] %v8099_v30  ;;  %v8103_v7 = vpack.c.bf16 %v10638_v18, %v10637_v43 }
 0x163   : > { %v8092_v59 = vpop.f32.mrf.mxu3 }
 0x164   : > { %10634 = vst [vmem:[#allocation11_spill] sm:$0xff] %v8092_v59  ;;  %v908_v46 = vpop.f32.mrf.mxu1  ;;  %v776_v23 = vpop.f32.mrf.mxu0  ;;  %v10639_v59 = vld [vmem:[#allocation9_spill] sm:$0xff] }
 0x165   : > { %v2085_v23 = vshrl.u32 %v8001_v57, 16 }
 0x168   : > { %v843_v11 = vpop.f32.mrf.mxu2 }
 0x16b   : > { %v8096_v14 = vpop.f32.mrf.mxu3 }
 0x16c   : > { %10635 = vst [vmem:[#allocation8_spill] sm:$0xff] %v8096_v14  ;;  %v911_v56 = vpop.f32.mrf.mxu1  ;;  %v779_v46 = vpop.f32.mrf.mxu0 }
 0x16d   : > { %v8105_v33 = vadd.f32 %v911_v56, %v771_v13  ;;  %1146 = vmatmul.bf16.gmra.mxu2 %v7866_v48  ;;  %1868 = vmatmul.bf16.gmra.mxu0 %v8103_v7  ;;  %v2089_v56 = vshll.u32 %v8028_v41, 16  ;;  %v6549_v48 = vld [vmem:[%s10457_s3 + $0x80] sm:$0xf]  ;;  %v6972_v13 = vld [vmem:[%s10457_s3 + $0x88] sm:$0xf0] }
 0x16e   : > { %v6550_v18 = vor.u32 %v6972_v13, %v6549_v48 }
 0x16f   : > { %950 = vmatmul.bf16.gmra.mxu1 %v10639_v59 }
 0x170   : > { %2514 = vmatmul.bf16.gmra.mxu3 %v8099_v30  ;;  %v1107_v11 = vpop.f32.mrf.mxu2 }
 0x171   : > { %v8112_v17 = vadd.f32 %v1107_v11, %v7818_v54  ;;  %3852 = vmatpush.bf16.msra.mxu3 %v6550_v18  ;;  %v2087_v54 = vor.u32 %v2085_v23, %v2083_v52  ;;  %v2091_v11 = vrot.slane %v2089_v56, 1  ;;  %v2093_v56 = vshrl.u32 %v8028_v41, 16 }
 0x173   : > { %v1533_v51 = vpop.f32.mrf.mxu3  ;;  %v8130_v0 = vsel %vm2040_vm1, %v2087_v54, %v2091_v11 }
 0x174   : > { %v913_v21 = vpop.f32.mrf.mxu1  ;;  %v781_v43 = vpop.f32.mrf.mxu0  ;;  %10641 = vst [vmem:[#allocation15_spill] sm:$0xff] %v8130_v0 }
 0x175   : > { %v8122_v29 = vadd.f32 %v913_v21, %v774_v22  ;;  %v10642_v22 = vld [vmem:[#allocation13_spill] sm:$0xff]  ;;  %v10643_v21 = vld [vmem:[#allocation2_spill] sm:$0xff] }
 0x178   : > { %v1109_v51 = vpop.f32.mrf.mxu2 }
 0x179   : > { %v8125_v14 = vadd.f32 %v1109_v51, %v7837_v27 }
 0x17b   : > { %v8127_v30 = vpop.f32.mrf.mxu3 }
 0x17c   : > { %10640 = vst [vmem:[#allocation12_spill] sm:$0xff] %v8127_v30  ;;  %v916_v37 = vpop.f32.mrf.mxu1  ;;  %v784_v16 = vpop.f32.mrf.mxu0 }
 0x17d   : > { %1151 = vmatmul.bf16.gmra.mxu2 %v7893_v12  ;;  %1873 = vmatmul.bf16.gmra.mxu0 %v10643_v21  ;;  %v2097_v37 = vshll.u32 %v8055_v47, 16  ;;  %v2095_v16 = vor.u32 %v2093_v56, %v2091_v11  ;;  %v6916_v56 = vld [vmem:[%s10456_s2 + $0x10c] sm:$0xf] }
 0x17f   : > { %955 = vmatmul.bf16.gmra.mxu1 %v10642_v22  ;;  %v2099_v18 = vrot.slane %v2097_v37, 1  ;;  %v10648_v37 = vld [vmem:[#allocation3_spill] sm:$0xff] }
 0x180   : > { %2519 = vmatmul.bf16.gmra.mxu3 %v8130_v0  ;;  %v1112_v52 = vpop.f32.mrf.mxu2 }
 0x181   : > { %v6449_v52 = vld [vmem:[%s10456_s2 + $0x1e8] sm:$0xf] }
 0x183   : > { %v8136_v23 = vpop.f32.mrf.mxu3 }
 0x184   : > { %10644 = vst [vmem:[#allocation9_spill] sm:$0xff] %v8136_v23  ;;  %v918_v27 = vpop.f32.mrf.mxu1  ;;  %v786_v13 = vpop.f32.mrf.mxu0  ;;  %v6945_v23 = vld [vmem:[%s10456_s2 + $0x1f0] sm:$0xf0] }
 0x185   : > { %v8140_v48 = vadd.f32 %v918_v27, %v779_v46  ;;  %v6450_v30 = vor.u32 %v6945_v23, %v6449_v52  ;;  %v8152_v46 = vsel %vm2040_vm1, %v2095_v16, %v2099_v18  ;;  %v6267_v23 = vld [vmem:[%s10456_s2 + $0x114] sm:$0xf0] }
 0x186   : > { %10645 = vst [vmem:[#allocation13_spill] sm:$0xff] %v8152_v46 }
 0x187   : > { %2787 = vmatpush.bf16.msra.mxu0 %v6450_v30 }
 0x188   : > { %v1114_v12 = vpop.f32.mrf.mxu2 }
 0x189   : > { %v8143_v54 = vadd.f32 %v1114_v12, %v7870_v62  ;;  %v10647_v62 = vld [vmem:[#allocation16_spill] sm:$0xff]  ;;  %v2101_v12 = vshrl.u32 %v8055_v47, 16 }
 0x18b   : > { %v1540_v51 = vpop.f32.mrf.mxu3 }
 0x18c   : > { %v921_v0 = vpop.f32.mrf.mxu1  ;;  %v8156_v27 = vpop.f32.mrf.mxu0  ;;  %v2105_v51 = vshll.u32 %v8078_v6, 16 }
 0x18d   : > { %v8154_v11 = vadd.f32 %v921_v0, %v781_v43  ;;  %10646 = vst [vmem:[#allocation54_spill] sm:$0xff] %v8156_v27  ;;  %1156 = vmatmul.bf16.gmra.mxu2 %v7925_v5  ;;  %1878 = vmatmul.bf16.gmra.mxu0 %v10648_v37  ;;  %v6270_v0 = vor.u32 %v6916_v56, %v6267_v23 }
 0x18e   : > { %v2103_v27 = vor.u32 %v2101_v12, %v2099_v18 }
 0x18f   : > { %960 = vmatmul.bf16.gmra.mxu1 %v10647_v62  ;;  %1553 = vmatpush.bf16.msra.mxu2 %v6270_v0  ;;  %v10652_v0 = vld [vmem:[#allocation20_spill] sm:$0xff] }
 0x190   : > { %2524 = vmatmul.bf16.gmra.mxu3 %v8152_v46  ;;  %v1117_v43 = vpop.f32.mrf.mxu2  ;;  %v2107_v46 = vrot.slane %v2105_v51, 1 }
 0x191   : > { %v8169_v30 = vadd.f32 %v1117_v43, %v7884_v31  ;;  %v10653_v43 = vld [vmem:[#allocation4_spill] sm:$0xff] }
 0x192   : > { %v8176_v56 = vsel %vm2040_vm1, %v2103_v27, %v2107_v46  ;;  %v2109_v27 = vshrl.u32 %v8078_v6, 16 }
 0x193   : > { %10649 = vst [vmem:[#allocation16_spill] sm:$0xff] %v8169_v30  ;;  %v1543_v5 = vpop.f32.mrf.mxu3 }
 0x194   : > { %v923_v16 = vpop.f32.mrf.mxu1  ;;  %v8173_v52 = vpop.f32.mrf.mxu0  ;;  %10651 = vst [vmem:[#allocation56_spill] sm:$0xff] %v8176_v56 }
 0x195   : > { %10650 = vst [vmem:[#allocation55_spill] sm:$0xff] %v8173_v52 }
 0x198   : > { %v1119_v2 = vpop.f32.mrf.mxu2 }
 0x19b   : > { %v1544_v35 = vpop.f32.mrf.mxu3 }
 0x19c   : > { %v926_v26 = vpop.f32.mrf.mxu1  ;;  %v1844_v31 = vpop.f32.mrf.mxu0 }
 0x19d   : > { %v8178_v23 = vadd.f32 %v926_v26, %v786_v13  ;;  %1161 = vmatmul.bf16.gmra.mxu2 %v7432_v4  ;;  %1883 = vmatmul.bf16.gmra.mxu0 %v10653_v43  ;;  %v2113_v26 = vshll.u32 %v8103_v7, 16  ;;  %v2111_v4 = vor.u32 %v2109_v27, %v2107_v46 }
 0x19f   : > { %965 = vmatmul.bf16.gmra.mxu1 %v10652_v0  ;;  %v2115_v16 = vrot.slane %v2113_v26, 1 }
 0x1a0   : > { %2529 = vmatmul.bf16.gmra.mxu3 %v8176_v56  ;;  %v1122_v5 = vpop.f32.mrf.mxu2 }
 0x1a1   : > { %v8185_v18 = vadd.f32 %v1122_v5, %v7909_v49  ;;  %v6545_v49 = vld [vmem:[%s10457_s3 + $0x68] sm:$0xf]  ;;  %v6969_v5 = vld [vmem:[%s10457_s3 + $0x70] sm:$0xf0]  ;;  %v8203_v56 = vsel %vm2040_vm1, %v2111_v4, %v2115_v16  ;;  %v2121_v4 = vshll.u32 %v10643_v21, 16 }
 0x1a2   : > { %10657 = vst [vmem:[#allocation59_spill] sm:$0xff] %v8203_v56 }
 0x1a3   : > { %10654 = vst [vmem:[#allocation20_spill] sm:$0xff] %v8185_v18  ;;  %v1546_v2 = vpop.f32.mrf.mxu3 }
 0x1a4   : > { %v8187_v35 = vpop.f32.mrf.mxu1  ;;  %v8191_v13 = vpop.f32.mrf.mxu0  ;;  %v6546_v2 = vor.u32 %v6969_v5, %v6545_v49  ;;  %v2123_v5 = vrot.slane %v2121_v4, 1 }
 0x1a5   : > { %10655 = vst [vmem:[#allocation57_spill] sm:$0xff] %v8191_v13  ;;  %v6445_v13 = vld [vmem:[%s10456_s2 + $0x1d0] sm:$0xf] }
 0x1a6   : > { %3853 = vmatpush.bf16.msra.mxu3 %v6546_v2 }
 0x1a8   : > { %v1124_v12 = vpop.f32.mrf.mxu2 }
 0x1a9   : > { %v8194_v51 = vadd.f32 %v1124_v12, %v7927_v40  ;;  %v10659_v40 = vld [vmem:[#allocation6_spill] sm:$0xff] }
 0x1ab   : > { %10656 = vst [vmem:[#allocation58_spill] sm:$0xff] %v8194_v51  ;;  %v1547_v31 = vpop.f32.mrf.mxu3 }
 0x1ac   : > { %v931_v52 = vpop.f32.mrf.mxu1  ;;  %v8205_v46 = vpop.f32.mrf.mxu0 }
 0x1ad   : > { %10658 = vst [vmem:[#allocation60_spill] sm:$0xff] %v8205_v46  ;;  %1166 = vmatmul.bf16.gmra.mxu2 %v7472_v44  ;;  %1888 = vmatmul.bf16.gmra.mxu0 %v10659_v40  ;;  %v2117_v52 = vshrl.u32 %v8103_v7, 16 }
 0x1af   : > { %970 = vmatmul.bf16.gmra.mxu1 %v7826_v63  ;;  %v2119_v49 = vor.u32 %v2117_v52, %v2115_v16  ;;  %v10663_v52 = vld [vmem:[#allocation5_spill] sm:$0xff] }
 0x1b0   : > { %2534 = vmatmul.bf16.gmra.mxu3 %v8203_v56  ;;  %v1127_v27 = vpop.f32.mrf.mxu2 }
 0x1b1   : > { %v6942_v27 = vld [vmem:[%s10456_s2 + $0x1d8] sm:$0xf0] }
 0x1b3   : > { %v2498_v26 = vpop.f32.mrf.mxu3 }
 0x1b4   : > { %v8211_v12 = vpop.f32.mrf.mxu1  ;;  %v1851_v31 = vpop.f32.mrf.mxu0  ;;  %v6446_v26 = vor.u32 %v6942_v27, %v6445_v13  ;;  %v6259_v13 = vld [vmem:[%s10456_s2 + $0xfc] sm:$0xf0] }
 0x1b5   : > { %v8227_v31 = vsel %vm2040_vm1, %v2119_v49, %v2123_v5 }
 0x1b6   : > { %10661 = vst [vmem:[#allocation62_spill] sm:$0xff] %v8227_v31  ;;  %2788 = vmatpush.bf16.msra.mxu0 %v6446_v26 }
 0x1b8   : > { %v1129_v2 = vpop.f32.mrf.mxu2 }
 0x1b9   : > { %v8216_v44 = vadd.f32 %v1129_v2, %v7949_v39  ;;  %v6913_v39 = vld [vmem:[%s10456_s2 + $0xf4] sm:$0xf] }
 0x1ba   : > { %v6262_v4 = vor.u32 %v6913_v39, %v6259_v13 }
 0x1bb   : > { %10660 = vst [vmem:[#allocation61_spill] sm:$0xff] %v8216_v44  ;;  %v2499_v46 = vpop.f32.mrf.mxu3  ;;  %v2129_v44 = vshll.u32 %v10648_v37, 16 }
 0x1bc   : > { %v8224_v56 = vpop.f32.mrf.mxu1  ;;  %v8229_v16 = vpop.f32.mrf.mxu0  ;;  %v6425_v46 = vld [vmem:[%s10456_s2 + $0x228] sm:$0xf]  ;;  %1554 = vmatpush.bf16.msra.mxu2 %v6262_v4 }
 0x1bd   : > { %10662 = vst [vmem:[#allocation63_spill] sm:$0xff] %v8229_v16  ;;  %1171 = vmatmul.bf16.gmra.mxu2 %v7511_v9  ;;  %1893 = vmatmul.bf16.gmra.mxu0 %v10663_v52  ;;  %v6953_v9 = vld [vmem:[%s10456_s2 + $0x230] sm:$0xf0]  ;;  %v2131_v13 = vrot.slane %v2129_v44, 1 }
 0x1be   : > { %v6426_v2 = vor.u32 %v6953_v9, %v6425_v46  ;;  %v2137_v9 = vshll.u32 %v10653_v43, 16 }
 0x1bf   : > { %975 = vmatmul.bf16.gmra.mxu1 %v7820_v38 }
 0x1c0   : > { %2539 = vmatmul.bf16.gmra.mxu3 %v8227_v31  ;;  %v1132_v49 = vpop.f32.mrf.mxu2  ;;  %2354 = vmatpush.bf16.msra.mxu1 %v6426_v2  ;;  %v2125_v31 = vshrl.u32 %v10643_v21, 16 }
 0x1c1   : > { %v8248_v27 = vadd.f32 %v1132_v49, %v7963_v55  ;;  %v6950_v49 = vld [vmem:[%s10456_s2 + $0x218] sm:$0xf0] }
 0x1c2   : > { %v2127_v39 = vor.u32 %v2125_v31, %v2123_v5  ;;  %v2133_v31 = vshrl.u32 %v10648_v37, 16 }
 0x1c3   : > { %v2501_v26 = vpop.f32.mrf.mxu3 }
 0x1c4   : > { %v938_v16 = vpop.f32.mrf.mxu1  ;;  %v8252_v51 = vpop.f32.mrf.mxu0  ;;  %v8259_v55 = vsel %vm2040_vm1, %v2127_v39, %v2131_v13  ;;  %v2135_v26 = vor.u32 %v2133_v31, %v2131_v13  ;;  %v2139_v39 = vrot.slane %v2137_v9, 1  ;;  %v6541_v13 = vld [vmem:[%s10457_s3 + $0x50] sm:$0xf] }
 0x1c5   : > { %10664 = vst [vmem:[#allocation64_spill] sm:$0xff] %v8252_v51  ;;  %v10667_v16 = vld [vmem:[#allocation7_spill] sm:$0xff] }
 0x1c6   : > { %10666 = vst [vmem:[#allocation66_spill] sm:$0xff] %v8259_v55 }
 0x1c8   : > { %v1134_v18 = vpop.f32.mrf.mxu2 }
 0x1cb   : > { %v8254_v8 = vpop.f32.mrf.mxu3 }
 0x1cc   : > { %10665 = vst [vmem:[#allocation65_spill] sm:$0xff] %v8254_v8  ;;  %v8256_v30 = vpop.f32.mrf.mxu1  ;;  %v1859_v46 = vpop.f32.mrf.mxu0 }
 0x1cd   : > { %1176 = vmatmul.bf16.gmra.mxu2 %v7560_v53  ;;  %1898 = vmatmul.bf16.gmra.mxu0 %v10667_v16  ;;  %v6417_v53 = vld [vmem:[%s10456_s2 + $0x210] sm:$0xf] }
 0x1cf   : > { %1422 = vmatmul.bf16.vlgmr.msrb.gmra.mxu1 %v7396_v34 }
 0x1d0   : > { %2544 = vmatmul.bf16.gmra.mxu3 %v8259_v55  ;;  %v1137_v4 = vpop.f32.mrf.mxu2 }
 0x1d1   : > { %v8266_v5 = vadd.f32 %v1137_v4, %v7986_v24  ;;  %v6418_v24 = vor.u32 %v6950_v49, %v6417_v53  ;;  %v2141_v53 = vshrl.u32 %v10653_v43, 16  ;;  %v2145_v49 = vshll.u32 %v10659_v40, 16  ;;  %v6939_v43 = vld [vmem:[%s10456_s2 + $0x1c0] sm:$0xf0] }
 0x1d3   : > { %v8268_v18 = vpop.f32.mrf.mxu3  ;;  %2355 = vmatpush.bf16.msra.mxu1 %v6418_v24 }
 0x1d4   : > { %10668 = vst [vmem:[#allocation67_spill] sm:$0xff] %v8268_v18  ;;  %v8270_v44 = vpop.f32.mrf.mxu1  ;;  %v8280_v2 = vpop.f32.mrf.mxu0  ;;  %v8286_v18 = vsel %vm2040_vm1, %v2135_v26, %v2139_v39  ;;  %v6409_v26 = vld [vmem:[%s10456_s2 + $0x1f8] sm:$0xf] }
 0x1d5   : > { %10669 = vst [vmem:[#allocation68_spill] sm:$0xff] %v8280_v2 }
 0x1d6   : > { %10670 = vst [vmem:[#allocation69_spill] sm:$0xff] %v8286_v18 }
 0x1d8   : > { %v1139_v46 = vpop.f32.mrf.mxu2 }
 0x1d9   : > { %v8283_v4 = vadd.f32 %v1139_v46, %v8003_v42  ;;  %v6966_v42 = vld [vmem:[%s10457_s3 + $0x58] sm:$0xf0]  ;;  %v6947_v46 = vld [vmem:[%s10456_s2 + $0x200] sm:$0xf0] }
 0x1db   : > { %v2507_v51 = vpop.f32.mrf.mxu3 }
 0x1dc   : > { %v946_v37 = vpop.f32.mrf.mxu1  ;;  %v8288_v8 = vpop.f32.mrf.mxu0  ;;  %v6542_v51 = vor.u32 %v6966_v42, %v6541_v13  ;;  %v6410_v13 = vor.u32 %v6947_v46, %v6409_v26  ;;  %v2143_v42 = vor.u32 %v2141_v53, %v2139_v39 }
 0x1dd   : > { %10671 = vst [vmem:[#allocation70_spill] sm:$0xff] %v8288_v8  ;;  %1181 = vmatmul.bf16.gmra.mxu2 %v7598_v15  ;;  %v10672_v37 = vld [vmem:[#allocation10_spill] sm:$0xff] }
 0x1de   : > { %1903 = vmatmul.bf16.gmra.mxu0 %v10672_v37  ;;  %3854 = vmatpush.bf16.msra.mxu3 %v6542_v51 }
 0x1df   : > { %1427 = vmatmul.bf16.gmra.mxu1 %v7428_v3 }
 0x1e0   : > { %2549 = vmatmul.bf16.gmra.mxu3 %v8286_v18  ;;  %v1142_v31 = vpop.f32.mrf.mxu2  ;;  %2356 = vmatpush.bf16.msra.mxu1 %v6410_v13 }
 0x1e1   : > { %v2147_v31 = vrot.slane %v2145_v49, 1  ;;  %v10677_v49 = vld [vmem:[#allocation14_spill] sm:$0xff] }
 0x1e3   : > { %v8300_v9 = vpop.f32.mrf.mxu3  ;;  %v8326_v39 = vsel %vm2040_vm1, %v2143_v42, %v2147_v31  ;;  %v2149_v42 = vshrl.u32 %v10659_v40, 16 }
 0x1e4   : > { %10673 = vst [vmem:[#allocation71_spill] sm:$0xff] %v8300_v9  ;;  %v8302_v15 = vpop.f32.mrf.mxu1  ;;  %v1866_v24 = vpop.f32.mrf.mxu0 }
 0x1e5   : > { %v6441_v24 = vld [vmem:[%s10456_s2 + $0x1b8] sm:$0xf]  ;;  %10675 = vst [vmem:[#allocation73_spill] sm:$0xff] %v8326_v39 }
 0x1e6   : > { %v6442_v9 = vor.u32 %v6939_v43, %v6441_v24  ;;  %v6251_v43 = vld [vmem:[%s10456_s2 + $0xe4] sm:$0xf0] }
 0x1e8   : > { %v1144_v51 = vpop.f32.mrf.mxu2  ;;  %2789 = vmatpush.bf16.msra.mxu0 %v6442_v9 }
 0x1e9   : > { %v8313_v8 = vadd.f32 %v1144_v51, %v8030_v61  ;;  %v6910_v61 = vld [vmem:[%s10456_s2 + $0xdc] sm:$0xf]  ;;  %v2153_v51 = vshll.u32 %v10663_v52, 16 }
 0x1ea   : > { %v6254_v26 = vor.u32 %v6910_v61, %v6251_v43  ;;  %v6401_v43 = vld [vmem:[%s10456_s2 + $0x1e0] sm:$0xf] }
 0x1eb   : > { %v8315_v2 = vpop.f32.mrf.mxu3 }
 0x1ec   : > { %10674 = vst [vmem:[#allocation72_spill] sm:$0xff] %v8315_v2  ;;  %v8323_v18 = vpop.f32.mrf.mxu1  ;;  %v8328_v53 = vpop.f32.mrf.mxu0  ;;  %1555 = vmatpush.bf16.msra.mxu2 %v6254_v26  ;;  %v2155_v2 = vrot.slane %v2153_v51, 1  ;;  %v6944_v26 = vld [vmem:[%s10456_s2 + $0x1e8] sm:$0xf0] }
 0x1ed   : > { %10676 = vst [vmem:[#allocation74_spill] sm:$0xff] %v8328_v53  ;;  %1186 = vmatmul.bf16.gmra.mxu2 %v10633_v32  ;;  %v2151_v53 = vor.u32 %v2149_v42, %v2147_v31  ;;  %v6402_v31 = vor.u32 %v6944_v26, %v6401_v43  ;;  %v2157_v42 = vshrl.u32 %v10663_v52, 16 }
 0x1ee   : > { %1908 = vmatmul.bf16.gmra.mxu0 %v10677_v49 }
 0x1ef   : > { %1432 = vmatmul.bf16.gmra.mxu1 %v7439_v20  ;;  %v8352_v61 = vsel %vm2040_vm1, %v2151_v53, %v2155_v2 }
 0x1f0   : > { %2554 = vmatmul.bf16.gmra.mxu3 %v8326_v39  ;;  %v1147_v46 = vpop.f32.mrf.mxu2  ;;  %2357 = vmatpush.bf16.msra.mxu1 %v6402_v31 }
 0x1f1   : > { %v8341_v9 = vadd.f32 %v1147_v46, %v8046_v1 }
 0x1f3   : > { %v2515_v32 = vpop.f32.mrf.mxu3 }
 0x1f4   : > { %v953_v13 = vpop.f32.mrf.mxu1  ;;  %v8345_v24 = vpop.f32.mrf.mxu0 }
 0x1f5   : > { %10678 = vst [vmem:[#allocation75_spill] sm:$0xff] %v8345_v24 }
 0x1f8   : > { %v1149_v39 = vpop.f32.mrf.mxu2 }
 0x1f9   : > { %v10680_v39 = vld [vmem:[#allocation17_spill] sm:$0xff] }
 0x1fb   : > { %v8347_v21 = vpop.f32.mrf.mxu3 }
 0x1fc   : > { %10679 = vst [vmem:[#allocation76_spill] sm:$0xff] %v8347_v21  ;;  %v8349_v55 = vpop.f32.mrf.mxu1  ;;  %v1874_v1 = vpop.f32.mrf.mxu0 }
 0x1fd   : > { %1191 = vmatmul.bf16.gmra.mxu2 %v10639_v59  ;;  %v2161_v59 = vshll.u32 %v10667_v16, 16  ;;  %v2159_v1 = vor.u32 %v2157_v42, %v2155_v2  ;;  %v6393_v2 = vld [vmem:[%s10456_s2 + $0x1c8] sm:$0xf] }
 0x1fe   : > { %1913 = vmatmul.bf16.gmra.mxu0 %v10680_v39 }
 0x1ff   : > { %1437 = vmatmul.bf16.gmra.mxu1 %v7449_v25  ;;  %v2163_v43 = vrot.slane %v2161_v59, 1 }
 0x200   : > { %2559 = vmatmul.bf16.gmra.mxu3 %v8352_v61  ;;  %v1152_v53 = vpop.f32.mrf.mxu2 }
 0x201   : > { %v8365_v46 = vadd.f32 %v1152_v53, %v8065_v36  ;;  %v8379_v36 = vsel %vm2040_vm1, %v2159_v1, %v2163_v43 }
 0x202   : > { %10683 = vst [vmem:[#allocation79_spill] sm:$0xff] %v8379_v36 }
 0x203   : > { %v8367_v32 = vpop.f32.mrf.mxu3 }
 0x204   : > { %10681 = vst [vmem:[#allocation77_spill] sm:$0xff] %v8367_v32  ;;  %v8369_v13 = vpop.f32.mrf.mxu1  ;;  %v8373_v51 = vpop.f32.mrf.mxu0  ;;  %v6437_v32 = vld [vmem:[%s10456_s2 + $0x1a0] sm:$0xf] }
 0x205   : > { %10682 = vst [vmem:[#allocation78_spill] sm:$0xff] %v8373_v51  ;;  %v6963_v51 = vld [vmem:[%s10457_s3 + $0x40] sm:$0xf0] }
 0x208   : > { %v1154_v26 = vpop.f32.mrf.mxu2 }
 0x209   : > { %v8376_v24 = vadd.f32 %v1154_v26, %v8080_v28  ;;  %v6941_v28 = vld [vmem:[%s10456_s2 + $0x1d0] sm:$0xf0]  ;;  %v2165_v26 = vshrl.u32 %v10667_v16, 16 }
 0x20a   : > { %v6394_v42 = vor.u32 %v6941_v28, %v6393_v2 }
 0x20b   : > { %v2522_v31 = vpop.f32.mrf.mxu3  ;;  %v2167_v28 = vor.u32 %v2165_v26, %v2163_v43 }
 0x20c   : > { %v961_v21 = vpop.f32.mrf.mxu1  ;;  %v8381_v53 = vpop.f32.mrf.mxu0  ;;  %2358 = vmatpush.bf16.msra.mxu1 %v6394_v42  ;;  %v2169_v31 = vshll.u32 %v10672_v37, 16 }
 0x20d   : > { %10684 = vst [vmem:[#allocation80_spill] sm:$0xff] %v8381_v53  ;;  %1196 = vmatmul.bf16.gmra.mxu2 %v10642_v22  ;;  %v10685_v21 = vld [vmem:[#allocation21_spill] sm:$0xff] }
 0x20e   : > { %1918 = vmatmul.bf16.gmra.mxu0 %v10685_v21  ;;  %v6537_v53 = vld [vmem:[%s10457_s3 + $0x38] sm:$0xf] }
 0x20f   : > { %1442 = vmatmul.bf16.gmra.mxu1 %v7973_v60  ;;  %v6538_v2 = vor.u32 %v6963_v51, %v6537_v53 }
 0x210   : > { %2564 = vmatmul.bf16.gmra.mxu3 %v8379_v36  ;;  %v1157_v59 = vpop.f32.mrf.mxu2  ;;  %v6936_v36 = vld [vmem:[%s10456_s2 + $0x1a8] sm:$0xf0] }
 0x211   : > { %3855 = vmatpush.bf16.msra.mxu3 %v6538_v2  ;;  %v2171_v59 = vrot.slane %v2169_v31, 1  ;;  %v6438_v40 = vor.u32 %v6936_v36, %v6437_v32  ;;  %v6243_v32 = vld [vmem:[%s10456_s2 + $0xcc] sm:$0xf0]  ;;  %v2173_v31 = vshrl.u32 %v10672_v37, 16  ;;  %v2177_v2 = vshll.u32 %v10677_v49, 16 }
 0x213   : > { %v8393_v1 = vpop.f32.mrf.mxu3  ;;  %v8419_v51 = vsel %vm2040_vm1, %v2167_v28, %v2171_v59  ;;  %2790 = vmatpush.bf16.msra.mxu0 %v6438_v40  ;;  %v6385_v28 = vld [vmem:[%s10456_s2 + $0x1b0] sm:$0xf] }
 0x214   : > { %10686 = vst [vmem:[#allocation21_spill] sm:$0xff] %v8393_v1  ;;  %v8395_v22 = vpop.f32.mrf.mxu1  ;;  %v1881_v52 = vpop.f32.mrf.mxu0 }
 0x218   : > { %v1159_v42 = vpop.f32.mrf.mxu2 }
 0x219   : > { %v8406_v1 = vadd.f32 %v1159_v42, %v8105_v33  ;;  %v6907_v33 = vld [vmem:[%s10456_s2 + $0xc4] sm:$0xf]  ;;  %v6938_v42 = vld [vmem:[%s10456_s2 + $0x1b8] sm:$0xf0] }
 0x21a   : > { %v6246_v36 = vor.u32 %v6907_v33, %v6243_v32  ;;  %v6386_v32 = vor.u32 %v6938_v42, %v6385_v28 }
 0x21b   : > { %10687 = vst [vmem:[#allocation81_spill] sm:$0xff] %v8406_v1  ;;  %v8408_v16 = vpop.f32.mrf.mxu3 }
 0x21c   : > { %v8416_v52 = vpop.f32.mrf.mxu1  ;;  %v8421_v43 = vpop.f32.mrf.mxu0  ;;  %1556 = vmatpush.bf16.msra.mxu2 %v6246_v36  ;;  %2359 = vmatpush.bf16.msra.mxu1 %v6386_v32  ;;  %v6377_v32 = vld [vmem:[%s10456_s2 + $0x198] sm:$0xf] }
 0x21d   : > { %10688 = vst [vmem:[#allocation82_spill] sm:$0xff] %v8421_v43  ;;  %1201 = vmatmul.bf16.gmra.mxu2 %v10647_v62 }
 0x21e   : > { %1923 = vmatmul.bf16.gmra.mxu0 %v7830_v58 }
 0x21f   : > { %1447 = vmatmul.bf16.gmra.mxu1 %v8001_v57 }
 0x220   : > { %2569 = vmatmul.bf16.gmra.mxu3 %v8419_v51  ;;  %v1162_v53 = vpop.f32.mrf.mxu2 }
 0x221   : > { %v8434_v40 = vadd.f32 %v1162_v53, %v8122_v29  ;;  %v2175_v29 = vor.u32 %v2173_v31, %v2171_v59  ;;  %v2179_v53 = vrot.slane %v2177_v2, 1 }
 0x223   : > { %10689 = vst [vmem:[#allocation83_spill] sm:$0xff] %v8434_v40  ;;  %v2530_v62 = vpop.f32.mrf.mxu3  ;;  %v8451_v40 = vsel %vm2040_vm1, %v2175_v29, %v2179_v53  ;;  %v6935_v29 = vld [vmem:[%s10456_s2 + $0x1a0] sm:$0xf0] }
 0x224   : > { %v968_v26 = vpop.f32.mrf.mxu1  ;;  %v8444_v33 = vpop.f32.mrf.mxu0  ;;  %10692 = vst [vmem:[#allocation86_spill] sm:$0xff] %v8451_v40 }
 0x225   : > { %10690 = vst [vmem:[#allocation84_spill] sm:$0xff] %v8444_v33  ;;  %v8478_v33 = vld [vmem:[%s7346_s8 + $0x1b8] sm:$0xff] }
 0x228   : > { %v1164_v36 = vpop.f32.mrf.mxu2 }
 0x22b   : > { %v8446_v62 = vpop.f32.mrf.mxu3 }
 0x22c   : > { %10691 = vst [vmem:[#allocation85_spill] sm:$0xff] %v8446_v62  ;;  %v8448_v26 = vpop.f32.mrf.mxu1  ;;  %v1889_v1 = vpop.f32.mrf.mxu0 }
 0x22d   : > { %1206 = vmatmul.bf16.gmra.mxu2 %v10652_v0  ;;  %v2181_v1 = vshrl.u32 %v10677_v49, 16  ;;  %v2185_v0 = vshll.u32 %v10680_v39, 16 }
 0x22e   : > { %1928 = vmatmul.bf16.gmra.mxu0 %v7863_v19 }
 0x22f   : > { %1452 = vmatmul.bf16.gmra.mxu1 %v8028_v41  ;;  %v2183_v36 = vor.u32 %v2181_v1, %v2179_v53 }
 0x230   : > { %2574 = vmatmul.bf16.gmra.mxu3 %v8451_v40  ;;  %v1167_v59 = vpop.f32.mrf.mxu2 }
 0x231   : > { %v8458_v31 = vadd.f32 %v1167_v59, %v8140_v48  ;;  %v6378_v48 = vor.u32 %v6935_v29, %v6377_v32  ;;  %v2187_v59 = vrot.slane %v2185_v0, 1  ;;  %v2189_v29 = vshrl.u32 %v10680_v39, 16 }
 0x233   : > { %10693 = vst [vmem:[#allocation87_spill] sm:$0xff] %v8458_v31  ;;  %v8460_v2 = vpop.f32.mrf.mxu3  ;;  %v8475_v31 = vld [vmem:[%s7346_s8 + $0x1b0] sm:$0xff]  ;;  %2360 = vmatpush.bf16.msra.mxu1 %v6378_v48  ;;  %v8486_v37 = vsel %vm2040_vm1, %v2183_v36, %v2187_v59  ;;  %v2193_v48 = vshll.u32 %v10685_v21, 16  ;;  %v6533_v36 = vld [vmem:[%s10457_s3 + $0x20] sm:$0xf] }
 0x234   : > { %10694 = vst [vmem:[#allocation88_spill] sm:$0xff] %v8460_v2  ;;  %v8462_v28 = vpop.f32.mrf.mxu1  ;;  %v8466_v42 = vpop.f32.mrf.mxu0  ;;  %v1028_v2 = vpack.c.bf16 %v8478_v33, %v8475_v31 }
 0x235   : > { %10695 = vst [vmem:[#allocation89_spill] sm:$0xff] %v8466_v42 }
 0x236   : > { %10697 = vst [vmem:[#allocation91_spill] sm:$0xff] %v8486_v37  ;;  %v1031_v53 = vshrl.u32 %v1028_v2, 16  ;;  %v1034_v1 = vshll.u32 %v1028_v2, 16  ;;  %v6960_v2 = vld [vmem:[%s10457_s3 + $0x28] sm:$0xf0] }
 0x238   : > { %v1169_v43 = vpop.f32.mrf.mxu2  ;;  %v1036_v0 = vrot.slane %v1034_v1, 4 }
 0x239   : > { %v8481_v49 = vadd.f32 %v1169_v43, %v8154_v11 }
 0x23b   : > { %10696 = vst [vmem:[#allocation90_spill] sm:$0xff] %v8481_v49  ;;  %v2537_v42 = vpop.f32.mrf.mxu3  ;;  %v6534_v49 = vor.u32 %v6960_v2, %v6533_v36 }
 0x23c   : > { %v976_v62 = vpop.f32.mrf.mxu1  ;;  %v8488_v32 = vpop.f32.mrf.mxu0 }
 0x23d   : > { %10698 = vst [vmem:[#allocation92_spill] sm:$0xff] %v8488_v32  ;;  %1211 = vmatmul.bf16.gmra.mxu2 %v7826_v63  ;;  %v1033_v62 = vrot.slane %v1031_v53, 3  ;;  %v2191_v32 = vor.u32 %v2189_v29, %v2187_v59  ;;  %v8505_v53 = vld [vmem:[%s7346_s8 + $0x1c0] sm:$0xff]  ;;  %3856 = vmatpush.bf16.msra.mxu3 %v6534_v49  ;;  %v6433_v59 = vld [vmem:[%s10456_s2 + $0x188] sm:$0xf] }
 0x23e   : > { %1933 = vmatmul.bf16.gmra.mxu0 %v7890_v45  ;;  %v6933_v49 = vld [vmem:[%s10456_s2 + $0x190] sm:$0xf0]  ;;  %v1029_v29 = vpack.c.bf16 %v8505_v53, %v8505_v53 }
 0x23f   : > { %1457 = vmatmul.bf16.gmra.mxu1 %v8055_v47 }
 0x240   : > { %2579 = vmatmul.bf16.gmra.mxu3 %v8486_v37  ;;  %v1172_v11 = vpop.f32.mrf.mxu2 }
 0x241   : > { %v1037_v11 = vor.u32 %v1036_v0, %v1033_v62 }
 0x243   : > { %v8494_v43 = vpop.f32.mrf.mxu3  ;;  %v1038_v0 = vsel %vm370_vm0, %v7820_v38, %v1037_v11  ;;  %v1040_v38 = vshrl.u32 %v1029_v29, 16 }
 0x244   : > { %10699 = vst [vmem:[#allocation93_spill] sm:$0xff] %v8494_v43  ;;  %v978_v42 = vpop.f32.mrf.mxu1  ;;  %v1896_v63 = vpop.f32.mrf.mxu0  ;;  %v2195_v43 = vrot.slane %v2193_v48, 1  ;;  %v6434_v48 = vor.u32 %v6933_v49, %v6433_v59 }
 0x245   : > { %v6369_v42 = vld [vmem:[%s10456_s2 + $0x180] sm:$0xf]  ;;  %v6932_v63 = vld [vmem:[%s10456_s2 + $0x188] sm:$0xf0] }
 0x246   : > { %v6370_v62 = vor.u32 %v6932_v63, %v6369_v42  ;;  %v8529_v36 = vsel %vm2040_vm1, %v2191_v32, %v2195_v43  ;;  %2791 = vmatpush.bf16.msra.mxu0 %v6434_v48  ;;  %v1043_v42 = vshll.u32 %v1029_v29, 16  ;;  %v6521_v63 = vld [vmem:[%s10457_s3 + $0xa8] sm:$0xf]  ;;  %v6977_v32 = vld [vmem:[%s10457_s3 + $0xb0] sm:$0xf0]  ;;  %v1042_v29 = vrot.slane %v1040_v38, 3 }
 0x247   : > { %10702 = vst [vmem:[#allocation96_spill] sm:$0xff] %v8529_v36  ;;  %v6522_v49 = vor.u32 %v6977_v32, %v6521_v63 }
 0x248   : > { %v1174_v1 = vpop.f32.mrf.mxu2  ;;  %2361 = vmatpush.bf16.msra.mxu1 %v6370_v62 }
 0x249   : > { %v8514_v39 = vadd.f32 %v1174_v1, %v8178_v23  ;;  %3414 = vmatpush.bf16.msrb.mxu2 %v6522_v49 }
 0x24b   : > { %10700 = vst [vmem:[#allocation94_spill] sm:$0xff] %v8514_v39  ;;  %v8516_v37 = vpop.f32.mrf.mxu3 }
 0x24c   : > { %10701 = vst [vmem:[#allocation95_spill] sm:$0xff] %v8516_v37  ;;  %v1423_v23 = vpop.f32.mrf.mxu1  ;;  %v8534_v1 = vpop.f32.mrf.mxu0  ;;  %v2201_v37 = vshll.u32 %v7830_v58, 16 }
 0x24d   : > { %v8532_v2 = vadd.f32 %v1423_v23, %v8112_v17  ;;  %10703 = vst [vmem:[#allocation97_spill] sm:$0xff] %v8534_v1  ;;  %1216 = vmatmul.bf16.gmra.mxu2 %v1038_v0  ;;  %v10704_v17 = vld [vmem:[#allocation18_spill] sm:$0xff]  ;;  %v1045_v23 = vrot.slane %v1043_v42, 4  ;;  %v2197_v1 = vshrl.u32 %v10685_v21, 16 }
 0x24e   : > { %v1008_v59 = vadd.f32 %v8187_v35, %v10704_v17  ;;  %1938 = vmatmul.bf16.gmra.mxu0 %v7921_v10  ;;  %v2203_v63 = vrot.slane %v2201_v37, 1  ;;  %v6523_v37 = vld [vmem:[%s10457_s3 + $0xb4] sm:$0xf0] }
 0x24f   : > { %1462 = vmatmul.bf16.gmra.mxu1 %v8078_v6  ;;  %v1046_v35 = vor.u32 %v1045_v23, %v1042_v29  ;;  %v2199_v17 = vor.u32 %v2197_v1, %v2195_v43 }
 0x250   : > { %2584 = vmatmul.bf16.gmra.mxu3 %v8529_v36  ;;  %v1177_v62 = vpop.f32.mrf.mxu2 }
 0x251   : > { %v8547_v0 = vadd.f32 %v1177_v62, %v1008_v59  ;;  %v1047_v49 = vsel %vm370_vm0, %v1037_v11, %v1046_v35  ;;  %v8560_v42 = vsel %vm2040_vm1, %v2199_v17, %v2203_v63  ;;  %v2205_v35 = vshrl.u32 %v7830_v58, 16 }
 0x252   : > { %v2209_v17 = vshll.u32 %v7863_v19, 16 }
 0x253   : > { %10705 = vst [vmem:[#allocation18_spill] sm:$0xff] %v8547_v0  ;;  %v2545_v48 = vpop.f32.mrf.mxu3 }
 0x254   : > { %v1425_v39 = vpop.f32.mrf.mxu1  ;;  %v8554_v40 = vpop.f32.mrf.mxu0 }
 0x255   : > { %v8552_v36 = vadd.f32 %v1425_v39, %v8125_v14  ;;  %10706 = vst [vmem:[#allocation98_spill] sm:$0xff] %v8554_v40  ;;  %v6976_v14 = vld [vmem:[%s10457_s3 + $0xac] sm:$0xf]  ;;  %v10707_v39 = vld [vmem:[#allocation22_spill] sm:$0xff] }
 0x256   : > { %v1010_v43 = vadd.f32 %v8211_v12, %v10707_v39  ;;  %v6526_v11 = vor.u32 %v6976_v14, %v6523_v37  ;;  %v10710_v12 = vld [vmem:[#allocation24_spill] sm:$0xff]  ;;  %v2211_v14 = vrot.slane %v2209_v17, 1 }
 0x258   : > { %v1179_v32 = vpop.f32.mrf.mxu2  ;;  %3549 = vmatpush.bf16.msrb.mxu1 %v6526_v11 }
 0x25b   : > { %v8556_v59 = vpop.f32.mrf.mxu3 }
 0x25c   : > { %v1428_v38 = vpop.f32.mrf.mxu1  ;;  %v1904_v62 = vpop.f32.mrf.mxu0 }
 0x25d   : > { %1221 = vmatmul.bf16.gmra.mxu2 %v1047_v49  ;;  %v1011_v38 = vadd.f32 %v8224_v56, %v10710_v12  ;;  %v2207_v62 = vor.u32 %v2205_v35, %v2203_v63  ;;  %v10714_v56 = vld [vmem:[#allocation43_spill] sm:$0xff] }
 0x25e   : > { %1943 = vmatmul.bf16.gmra.mxu0 %v7947_v50 }
 0x25f   : > { %1467 = vmatmul.bf16.gmra.mxu1 %v8103_v7 }
 0x260   : > { %2589 = vmatmul.bf16.gmra.mxu3 %v8560_v42  ;;  %v1182_v1 = vpop.f32.mrf.mxu2 }
 0x261   : > { %v8573_v48 = vadd.f32 %v1182_v1, %v1010_v43  ;;  %v8589_v1 = vsel %vm2040_vm1, %v2207_v62, %v2211_v14 }
 0x263   : > { %10708 = vst [vmem:[#allocation22_spill] sm:$0xff] %v8573_v48  ;;  %v8575_v29 = vpop.f32.mrf.mxu3  ;;  %v7053_v48 = vld [vmem:[%s7346_s8 + $0x1a8] sm:$0xff] }
 0x264   : > { %v1430_v23 = vpop.f32.mrf.mxu1  ;;  %v8582_v49 = vpop.f32.mrf.mxu0  ;;  %v8593_v0 = vpack.c.bf16 %v8475_v31, %v7053_v48  ;;  %v2213_v31 = vshrl.u32 %v7863_v19, 16  ;;  %v2217_v48 = vshll.u32 %v7890_v45, 16 }
 0x265   : > { %v8580_v32 = vadd.f32 %v1430_v23, %v8143_v54  ;;  %10709 = vst [vmem:[#allocation99_spill] sm:$0xff] %v8582_v49  ;;  %v10712_v54 = vld [vmem:[#allocation16_spill] sm:$0xff] }
 0x268   : > { %v1184_v37 = vpop.f32.mrf.mxu2 }
 0x269   : > { %v8586_v39 = vadd.f32 %v1184_v37, %v1011_v38  ;;  %v10715_v38 = vld [vmem:[#allocation26_spill] sm:$0xff]  ;;  %v2215_v37 = vor.u32 %v2213_v31, %v2211_v14  ;;  %v7001_v14 = vld [vmem:[%s10457_s3 + $0x170] sm:$0xf0] }
 0x26a   : > { %v1013_v62 = vadd.f32 %v8256_v30, %v10715_v38 }
 0x26b   : > { %10711 = vst [vmem:[#allocation24_spill] sm:$0xff] %v8586_v39  ;;  %v2552_v43 = vpop.f32.mrf.mxu3 }
 0x26c   : > { %v1433_v11 = vpop.f32.mrf.mxu1  ;;  %v8598_v49 = vpop.f32.mrf.mxu0 }
 0x26d   : > { %v8596_v23 = vadd.f32 %v1433_v11, %v10712_v54  ;;  %10713 = vst [vmem:[#allocation16_spill] sm:$0xff] %v8598_v49  ;;  %1557 = vmatmul.bf16.vlgmr.msra.gmra.mxu2 %v7396_v34  ;;  %v2219_v34 = vrot.slane %v2217_v48, 1 }
 0x26e   : > { %1948 = vmatmul.bf16.gmra.mxu0 %v8593_v0 }
 0x26f   : > { %2362 = vmatmul.bf16.vlgmr.msra.gmra.mxu1 %v10714_v56  ;;  %v6529_v56 = vld [vmem:[%s10457_s3 + $0x8] sm:$0xf]  ;;  %v8627_v48 = vsel %vm2040_vm1, %v2215_v37, %v2219_v34  ;;  %v10721_v37 = vld [vmem:[#allocation28_spill] sm:$0xff] }
 0x270   : > { %2594 = vmatmul.bf16.gmra.mxu3 %v8589_v1  ;;  %v1187_v63 = vpop.f32.mrf.mxu2 }
 0x271   : > { %v6957_v63 = vld [vmem:[%s10457_s3 + $0x10] sm:$0xf0] }
 0x272   : > { %v6530_v30 = vor.u32 %v6957_v63, %v6529_v56  ;;  %v10720_v56 = vld [vmem:[#allocation47_spill] sm:$0xff]  ;;  %v1014_v63 = vadd.f32 %v8270_v44, %v10721_v37  ;;  %v2225_v44 = vshll.u32 %v7921_v10, 16 }
 0x273   : > { %v8604_v35 = vpop.f32.mrf.mxu3 }
 0x274   : > { %v1435_v17 = vpop.f32.mrf.mxu1  ;;  %v1911_v12 = vpop.f32.mrf.mxu0  ;;  %3857 = vmatpush.bf16.msra.mxu3 %v6530_v30  ;;  %v6513_v30 = vld [vmem:[%s10457_s3 + $0x90] sm:$0xf] }
 0x275   : > { %v6649_v17 = vld [vmem:[%s10457_s3 + $0x168] sm:$0xf]  ;;  %v8631_v12 = vpack.c.bf16 %v8505_v53, %v8478_v33 }
 0x276   : > { %v6650_v38 = vor.u32 %v7001_v14, %v6649_v17 }
 0x277   : > { %10717 = vst [vmem:[#allocation26_spill] sm:$0xff] %v8631_v12 }
 0x278   : > { %v1189_v43 = vpop.f32.mrf.mxu2  ;;  %4166 = vmatpush.bf16.msrb.mxu0 %v6650_v38  ;;  %v2221_v38 = vshrl.u32 %v7890_v45, 16 }
 0x279   : > { %v8610_v11 = vadd.f32 %v1189_v43, %v1013_v62  ;;  %v10718_v62 = vld [vmem:[#allocation20_spill] sm:$0xff] }
 0x27b   : > { %10716 = vst [vmem:[#allocation43_spill] sm:$0xff] %v8610_v11  ;;  %v8612_v54 = vpop.f32.mrf.mxu3 }
 0x27c   : > { %v1438_v31 = vpop.f32.mrf.mxu1  ;;  %v8636_v11 = vpop.f32.mrf.mxu0 }
 0x27d   : > { %v8634_v43 = vadd.f32 %v1438_v31, %v10718_v62  ;;  %10719 = vst [vmem:[#allocation20_spill] sm:$0xff] %v8636_v11  ;;  %1560 = vmatmul.bf16.gmra.mxu2 %v7428_v3  ;;  %v6974_v3 = vld [vmem:[%s10457_s3 + $0x98] sm:$0xf0]  ;;  %v10723_v62 = vld [vmem:[#allocation58_spill] sm:$0xff] }
 0x27e   : > { %1953 = vmatmul.bf16.gmra.mxu0 %v8631_v12  ;;  %v6514_v14 = vor.u32 %v6974_v3, %v6513_v30  ;;  %v10725_v3 = vld [vmem:[#allocation50_spill] sm:$0xff] }
 0x27f   : > { %2367 = vmatmul.bf16.gmra.mxu1 %v10720_v56 }
 0x280   : > { %2599 = vmatmul.bf16.gmra.mxu3 %v8627_v48  ;;  %v1192_v33 = vpop.f32.mrf.mxu2  ;;  %3415 = vmatpush.bf16.msrb.mxu2 %v6514_v14  ;;  %v10727_v14 = vld [vmem:[#allocation52_spill] sm:$0xff] }
 0x281   : > { %v8644_v53 = vadd.f32 %v1192_v33, %v1014_v63  ;;  %v2223_v63 = vor.u32 %v2221_v38, %v2219_v34  ;;  %v2227_v33 = vrot.slane %v2225_v44, 1 }
 0x283   : > { %10722 = vst [vmem:[#allocation47_spill] sm:$0xff] %v8644_v53  ;;  %v2560_v17 = vpop.f32.mrf.mxu3  ;;  %v8662_v11 = vsel %vm2040_vm1, %v2223_v63, %v2227_v33  ;;  %v2229_v63 = vshrl.u32 %v7921_v10, 16 }
 0x284   : > { %v1440_v31 = vpop.f32.mrf.mxu1  ;;  %v8657_v37 = vpop.f32.mrf.mxu0 }
 0x285   : > { %v8655_v56 = vadd.f32 %v1440_v31, %v10723_v62  ;;  %10724 = vst [vmem:[#allocation28_spill] sm:$0xff] %v8657_v37  ;;  %v10726_v31 = vld [vmem:[#allocation30_spill] sm:$0xff]  ;;  %v2231_v37 = vor.u32 %v2229_v63, %v2227_v33  ;;  %v2241_v63 = vshll.u32 %v8593_v0, 16 }
 0x286   : > { %v1016_v62 = vadd.f32 %v8302_v15, %v10726_v31  ;;  %v6973_v15 = vld [vmem:[%s10457_s3 + $0x94] sm:$0xf]  ;;  %v6515_v31 = vld [vmem:[%s10457_s3 + $0x9c] sm:$0xf0] }
 0x288   : > { %v1194_v17 = vpop.f32.mrf.mxu2 }
 0x289   : > { %v2233_v17 = vshll.u32 %v7947_v50, 16 }
 0x28b   : > { %v8659_v53 = vpop.f32.mrf.mxu3  ;;  %v2235_v49 = vrot.slane %v2233_v17, 1  ;;  %v10736_v17 = vld [vmem:[#allocation35_spill] sm:$0xff] }
 0x28c   : > { %v1443_v39 = vpop.f32.mrf.mxu1  ;;  %v1919_v30 = vpop.f32.mrf.mxu0 }
 0x28d   : > { %1564 = vmatmul.bf16.gmra.mxu2 %v7439_v20  ;;  %v10730_v20 = vld [vmem:[#allocation61_spill] sm:$0xff]  ;;  %v8692_v10 = vsel %vm2040_vm1, %v2231_v37, %v2235_v49  ;;  %v2237_v37 = vshrl.u32 %v7947_v50, 16 }
 0x28e   : > { %2792 = vmatmul.bf16.vlgmr.msra.gmra.mxu0 %v10727_v14 }
 0x28f   : > { %2372 = vmatmul.bf16.gmra.mxu1 %v10725_v3 }
 0x290   : > { %2604 = vmatmul.bf16.gmra.mxu3 %v8662_v11  ;;  %v1197_v34 = vpop.f32.mrf.mxu2 }
 0x291   : > { %v8670_v38 = vadd.f32 %v1197_v34, %v1016_v62  ;;  %v6518_v62 = vor.u32 %v6973_v15, %v6515_v31  ;;  %v10732_v34 = vld [vmem:[#allocation32_spill] sm:$0xff]  ;;  %v2239_v15 = vor.u32 %v2237_v37, %v2235_v49 }
 0x292   : > { %v6685_v37 = vld [vmem:[%s10457_s3 + $0x170] sm:$0xf] }
 0x293   : > { %10728 = vst [vmem:[#allocation58_spill] sm:$0xff] %v8670_v38  ;;  %v8672_v44 = vpop.f32.mrf.mxu3  ;;  %v1017_v38 = vadd.f32 %v8323_v18, %v10732_v34  ;;  %3550 = vmatpush.bf16.msrb.mxu1 %v6518_v62  ;;  %v10735_v18 = vld [vmem:[#allocation53_spill] sm:$0xff]  ;;  %v6641_v34 = vld [vmem:[%s10457_s3 + $0x150] sm:$0xf] }
 0x294   : > { %10729 = vst [vmem:[#allocation50_spill] sm:$0xff] %v8672_v44  ;;  %v1445_v39 = vpop.f32.mrf.mxu1  ;;  %v8679_v3 = vpop.f32.mrf.mxu0 }
 0x295   : > { %v8677_v30 = vadd.f32 %v1445_v39, %v10730_v20  ;;  %10731 = vst [vmem:[#allocation30_spill] sm:$0xff] %v8679_v3 }
 0x298   : > { %v1199_v12 = vpop.f32.mrf.mxu2 }
 0x299   : > { %v8689_v39 = vadd.f32 %v1199_v12, %v1017_v38 }
 0x29b   : > { %10733 = vst [vmem:[#allocation52_spill] sm:$0xff] %v8689_v39  ;;  %v2567_v20 = vpop.f32.mrf.mxu3 }
 0x29c   : > { %v1448_v3 = vpop.f32.mrf.mxu1  ;;  %v8697_v40 = vpop.f32.mrf.mxu0  ;;  %v6998_v20 = vld [vmem:[%s10457_s3 + $0x158] sm:$0xf0] }
 0x29d   : > { %v8695_v44 = vadd.f32 %v1448_v3, %v8248_v27  ;;  %10734 = vst [vmem:[#allocation61_spill] sm:$0xff] %v8697_v40  ;;  %1569 = vmatmul.bf16.gmra.mxu2 %v7449_v25  ;;  %v1019_v3 = vadd.f32 %v8349_v55, %v10736_v17  ;;  %v2243_v25 = vrot.slane %v2241_v63, 1  ;;  %v7002_v63 = vld [vmem:[%s10457_s3 + $0x178] sm:$0xf0] }
 0x29e   : > { %2797 = vmatmul.bf16.gmra.mxu0 %v10735_v18 }
 0x29f   : > { %2377 = vmatmul.bf16.gmra.mxu1 %v10727_v14 }
 0x2a0   : > { %2609 = vmatmul.bf16.gmra.mxu3 %v8692_v10  ;;  %v1202_v12 = vpop.f32.mrf.mxu2 }
 0x2a1   : > { %v6642_v12 = vor.u32 %v6998_v20, %v6641_v34  ;;  %v6505_v20 = vld [vmem:[%s10457_s3 + $0x78] sm:$0xf] }
 0x2a3   : > { %v8703_v33 = vpop.f32.mrf.mxu3  ;;  %4167 = vmatpush.bf16.msrb.mxu0 %v6642_v12  ;;  %v6971_v12 = vld [vmem:[%s10457_s3 + $0x80] sm:$0xf0] }
 0x2a4   : > { %v1450_v38 = vpop.f32.mrf.mxu1  ;;  %v1926_v27 = vpop.f32.mrf.mxu0 }
 0x2a5   : > { %v8720_v27 = vsel %vm2040_vm1, %v2239_v15, %v2243_v25  ;;  %v6686_v15 = vor.u32 %v7002_v63, %v6685_v37  ;;  %v6506_v37 = vor.u32 %v6971_v12, %v6505_v20  ;;  %v2245_v63 = vshrl.u32 %v8593_v0, 16  ;;  %v10744_v0 = vld [vmem:[#allocation13_spill] sm:$0xff] }
 0x2a7   : > { %4582 = vmatpush.bf16.msrb.mxu3 %v6686_v15  ;;  %3416 = vmatpush.bf16.msrb.mxu2 %v6506_v37  ;;  %v2968_v15 = vld [vmem:[%s8756_s9 + $0x48] sm:$0xff] }
 0x2a8   : > { %v1204_v31 = vpop.f32.mrf.mxu2 }
 0x2a9   : > { %v8709_v14 = vadd.f32 %v1204_v31, %v1019_v3  ;;  %v10740_v3 = vld [vmem:[#allocation15_spill] sm:$0xff] }
 0x2ab   : > { %10737 = vst [vmem:[#allocation32_spill] sm:$0xff] %v8709_v14  ;;  %v8711_v62 = vpop.f32.mrf.mxu3 }
 0x2ac   : > { %v1453_v38 = vpop.f32.mrf.mxu1  ;;  %v8725_v49 = vpop.f32.mrf.mxu0 }
 0x2ad   : > { %v8723_v55 = vadd.f32 %v1453_v38, %v8266_v5  ;;  %10738 = vst [vmem:[#allocation53_spill] sm:$0xff] %v8725_v49  ;;  %1574 = vmatmul.bf16.gmra.mxu2 %v7973_v60  ;;  %v10739_v5 = vld [vmem:[#allocation37_spill] sm:$0xff]  ;;  %v10743_v49 = vld [vmem:[#allocation40_spill] sm:$0xff] }
 0x2ae   : > { %v1020_v17 = vadd.f32 %v8369_v13, %v10739_v5  ;;  %2802 = vmatmul.bf16.gmra.mxu0 %v10740_v3  ;;  %v2967_v5 = vld [vmem:[%s8756_s9 + $0x40] sm:$0xff]  ;;  %v1022_v20 = vadd.f32 %v8395_v22, %v10743_v49 }
 0x2af   : > { %2382 = vmatmul.bf16.gmra.mxu1 %v10735_v18  ;;  %v3052_v14 = vpack.c.bf16 %v2968_v15, %v2967_v5 }
 0x2b0   : > { %2614 = vmatmul.bf16.gmra.mxu3 %v8720_v27  ;;  %v1207_v60 = vpop.f32.mrf.mxu2 }
 0x2b1   : > { %v8739_v31 = vadd.f32 %v1207_v60, %v1020_v17  ;;  %v2970_v60 = vld [vmem:[%s8756_s9 + $0x58] sm:$0xff]  ;;  %v3102_v12 = vshrl.u32 %v3052_v14, 16  ;;  %v3105_v37 = vshll.u32 %v3052_v14, 16 }
 0x2b2   : > { %v6970_v14 = vld [vmem:[%s10457_s3 + $0x7c] sm:$0xf] }
 0x2b3   : > { %10741 = vst [vmem:[#allocation35_spill] sm:$0xff] %v8739_v31  ;;  %v2575_v18 = vpop.f32.mrf.mxu3  ;;  %v3107_v22 = vrot.slane %v3105_v37, 4 }
 0x2b4   : > { %v1455_v34 = vpop.f32.mrf.mxu1  ;;  %v8750_v13 = vpop.f32.mrf.mxu0 }
 0x2b5   : > { %v8748_v38 = vadd.f32 %v1455_v34, %v8283_v4  ;;  %10742 = vst [vmem:[#allocation37_spill] sm:$0xff] %v8750_v13  ;;  %v2969_v4 = vld [vmem:[%s8756_s9 + $0x50] sm:$0xff]  ;;  %v8765_v34 = vor.u32 %v2245_v63, %v2243_v25 }
 0x2b6   : > { %v3053_v13 = vpack.c.bf16 %v2970_v60, %v2969_v4 }
 0x2b8   : > { %v1209_v17 = vpop.f32.mrf.mxu2  ;;  %v3114_v25 = vshll.u32 %v3053_v13, 16 }
 0x2b9   : > { %v3111_v17 = vshrl.u32 %v3053_v13, 16  ;;  %v6507_v13 = vld [vmem:[%s10457_s3 + $0x84] sm:$0xf0] }
 0x2ba   : > { %v6510_v60 = vor.u32 %v6970_v14, %v6507_v13 }
 0x2bb   : > { %v8763_v18 = vpop.f32.mrf.mxu3  ;;  %v3113_v49 = vrot.slane %v3111_v17, 3 }
 0x2bc   : > { %v1458_v31 = vpop.f32.mrf.mxu1  ;;  %v1934_v39 = vpop.f32.mrf.mxu0  ;;  %3551 = vmatpush.bf16.msrb.mxu1 %v6510_v60 }
 0x2bd   : > { %1579 = vmatmul.bf16.gmra.mxu2 %v8001_v57  ;;  %v3104_v39 = vrot.slane %v3102_v12, 3 }
 0x2be   : > { %2807 = vmatmul.bf16.gmra.mxu0 %v10744_v0 }
 0x2bf   : > { %2387 = vmatmul.bf16.gmra.mxu1 %v10740_v3  ;;  %v3116_v3 = vrot.slane %v3114_v25, 4  ;;  %v8790_v37 = vor.u32 %v3107_v22, %v3104_v39  ;;  %v2971_v25 = vld [vmem:[%s8756_s9 + $0x60] sm:$0xff] }
 0x2c0   : > { %2619 = vmatmul.bf16.gmra.mxu3 %v8765_v34  ;;  %v1212_v63 = vpop.f32.mrf.mxu2 }
 0x2c1   : > { %v8773_v31 = vadd.f32 %v1212_v63, %v1022_v20  ;;  %v10748_v20 = vld [vmem:[#allocation42_spill] sm:$0xff]  ;;  %v3117_v17 = vor.u32 %v3116_v3, %v3113_v49  ;;  %v2972_v63 = vld [vmem:[%s8756_s9 + $0x68] sm:$0xff] }
 0x2c2   : > { %v1023_v12 = vadd.f32 %v8416_v52, %v10748_v20  ;;  %10749 = vst [vmem:[#allocation42_spill] sm:$0xff] %v8790_v37  ;;  %v10754_v20 = vld [vmem:[#allocation45_spill] sm:$0xff] }
 0x2c3   : > { %10745 = vst [vmem:[#allocation15_spill] sm:$0xff] %v8773_v31  ;;  %v8775_v5 = vpop.f32.mrf.mxu3  ;;  %v8798_v40 = vsel %vm370_vm0, %v8790_v37, %v3117_v17 }
 0x2c4   : > { %10746 = vst [vmem:[#allocation40_spill] sm:$0xff] %v8775_v5  ;;  %v1460_v57 = vpop.f32.mrf.mxu1  ;;  %v8780_v4 = vpop.f32.mrf.mxu0  ;;  %v3054_v5 = vpack.c.bf16 %v2972_v63, %v2971_v25  ;;  %v2973_v25 = vld [vmem:[%s8756_s9 + $0x70] sm:$0xff] }
 0x2c5   : > { %v8778_v15 = vadd.f32 %v1460_v57, %v8313_v8  ;;  %10747 = vst [vmem:[#allocation13_spill] sm:$0xff] %v8780_v4 }
 0x2c6   : > { %10751 = vst [vmem:[#allocation101_spill] sm:$0xff] %v8798_v40  ;;  %v3120_v39 = vshrl.u32 %v3054_v5, 16  ;;  %v3123_v22 = vshll.u32 %v3054_v5, 16  ;;  %v6633_v5 = vld [vmem:[%s10457_s3 + $0x138] sm:$0xf] }
 0x2c8   : > { %v1214_v8 = vpop.f32.mrf.mxu2 }
 0x2c9   : > { %v8794_v57 = vadd.f32 %v1214_v8, %v1023_v12  ;;  %v1025_v12 = vadd.f32 %v8448_v26, %v10754_v20  ;;  %v10759_v20 = vld [vmem:[#allocation48_spill] sm:$0xff] }
 0x2cb   : > { %10750 = vst [vmem:[#allocation100_spill] sm:$0xff] %v8794_v57  ;;  %v2582_v31 = vpop.f32.mrf.mxu3 }
 0x2cc   : > { %v1463_v4 = vpop.f32.mrf.mxu1  ;;  %v8803_v52 = vpop.f32.mrf.mxu0  ;;  %v10753_v31 = vld [vmem:[#allocation56_spill] sm:$0xff] }
 0x2cd   : > { %v8801_v14 = vadd.f32 %v1463_v4, %v8341_v9  ;;  %10752 = vst [vmem:[#allocation102_spill] sm:$0xff] %v8803_v52  ;;  %1584 = vmatmul.bf16.gmra.mxu2 %v8028_v41  ;;  %v3122_v9 = vrot.slane %v3120_v39, 3  ;;  %v3125_v4 = vrot.slane %v3123_v22, 4  ;;  %v6995_v39 = vld [vmem:[%s10457_s3 + $0x140] sm:$0xf0]  ;;  %v2976_v52 = vld [vmem:[%s8756_s9 + $0x88] sm:$0xff] }
 0x2ce   : > { %2812 = vmatmul.bf16.gmra.mxu0 %v10753_v31  ;;  %v6634_v22 = vor.u32 %v6995_v39, %v6633_v5 }
 0x2cf   : > { %2392 = vmatmul.bf16.gmra.mxu1 %v10744_v0  ;;  %v3126_v41 = vor.u32 %v3125_v4, %v3122_v9  ;;  %v2974_v0 = vld [vmem:[%s8756_s9 + $0x78] sm:$0xff] }
 0x2d0   : > { %3858 = vmatmul.bf16.vlgmr.msra.gmra.mxu3 %v8798_v40  ;;  %v1217_v49 = vpop.f32.mrf.mxu2  ;;  %4168 = vmatpush.bf16.msrb.mxu0 %v6634_v22 }
 0x2d1   : > { %v8826_v26 = vsel %vm370_vm0, %v3117_v17, %v3126_v41  ;;  %v6999_v17 = vld [vmem:[%s10457_s3 + $0x160] sm:$0xf0] }
 0x2d2   : > { %10757 = vst [vmem:[#allocation103_spill] sm:$0xff] %v8826_v26 }
 0x2d3   : > { %v8809_v3 = vpop.f32.mrf.mxu3 }
 0x2d4   : > { %v1465_v13 = vpop.f32.mrf.mxu1  ;;  %v1941_v60 = vpop.f32.mrf.mxu0 }
 0x2d5   : > { %v3055_v13 = vpack.c.bf16 %v2974_v0, %v2973_v25  ;;  %v6681_v60 = vld [vmem:[%s10457_s3 + $0x158] sm:$0xf] }
 0x2d8   : > { %v1219_v8 = vpop.f32.mrf.mxu2 }
 0x2d9   : > { %v8815_v63 = vadd.f32 %v1219_v8, %v1025_v12  ;;  %v10760_v12 = vld [vmem:[#allocation59_spill] sm:$0xff]  ;;  %v3132_v8 = vshll.u32 %v3055_v13, 16 }
 0x2db   : > { %10755 = vst [vmem:[#allocation56_spill] sm:$0xff] %v8815_v63  ;;  %v8817_v57 = vpop.f32.mrf.mxu3 }
 0x2dc   : > { %10756 = vst [vmem:[#allocation45_spill] sm:$0xff] %v8817_v57  ;;  %v1468_v49 = vpop.f32.mrf.mxu1  ;;  %v8831_v4 = vpop.f32.mrf.mxu0  ;;  %v2981_v57 = vld [vmem:[%s8756_s9 + $0xb0] sm:$0xff] }
 0x2dd   : > { %v8829_v9 = vadd.f32 %v1468_v49, %v8365_v46  ;;  %10758 = vst [vmem:[#allocation104_spill] sm:$0xff] %v8831_v4  ;;  %1589 = vmatmul.bf16.gmra.mxu2 %v8055_v47  ;;  %v1026_v46 = vadd.f32 %v8462_v28, %v10759_v20  ;;  %v3129_v47 = vshrl.u32 %v3055_v13, 16  ;;  %v3134_v49 = vrot.slane %v3132_v8, 4 }
 0x2de   : > { %2817 = vmatmul.bf16.gmra.mxu0 %v10760_v12 }
 0x2df   : > { %2397 = vmatmul.bf16.gmra.mxu1 %v10753_v31  ;;  %v6682_v31 = vor.u32 %v6999_v17, %v6681_v60  ;;  %v3131_v22 = vrot.slane %v3129_v47, 3 }
 0x2e0   : > { %3863 = vmatmul.bf16.gmra.mxu3 %v8826_v26  ;;  %v1222_v25 = vpop.f32.mrf.mxu2  ;;  %v2975_v26 = vld [vmem:[%s8756_s9 + $0x80] sm:$0xff] }
 0x2e1   : > { %v8845_v0 = vadd.f32 %v1222_v25, %v1026_v46  ;;  %4583 = vmatpush.bf16.msrb.mxu3 %v6682_v31  ;;  %v3135_v28 = vor.u32 %v3134_v49, %v3131_v22  ;;  %v3056_v17 = vpack.c.bf16 %v2976_v52, %v2975_v26  ;;  %v6497_v46 = vld [vmem:[%s10457_s3 + $0x60] sm:$0xf] }
 0x2e3   : > { %10761 = vst [vmem:[#allocation48_spill] sm:$0xff] %v8845_v0  ;;  %v2590_v5 = vpop.f32.mrf.mxu3  ;;  %v8857_v60 = vsel %vm370_vm0, %v3126_v41, %v3135_v28  ;;  %v10765_v41 = vld [vmem:[#allocation62_spill] sm:$0xff]  ;;  %v3138_v52 = vshrl.u32 %v3056_v17, 16  ;;  %v3141_v26 = vshll.u32 %v3056_v17, 16 }
 0x2e4   : > { %v1470_v39 = vpop.f32.mrf.mxu1  ;;  %v8850_v4 = vpop.f32.mrf.mxu0  ;;  %10764 = vst [vmem:[#allocation106_spill] sm:$0xff] %v8857_v60 }
 0x2e5   : > { %v8848_v63 = vadd.f32 %v1470_v39, %v8376_v24  ;;  %10762 = vst [vmem:[#allocation59_spill] sm:$0xff] %v8850_v4  ;;  %v6968_v24 = vld [vmem:[%s10457_s3 + $0x68] sm:$0xf0]  ;;  %v3140_v39 = vrot.slane %v3138_v52, 3  ;;  %v3143_v22 = vrot.slane %v3141_v26, 4  ;;  %v10773_v4 = vld [vmem:[#allocation54_spill] sm:$0xff] }
 0x2e6   : > { %v6498_v8 = vor.u32 %v6968_v24, %v6497_v46  ;;  %v2977_v46 = vld [vmem:[%s8756_s9 + $0x90] sm:$0xff] }
 0x2e7   : > { %v6499_v52 = vld [vmem:[%s10457_s3 + $0x6c] sm:$0xf0] }
 0x2e8   : > { %v1224_v20 = vpop.f32.mrf.mxu2  ;;  %3417 = vmatpush.bf16.msrb.mxu2 %v6498_v8  ;;  %v6967_v8 = vld [vmem:[%s10457_s3 + $0x64] sm:$0xf] }
 0x2eb   : > { %v8854_v40 = vpop.f32.mrf.mxu3 }
 0x2ec   : > { %10763 = vst [vmem:[#allocation105_spill] sm:$0xff] %v8854_v40  ;;  %v2363_v13 = vpop.f32.mrf.mxu1  ;;  %v1949_v47 = vpop.f32.mrf.mxu0 }
 0x2ed   : > { %1594 = vmatmul.bf16.gmra.mxu2 %v8078_v6  ;;  %v3144_v6 = vor.u32 %v3143_v22, %v3140_v39 }
 0x2ee   : > { %2822 = vmatmul.bf16.gmra.mxu0 %v10765_v41 }
 0x2ef   : > { %2402 = vmatmul.bf16.gmra.mxu1 %v10760_v12  ;;  %v2978_v12 = vld [vmem:[%s8756_s9 + $0x98] sm:$0xff]  ;;  %v8878_v0 = vsel %vm370_vm0, %v3135_v28, %v3144_v6  ;;  %v10770_v28 = vld [vmem:[#allocation66_spill] sm:$0xff] }
 0x2f0   : > { %3868 = vmatmul.bf16.gmra.mxu3 %v8857_v60  ;;  %v1558_v31 = vpop.f32.mrf.mxu2  ;;  %10768 = vst [vmem:[#allocation108_spill] sm:$0xff] %v8878_v0  ;;  %v3057_v17 = vpack.c.bf16 %v2978_v12, %v2977_v46 }
 0x2f1   : > { %v6502_v31 = vor.u32 %v6967_v8, %v6499_v52 }
 0x2f2   : > { %v3147_v39 = vshrl.u32 %v3057_v17, 16  ;;  %v3150_v22 = vshll.u32 %v3057_v17, 16 }
 0x2f3   : > { %v8869_v25 = vpop.f32.mrf.mxu3  ;;  %3552 = vmatpush.bf16.msrb.mxu1 %v6502_v31 }
 0x2f4   : > { %10766 = vst [vmem:[#allocation62_spill] sm:$0xff] %v8869_v25  ;;  %v8871_v5 = vpop.f32.mrf.mxu1  ;;  %v8873_v49 = vpop.f32.mrf.mxu0 }
 0x2f5   : > { %10767 = vst [vmem:[#allocation107_spill] sm:$0xff] %v8873_v49  ;;  %v2980_v49 = vld [vmem:[%s8756_s9 + $0xa8] sm:$0xff] }
 0x2f8   : > { %v1559_v20 = vpop.f32.mrf.mxu2 }
 0x2fb   : > { %v2597_v24 = vpop.f32.mrf.mxu3 }
 0x2fc   : > { %v2368_v47 = vpop.f32.mrf.mxu1  ;;  %v8886_v26 = vpop.f32.mrf.mxu0  ;;  %v3149_v24 = vrot.slane %v3147_v39, 3  ;;  %v6625_v39 = vld [vmem:[%s10457_s3 + $0x120] sm:$0xf] }
 0x2fd   : > { %10769 = vst [vmem:[#allocation109_spill] sm:$0xff] %v8886_v26  ;;  %1599 = vmatmul.bf16.gmra.mxu2 %v8103_v7  ;;  %v3152_v47 = vrot.slane %v3150_v22, 4  ;;  %v2979_v26 = vld [vmem:[%s8756_s9 + $0xa0] sm:$0xff]  ;;  %v6992_v22 = vld [vmem:[%s10457_s3 + $0x128] sm:$0xf0] }
 0x2fe   : > { %2827 = vmatmul.bf16.gmra.mxu0 %v10770_v28 }
 0x2ff   : > { %2407 = vmatmul.bf16.gmra.mxu1 %v10765_v41  ;;  %v3153_v52 = vor.u32 %v3152_v47, %v3149_v24  ;;  %v10775_v47 = vld [vmem:[#allocation2_spill] sm:$0xff] }
 0x300   : > { %3873 = vmatmul.bf16.gmra.mxu3 %v8878_v0  ;;  %v1561_v20 = vpop.f32.mrf.mxu2 }
 0x301   : > { %v8905_v31 = vsel %vm370_vm0, %v3144_v6, %v3153_v52  ;;  %v3058_v20 = vpack.c.bf16 %v2980_v49, %v2979_v26  ;;  %v6996_v49 = vld [vmem:[%s10457_s3 + $0x148] sm:$0xf0]  ;;  %v10776_v6 = vld [vmem:[#allocation65_spill] sm:$0xff] }
 0x302   : > { %10774 = vst [vmem:[#allocation54_spill] sm:$0xff] %v8905_v31 }
 0x303   : > { %v8892_v46 = vpop.f32.mrf.mxu3 }
 0x304   : > { %10771 = vst [vmem:[#allocation66_spill] sm:$0xff] %v8892_v46  ;;  %v8894_v12 = vpop.f32.mrf.mxu1  ;;  %v1956_v8 = vpop.f32.mrf.mxu0 }
 0x308   : > { %v1562_v7 = vpop.f32.mrf.mxu2 }
 0x309   : > { %v1732_v41 = vadd.f32 %v8532_v2, %v1562_v7  ;;  %v6626_v2 = vor.u32 %v6992_v22, %v6625_v39  ;;  %v10777_v7 = vld [vmem:[#allocation69_spill] sm:$0xff]  ;;  %v3159_v39 = vshll.u32 %v3058_v20, 16 }
 0x30b   : > { %v8899_v0 = vpop.f32.mrf.mxu3  ;;  %v1959_v60 = vadd.f32 %v10773_v4, %v1732_v41  ;;  %v6677_v4 = vld [vmem:[%s10457_s3 + $0x140] sm:$0xf]  ;;  %v3156_v41 = vshrl.u32 %v3058_v20, 16  ;;  %4169 = vmatpush.bf16.msrb.mxu0 %v6626_v2  ;;  %v10780_v20 = vld [vmem:[#allocation67_spill] sm:$0xff]  ;;  %v2982_v2 = vld [vmem:[%s8756_s9 + $0xb8] sm:$0xff] }
 0x30c   : > { %10772 = vst [vmem:[#allocation110_spill] sm:$0xff] %v8899_v0  ;;  %v8902_v17 = vpop.f32.mrf.mxu1  ;;  %v2793_v24 = vpop.f32.mrf.mxu0  ;;  %v6678_v22 = vor.u32 %v6996_v49, %v6677_v4 }
 0x30d   : > { %1604 = vmatmul.bf16.gmra.mxu2 %v10775_v47  ;;  %v2624_v8 = vadd.f32 %v2363_v13, %v1959_v60  ;;  %v3158_v25 = vrot.slane %v3156_v41, 3 }
 0x30e   : > { %2832 = vmatmul.bf16.gmra.mxu0 %v10777_v7  ;;  %4584 = vmatpush.bf16.msrb.mxu3 %v6678_v22 }
 0x30f   : > { %2412 = vmatmul.bf16.gmra.mxu1 %v10770_v28  ;;  %v2672_v26 = vadd.f32 %v2624_v8, %v10776_v6  ;;  %v3161_v8 = vrot.slane %v3159_v39, 4  ;;  %v10782_v39 = vld [vmem:[#allocation3_spill] sm:$0xff] }
 0x310   : > { %3878 = vmatmul.bf16.gmra.mxu3 %v8905_v31  ;;  %v1565_v13 = vpop.f32.mrf.mxu2  ;;  %v10779_v31 = vld [vmem:[#allocation55_spill] sm:$0xff] }
 0x311   : > { %v8924_v60 = vadd.f32 %v2793_v24, %v2672_v26  ;;  %v1733_v28 = vadd.f32 %v8552_v36, %v1565_v13  ;;  %v3162_v49 = vor.u32 %v3161_v8, %v3158_v25  ;;  %v10784_v13 = vld [vmem:[#allocation57_spill] sm:$0xff] }
 0x313   : > { %10778 = vst [vmem:[#allocation2_spill] sm:$0xff] %v8924_v60  ;;  %v2605_v47 = vpop.f32.mrf.mxu3  ;;  %v1960_v0 = vadd.f32 %v10779_v31, %v1733_v28  ;;  %v8939_v31 = vsel %vm370_vm0, %v3153_v52, %v3162_v49 }
 0x314   : > { %v2375_v46 = vpop.f32.mrf.mxu1  ;;  %v2795_v6 = vpop.f32.mrf.mxu0 }
 0x315   : > { %v2625_v40 = vadd.f32 %v8871_v5, %v1960_v0  ;;  %v3059_v46 = vpack.c.bf16 %v2982_v2, %v2981_v57  ;;  %v10783_v0 = vld [vmem:[#allocation73_spill] sm:$0xff]  ;;  %v10785_v2 = vld [vmem:[#allocation71_spill] sm:$0xff] }
 0x317   : > { %v2673_v4 = vadd.f32 %v2625_v40, %v10780_v20  ;;  %v6489_v40 = vld [vmem:[%s10457_s3 + $0x48] sm:$0xf]  ;;  %v3165_v25 = vshrl.u32 %v3059_v46, 16  ;;  %v3168_v57 = vshll.u32 %v3059_v46, 16 }
 0x318   : > { %v1567_v37 = vpop.f32.mrf.mxu2 }
 0x319   : > { %v8932_v24 = vadd.f32 %v2795_v6, %v2673_v4  ;;  %v6965_v37 = vld [vmem:[%s10457_s3 + $0x50] sm:$0xf0]  ;;  %v3167_v8 = vrot.slane %v3165_v25, 3  ;;  %v3170_v6 = vrot.slane %v3168_v57, 4 }
 0x31a   : > { %v6490_v5 = vor.u32 %v6965_v37, %v6489_v40  ;;  %v2983_v40 = vld [vmem:[%s8756_s9 + $0xc0] sm:$0xff]  ;;  %v2984_v37 = vld [vmem:[%s8756_s9 + $0xc8] sm:$0xff] }
 0x31b   : > { %10781 = vst [vmem:[#allocation65_spill] sm:$0xff] %v8932_v24  ;;  %v8934_v26 = vpop.f32.mrf.mxu3  ;;  %v3171_v46 = vor.u32 %v3170_v6, %v3167_v8  ;;  %v3060_v57 = vpack.c.bf16 %v2984_v37, %v2983_v40  ;;  %v6491_v8 = vld [vmem:[%s10457_s3 + $0x54] sm:$0xf0] }
 0x31c   : > { %v8936_v36 = vpop.f32.mrf.mxu1  ;;  %v2798_v41 = vpop.f32.mrf.mxu0  ;;  %3418 = vmatpush.bf16.msrb.mxu2 %v6490_v5 }
 0x31d   : > { %1609 = vmatmul.bf16.gmra.mxu2 %v10782_v39  ;;  %v8966_v25 = vsel %vm370_vm0, %v3162_v49, %v3171_v46  ;;  %v10790_v49 = vld [vmem:[#allocation72_spill] sm:$0xff] }
 0x31e   : > { %2837 = vmatmul.bf16.gmra.mxu0 %v10783_v0  ;;  %10788 = vst [vmem:[#allocation55_spill] sm:$0xff] %v8966_v25 }
 0x31f   : > { %2417 = vmatmul.bf16.gmra.mxu1 %v10777_v7 }
 0x320   : > { %3883 = vmatmul.bf16.gmra.mxu3 %v8939_v31  ;;  %v1570_v52 = vpop.f32.mrf.mxu2 }
 0x321   : > { %v1735_v7 = vadd.f32 %v8580_v32, %v1570_v52  ;;  %v10787_v52 = vld [vmem:[#allocation60_spill] sm:$0xff] }
 0x323   : > { %v8952_v22 = vpop.f32.mrf.mxu3  ;;  %v1962_v28 = vadd.f32 %v10784_v13, %v1735_v7 }
 0x324   : > { %v8955_v47 = vpop.f32.mrf.mxu1  ;;  %v2800_v20 = vpop.f32.mrf.mxu0 }
 0x325   : > { %v2627_v4 = vadd.f32 %v8894_v12, %v1962_v28  ;;  %v10789_v12 = vld [vmem:[#allocation4_spill] sm:$0xff] }
 0x327   : > { %v2675_v41 = vadd.f32 %v2627_v4, %v10785_v2 }
 0x328   : > { %v1572_v39 = vpop.f32.mrf.mxu2 }
 0x329   : > { %v8961_v24 = vadd.f32 %v2800_v20, %v2675_v41  ;;  %v1736_v32 = vadd.f32 %v8596_v23, %v1572_v39  ;;  %v6964_v23 = vld [vmem:[%s10457_s3 + $0x4c] sm:$0xf]  ;;  %v3174_v20 = vshrl.u32 %v3060_v57, 16 }
 0x32a   : > { %v6494_v4 = vor.u32 %v6964_v23, %v6491_v8 }
 0x32b   : > { %10786 = vst [vmem:[#allocation69_spill] sm:$0xff] %v8961_v24  ;;  %v2612_v5 = vpop.f32.mrf.mxu3  ;;  %v1963_v7 = vadd.f32 %v10787_v52, %v1736_v32  ;;  %v3176_v40 = vrot.slane %v3174_v20, 3  ;;  %v6989_v20 = vld [vmem:[%s10457_s3 + $0x110] sm:$0xf0] }
 0x32c   : > { %v2383_v13 = vpop.f32.mrf.mxu1  ;;  %v2803_v60 = vpop.f32.mrf.mxu0  ;;  %3553 = vmatpush.bf16.msrb.mxu1 %v6494_v4  ;;  %v10794_v4 = vld [vmem:[#allocation6_spill] sm:$0xff] }
 0x32d   : > { %1614 = vmatmul.bf16.gmra.mxu2 %v10789_v12  ;;  %v2628_v28 = vadd.f32 %v8902_v17, %v1963_v7  ;;  %v3177_v17 = vshll.u32 %v3060_v57, 16  ;;  %v2985_v7 = vld [vmem:[%s8756_s9 + $0xd0] sm:$0xff]  ;;  %v2986_v13 = vld [vmem:[%s8756_s9 + $0xd8] sm:$0xff]  ;;  %v10792_v57 = vld [vmem:[#allocation63_spill] sm:$0xff] }
 0x32e   : > { %2842 = vmatmul.bf16.gmra.mxu0 %v8352_v61 }
 0x32f   : > { %2422 = vmatmul.bf16.gmra.mxu1 %v10783_v0  ;;  %v2676_v6 = vadd.f32 %v2628_v28, %v10790_v49  ;;  %v3179_v37 = vrot.slane %v3177_v17, 4  ;;  %v3061_v49 = vpack.c.bf16 %v2986_v13, %v2985_v7 }
 0x330   : > { %3888 = vmatmul.bf16.gmra.mxu3 %v8966_v25  ;;  %v1575_v0 = vpop.f32.mrf.mxu2  ;;  %v2987_v25 = vld [vmem:[%s8756_s9 + $0xe0] sm:$0xff] }
 0x331   : > { %v8980_v2 = vadd.f32 %v2803_v60, %v2676_v6  ;;  %v3180_v5 = vor.u32 %v3179_v37, %v3176_v40  ;;  %v6617_v6 = vld [vmem:[%s10457_s3 + $0x108] sm:$0xf]  ;;  %v6993_v40 = vld [vmem:[%s10457_s3 + $0x130] sm:$0xf0]  ;;  %v3183_v7 = vshrl.u32 %v3061_v49, 16  ;;  %v3186_v13 = vshll.u32 %v3061_v49, 16 }
 0x332   : > { %v10795_v37 = vld [vmem:[#allocation76_spill] sm:$0xff]  ;;  %v10798_v49 = vld [vmem:[#allocation77_spill] sm:$0xff] }
 0x333   : > { %10791 = vst [vmem:[#allocation67_spill] sm:$0xff] %v8980_v2  ;;  %v8982_v41 = vpop.f32.mrf.mxu3  ;;  %v8995_v8 = vsel %vm370_vm0, %v3171_v46, %v3180_v5  ;;  %v6673_v46 = vld [vmem:[%s10457_s3 + $0x128] sm:$0xf]  ;;  %v3185_v2 = vrot.slane %v3183_v7, 3 }
 0x334   : > { %v8984_v39 = vpop.f32.mrf.mxu1  ;;  %v2805_v32 = vpop.f32.mrf.mxu0  ;;  %10793 = vst [vmem:[#allocation3_spill] sm:$0xff] %v8995_v8 }
 0x338   : > { %v1577_v52 = vpop.f32.mrf.mxu2 }
 0x339   : > { %v1738_v12 = vadd.f32 %v8634_v43, %v1577_v52  ;;  %v6618_v43 = vor.u32 %v6989_v20, %v6617_v6  ;;  %v10796_v52 = vld [vmem:[#allocation79_spill] sm:$0xff]  ;;  %v10797_v6 = vld [vmem:[#allocation64_spill] sm:$0xff] }
 0x33b   : > { %v8989_v28 = vpop.f32.mrf.mxu3  ;;  %v1965_v23 = vadd.f32 %v10792_v57, %v1738_v12  ;;  %v6674_v12 = vor.u32 %v6993_v40, %v6673_v46  ;;  %4170 = vmatpush.bf16.msrb.mxu0 %v6618_v43  ;;  %v2988_v43 = vld [vmem:[%s8756_s9 + $0xe8] sm:$0xff] }
 0x33c   : > { %v8992_v60 = vpop.f32.mrf.mxu1  ;;  %v2808_v17 = vpop.f32.mrf.mxu0 }
 0x33d   : > { %1619 = vmatmul.bf16.gmra.mxu2 %v10794_v4  ;;  %v2630_v0 = vadd.f32 %v8936_v36, %v1965_v23  ;;  %4585 = vmatpush.bf16.msrb.mxu3 %v6674_v12 }
 0x33e   : > { %2847 = vmatmul.bf16.gmra.mxu0 %v10796_v52 }
 0x33f   : > { %2427 = vmatmul.bf16.gmra.mxu1 %v8352_v61  ;;  %v2678_v32 = vadd.f32 %v2630_v0, %v10795_v37  ;;  %v3188_v0 = vrot.slane %v3186_v13, 4  ;;  %v10799_v13 = vld [vmem:[#allocation5_spill] sm:$0xff] }
 0x340   : > { %3893 = vmatmul.bf16.gmra.mxu3 %v8995_v8  ;;  %v1580_v36 = vpop.f32.mrf.mxu2 }
 0x341   : > { %v9015_v61 = vadd.f32 %v2808_v17, %v2678_v32  ;;  %v1739_v57 = vadd.f32 %v8655_v56, %v1580_v36  ;;  %v3189_v40 = vor.u32 %v3188_v0, %v3185_v2  ;;  %v3062_v36 = vpack.c.bf16 %v2988_v43, %v2987_v25  ;;  %v6481_v0 = vld [vmem:[%s10457_s3 + $0x30] sm:$0xf] }
 0x343   : > { %v2620_v23 = vpop.f32.mrf.mxu3  ;;  %v1966_v20 = vadd.f32 %v10797_v6, %v1739_v57  ;;  %v9028_v12 = vsel %vm370_vm0, %v3180_v5, %v3189_v40  ;;  %v10800_v5 = vld [vmem:[#allocation68_spill] sm:$0xff] }
 0x344   : > { %v2390_v4 = vpop.f32.mrf.mxu1  ;;  %v2810_v37 = vpop.f32.mrf.mxu0 }
 0x345   : > { %v2631_v8 = vadd.f32 %v8955_v47, %v1966_v20  ;;  %v3195_v47 = vshll.u32 %v3062_v36, 16 }
 0x347   : > { %v2679_v46 = vadd.f32 %v2631_v8, %v10798_v49  ;;  %v3197_v20 = vrot.slane %v3195_v47, 4  ;;  %v10801_v49 = vld [vmem:[#allocation21_spill] sm:$0xff]  ;;  %v10803_v47 = vld [vmem:[#allocation70_spill] sm:$0xff] }
 0x348   : > { %v1582_v24 = vpop.f32.mrf.mxu2 }
 0x349   : > { %v9023_v17 = vadd.f32 %v2810_v37, %v2679_v46  ;;  %v3192_v24 = vshrl.u32 %v3062_v36, 16  ;;  %v6962_v37 = vld [vmem:[%s10457_s3 + $0x38] sm:$0xf0]  ;;  %v2989_v36 = vld [vmem:[%s8756_s9 + $0xf0] sm:$0xff] }
 0x34b   : > { %v2622_v32 = vpop.f32.mrf.mxu3  ;;  %v3194_v6 = vrot.slane %v3192_v24, 3 }
 0x34c   : > { %v9025_v56 = vpop.f32.mrf.mxu1  ;;  %v2813_v7 = vpop.f32.mrf.mxu0 }
 0x34d   : > { %1624 = vmatmul.bf16.gmra.mxu2 %v10799_v13  ;;  %v3198_v43 = vor.u32 %v3197_v20, %v3194_v6  ;;  %v2990_v7 = vld [vmem:[%s8756_s9 + $0xf8] sm:$0xff]  ;;  %v10805_v20 = vld [vmem:[#allocation86_spill] sm:$0xff] }
 0x34e   : > { %2852 = vmatmul.bf16.gmra.mxu0 %v8419_v51 }
 0x34f   : > { %2432 = vmatmul.bf16.gmra.mxu1 %v10796_v52 }
 0x350   : > { %3898 = vmatmul.bf16.gmra.mxu3 %v9028_v12  ;;  %v1585_v2 = vpop.f32.mrf.mxu2 }
 0x351   : > { %v1741_v8 = vadd.f32 %v8677_v30, %v1585_v2  ;;  %v6482_v30 = vor.u32 %v6962_v37, %v6481_v0 }
 0x353   : > { %v9035_v57 = vpop.f32.mrf.mxu3  ;;  %v1968_v25 = vadd.f32 %v10800_v5, %v1741_v8  ;;  %3419 = vmatpush.bf16.msrb.mxu2 %v6482_v30  ;;  %v9057_v5 = vsel %vm370_vm0, %v3189_v40, %v3198_v43 }
 0x354   : > { %v9038_v23 = vpop.f32.mrf.mxu1  ;;  %v2815_v52 = vpop.f32.mrf.mxu0 }
 0x355   : > { %v2633_v4 = vadd.f32 %v8984_v39, %v1968_v25  ;;  %v3063_v25 = vpack.c.bf16 %v2990_v7, %v2989_v36 }
 0x357   : > { %v2681_v46 = vadd.f32 %v2633_v4, %v10801_v49  ;;  %v10804_v4 = vld [vmem:[#allocation7_spill] sm:$0xff]  ;;  %v3204_v37 = vshll.u32 %v3063_v25, 16 }
 0x358   : > { %v1587_v32 = vpop.f32.mrf.mxu2 }
 0x359   : > { %v9050_v13 = vadd.f32 %v2815_v52, %v2681_v46  ;;  %v1742_v39 = vadd.f32 %v8695_v44, %v1587_v32  ;;  %v3201_v52 = vshrl.u32 %v3063_v25, 16 }
 0x35b   : > { %10802 = vst [vmem:[#allocation73_spill] sm:$0xff] %v9050_v13  ;;  %v9053_v24 = vpop.f32.mrf.mxu3  ;;  %v1969_v2 = vadd.f32 %v10803_v47, %v1742_v39  ;;  %v3203_v32 = vrot.slane %v3201_v52, 3 }
 0x35c   : > { %v2398_v8 = vpop.f32.mrf.mxu1  ;;  %v2818_v0 = vpop.f32.mrf.mxu0 }
 0x35d   : > { %1629 = vmatmul.bf16.gmra.mxu2 %v10804_v4  ;;  %v2634_v6 = vadd.f32 %v8992_v60, %v1969_v2  ;;  %v3206_v60 = vrot.slane %v3204_v37, 4  ;;  %v2991_v2 = vld [vmem:[%s8756_s9 + $0x100] sm:$0xff]  ;;  %v2992_v8 = vld [vmem:[%s8756_s9 + $0x108] sm:$0xff] }
 0x35e   : > { %2857 = vmatmul.bf16.gmra.mxu0 %v10805_v20  ;;  %v10807_v4 = vld [vmem:[#allocation74_spill] sm:$0xff]  ;;  %v3064_v37 = vpack.c.bf16 %v2992_v8, %v2991_v2 }
 0x35f   : > { %2437 = vmatmul.bf16.gmra.mxu1 %v8419_v51  ;;  %v2682_v44 = vadd.f32 %v2634_v6, %v8408_v16  ;;  %v6961_v51 = vld [vmem:[%s10457_s3 + $0x34] sm:$0xf]  ;;  %v6483_v16 = vld [vmem:[%s10457_s3 + $0x3c] sm:$0xf0]  ;;  %v3207_v39 = vor.u32 %v3206_v60, %v3203_v32 }
 0x360   : > { %3903 = vmatmul.bf16.gmra.mxu3 %v9057_v5  ;;  %v1590_v40 = vpop.f32.mrf.mxu2  ;;  %v6486_v7 = vor.u32 %v6961_v51, %v6483_v16  ;;  %v10809_v60 = vld [vmem:[#allocation10_spill] sm:$0xff]  ;;  %v6990_v51 = vld [vmem:[%s10457_s3 + $0x118] sm:$0xf0]  ;;  %v3210_v2 = vshrl.u32 %v3064_v37, 16  ;;  %v3213_v8 = vshll.u32 %v3064_v37, 16 }
 0x361   : > { %v9065_v30 = vadd.f32 %v2818_v0, %v2682_v44  ;;  %v9084_v52 = vsel %vm370_vm0, %v3198_v43, %v3207_v39  ;;  %v6609_v40 = vld [vmem:[%s10457_s3 + $0xf0] sm:$0xf]  ;;  %v10810_v16 = vld [vmem:[#allocation85_spill] sm:$0xff] }
 0x362   : > { %3554 = vmatpush.bf16.msrb.mxu1 %v6486_v7  ;;  %10808 = vst [vmem:[#allocation71_spill] sm:$0xff] %v9084_v52  ;;  %v6669_v43 = vld [vmem:[%s10457_s3 + $0x110] sm:$0xf] }
 0x363   : > { %10806 = vst [vmem:[#allocation57_spill] sm:$0xff] %v9065_v30  ;;  %v3864_v49 = vpop.f32.mrf.mxu3 }
 0x364   : > { %v9067_v46 = vpop.f32.mrf.mxu1  ;;  %v2820_v36 = vpop.f32.mrf.mxu0  ;;  %v6986_v49 = vld [vmem:[%s10457_s3 + $0xf8] sm:$0xf0] }
 0x368   : > { %v1592_v47 = vpop.f32.mrf.mxu2 }
 0x369   : > { %v1744_v25 = vadd.f32 %v8723_v55, %v1592_v47  ;;  %v6610_v55 = vor.u32 %v6986_v49, %v6609_v40  ;;  %v10811_v47 = vld [vmem:[#allocation91_spill] sm:$0xff] }
 0x36a   : > { %v10813_v40 = vld [vmem:[#allocation75_spill] sm:$0xff] }
 0x36b   : > { %v9078_v0 = vpop.f32.mrf.mxu3  ;;  %v1971_v6 = vadd.f32 %v10807_v4, %v1744_v25  ;;  %v6670_v25 = vor.u32 %v6990_v51, %v6669_v43  ;;  %4171 = vmatpush.bf16.msrb.mxu0 %v6610_v55  ;;  %v10814_v43 = vld [vmem:[#allocation88_spill] sm:$0xff] }
 0x36c   : > { %v9081_v44 = vpop.f32.mrf.mxu1  ;;  %v2823_v32 = vpop.f32.mrf.mxu0  ;;  %v2993_v55 = vld [vmem:[%s8756_s9 + $0x110] sm:$0xff] }
 0x36d   : > { %1634 = vmatmul.bf16.gmra.mxu2 %v10809_v60  ;;  %v2636_v36 = vadd.f32 %v9025_v56, %v1971_v6  ;;  %4586 = vmatpush.bf16.msrb.mxu3 %v6670_v25 }
 0x36e   : > { %2862 = vmatmul.bf16.gmra.mxu0 %v10811_v47 }
 0x36f   : > { %2442 = vmatmul.bf16.gmra.mxu1 %v10805_v20  ;;  %v2684_v7 = vadd.f32 %v2636_v36, %v10810_v16  ;;  %v3212_v36 = vrot.slane %v3210_v2, 3  ;;  %v3215_v16 = vrot.slane %v3213_v8, 4  ;;  %v10816_v8 = vld [vmem:[#allocation14_spill] sm:$0xff] }
 0x370   : > { %3908 = vmatmul.bf16.gmra.mxu3 %v9084_v52  ;;  %v1595_v56 = vpop.f32.mrf.mxu2 }
 0x371   : > { %v9104_v20 = vadd.f32 %v2823_v32, %v2684_v7  ;;  %v1745_v4 = vadd.f32 %v8748_v38, %v1595_v56  ;;  %v3216_v52 = vor.u32 %v3215_v16, %v3212_v36  ;;  %v2994_v32 = vld [vmem:[%s8756_s9 + $0x118] sm:$0xff] }
 0x373   : > { %10812 = vst [vmem:[#allocation60_spill] sm:$0xff] %v9104_v20  ;;  %v9107_v6 = vpop.f32.mrf.mxu3  ;;  %v1972_v49 = vadd.f32 %v10813_v40, %v1745_v4  ;;  %v9119_v25 = vsel %vm370_vm0, %v3207_v39, %v3216_v52  ;;  %v3065_v4 = vpack.c.bf16 %v2994_v32, %v2993_v55  ;;  %v10818_v39 = vld [vmem:[#allocation78_spill] sm:$0xff]  ;;  %v6473_v55 = vld [vmem:[%s10457_s3 + $0x18] sm:$0xf] }
 0x374   : > { %v2405_v60 = vpop.f32.mrf.mxu1  ;;  %v2825_v30 = vpop.f32.mrf.mxu0  ;;  %v6959_v32 = vld [vmem:[%s10457_s3 + $0x20] sm:$0xf0] }
 0x375   : > { %v2637_v37 = vadd.f32 %v9038_v23, %v1972_v49  ;;  %v10817_v23 = vld [vmem:[#allocation96_spill] sm:$0xff]  ;;  %v3222_v40 = vshll.u32 %v3065_v4, 16 }
 0x377   : > { %v2685_v51 = vadd.f32 %v2637_v37, %v10814_v43  ;;  %v3224_v43 = vrot.slane %v3222_v40, 4 }
 0x378   : > { %v1597_v13 = vpop.f32.mrf.mxu2 }
 0x379   : > { %v9114_v7 = vadd.f32 %v2825_v30, %v2685_v51  ;;  %v3219_v13 = vshrl.u32 %v3065_v4, 16 }
 0x37b   : > { %10815 = vst [vmem:[#allocation4_spill] sm:$0xff] %v9114_v7  ;;  %v3871_v38 = vpop.f32.mrf.mxu3  ;;  %v3221_v37 = vrot.slane %v3219_v13, 3 }
 0x37c   : > { %v9116_v56 = vpop.f32.mrf.mxu1  ;;  %v2828_v2 = vpop.f32.mrf.mxu0  ;;  %v10819_v38 = vld [vmem:[#allocation93_spill] sm:$0xff] }
 0x37d   : > { %1639 = vmatmul.bf16.gmra.mxu2 %v10816_v8  ;;  %v3225_v2 = vor.u32 %v3224_v43, %v3221_v37 }
 0x37e   : > { %2867 = vmatmul.bf16.gmra.mxu0 %v10817_v23 }
 0x37f   : > { %2447 = vmatmul.bf16.gmra.mxu1 %v10811_v47  ;;  %v9148_v20 = vsel %vm370_vm0, %v3216_v52, %v3225_v2 }
 0x380   : > { %3913 = vmatmul.bf16.gmra.mxu3 %v9119_v25  ;;  %v1600_v30 = vpop.f32.mrf.mxu2 }
 0x381   : > { %v1747_v49 = vadd.f32 %v8778_v15, %v1600_v30  ;;  %v6474_v15 = vor.u32 %v6959_v32, %v6473_v55  ;;  %v2995_v30 = vld [vmem:[%s8756_s9 + $0x120] sm:$0xff] }
 0x383   : > { %v9126_v60 = vpop.f32.mrf.mxu3  ;;  %v1974_v36 = vadd.f32 %v10818_v39, %v1747_v49  ;;  %v2996_v49 = vld [vmem:[%s8756_s9 + $0x128] sm:$0xff]  ;;  %3420 = vmatpush.bf16.msrb.mxu2 %v6474_v15  ;;  %v10820_v39 = vld [vmem:[#allocation80_spill] sm:$0xff] }
 0x384   : > { %v9129_v16 = vpop.f32.mrf.mxu1  ;;  %v2830_v47 = vpop.f32.mrf.mxu0  ;;  %v3066_v55 = vpack.c.bf16 %v2996_v49, %v2995_v30 }
 0x385   : > { %v2639_v51 = vadd.f32 %v9067_v46, %v1974_v36 }
 0x387   : > { %v2687_v4 = vadd.f32 %v2639_v51, %v10819_v38  ;;  %v10821_v51 = vld [vmem:[#allocation17_spill] sm:$0xff] }
 0x388   : > { %v1602_v8 = vpop.f32.mrf.mxu2 }
 0x389   : > { %v9141_v13 = vadd.f32 %v2830_v47, %v2687_v4  ;;  %v1748_v46 = vadd.f32 %v8801_v14, %v1602_v8  ;;  %v10822_v14 = vld [vmem:[#allocation95_spill] sm:$0xff]  ;;  %v3231_v47 = vshll.u32 %v3066_v55, 16 }
 0x38b   : > { %v9144_v40 = vpop.f32.mrf.mxu3  ;;  %v1975_v36 = vadd.f32 %v10820_v39, %v1748_v46  ;;  %v2997_v46 = vld [vmem:[%s8756_s9 + $0x130] sm:$0xff]  ;;  %v2998_v39 = vld [vmem:[%s8756_s9 + $0x138] sm:$0xff] }
 0x38c   : > { %v2413_v7 = vpop.f32.mrf.mxu1  ;;  %v2833_v32 = vpop.f32.mrf.mxu0 }
 0x38d   : > { %1644 = vmatmul.bf16.gmra.mxu2 %v10821_v51  ;;  %v2640_v37 = vadd.f32 %v9081_v44, %v1975_v36  ;;  %v3228_v7 = vshrl.u32 %v3066_v55, 16  ;;  %v3233_v44 = vrot.slane %v3231_v47, 4  ;;  %v6958_v55 = vld [vmem:[%s10457_s3 + $0x1c] sm:$0xf] }
 0x38e   : > { %2872 = vmatmul.bf16.gmra.mxu0 %v8560_v42 }
 0x38f   : > { %2452 = vmatmul.bf16.gmra.mxu1 %v10817_v23  ;;  %v2688_v43 = vadd.f32 %v2640_v37, %v10822_v14  ;;  %v3230_v8 = vrot.slane %v3228_v7, 3  ;;  %v10823_v14 = vld [vmem:[#allocation82_spill] sm:$0xff] }
 0x390   : > { %3918 = vmatmul.bf16.gmra.mxu3 %v9148_v20  ;;  %v1605_v52 = vpop.f32.mrf.mxu2 }
 0x391   : > { %v9156_v15 = vadd.f32 %v2833_v32, %v2688_v43  ;;  %v3234_v49 = vor.u32 %v3233_v44, %v3230_v8  ;;  %v6475_v32 = vld [vmem:[%s10457_s3 + $0x24] sm:$0xf0]  ;;  %v3067_v52 = vpack.c.bf16 %v2998_v39, %v2997_v46 }
 0x392   : > { %v6478_v37 = vor.u32 %v6958_v55, %v6475_v32 }
 0x393   : > { %v3879_v38 = vpop.f32.mrf.mxu3  ;;  %v9175_v47 = vsel %vm370_vm0, %v3225_v2, %v3234_v49  ;;  %v6665_v2 = vld [vmem:[%s10457_s3 + $0xf8] sm:$0xf]  ;;  %v3237_v39 = vshrl.u32 %v3067_v52, 16 }
 0x394   : > { %v9158_v4 = vpop.f32.mrf.mxu1  ;;  %v2835_v30 = vpop.f32.mrf.mxu0  ;;  %v6983_v38 = vld [vmem:[%s10457_s3 + $0xe0] sm:$0xf0]  ;;  %3555 = vmatpush.bf16.msrb.mxu1 %v6478_v37  ;;  %v10824_v37 = vld [vmem:[#allocation84_spill] sm:$0xff] }
 0x398   : > { %v1607_v23 = vpop.f32.mrf.mxu2 }
 0x399   : > { %v1750_v36 = vadd.f32 %v8829_v9, %v1607_v23  ;;  %v6601_v9 = vld [vmem:[%s10457_s3 + $0xd8] sm:$0xf]  ;;  %v6987_v23 = vld [vmem:[%s10457_s3 + $0x100] sm:$0xf0] }
 0x39a   : > { %v6602_v44 = vor.u32 %v6983_v38, %v6601_v9 }
 0x39b   : > { %v9163_v51 = vpop.f32.mrf.mxu3  ;;  %v1977_v43 = vadd.f32 %v10823_v14, %v1750_v36  ;;  %v6666_v36 = vor.u32 %v6987_v23, %v6665_v2 }
 0x39c   : > { %v9172_v7 = vpop.f32.mrf.mxu1  ;;  %v2838_v8 = vpop.f32.mrf.mxu0  ;;  %4172 = vmatpush.bf16.msrb.mxu0 %v6602_v44  ;;  %v2999_v44 = vld [vmem:[%s8756_s9 + $0x140] sm:$0xff] }
 0x39d   : > { %1649 = vmatmul.bf16.gmra.mxu2 %v10685_v21  ;;  %v2642_v30 = vadd.f32 %v9116_v56, %v1977_v43  ;;  %v3240_v21 = vshll.u32 %v3067_v52, 16  ;;  %4587 = vmatpush.bf16.msrb.mxu3 %v6666_v36 }
 0x39e   : > { %2877 = vmatmul.bf16.gmra.mxu0 %v8589_v1 }
 0x39f   : > { %2457 = vmatmul.bf16.gmra.mxu1 %v8560_v42  ;;  %v2690_v46 = vadd.f32 %v2642_v30, %v8556_v59  ;;  %v3239_v59 = vrot.slane %v3237_v39, 3  ;;  %v3242_v9 = vrot.slane %v3240_v21, 4 }
 0x3a0   : > { %3923 = vmatmul.bf16.gmra.mxu3 %v9175_v47  ;;  %v1610_v56 = vpop.f32.mrf.mxu2 }
 0x3a1   : > { %v9195_v42 = vadd.f32 %v2838_v8, %v2690_v46  ;;  %v1751_v55 = vadd.f32 %v8848_v63, %v1610_v56  ;;  %v3243_v2 = vor.u32 %v3242_v9, %v3239_v59  ;;  %v3000_v8 = vld [vmem:[%s8756_s9 + $0x148] sm:$0xff]  ;;  %v10828_v9 = vld [vmem:[#allocation89_spill] sm:$0xff] }
 0x3a3   : > { %v9198_v32 = vpop.f32.mrf.mxu3  ;;  %v1978_v14 = vadd.f32 %v10824_v37, %v1751_v55  ;;  %v9210_v36 = vsel %vm370_vm0, %v3234_v49, %v3243_v2  ;;  %v3068_v55 = vpack.c.bf16 %v3000_v8, %v2999_v44  ;;  %v10829_v44 = vld [vmem:[#allocation83_spill] sm:$0xff] }
 0x3a4   : > { %v2420_v43 = vpop.f32.mrf.mxu1  ;;  %v2840_v38 = vpop.f32.mrf.mxu0  ;;  %v10830_v8 = vld [vmem:[#allocation23_spill] sm:$0xff] }
 0x3a5   : > { %v2643_v52 = vadd.f32 %v9129_v16, %v1978_v14  ;;  %v10827_v16 = vld [vmem:[#allocation19_spill] sm:$0xff]  ;;  %v3246_v37 = vshrl.u32 %v3068_v55, 16  ;;  %v3249_v14 = vshll.u32 %v3068_v55, 16 }
 0x3a7   : > { %v2691_v30 = vadd.f32 %v2643_v52, %v8575_v29  ;;  %v10826_v29 = vld [vmem:[#allocation81_spill] sm:$0xff]  ;;  %v3251_v52 = vrot.slane %v3249_v14, 4 }
 0x3a8   : > { %v1612_v23 = vpop.f32.mrf.mxu2  ;;  %v1705_v21 = vadd.f32 %v10827_v16, %v10826_v29  ;;  %v3001_v16 = vld [vmem:[%s8756_s9 + $0x150] sm:$0xff] }
 0x3a9   : > { %v9205_v46 = vadd.f32 %v2840_v38, %v2691_v30 }
 0x3ab   : > { %10825 = vst [vmem:[#allocation72_spill] sm:$0xff] %v9205_v46  ;;  %v3886_v63 = vpop.f32.mrf.mxu3 }
 0x3ac   : > { %v9207_v56 = vpop.f32.mrf.mxu1  ;;  %v2843_v39 = vpop.f32.mrf.mxu0  ;;  %v1706_v63 = vadd.f32 %v10830_v8, %v10829_v44 }
 0x3ad   : > { %1654 = vmatmul.bf16.gmra.mxu2 %v7830_v58 }
 0x3ae   : > { %2882 = vmatmul.bf16.gmra.mxu0 %v8627_v48 }
 0x3af   : > { %2462 = vmatmul.bf16.gmra.mxu1 %v8589_v1  ;;  %v3248_v1 = vrot.slane %v3246_v37, 3  ;;  %v6465_v37 = vld [vmem:[%s10457_s3] sm:$0xf] }
 0x3b0   : > { %3928 = vmatmul.bf16.gmra.mxu3 %v9210_v36  ;;  %v1615_v43 = vpop.f32.mrf.mxu2 }
 0x3b1   : > { %v1753_v49 = vadd.f32 %v1705_v21, %v1615_v43  ;;  %v3252_v29 = vor.u32 %v3251_v52, %v3248_v1  ;;  %v3002_v21 = vld [vmem:[%s8756_s9 + $0x158] sm:$0xff] }
 0x3b2   : > { %v3069_v52 = vpack.c.bf16 %v3002_v21, %v3001_v16  ;;  %v10835_v21 = vld [vmem:[#allocation25_spill] sm:$0xff] }
 0x3b3   : > { %v9218_v59 = vpop.f32.mrf.mxu3  ;;  %v1980_v38 = vadd.f32 %v10828_v9, %v1753_v49  ;;  %v10832_v9 = vld [vmem:[#allocation92_spill] sm:$0xff]  ;;  %v9241_v1 = vsel %vm370_vm0, %v3243_v2, %v3252_v29 }
 0x3b4   : > { %v9221_v58 = vpop.f32.mrf.mxu1  ;;  %v2845_v30 = vpop.f32.mrf.mxu0  ;;  %v3258_v2 = vshll.u32 %v3069_v52, 16 }
 0x3b5   : > { %v2645_v23 = vadd.f32 %v9158_v4, %v1980_v38  ;;  %v6956_v4 = vld [vmem:[%s10457_s3 + $0x8] sm:$0xf0] }
 0x3b6   : > { %v6466_v14 = vor.u32 %v6956_v4, %v6465_v37 }
 0x3b7   : > { %v2693_v39 = vadd.f32 %v2645_v23, %v8604_v35 }
 0x3b8   : > { %v1617_v55 = vpop.f32.mrf.mxu2  ;;  %3421 = vmatpush.bf16.msrb.mxu2 %v6466_v14 }
 0x3b9   : > { %v9229_v43 = vadd.f32 %v2845_v30, %v2693_v39  ;;  %v1754_v46 = vadd.f32 %v1706_v63, %v1617_v55 }
 0x3bb   : > { %10831 = vst [vmem:[#allocation63_spill] sm:$0xff] %v9229_v43  ;;  %v9231_v49 = vpop.f32.mrf.mxu3  ;;  %v1981_v35 = vadd.f32 %v10832_v9, %v1754_v46  ;;  %v3255_v46 = vshrl.u32 %v3069_v52, 16  ;;  %v3003_v9 = vld [vmem:[%s8756_s9 + $0x160] sm:$0xff]  ;;  %v10836_v52 = vld [vmem:[#allocation97_spill] sm:$0xff] }
 0x3bc   : > { %v2428_v38 = vpop.f32.mrf.mxu1  ;;  %v2848_v30 = vpop.f32.mrf.mxu0 }
 0x3bd   : > { %1659 = vmatmul.bf16.gmra.mxu2 %v7863_v19  ;;  %v2646_v23 = vadd.f32 %v9172_v7, %v1981_v35  ;;  %v3257_v19 = vrot.slane %v3255_v46, 3  ;;  %v3260_v7 = vrot.slane %v3258_v2, 4  ;;  %v6593_v2 = vld [vmem:[%s10457_s3 + $0xc0] sm:$0xf] }
 0x3be   : > { %2887 = vmatmul.bf16.gmra.mxu0 %v8662_v11 }
 0x3bf   : > { %2467 = vmatmul.bf16.gmra.mxu1 %v8627_v48  ;;  %v2694_v44 = vadd.f32 %v2646_v23, %v8612_v54  ;;  %v10834_v48 = vld [vmem:[#allocation87_spill] sm:$0xff]  ;;  %v3261_v4 = vor.u32 %v3260_v7, %v3257_v19 }
 0x3c0   : > { %3933 = vmatmul.bf16.gmra.mxu3 %v9241_v1  ;;  %v1620_v8 = vpop.f32.mrf.mxu2  ;;  %v1708_v37 = vadd.f32 %v10835_v21, %v10834_v48  ;;  %v3004_v54 = vld [vmem:[%s8756_s9 + $0x168] sm:$0xff]  ;;  %v10838_v21 = vld [vmem:[#allocation90_spill] sm:$0xff] }
 0x3c1   : > { %v9249_v63 = vadd.f32 %v2848_v30, %v2694_v44  ;;  %v9263_v44 = vsel %vm370_vm0, %v3252_v29, %v3261_v4  ;;  %v3070_v46 = vpack.c.bf16 %v3004_v54, %v3003_v9  ;;  %v6980_v8 = vld [vmem:[%s10457_s3 + $0xc8] sm:$0xf0]  ;;  %v6467_v29 = vld [vmem:[%s10457_s3 + $0xc] sm:$0xf0]  ;;  %v6661_v9 = vld [vmem:[%s10457_s3 + $0xe0] sm:$0xf] }
 0x3c2   : > { %10837 = vst [vmem:[#allocation76_spill] sm:$0xff] %v9263_v44  ;;  %v6594_v7 = vor.u32 %v6980_v8, %v6593_v2  ;;  %v6984_v54 = vld [vmem:[%s10457_s3 + $0xe8] sm:$0xf0] }
 0x3c3   : > { %10833 = vst [vmem:[#allocation6_spill] sm:$0xff] %v9249_v63  ;;  %v3894_v39 = vpop.f32.mrf.mxu3 }
 0x3c4   : > { %v9251_v55 = vpop.f32.mrf.mxu1  ;;  %v2850_v16 = vpop.f32.mrf.mxu0  ;;  %v6955_v39 = vld [vmem:[%s10457_s3 + $0x4] sm:$0xf]  ;;  %4173 = vmatpush.bf16.msrb.mxu0 %v6594_v7  ;;  %v3006_v7 = vld [vmem:[%s8756_s9 + $0x178] sm:$0xff] }
 0x3c5   : > { %v6470_v48 = vor.u32 %v6955_v39, %v6467_v29  ;;  %v10841_v39 = vld [vmem:[#allocation98_spill] sm:$0xff] }
 0x3c7   : > { %3556 = vmatpush.bf16.msrb.mxu1 %v6470_v48  ;;  %v10842_v48 = vld [vmem:[#allocation50_spill] sm:$0xff] }
 0x3c8   : > { %v1622_v14 = vpop.f32.mrf.mxu2 }
 0x3c9   : > { %v1756_v35 = vadd.f32 %v1708_v37, %v1622_v14  ;;  %v10839_v37 = vld [vmem:[#allocation27_spill] sm:$0xff] }
 0x3ca   : > { %v1709_v14 = vadd.f32 %v10839_v37, %v10838_v21 }
 0x3cb   : > { %v9257_v38 = vpop.f32.mrf.mxu3  ;;  %v1983_v23 = vadd.f32 %v10836_v52, %v1756_v35  ;;  %v3267_v35 = vshll.u32 %v3070_v46, 16 }
 0x3cc   : > { %v9260_v30 = vpop.f32.mrf.mxu1  ;;  %v2853_v19 = vpop.f32.mrf.mxu0 }
 0x3cd   : > { %1664 = vmatmul.bf16.gmra.mxu2 %v7890_v45  ;;  %v2648_v16 = vadd.f32 %v9207_v56, %v1983_v23  ;;  %v3264_v56 = vshrl.u32 %v3070_v46, 16 }
 0x3ce   : > { %2892 = vmatmul.bf16.gmra.mxu0 %v8692_v10 }
 0x3cf   : > { %2472 = vmatmul.bf16.gmra.mxu1 %v8662_v11  ;;  %v2696_v45 = vadd.f32 %v2648_v16, %v8659_v53  ;;  %v6662_v11 = vor.u32 %v6984_v54, %v6661_v9  ;;  %v3266_v53 = vrot.slane %v3264_v56, 3  ;;  %v3269_v16 = vrot.slane %v3267_v35, 4  ;;  %v10845_v35 = vld [vmem:[#allocation33_spill] sm:$0xff] }
 0x3d0   : > { %3938 = vmatmul.bf16.gmra.mxu3 %v9263_v44  ;;  %v1625_v52 = vpop.f32.mrf.mxu2  ;;  %v3005_v44 = vld [vmem:[%s8756_s9 + $0x170] sm:$0xff] }
 0x3d1   : > { %v9291_v23 = vadd.f32 %v2853_v19, %v2696_v45  ;;  %v1757_v2 = vadd.f32 %v1709_v14, %v1625_v52  ;;  %4588 = vmatpush.bf16.msrb.mxu3 %v6662_v11  ;;  %v3270_v54 = vor.u32 %v3269_v16, %v3266_v53  ;;  %v3071_v52 = vpack.c.bf16 %v3006_v7, %v3005_v44  ;;  %v10848_v44 = vld [vmem:[#allocation99_spill] sm:$0xff] }
 0x3d3   : > { %10840 = vst [vmem:[#allocation79_spill] sm:$0xff] %v9291_v23  ;;  %v9293_v8 = vpop.f32.mrf.mxu3  ;;  %v1984_v29 = vadd.f32 %v10841_v39, %v1757_v2  ;;  %v9305_v11 = vsel %vm370_vm0, %v3261_v4, %v3270_v54  ;;  %v3273_v39 = vshrl.u32 %v3071_v52, 16  ;;  %v10854_v23 = vld [vmem:[#allocation16_spill] sm:$0xff] }
 0x3d4   : > { %v2435_v21 = vpop.f32.mrf.mxu1  ;;  %v2855_v37 = vpop.f32.mrf.mxu0  ;;  %10844 = vst [vmem:[#allocation77_spill] sm:$0xff] %v9305_v11 }
 0x3d5   : > { %v2649_v46 = vadd.f32 %v9221_v58, %v1984_v29  ;;  %v10846_v58 = vld [vmem:[#allocation94_spill] sm:$0xff]  ;;  %v3276_v29 = vshll.u32 %v3071_v52, 16 }
 0x3d7   : > { %v2697_v9 = vadd.f32 %v2649_v46, %v10842_v48  ;;  %v3278_v46 = vrot.slane %v3276_v29, 4 }
 0x3d8   : > { %v1627_v63 = vpop.f32.mrf.mxu2 }
 0x3d9   : > { %v9300_v19 = vadd.f32 %v2855_v37, %v2697_v9  ;;  %v10847_v63 = vld [vmem:[#allocation29_spill] sm:$0xff]  ;;  %v10849_v9 = vld [vmem:[#allocation26_spill] sm:$0xff] }
 0x3da   : > { %v1711_v2 = vadd.f32 %v10847_v63, %v10846_v58  ;;  %v2722_v7 = vshll.u32 %v10849_v9, 16 }
 0x3db   : > { %10843 = vst [vmem:[#allocation64_spill] sm:$0xff] %v9300_v19  ;;  %v3901_v14 = vpop.f32.mrf.mxu3  ;;  %v3007_v19 = vld [vmem:[%s8756_s9 + $0x180] sm:$0xff] }
 0x3dc   : > { %v9302_v45 = vpop.f32.mrf.mxu1  ;;  %v2858_v56 = vpop.f32.mrf.mxu0 }
 0x3dd   : > { %1669 = vmatmul.bf16.gmra.mxu2 %v10845_v35  ;;  %v10850_v56 = vld [vmem:[#allocation18_spill] sm:$0xff]  ;;  %v10851_v35 = vld [vmem:[#allocation31_spill] sm:$0xff] }
 0x3de   : > { %2897 = vmatmul.bf16.gmra.mxu0 %v8720_v27  ;;  %v1712_v52 = vadd.f32 %v10851_v35, %v10850_v56 }
 0x3df   : > { %2477 = vmatmul.bf16.gmra.mxu1 %v8692_v10  ;;  %v3275_v10 = vrot.slane %v3273_v39, 3 }
 0x3e0   : > { %3943 = vmatmul.bf16.gmra.mxu3 %v9305_v11  ;;  %v1630_v21 = vpop.f32.mrf.mxu2 }
 0x3e1   : > { %v1759_v4 = vadd.f32 %v1711_v2, %v1630_v21  ;;  %v3279_v63 = vor.u32 %v3278_v46, %v3275_v10  ;;  %v2724_v21 = vrot.slane %v2722_v7, 1  ;;  %v311_v46 = vld [vmem:[%s7346_s8 + $0x1c8] sm:$0xff] }
 0x3e3   : > { %v9313_v53 = vpop.f32.mrf.mxu3  ;;  %v1986_v16 = vadd.f32 %v10848_v44, %v1759_v4  ;;  %v3008_v4 = vld [vmem:[%s8756_s9 + $0x188] sm:$0xff] }
 0x3e4   : > { %v9316_v37 = vpop.f32.mrf.mxu1  ;;  %v2860_v48 = vpop.f32.mrf.mxu0 }
 0x3e5   : > { %v2651_v14 = vadd.f32 %v9251_v55, %v1986_v16  ;;  %v9331_v55 = vsel %vm370_vm0, %v3270_v54, %v3279_v63  ;;  %v3072_v16 = vpack.c.bf16 %v3008_v4, %v3007_v19  ;;  %v2961_v4 = vld [vmem:[%s8756_s9 + $0x10] sm:$0xff] }
 0x3e6   : > { %10855 = vst [vmem:[#allocation21_spill] sm:$0xff] %v9331_v55 }
 0x3e7   : > { %v2699_v58 = vadd.f32 %v2651_v14, %v8703_v33  ;;  %v2725_v33 = vsel %vm2040_vm1, %v8765_v34, %v2724_v21 }
 0x3e8   : > { %v1632_v2 = vpop.f32.mrf.mxu2 }
 0x3e9   : > { %v9325_v44 = vadd.f32 %v2860_v48, %v2699_v58  ;;  %v1760_v39 = vadd.f32 %v1712_v52, %v1632_v2  ;;  %v2726_v58 = vshrl.u32 %v10849_v9, 16 }
 0x3eb   : > { %10852 = vst [vmem:[#allocation5_spill] sm:$0xff] %v9325_v44  ;;  %v9327_v29 = vpop.f32.mrf.mxu3  ;;  %v1987_v11 = vadd.f32 %v10854_v23, %v1760_v39  ;;  %v6651_v23 = vld [vmem:[%s10457_s3 + $0x174] sm:$0xf0] }
 0x3ec   : > { %10853 = vst [vmem:[#allocation68_spill] sm:$0xff] %v9327_v29  ;;  %v2443_v43 = vpop.f32.mrf.mxu1  ;;  %v2863_v56 = vpop.f32.mrf.mxu0  ;;  %v9354_v39 = vld [vmem:[%s8756_s9 + $0x18] sm:$0xff] }
 0x3ed   : > { %1674 = vmatmul.bf16.gmra.mxu2 %v7947_v50  ;;  %v2652_v10 = vadd.f32 %v9260_v30, %v1987_v11  ;;  %v7000_v43 = vld [vmem:[%s10457_s3 + $0x16c] sm:$0xf]  ;;  %v3282_v50 = vshrl.u32 %v3072_v16, 16  ;;  %v3285_v30 = vshll.u32 %v3072_v16, 16  ;;  %v2720_v11 = vpack.c.bf16 %v311_v46, %v311_v46  ;;  %v10857_v16 = vld [vmem:[#allocation22_spill] sm:$0xff] }
 0x3ee   : > { %2902 = vmatmul.bf16.gmra.mxu0 %v2725_v33  ;;  %v6654_v19 = vor.u32 %v7000_v43, %v6651_v23  ;;  %v10858_v33 = vld [vmem:[#allocation34_spill] sm:$0xff]  ;;  %v9364_v43 = vld [vmem:[%s8756_s9 + $0x28] sm:$0xff] }
 0x3ef   : > { %2482 = vmatmul.bf16.gmra.mxu1 %v8720_v27  ;;  %v2700_v54 = vadd.f32 %v2652_v10, %v8711_v62  ;;  %v3284_v35 = vrot.slane %v3282_v50, 3  ;;  %v3287_v62 = vrot.slane %v3285_v30, 4  ;;  %v2730_v2 = vshll.u32 %v2720_v11, 16  ;;  %v9361_v46 = vld [vmem:[%s8756_s9 + $0x20] sm:$0xff]  ;;  %v3009_v30 = vld [vmem:[%s8756_s9 + $0x190] sm:$0xff] }
 0x3f0   : > { %3948 = vmatmul.bf16.gmra.mxu3 %v9331_v55  ;;  %v1635_v27 = vpop.f32.mrf.mxu2  ;;  %4301 = vmatpush.bf16.msra.mxu2 %v6654_v19  ;;  %v1714_v10 = vadd.f32 %v10858_v33, %v10857_v16  ;;  %v3010_v19 = vld [vmem:[%s8756_s9 + $0x198] sm:$0xff]  ;;  %v3049_v11 = vpack.c.bf16 %v9354_v39, %v2961_v4 }
 0x3f1   : > { %v9347_v48 = vadd.f32 %v2863_v56, %v2700_v54  ;;  %v9358_v56 = vor.u32 %v3287_v62, %v3284_v35  ;;  %v2728_v54 = vor.u32 %v2726_v58, %v2724_v21  ;;  %v2732_v50 = vrot.slane %v2730_v2, 1  ;;  %v7024_v58 = vld [vmem:[%s10457_s3 + $0x22c] sm:$0xf]  ;;  %v6779_v2 = vld [vmem:[%s10457_s3 + $0x234] sm:$0xf0] }
 0x3f2   : > { %v3073_v21 = vpack.c.bf16 %v3010_v19, %v3009_v30  ;;  %v10863_v30 = vld [vmem:[#allocation24_spill] sm:$0xff] }
 0x3f3   : > { %10856 = vst [vmem:[#allocation70_spill] sm:$0xff] %v9347_v48  ;;  %v3909_v7 = vpop.f32.mrf.mxu3  ;;  %v9378_v16 = vsel %vm370_vm0, %v3279_v63, %v9358_v56  ;;  %v2733_v33 = vsel %vm2040_vm1, %v2728_v54, %v2732_v50  ;;  %v3079_v63 = vshll.u32 %v3049_v11, 16  ;;  %v10864_v19 = vld [vmem:[#allocation36_spill] sm:$0xff]  ;;  %v6657_v54 = vld [vmem:[%s10457_s3 + $0xc8] sm:$0xf] }
 0x3f4   : > { %v9349_v14 = vpop.f32.mrf.mxu1  ;;  %v2865_v52 = vpop.f32.mrf.mxu0  ;;  %v3050_v7 = vpack.c.bf16 %v9364_v43, %v9361_v46  ;;  %10861 = vst [vmem:[#allocation86_spill] sm:$0xff] %v9378_v16  ;;  %v1715_v48 = vadd.f32 %v10864_v19, %v10863_v30  ;;  %v6981_v50 = vld [vmem:[%s10457_s3 + $0xd0] sm:$0xf0]  ;;  %v6777_v19 = vld [vmem:[%s10457_s3 + $0x228] sm:$0xf] }
 0x3f5   : > { %v10860_v52 = vld [vmem:[#allocation20_spill] sm:$0xff] }
 0x3f6   : > { %v3084_v44 = vshrl.u32 %v3050_v7, 16  ;;  %v3087_v55 = vshll.u32 %v3050_v7, 16 }
 0x3f8   : > { %v1637_v23 = vpop.f32.mrf.mxu2 }
 0x3f9   : > { %v1762_v27 = vadd.f32 %v1714_v10, %v1637_v23  ;;  %v6782_v10 = vor.u32 %v7024_v58, %v6779_v2  ;;  %v10862_v23 = vld [vmem:[#allocation39_spill] sm:$0xff] }
 0x3fb   : > { %v9368_v9 = vpop.f32.mrf.mxu3  ;;  %v1989_v35 = vadd.f32 %v10860_v52, %v1762_v27  ;;  %v3076_v52 = vshrl.u32 %v3049_v11, 16  ;;  %v3291_v11 = vshrl.u32 %v3073_v21, 16  ;;  %5240 = vmatpush.bf16.msra.mxu0 %v6782_v10  ;;  %v3089_v10 = vrot.slane %v3087_v55, 4 }
 0x3fc   : > { %10859 = vst [vmem:[#allocation7_spill] sm:$0xff] %v9368_v9  ;;  %v9374_v62 = vpop.f32.mrf.mxu1  ;;  %v2868_v4 = vpop.f32.mrf.mxu0  ;;  %v2965_v9 = vld [vmem:[%s8756_s9 + $0x30] sm:$0xff] }
 0x3fd   : > { %1679 = vmatmul.bf16.gmra.mxu2 %v10862_v23  ;;  %v2654_v27 = vadd.f32 %v9302_v45, %v1989_v35  ;;  %v6658_v35 = vor.u32 %v6981_v50, %v6657_v54  ;;  %v3078_v30 = vrot.slane %v3076_v52, 3  ;;  %v3293_v54 = vrot.slane %v3291_v11, 3 }
 0x3fe   : > { %2907 = vmatmul.bf16.gmra.mxu0 %v2733_v33  ;;  %v3086_v33 = vrot.slane %v3084_v44, 3  ;;  %v9415_v44 = vld [vmem:[%s8756_s9 + $0x38] sm:$0xff] }
 0x3ff   : > { %2485 = vmatmul.bf16.gmra.mxu1 %v8765_v34  ;;  %v2702_v45 = vadd.f32 %v2654_v27, %v8763_v18  ;;  %v3294_v34 = vshll.u32 %v3073_v21, 16  ;;  %4589 = vmatpush.bf16.msrb.mxu3 %v6658_v35  ;;  %v7025_v18 = vld [vmem:[%s10457_s3 + $0x230] sm:$0xf0]  ;;  %v3081_v21 = vrot.slane %v3079_v63, 4 }
 0x400   : > { %3953 = vmatmul.bf16.gmra.mxu3 %v9378_v16  ;;  %v1640_v58 = vpop.f32.mrf.mxu2  ;;  %v10868_v16 = vld [vmem:[#allocation40_spill] sm:$0xff] }
 0x401   : > { %v9400_v2 = vadd.f32 %v2868_v4, %v2702_v45  ;;  %v1763_v23 = vadd.f32 %v1715_v48, %v1640_v58  ;;  %v6778_v4 = vor.u32 %v7025_v18, %v6777_v19  ;;  %v10867_v48 = vld [vmem:[#allocation28_spill] sm:$0xff]  ;;  %v3296_v50 = vrot.slane %v3294_v34, 4  ;;  %v3011_v19 = vld [vmem:[%s8756_s9 + $0x1a0] sm:$0xff]  ;;  %v3012_v18 = vld [vmem:[%s8756_s9 + $0x1a8] sm:$0xff] }
 0x402   : > { %v3082_v58 = vor.u32 %v3081_v21, %v3078_v30  ;;  %v3051_v34 = vpack.c.bf16 %v9415_v44, %v2965_v9  ;;  %v3074_v30 = vpack.c.bf16 %v3012_v18, %v3011_v19 }
 0x403   : > { %10865 = vst [vmem:[#allocation74_spill] sm:$0xff] %v9400_v2  ;;  %v9402_v7 = vpop.f32.mrf.mxu3  ;;  %v1990_v27 = vadd.f32 %v10867_v48, %v1763_v23  ;;  %5105 = vmatpush.bf16.msra.mxu1 %v6778_v4  ;;  %v3090_v2 = vor.u32 %v3089_v10, %v3086_v33  ;;  %v3297_v63 = vor.u32 %v3296_v50, %v3293_v54  ;;  %v10870_v10 = vld [vmem:[#allocation43_spill] sm:$0xff]  ;;  %v10871_v48 = vld [vmem:[#allocation38_spill] sm:$0xff] }
 0x404   : > { %10866 = vst [vmem:[#allocation10_spill] sm:$0xff] %v9402_v7  ;;  %v2450_v52 = vpop.f32.mrf.mxu1  ;;  %v2870_v45 = vpop.f32.mrf.mxu0  ;;  %v3096_v33 = vshll.u32 %v3051_v34, 16 }
 0x405   : > { %v2655_v35 = vadd.f32 %v9316_v37, %v1990_v27  ;;  %v3091_v11 = vsel %vm370_vm0, %v3082_v58, %v3090_v2  ;;  %v9427_v37 = vsel %vm370_vm0, %v9358_v56, %v3297_v63  ;;  %v1717_v27 = vadd.f32 %v10871_v48, %v10870_v10 }
 0x406   : > { %v3300_v52 = vshrl.u32 %v3074_v30, 16  ;;  %v3303_v56 = vshll.u32 %v3074_v30, 16  ;;  %v10874_v30 = vld [vmem:[#allocation41_spill] sm:$0xff] }
 0x407   : > { %v2703_v7 = vadd.f32 %v2655_v35, %v10868_v16  ;;  %v9431_v16 = vpack.c.bf16 %v9361_v46, %v9354_v39  ;;  %v10872_v35 = vld [vmem:[#allocation30_spill] sm:$0xff] }
 0x408   : > { %v1642_v55 = vpop.f32.mrf.mxu2  ;;  %v3302_v19 = vrot.slane %v3300_v52, 3  ;;  %v3305_v18 = vrot.slane %v3303_v56, 4  ;;  %v10875_v56 = vld [vmem:[#allocation61_spill] sm:$0xff] }
 0x409   : > { %v9419_v29 = vadd.f32 %v2870_v45, %v2703_v7  ;;  %10869 = vst [vmem:[#allocation85_spill] sm:$0xff] %v9431_v16  ;;  %v3093_v7 = vshrl.u32 %v3051_v34, 16  ;;  %v3098_v45 = vrot.slane %v3096_v33, 4  ;;  %v3014_v33 = vld [vmem:[%s8756_s9 + $0x1b8] sm:$0xff] }
 0x40b   : > { %v3916_v23 = vpop.f32.mrf.mxu3  ;;  %v3095_v46 = vrot.slane %v3093_v7, 3  ;;  %v3013_v7 = vld [vmem:[%s8756_s9 + $0x1b0] sm:$0xff] }
 0x40c   : > { %v9423_v4 = vpop.f32.mrf.mxu1  ;;  %v2873_v21 = vpop.f32.mrf.mxu0 }
 0x40d   : > { %3422 = vmatmul.bf16.vlgmr.msrb.gmra.mxu2 %v3091_v11  ;;  %v3099_v34 = vor.u32 %v3098_v45, %v3095_v46  ;;  %v10873_v21 = vld [vmem:[#allocation47_spill] sm:$0xff] }
 0x40e   : > { %4174 = vmatmul.bf16.vlgmr.msrb.gmra.mxu0 %v9431_v16  ;;  %v1718_v10 = vadd.f32 %v10874_v30, %v10873_v21 }
 0x40f   : > { %3557 = vmatmul.bf16.vlgmr.msrb.gmra.mxu1 %v3091_v11  ;;  %v3100_v52 = vsel %vm370_vm0, %v3090_v2, %v3099_v34 }
 0x410   : > { %3958 = vmatmul.bf16.gmra.mxu3 %v9427_v37  ;;  %v1645_v54 = vpop.f32.mrf.mxu2 }
 0x411   : > { %v1765_v50 = vadd.f32 %v1717_v27, %v1645_v54  ;;  %v9446_v27 = vor.u32 %v3305_v18, %v3302_v19 }
 0x413   : > { %v9437_v39 = vpop.f32.mrf.mxu3  ;;  %v1992_v58 = vadd.f32 %v10872_v35, %v1765_v50  ;;  %v9458_v45 = vsel %vm370_vm0, %v3297_v63, %v9446_v27 }
 0x414   : > { %v9440_v55 = vpop.f32.mrf.mxu1  ;;  %v2875_v23 = vpop.f32.mrf.mxu0 }
 0x415   : > { %v2657_v11 = vadd.f32 %v9349_v14, %v1992_v58  ;;  %v3780_v58 = vpack.c.bf16 %v3014_v33, %v3013_v7  ;;  %v6643_v7 = vld [vmem:[%s10457_s3 + $0x15c] sm:$0xf0] }
 0x417   : > { %v2705_v48 = vadd.f32 %v2657_v11, %v8809_v3  ;;  %v9461_v3 = vpack.c.bf16 %v2965_v9, %v9364_v43  ;;  %v3783_v11 = vshrl.u32 %v3780_v58, 16  ;;  %v3786_v21 = vshll.u32 %v3780_v58, 16  ;;  %v3015_v58 = vld [vmem:[%s8756_s9 + $0x1c0] sm:$0xff] }
 0x418   : > { %v1647_v54 = vpop.f32.mrf.mxu2 }
 0x419   : > { %v9450_v16 = vadd.f32 %v2875_v23, %v2705_v48  ;;  %v1766_v50 = vadd.f32 %v1718_v10, %v1647_v54  ;;  %10876 = vst [vmem:[#allocation91_spill] sm:$0xff] %v9461_v3  ;;  %v10877_v23 = vld [vmem:[#allocation45_spill] sm:$0xff]  ;;  %v3785_v10 = vrot.slane %v3783_v11, 3  ;;  %v3788_v48 = vrot.slane %v3786_v21, 4  ;;  %v6997_v54 = vld [vmem:[%s10457_s3 + $0x154] sm:$0xf] }
 0x41a   : > { %v6646_v33 = vor.u32 %v6997_v54, %v6643_v7  ;;  %v10882_v11 = vld [vmem:[#allocation53_spill] sm:$0xff] }
 0x41b   : > { %v9452_v35 = vpop.f32.mrf.mxu3  ;;  %v1993_v14 = vadd.f32 %v10875_v56, %v1766_v50  ;;  %v10879_v50 = vld [vmem:[#allocation58_spill] sm:$0xff] }
 0x41c   : > { %v2458_v46 = vpop.f32.mrf.mxu1  ;;  %v2878_v19 = vpop.f32.mrf.mxu0  ;;  %4302 = vmatpush.bf16.msra.mxu2 %v6646_v33  ;;  %v10884_v33 = vld [vmem:[#allocation52_spill] sm:$0xff] }
 0x41d   : > { %3427 = vmatmul.bf16.gmra.mxu2 %v3100_v52  ;;  %v2658_v18 = vadd.f32 %v9374_v62, %v1993_v14  ;;  %v3789_v14 = vor.u32 %v3788_v48, %v3785_v10  ;;  %v3781_v10 = vpack.c.bf16 %v3015_v58, %v3015_v58 }
 0x41e   : > { %4179 = vmatmul.bf16.gmra.mxu0 %v9461_v3 }
 0x41f   : > { %3560 = vmatmul.bf16.gmra.mxu1 %v3100_v52  ;;  %v2706_v2 = vadd.f32 %v2658_v18, %v10877_v23  ;;  %v10880_v52 = vld [vmem:[#allocation44_spill] sm:$0xff]  ;;  %v10881_v23 = vld [vmem:[#allocation42_spill] sm:$0xff] }
 0x420   : > { %3963 = vmatmul.bf16.gmra.mxu3 %v9458_v45  ;;  %v1650_v63 = vpop.f32.mrf.mxu2  ;;  %v1720_v56 = vadd.f32 %v10880_v52, %v10879_v50  ;;  %v7021_v52 = vld [vmem:[%s10457_s3 + $0x214] sm:$0xf] }
 0x421   : > { %v9467_v30 = vadd.f32 %v2878_v19, %v2706_v2  ;;  %v3109_v2 = vsel %vm370_vm0, %v3099_v34, %v10881_v23  ;;  %v10885_v34 = vld [vmem:[#allocation46_spill] sm:$0xff] }
 0x422   : > { %v1721_v50 = vadd.f32 %v10885_v34, %v10884_v33  ;;  %v10888_v34 = vld [vmem:[#allocation37_spill] sm:$0xff] }
 0x423   : > { %10878 = vst [vmem:[#allocation75_spill] sm:$0xff] %v9467_v30  ;;  %v3924_v43 = vpop.f32.mrf.mxu3  ;;  %v10891_v30 = vld [vmem:[#allocation101_spill] sm:$0xff] }
 0x424   : > { %v9469_v9 = vpop.f32.mrf.mxu1  ;;  %v2880_v62 = vpop.f32.mrf.mxu0  ;;  %v3790_v43 = vsel %vm370_vm0, %v9446_v27, %v3789_v14 }
 0x425   : > { %v7054_v62 = vld [vmem:[%s8756_s9 + $0x40] sm:$0xff] }
 0x426   : > { %v9491_v54 = vpack.c.bf16 %v7054_v62, %v9415_v44  ;;  %v6813_v44 = vld [vmem:[%s10457_s3 + $0x230] sm:$0xf] }
 0x428   : > { %v1652_v46 = vpop.f32.mrf.mxu2  ;;  %10883 = vst [vmem:[#allocation88_spill] sm:$0xff] %v9491_v54 }
 0x429   : > { %v1768_v19 = vadd.f32 %v1720_v56, %v1652_v46  ;;  %v6771_v56 = vld [vmem:[%s10457_s3 + $0x21c] sm:$0xf0]  ;;  %v10886_v46 = vld [vmem:[#allocation105_spill] sm:$0xff] }
 0x42a   : > { %v6774_v23 = vor.u32 %v7021_v52, %v6771_v56  ;;  %v6769_v52 = vld [vmem:[%s10457_s3 + $0x210] sm:$0xf] }
 0x42b   : > { %v9480_v18 = vpop.f32.mrf.mxu3  ;;  %v1995_v21 = vadd.f32 %v10882_v11, %v1768_v19  ;;  %v3795_v19 = vshll.u32 %v3781_v10, 16 }
 0x42c   : > { %v9485_v63 = vpop.f32.mrf.mxu1  ;;  %v2883_v48 = vpop.f32.mrf.mxu0  ;;  %5241 = vmatpush.bf16.msra.mxu0 %v6774_v23 }
 0x42d   : > { %3432 = vmatmul.bf16.gmra.mxu2 %v3109_v2  ;;  %v2660_v7 = vadd.f32 %v9423_v4, %v1995_v21  ;;  %v3792_v4 = vshrl.u32 %v3781_v10, 16  ;;  %v3797_v10 = vrot.slane %v3795_v19, 4 }
 0x42e   : > { %4184 = vmatmul.bf16.gmra.mxu0 %v9491_v54 }
 0x42f   : > { %3564 = vmatmul.bf16.gmra.mxu1 %v3109_v2  ;;  %v2708_v58 = vadd.f32 %v2660_v7, %v10886_v46  ;;  %v7026_v2 = vld [vmem:[%s10457_s3 + $0x238] sm:$0xf0]  ;;  %v3794_v54 = vrot.slane %v3792_v4, 3 }
 0x430   : > { %3968 = vmatmul.bf16.gmra.mxu3 %v3790_v43  ;;  %v1655_v11 = vpop.f32.mrf.mxu2  ;;  %v6814_v21 = vor.u32 %v7026_v2, %v6813_v44 }
 0x431   : > { %v9510_v43 = vadd.f32 %v2883_v48, %v2708_v58  ;;  %v1769_v62 = vadd.f32 %v1721_v50, %v1655_v11  ;;  %v7022_v48 = vld [vmem:[%s10457_s3 + $0x218] sm:$0xf0]  ;;  %v10889_v58 = vld [vmem:[#allocation62_spill] sm:$0xff]  ;;  %v3798_v2 = vor.u32 %v3797_v10, %v3794_v54 }
 0x432   : > { %5535 = vmatpush.bf16.msra.mxu3 %v6814_v21  ;;  %v6770_v56 = vor.u32 %v7022_v48, %v6769_v52  ;;  %v10894_v48 = vld [vmem:[#allocation13_spill] sm:$0xff] }
 0x433   : > { %10887 = vst [vmem:[#allocation14_spill] sm:$0xff] %v9510_v43  ;;  %v9512_v33 = vpop.f32.mrf.mxu3  ;;  %v1996_v7 = vadd.f32 %v10888_v34, %v1769_v62  ;;  %v3799_v62 = vsel %vm370_vm0, %v3789_v14, %v3798_v2  ;;  %v7055_v34 = vld [vmem:[%s8756_s9 + $0x48] sm:$0xff]  ;;  %v10897_v2 = vld [vmem:[#allocation66_spill] sm:$0xff] }
 0x434   : > { %v2465_v46 = vpop.f32.mrf.mxu1  ;;  %v2885_v50 = vpop.f32.mrf.mxu0  ;;  %5106 = vmatpush.bf16.msra.mxu1 %v6770_v56 }
 0x435   : > { %v2661_v44 = vadd.f32 %v9440_v55, %v1996_v7  ;;  %v7056_v46 = vld [vmem:[%s8756_s9 + $0x50] sm:$0xff]  ;;  %v10893_v7 = vld [vmem:[#allocation49_spill] sm:$0xff] }
 0x436   : > { %v9528_v43 = vpack.c.bf16 %v7056_v46, %v7055_v34  ;;  %v10892_v55 = vld [vmem:[#allocation32_spill] sm:$0xff] }
 0x437   : > { %v2709_v23 = vadd.f32 %v2661_v44, %v10889_v58  ;;  %v1723_v54 = vadd.f32 %v10893_v7, %v10892_v55  ;;  %v10896_v58 = vld [vmem:[#allocation51_spill] sm:$0xff]  ;;  %v10899_v55 = vld [vmem:[#allocation102_spill] sm:$0xff] }
 0x438   : > { %v1657_v11 = vpop.f32.mrf.mxu2 }
 0x439   : > { %v9523_v4 = vadd.f32 %v2885_v50, %v2709_v23 }
 0x43b   : > { %10890 = vst [vmem:[#allocation96_spill] sm:$0xff] %v9523_v4  ;;  %v3931_v19 = vpop.f32.mrf.mxu3 }
 0x43c   : > { %v2468_v21 = vpop.f32.mrf.mxu1  ;;  %v2888_v3 = vpop.f32.mrf.mxu0 }
 0x43d   : > { %3437 = vmatmul.bf16.gmra.mxu2 %v10891_v30 }
 0x43e   : > { %4189 = vmatmul.bf16.gmra.mxu0 %v9528_v43 }
 0x43f   : > { %3569 = vmatmul.bf16.gmra.mxu1 %v10891_v30  ;;  %v10895_v30 = vld [vmem:[#allocation35_spill] sm:$0xff] }
 0x440   : > { %3973 = vmatmul.bf16.gmra.mxu3 %v3799_v62  ;;  %v1660_v10 = vpop.f32.mrf.mxu2  ;;  %v1724_v23 = vadd.f32 %v10896_v58, %v10895_v30 }
 0x441   : > { %v1771_v52 = vadd.f32 %v1723_v54, %v1660_v10  ;;  %v7057_v10 = vld [vmem:[%s8756_s9 + $0x58] sm:$0xff] }
 0x443   : > { %v9535_v14 = vpop.f32.mrf.mxu3  ;;  %v1998_v50 = vadd.f32 %v10894_v48, %v1771_v52  ;;  %v7058_v52 = vld [vmem:[%s8756_s9 + $0x60] sm:$0xff] }
 0x444   : > { %v9538_v56 = vpop.f32.mrf.mxu1  ;;  %v2890_v3 = vpop.f32.mrf.mxu0  ;;  %v9551_v48 = vpack.c.bf16 %v7058_v52, %v7057_v10 }
 0x445   : > { %v2663_v44 = vadd.f32 %v9469_v9, %v1998_v50  ;;  %v10900_v9 = vld [vmem:[#allocation103_spill] sm:$0xff] }
 0x447   : > { %v2711_v11 = vadd.f32 %v2663_v44, %v10897_v2 }
 0x448   : > { %v1662_v19 = vpop.f32.mrf.mxu2 }
 0x449   : > { %v9544_v62 = vadd.f32 %v2890_v3, %v2711_v11  ;;  %v1772_v34 = vadd.f32 %v1724_v23, %v1662_v19  ;;  %v10901_v3 = vld [vmem:[#allocation110_spill] sm:$0xff]  ;;  %v6635_v19 = vld [vmem:[%s10457_s3 + $0x144] sm:$0xf0] }
 0x44b   : > { %10898 = vst [vmem:[#allocation78_spill] sm:$0xff] %v9544_v62  ;;  %v9546_v46 = vpop.f32.mrf.mxu3  ;;  %v1999_v7 = vadd.f32 %v10899_v55, %v1772_v34  ;;  %v10903_v55 = vld [vmem:[#allocation15_spill] sm:$0xff]  ;;  %v10914_v62 = vld [vmem:[#allocation108_spill] sm:$0xff] }
 0x44c   : > { %v2473_v54 = vpop.f32.mrf.mxu1  ;;  %v2893_v4 = vpop.f32.mrf.mxu0 }
 0x44d   : > { %3442 = vmatmul.bf16.gmra.mxu2 %v10900_v9  ;;  %v2664_v50 = vadd.f32 %v9485_v63, %v1999_v7  ;;  %v6994_v63 = vld [vmem:[%s10457_s3 + $0x13c] sm:$0xf]  ;;  %v10904_v7 = vld [vmem:[#allocation11_spill] sm:$0xff] }
 0x44e   : > { %4194 = vmatmul.bf16.gmra.mxu0 %v9551_v48  ;;  %v6638_v34 = vor.u32 %v6994_v63, %v6635_v19  ;;  %v1726_v54 = vadd.f32 %v10904_v7, %v10903_v55  ;;  %v6809_v19 = vld [vmem:[%s10457_s3 + $0x218] sm:$0xf]  ;;  %v10908_v7 = vld [vmem:[#allocation100_spill] sm:$0xff] }
 0x44f   : > { %3574 = vmatmul.bf16.gmra.mxu1 %v10900_v9  ;;  %v2712_v44 = vadd.f32 %v2664_v50, %v10901_v3  ;;  %v10905_v9 = vld [vmem:[#allocation104_spill] sm:$0xff] }
 0x450   : > { %4590 = vmatmul.bf16.vlgmr.msrb.gmra.mxu3 %v9528_v43  ;;  %v1665_v30 = vpop.f32.mrf.mxu2  ;;  %4303 = vmatpush.bf16.msra.mxu2 %v6638_v34  ;;  %v7023_v34 = vld [vmem:[%s10457_s3 + $0x220] sm:$0xf0] }
 0x451   : > { %v9559_v58 = vadd.f32 %v2893_v4, %v2712_v44  ;;  %v7059_v44 = vld [vmem:[%s8756_s9 + $0x68] sm:$0xff]  ;;  %v7060_v30 = vld [vmem:[%s8756_s9 + $0x70] sm:$0xff] }
 0x453   : > { %10902 = vst [vmem:[#allocation93_spill] sm:$0xff] %v9559_v58  ;;  %v3939_v23 = vpop.f32.mrf.mxu3  ;;  %v10907_v58 = vld [vmem:[#allocation106_spill] sm:$0xff] }
 0x454   : > { %v9561_v2 = vpop.f32.mrf.mxu1  ;;  %v2895_v11 = vpop.f32.mrf.mxu0  ;;  %v9578_v23 = vpack.c.bf16 %v7060_v30, %v7059_v44  ;;  %v7018_v44 = vld [vmem:[%s10457_s3 + $0x1fc] sm:$0xf] }
 0x456   : > { %10906 = vst [vmem:[#allocation80_spill] sm:$0xff] %v9578_v23 }
 0x458   : > { %v1667_v10 = vpop.f32.mrf.mxu2 }
 0x459   : > { %v1774_v4 = vadd.f32 %v1726_v54, %v1667_v10  ;;  %v10909_v54 = vld [vmem:[#allocation8_spill] sm:$0xff] }
 0x45a   : > { %v1727_v10 = vadd.f32 %v10909_v54, %v10908_v7  ;;  %v7019_v7 = vld [vmem:[%s10457_s3 + $0x200] sm:$0xf0] }
 0x45b   : > { %v9571_v52 = vpop.f32.mrf.mxu3  ;;  %v2001_v50 = vadd.f32 %v10905_v9, %v1774_v4 }
 0x45c   : > { %v9574_v3 = vpop.f32.mrf.mxu1  ;;  %v2898_v11 = vpop.f32.mrf.mxu0 }
 0x45d   : > { %3447 = vmatmul.bf16.gmra.mxu2 %v10907_v58  ;;  %v2666_v63 = vadd.f32 %v2468_v21, %v2001_v50  ;;  %v6810_v21 = vor.u32 %v7023_v34, %v6809_v19 }
 0x45e   : > { %4199 = vmatmul.bf16.gmra.mxu0 %v9578_v23 }
 0x45f   : > { %3579 = vmatmul.bf16.gmra.mxu1 %v10907_v58  ;;  %v2714_v55 = vadd.f32 %v2666_v63, %v8934_v26  ;;  %5536 = vmatpush.bf16.msra.mxu3 %v6810_v21  ;;  %v6763_v26 = vld [vmem:[%s10457_s3 + $0x204] sm:$0xf0] }
 0x460   : > { %4595 = vmatmul.bf16.gmra.mxu3 %v9551_v48  ;;  %v1670_v4 = vpop.f32.mrf.mxu2  ;;  %v6766_v30 = vor.u32 %v7018_v44, %v6763_v26  ;;  %v10911_v63 = vld [vmem:[#allocation59_spill] sm:$0xff] }
 0x461   : > { %v9593_v58 = vadd.f32 %v2898_v11, %v2714_v55  ;;  %v1775_v9 = vadd.f32 %v1727_v10, %v1670_v4  ;;  %v6761_v55 = vld [vmem:[%s10457_s3 + $0x1f8] sm:$0xf] }
 0x462   : > { %5242 = vmatpush.bf16.msra.mxu0 %v6766_v30  ;;  %v6762_v10 = vor.u32 %v7019_v7, %v6761_v55  ;;  %v7061_v30 = vld [vmem:[%s8756_s9 + $0x78] sm:$0xff] }
 0x463   : > { %10910 = vst [vmem:[#allocation17_spill] sm:$0xff] %v9593_v58  ;;  %v9595_v50 = vpop.f32.mrf.mxu3  ;;  %v2002_v19 = vadd.f32 %v10911_v63, %v1775_v9  ;;  %v7062_v63 = vld [vmem:[%s8756_s9 + $0x80] sm:$0xff] }
 0x464   : > { %v2480_v34 = vpop.f32.mrf.mxu1  ;;  %v2900_v11 = vpop.f32.mrf.mxu0  ;;  %5107 = vmatpush.bf16.msra.mxu1 %v6762_v10 }
 0x465   : > { %v2667_v54 = vadd.f32 %v9538_v56, %v2002_v19  ;;  %v9616_v34 = vpack.c.bf16 %v7062_v63, %v7061_v30  ;;  %v10915_v56 = vld [vmem:[#allocation56_spill] sm:$0xff] }
 0x466   : > { %v10916_v19 = vld [vmem:[#allocation12_spill] sm:$0xff] }
 0x467   : > { %v2715_v21 = vadd.f32 %v2667_v54, %v8952_v22  ;;  %10913 = vst [vmem:[#allocation82_spill] sm:$0xff] %v9616_v34  ;;  %v1729_v22 = vadd.f32 %v10916_v19, %v10915_v56  ;;  %v10918_v54 = vld [vmem:[#allocation107_spill] sm:$0xff] }
 0x468   : > { %v1672_v4 = vpop.f32.mrf.mxu2 }
 0x469   : > { %v9612_v44 = vadd.f32 %v2900_v11, %v2715_v21 }
 0x46b   : > { %10912 = vst [vmem:[#allocation95_spill] sm:$0xff] %v9612_v44  ;;  %v3946_v9 = vpop.f32.mrf.mxu3 }
 0x46c   : > { %v2483_v26 = vpop.f32.mrf.mxu1  ;;  %v2903_v58 = vpop.f32.mrf.mxu0  ;;  %v10920_v9 = vld [vmem:[#allocation9_spill] sm:$0xff] }
 0x46d   : > { %3452 = vmatmul.bf16.gmra.mxu2 %v10914_v62 }
 0x46e   : > { %4204 = vmatmul.bf16.gmra.mxu0 %v9616_v34 }
 0x46f   : > { %3584 = vmatmul.bf16.gmra.mxu1 %v10914_v62  ;;  %v10919_v62 = vld [vmem:[#allocation48_spill] sm:$0xff] }
 0x470   : > { %4600 = vmatmul.bf16.gmra.mxu3 %v9578_v23  ;;  %v1675_v11 = vpop.f32.mrf.mxu2  ;;  %v1730_v26 = vadd.f32 %v10920_v9, %v10919_v62 }
 0x471   : > { %v1777_v55 = vadd.f32 %v1729_v22, %v1675_v11  ;;  %v10922_v22 = vld [vmem:[#allocation109_spill] sm:$0xff] }
 0x473   : > { %v9624_v7 = vpop.f32.mrf.mxu3  ;;  %v2004_v10 = vadd.f32 %v10918_v54, %v1777_v55  ;;  %v7064_v55 = vld [vmem:[%s8756_s9 + $0x90] sm:$0xff] }
 0x474   : > { %10917 = vst [vmem:[#allocation84_spill] sm:$0xff] %v9624_v7  ;;  %v2484_v58 = vpop.f32.mrf.mxu1  ;;  %v2905_v21 = vpop.f32.mrf.mxu0  ;;  %v7063_v7 = vld [vmem:[%s8756_s9 + $0x88] sm:$0xff] }
 0x475   : > { %v2669_v4 = vadd.f32 %v9561_v2, %v2004_v10  ;;  %v9638_v54 = vpack.c.bf16 %v7064_v55, %v7063_v7  ;;  %v10924_v2 = vld [vmem:[#allocation54_spill] sm:$0xff] }
 0x477   : > { %v2717_v30 = vadd.f32 %v2669_v4, %v8982_v41  ;;  %10923 = vst [vmem:[#allocation19_spill] sm:$0xff] %v9638_v54 }
 0x478   : > { %v1677_v63 = vpop.f32.mrf.mxu2 }
 0x479   : > { %v9631_v56 = vadd.f32 %v2905_v21, %v2717_v30  ;;  %v1778_v19 = vadd.f32 %v1730_v26, %v1677_v63  ;;  %v6627_v30 = vld [vmem:[%s10457_s3 + $0x12c] sm:$0xf0] }
 0x47b   : > { %10921 = vst [vmem:[#allocation81_spill] sm:$0xff] %v9631_v56  ;;  %v9633_v44 = vpop.f32.mrf.mxu3  ;;  %v2005_v11 = vadd.f32 %v10922_v22, %v1778_v19  ;;  %v7065_v19 = vld [vmem:[%s8756_s9 + $0x98] sm:$0xff]  ;;  %v7066_v22 = vld [vmem:[%s8756_s9 + $0xa0] sm:$0xff] }
 0x47c   : > { %v2486_v23 = vpop.f32.mrf.mxu1  ;;  %v2908_v58 = vpop.f32.mrf.mxu0 }
 0x47d   : > { %3457 = vmatmul.bf16.gmra.mxu2 %v10924_v2  ;;  %v2670_v10 = vadd.f32 %v9574_v3, %v2005_v11  ;;  %v6991_v3 = vld [vmem:[%s10457_s3 + $0x124] sm:$0xf]  ;;  %v9658_v11 = vpack.c.bf16 %v7066_v22, %v7065_v19 }
 0x47e   : > { %4209 = vmatmul.bf16.gmra.mxu0 %v9638_v54 }
 0x47f   : > { %3589 = vmatmul.bf16.gmra.mxu1 %v10924_v2  ;;  %v2718_v41 = vadd.f32 %v2670_v10, %v8989_v28  ;;  %v6630_v28 = vor.u32 %v6991_v3, %v6627_v30  ;;  %10926 = vst [vmem:[#allocation83_spill] sm:$0xff] %v9658_v11  ;;  %v7020_v2 = vld [vmem:[%s10457_s3 + $0x208] sm:$0xf0] }
 0x480   : > { %4605 = vmatmul.bf16.gmra.mxu3 %v9616_v34  ;;  %v1680_v23 = vpop.f32.mrf.mxu2  ;;  %v7070_v34 = vld [vmem:[%s8756_s9 + $0xc0] sm:$0xff] }
 0x481   : > { %v9646_v21 = vadd.f32 %v2908_v58, %v2718_v41  ;;  %4304 = vmatpush.bf16.msra.mxu2 %v6630_v28  ;;  %v6805_v58 = vld [vmem:[%s10457_s3 + $0x200] sm:$0xf] }
 0x482   : > { %v6806_v10 = vor.u32 %v7020_v2, %v6805_v58  ;;  %v10927_v23 = vld [vmem:[#allocation2_spill] sm:$0xff]  ;;  %v7067_v2 = vld [vmem:[%s8756_s9 + $0xa8] sm:$0xff] }
 0x483   : > { %10925 = vst [vmem:[#allocation89_spill] sm:$0xff] %v9646_v21  ;;  %v3954_v7 = vpop.f32.mrf.mxu3 }
 0x484   : > { %v2487_v4 = vpop.f32.mrf.mxu1  ;;  %v2910_v62 = vpop.f32.mrf.mxu0  ;;  %5537 = vmatpush.bf16.msra.mxu3 %v6806_v10 }
 0x485   : > { %v7015_v62 = vld [vmem:[%s10457_s3 + $0x1e4] sm:$0xf] }
 0x488   : > { %v1682_v9 = vpop.f32.mrf.mxu2 }
 0x489   : > { %v6755_v9 = vld [vmem:[%s10457_s3 + $0x1ec] sm:$0xf0] }
 0x48a   : > { %v6758_v30 = vor.u32 %v7015_v62, %v6755_v9  ;;  %v6753_v62 = vld [vmem:[%s10457_s3 + $0x1e0] sm:$0xf]  ;;  %v7016_v9 = vld [vmem:[%s10457_s3 + $0x1e8] sm:$0xf0] }
 0x48b   : > { %v9648_v26 = vpop.f32.mrf.mxu3 }
 0x48c   : > { %v3558_v63 = vpop.f32.mrf.mxu1  ;;  %v4175_v55 = vpop.f32.mrf.mxu0  ;;  %5243 = vmatpush.bf16.msra.mxu0 %v6758_v30  ;;  %v6754_v30 = vor.u32 %v7016_v9, %v6753_v62 }
 0x48d   : > { %3462 = vmatmul.bf16.gmra.mxu2 %v8939_v31  ;;  %v10929_v63 = vld [vmem:[#allocation65_spill] sm:$0xff] }
 0x48e   : > { %4214 = vmatmul.bf16.gmra.mxu0 %v9658_v11  ;;  %5108 = vmatpush.bf16.msra.mxu1 %v6754_v30 }
 0x48f   : > { %3594 = vmatmul.bf16.gmra.mxu1 %v8939_v31 }
 0x490   : > { %4610 = vmatmul.bf16.gmra.mxu3 %v9638_v54  ;;  %v3423_v41 = vpop.f32.mrf.mxu2 }
 0x491   : > { %v3684_v7 = vadd.f32 %v3423_v41, %v10927_v23  ;;  %v7068_v41 = vld [vmem:[%s8756_s9 + $0xb0] sm:$0xff] }
 0x492   : > { %v9682_v10 = vpack.c.bf16 %v7068_v41, %v7067_v2 }
 0x493   : > { %v9671_v4 = vpop.f32.mrf.mxu3 }
 0x494   : > { %10928 = vst [vmem:[#allocation23_spill] sm:$0xff] %v9671_v4  ;;  %v3559_v31 = vpop.f32.mrf.mxu1  ;;  %v4177_v3 = vpop.f32.mrf.mxu0  ;;  %v7069_v4 = vld [vmem:[%s8756_s9 + $0xb8] sm:$0xff] }
 0x495   : > { %v10930_v31 = vld [vmem:[#allocation55_spill] sm:$0xff]  ;;  %v9704_v62 = vpack.c.bf16 %v7070_v34, %v7069_v4 }
 0x498   : > { %v3425_v28 = vpop.f32.mrf.mxu2 }
 0x499   : > { %v3685_v19 = vadd.f32 %v3425_v28, %v10929_v63 }
 0x49b   : > { %v3961_v22 = vpop.f32.mrf.mxu3 }
 0x49c   : > { %v3561_v58 = vpop.f32.mrf.mxu1  ;;  %v4180_v23 = vpop.f32.mrf.mxu0 }
 0x49d   : > { %3467 = vmatmul.bf16.gmra.mxu2 %v10930_v31 }
 0x49e   : > { %4219 = vmatmul.bf16.gmra.mxu0 %v9682_v10 }
 0x49f   : > { %3599 = vmatmul.bf16.gmra.mxu1 %v10930_v31 }
 0x4a0   : > { %4615 = vmatmul.bf16.gmra.mxu3 %v9658_v11  ;;  %v3428_v28 = vpop.f32.mrf.mxu2  ;;  %v10932_v11 = vld [vmem:[#allocation69_spill] sm:$0xff] }
 0x4a1   : > { %v10933_v28 = vld [vmem:[#allocation3_spill] sm:$0xff] }
 0x4a3   : > { %v9694_v63 = vpop.f32.mrf.mxu3 }
 0x4a4   : > { %v3562_v22 = vpop.f32.mrf.mxu1  ;;  %v4182_v2 = vpop.f32.mrf.mxu0 }
 0x4a5   : > { %v3732_v58 = vadd.f32 %v3684_v7, %v3562_v22  ;;  %v10934_v7 = vld [vmem:[#allocation67_spill] sm:$0xff] }
 0x4a7   : > { %v3979_v41 = vadd.f32 %v9035_v57, %v3732_v58 }
 0x4a8   : > { %v3430_v23 = vpop.f32.mrf.mxu2 }
 0x4a9   : > { %v9697_v31 = vadd.f32 %v4175_v55, %v3979_v41  ;;  %v3687_v21 = vadd.f32 %v3430_v23, %v10932_v11  ;;  %v7071_v23 = vld [vmem:[%s8756_s9 + $0xc8] sm:$0xff] }
 0x4ab   : > { %10931 = vst [vmem:[#allocation92_spill] sm:$0xff] %v9697_v31  ;;  %v9700_v56 = vpop.f32.mrf.mxu3 }
 0x4ac   : > { %v3565_v54 = vpop.f32.mrf.mxu1  ;;  %v4185_v30 = vpop.f32.mrf.mxu0 }
 0x4ad   : > { %v3733_v9 = vadd.f32 %v3685_v19, %v3565_v54  ;;  %3472 = vmatmul.bf16.gmra.mxu2 %v10933_v28 }
 0x4ae   : > { %4224 = vmatmul.bf16.gmra.mxu0 %v9704_v62 }
 0x4af   : > { %v3980_v57 = vadd.f32 %v9053_v24, %v3733_v9  ;;  %3604 = vmatmul.bf16.gmra.mxu1 %v10933_v28  ;;  %v7072_v24 = vld [vmem:[%s8756_s9 + $0xd0] sm:$0xff] }
 0x4b0   : > { %4620 = vmatmul.bf16.gmra.mxu3 %v9682_v10  ;;  %v3433_v11 = vpop.f32.mrf.mxu2  ;;  %v9718_v9 = vpack.c.bf16 %v7072_v24, %v7071_v23 }
 0x4b1   : > { %v9711_v55 = vadd.f32 %v4177_v3, %v3980_v57  ;;  %v3688_v34 = vadd.f32 %v3433_v11, %v10934_v7  ;;  %v6988_v57 = vld [vmem:[%s10457_s3 + $0x10c] sm:$0xf]  ;;  %v6619_v11 = vld [vmem:[%s10457_s3 + $0x114] sm:$0xf0] }
 0x4b2   : > { %v6622_v7 = vor.u32 %v6988_v57, %v6619_v11 }
 0x4b3   : > { %v3969_v4 = vpop.f32.mrf.mxu3 }
 0x4b4   : > { %v3567_v54 = vpop.f32.mrf.mxu1  ;;  %v4187_v19 = vpop.f32.mrf.mxu0  ;;  %4305 = vmatpush.bf16.msra.mxu2 %v6622_v7 }
 0x4b8   : > { %v3435_v22 = vpop.f32.mrf.mxu2 }
 0x4bb   : > { %v9714_v58 = vpop.f32.mrf.mxu3 }
 0x4bc   : > { %v3570_v41 = vpop.f32.mrf.mxu1  ;;  %v4190_v31 = vpop.f32.mrf.mxu0 }
 0x4bd   : > { %v3735_v28 = vadd.f32 %v3687_v21, %v3570_v41  ;;  %3477 = vmatmul.bf16.gmra.mxu2 %v9028_v12  ;;  %v6801_v21 = vld [vmem:[%s10457_s3 + $0x1e8] sm:$0xf] }
 0x4be   : > { %4229 = vmatmul.bf16.gmra.mxu0 %v9718_v9 }
 0x4bf   : > { %v3982_v3 = vadd.f32 %v9078_v0, %v3735_v28  ;;  %3609 = vmatmul.bf16.gmra.mxu1 %v9028_v12  ;;  %v7017_v12 = vld [vmem:[%s10457_s3 + $0x1f0] sm:$0xf0] }
 0x4c0   : > { %4625 = vmatmul.bf16.gmra.mxu3 %v9704_v62  ;;  %v3438_v0 = vpop.f32.mrf.mxu2  ;;  %v6802_v4 = vor.u32 %v7017_v12, %v6801_v21 }
 0x4c1   : > { %v9737_v54 = vadd.f32 %v4182_v2, %v3982_v3  ;;  %v3690_v19 = vadd.f32 %v3438_v0, %v9015_v61  ;;  %v7012_v61 = vld [vmem:[%s10457_s3 + $0x1cc] sm:$0xf]  ;;  %v6747_v3 = vld [vmem:[%s10457_s3 + $0x1d4] sm:$0xf0]  ;;  %v7074_v0 = vld [vmem:[%s8756_s9 + $0xe0] sm:$0xff] }
 0x4c2   : > { %5538 = vmatpush.bf16.msra.mxu3 %v6802_v4  ;;  %v6750_v7 = vor.u32 %v7012_v61, %v6747_v3 }
 0x4c3   : > { %10935 = vst [vmem:[#allocation87_spill] sm:$0xff] %v9737_v54  ;;  %v9740_v22 = vpop.f32.mrf.mxu3  ;;  %v7076_v54 = vld [vmem:[%s8756_s9 + $0xf0] sm:$0xff] }
 0x4c4   : > { %v3572_v41 = vpop.f32.mrf.mxu1  ;;  %v4192_v24 = vpop.f32.mrf.mxu0  ;;  %5244 = vmatpush.bf16.msra.mxu0 %v6750_v7 }
 0x4c5   : > { %v3736_v23 = vadd.f32 %v3688_v34, %v3572_v41  ;;  %v7073_v34 = vld [vmem:[%s8756_s9 + $0xd8] sm:$0xff] }
 0x4c6   : > { %v9754_v4 = vpack.c.bf16 %v7074_v0, %v7073_v34 }
 0x4c7   : > { %v3983_v28 = vadd.f32 %v9107_v6, %v3736_v23 }
 0x4c8   : > { %v3440_v57 = vpop.f32.mrf.mxu2 }
 0x4c9   : > { %v9743_v11 = vadd.f32 %v4185_v30, %v3983_v28  ;;  %v3691_v21 = vadd.f32 %v3440_v57, %v9023_v17  ;;  %v6745_v17 = vld [vmem:[%s10457_s3 + $0x1c8] sm:$0xf]  ;;  %v7013_v30 = vld [vmem:[%s10457_s3 + $0x1d0] sm:$0xf0] }
 0x4ca   : > { %v6746_v41 = vor.u32 %v7013_v30, %v6745_v17 }
 0x4cb   : > { %10936 = vst [vmem:[#allocation25_spill] sm:$0xff] %v9743_v11  ;;  %v3976_v2 = vpop.f32.mrf.mxu3  ;;  %v7075_v11 = vld [vmem:[%s8756_s9 + $0xe8] sm:$0xff] }
 0x4cc   : > { %v3575_v12 = vpop.f32.mrf.mxu1  ;;  %v4195_v6 = vpop.f32.mrf.mxu0  ;;  %5109 = vmatpush.bf16.msra.mxu1 %v6746_v41  ;;  %v9776_v17 = vpack.c.bf16 %v7076_v54, %v7075_v11 }
 0x4cd   : > { %3482 = vmatmul.bf16.gmra.mxu2 %v9057_v5  ;;  %v10938_v12 = vld [vmem:[#allocation73_spill] sm:$0xff] }
 0x4ce   : > { %4234 = vmatmul.bf16.gmra.mxu0 %v9754_v4 }
 0x4cf   : > { %3614 = vmatmul.bf16.gmra.mxu1 %v9057_v5 }
 0x4d0   : > { %4630 = vmatmul.bf16.gmra.mxu3 %v9718_v9  ;;  %v3443_v23 = vpop.f32.mrf.mxu2 }
 0x4d1   : > { %v10939_v23 = vld [vmem:[#allocation71_spill] sm:$0xff] }
 0x4d3   : > { %v9766_v28 = vpop.f32.mrf.mxu3 }
 0x4d4   : > { %v3577_v5 = vpop.f32.mrf.mxu1  ;;  %v4197_v2 = vpop.f32.mrf.mxu0 }
 0x4d5   : > { %v3738_v57 = vadd.f32 %v3690_v19, %v3577_v5  ;;  %v10941_v5 = vld [vmem:[#allocation57_spill] sm:$0xff] }
 0x4d7   : > { %v3985_v61 = vadd.f32 %v9126_v60, %v3738_v57 }
 0x4d8   : > { %v3445_v3 = vpop.f32.mrf.mxu2 }
 0x4d9   : > { %v9769_v7 = vadd.f32 %v4190_v31, %v3985_v61  ;;  %v3693_v34 = vadd.f32 %v3445_v3, %v10938_v12 }
 0x4db   : > { %10937 = vst [vmem:[#allocation97_spill] sm:$0xff] %v9769_v7  ;;  %v9772_v0 = vpop.f32.mrf.mxu3 }
 0x4dc   : > { %v3580_v6 = vpop.f32.mrf.mxu1  ;;  %v4200_v41 = vpop.f32.mrf.mxu0 }
 0x4dd   : > { %v3739_v30 = vadd.f32 %v3691_v21, %v3580_v6  ;;  %3487 = vmatmul.bf16.gmra.mxu2 %v10939_v23  ;;  %v7077_v6 = vld [vmem:[%s8756_s9 + $0xf8] sm:$0xff] }
 0x4de   : > { %4239 = vmatmul.bf16.gmra.mxu0 %v9776_v17 }
 0x4df   : > { %v3986_v60 = vadd.f32 %v9144_v40, %v3739_v30  ;;  %3619 = vmatmul.bf16.gmra.mxu1 %v10939_v23  ;;  %v7078_v40 = vld [vmem:[%s8756_s9 + $0x100] sm:$0xff] }
 0x4e0   : > { %4635 = vmatmul.bf16.gmra.mxu3 %v9754_v4  ;;  %v3448_v31 = vpop.f32.mrf.mxu2  ;;  %v9790_v30 = vpack.c.bf16 %v7078_v40, %v7077_v6 }
 0x4e1   : > { %v9783_v19 = vadd.f32 %v4192_v24, %v3986_v60  ;;  %v3694_v54 = vadd.f32 %v3448_v31, %v10941_v5  ;;  %v6797_v60 = vld [vmem:[%s10457_s3 + $0x1d0] sm:$0xf]  ;;  %v7014_v31 = vld [vmem:[%s10457_s3 + $0x1d8] sm:$0xf0] }
 0x4e3   : > { %10940 = vst [vmem:[#allocation90_spill] sm:$0xff] %v9783_v19  ;;  %v4596_v11 = vpop.f32.mrf.mxu3  ;;  %v7080_v19 = vld [vmem:[%s8756_s9 + $0x110] sm:$0xff] }
 0x4e4   : > { %v3582_v21 = vpop.f32.mrf.mxu1  ;;  %v4202_v57 = vpop.f32.mrf.mxu0 }
 0x4e5   : > { %v10944_v21 = vld [vmem:[#allocation60_spill] sm:$0xff] }
 0x4e6   : > { %v6985_v57 = vld [vmem:[%s10457_s3 + $0xf4] sm:$0xf] }
 0x4e8   : > { %v3450_v61 = vpop.f32.mrf.mxu2 }
 0x4e9   : > { %v6611_v61 = vld [vmem:[%s10457_s3 + $0xfc] sm:$0xf0] }
 0x4eb   : > { %v9786_v3 = vpop.f32.mrf.mxu3 }
 0x4ec   : > { %10942 = vst [vmem:[#allocation27_spill] sm:$0xff] %v9786_v3  ;;  %v3585_v12 = vpop.f32.mrf.mxu1  ;;  %v4205_v7 = vpop.f32.mrf.mxu0 }
 0x4ed   : > { %v3741_v23 = vadd.f32 %v3693_v34, %v3585_v12  ;;  %3492 = vmatmul.bf16.gmra.mxu2 %v9119_v25  ;;  %v6798_v34 = vor.u32 %v7014_v31, %v6797_v60  ;;  %v6614_v12 = vor.u32 %v6985_v57, %v6611_v61  ;;  %v10946_v31 = vld [vmem:[#allocation4_spill] sm:$0xff] }
 0x4ee   : > { %4244 = vmatmul.bf16.gmra.mxu0 %v9790_v30 }
 0x4ef   : > { %v3988_v24 = vadd.f32 %v9163_v51, %v3741_v23  ;;  %3624 = vmatmul.bf16.gmra.mxu1 %v9119_v25  ;;  %5539 = vmatpush.bf16.msra.mxu3 %v6798_v34 }
 0x4f0   : > { %4640 = vmatmul.bf16.gmra.mxu3 %v9776_v17  ;;  %v3453_v5 = vpop.f32.mrf.mxu2  ;;  %4306 = vmatpush.bf16.msra.mxu2 %v6614_v12  ;;  %v6737_v12 = vld [vmem:[%s10457_s3 + $0x1b0] sm:$0xf] }
 0x4f1   : > { %v9803_v11 = vadd.f32 %v4197_v2, %v3988_v24  ;;  %v3696_v51 = vadd.f32 %v3453_v5, %v10944_v21 }
 0x4f3   : > { %10943 = vst [vmem:[#allocation98_spill] sm:$0xff] %v9803_v11  ;;  %v9806_v25 = vpop.f32.mrf.mxu3  ;;  %v7079_v11 = vld [vmem:[%s8756_s9 + $0x108] sm:$0xff] }
 0x4f4   : > { %10945 = vst [vmem:[#allocation50_spill] sm:$0xff] %v9806_v25  ;;  %v3587_v6 = vpop.f32.mrf.mxu1  ;;  %v4207_v2 = vpop.f32.mrf.mxu0  ;;  %v9820_v25 = vpack.c.bf16 %v7080_v19, %v7079_v11 }
 0x4f5   : > { %v3742_v40 = vadd.f32 %v3694_v54, %v3587_v6  ;;  %v7010_v6 = vld [vmem:[%s10457_s3 + $0x1b8] sm:$0xf0] }
 0x4f7   : > { %v3989_v23 = vadd.f32 %v9198_v32, %v3742_v40  ;;  %v7009_v32 = vld [vmem:[%s10457_s3 + $0x1b4] sm:$0xf]  ;;  %v6738_v40 = vor.u32 %v7010_v6, %v6737_v12 }
 0x4f8   : > { %v3455_v24 = vpop.f32.mrf.mxu2 }
 0x4f9   : > { %v9815_v60 = vadd.f32 %v4200_v41, %v3989_v23  ;;  %v3697_v34 = vadd.f32 %v3455_v24, %v10946_v31  ;;  %v6739_v41 = vld [vmem:[%s10457_s3 + $0x1bc] sm:$0xf0]  ;;  %5110 = vmatpush.bf16.msra.mxu1 %v6738_v40 }
 0x4fa   : > { %v6742_v54 = vor.u32 %v7009_v32, %v6739_v41 }
 0x4fb   : > { %v4603_v5 = vpop.f32.mrf.mxu3 }
 0x4fc   : > { %v3590_v21 = vpop.f32.mrf.mxu1  ;;  %v4210_v3 = vpop.f32.mrf.mxu0  ;;  %5245 = vmatpush.bf16.msra.mxu0 %v6742_v54 }
 0x4fd   : > { %3497 = vmatmul.bf16.gmra.mxu2 %v9148_v20  ;;  %v7081_v21 = vld [vmem:[%s8756_s9 + $0x118] sm:$0xff] }
 0x4fe   : > { %4249 = vmatmul.bf16.gmra.mxu0 %v9820_v25 }
 0x4ff   : > { %3629 = vmatmul.bf16.gmra.mxu1 %v9148_v20 }
 0x500   : > { %4645 = vmatmul.bf16.gmra.mxu3 %v9790_v30  ;;  %v3458_v19 = vpop.f32.mrf.mxu2 }
 0x503   : > { %v9832_v3 = vpop.f32.mrf.mxu3 }
 0x504   : > { %v3592_v20 = vpop.f32.mrf.mxu1  ;;  %v4212_v57 = vpop.f32.mrf.mxu0 }
 0x505   : > { %v3744_v11 = vadd.f32 %v3696_v51, %v3592_v20 }
 0x507   : > { %v3991_v61 = vadd.f32 %v9218_v59, %v3744_v11  ;;  %v7082_v59 = vld [vmem:[%s8756_s9 + $0x120] sm:$0xff] }
 0x508   : > { %v3460_v23 = vpop.f32.mrf.mxu2  ;;  %v9848_v32 = vpack.c.bf16 %v7082_v59, %v7081_v21  ;;  %v7011_v59 = vld [vmem:[%s10457_s3 + $0x1c0] sm:$0xf0] }
 0x509   : > { %v9841_v24 = vadd.f32 %v4205_v7, %v3991_v61  ;;  %v3699_v31 = vadd.f32 %v3460_v23, %v9141_v13  ;;  %v7083_v23 = vld [vmem:[%s8756_s9 + $0x128] sm:$0xff] }
 0x50b   : > { %v9844_v5 = vpop.f32.mrf.mxu3 }
 0x50c   : > { %v3595_v51 = vpop.f32.mrf.mxu1  ;;  %v4215_v54 = vpop.f32.mrf.mxu0 }
 0x50d   : > { %v3745_v41 = vadd.f32 %v3697_v34, %v3595_v51  ;;  %3502 = vmatmul.bf16.gmra.mxu2 %v9175_v47 }
 0x50e   : > { %4254 = vmatmul.bf16.gmra.mxu0 %v9848_v32 }
 0x50f   : > { %v3992_v19 = vadd.f32 %v9231_v49, %v3745_v41  ;;  %3634 = vmatmul.bf16.gmra.mxu1 %v9175_v47  ;;  %v7084_v49 = vld [vmem:[%s8756_s9 + $0x130] sm:$0xff] }
 0x510   : > { %4650 = vmatmul.bf16.gmra.mxu3 %v9820_v25  ;;  %v3463_v13 = vpop.f32.mrf.mxu2  ;;  %v9862_v51 = vpack.c.bf16 %v7084_v49, %v7083_v23  ;;  %v10950_v49 = vld [vmem:[#allocation72_spill] sm:$0xff] }
 0x511   : > { %v9855_v7 = vadd.f32 %v4207_v2, %v3992_v19  ;;  %v3700_v20 = vadd.f32 %v3463_v13, %v9156_v15  ;;  %v6793_v15 = vld [vmem:[%s10457_s3 + $0x1b8] sm:$0xf] }
 0x513   : > { %10947 = vst [vmem:[#allocation33_spill] sm:$0xff] %v9855_v7  ;;  %v4611_v11 = vpop.f32.mrf.mxu3  ;;  %v10960_v7 = vld [vmem:[#allocation7_spill] sm:$0xff] }
 0x514   : > { %v3597_v34 = vpop.f32.mrf.mxu1  ;;  %v4217_v61 = vpop.f32.mrf.mxu0  ;;  %v6982_v11 = vld [vmem:[%s10457_s3 + $0xdc] sm:$0xf] }
 0x515   : > { %v6603_v34 = vld [vmem:[%s10457_s3 + $0xe4] sm:$0xf0] }
 0x518   : > { %v3465_v12 = vpop.f32.mrf.mxu2 }
 0x51b   : > { %v9858_v6 = vpop.f32.mrf.mxu3 }
 0x51c   : > { %v3600_v40 = vpop.f32.mrf.mxu1  ;;  %v4220_v21 = vpop.f32.mrf.mxu0 }
 0x51d   : > { %v3747_v47 = vadd.f32 %v3699_v31, %v3600_v40  ;;  %3507 = vmatmul.bf16.gmra.mxu2 %v9210_v36  ;;  %v6794_v31 = vor.u32 %v7011_v59, %v6793_v15  ;;  %v7085_v59 = vld [vmem:[%s8756_s9 + $0x138] sm:$0xff] }
 0x51e   : > { %4259 = vmatmul.bf16.gmra.mxu0 %v9862_v51 }
 0x51f   : > { %v3994_v2 = vadd.f32 %v9257_v38, %v3747_v47  ;;  %3639 = vmatmul.bf16.gmra.mxu1 %v9210_v36  ;;  %5540 = vmatpush.bf16.msra.mxu3 %v6794_v31  ;;  %v7086_v31 = vld [vmem:[%s8756_s9 + $0x140] sm:$0xff] }
 0x520   : > { %4655 = vmatmul.bf16.gmra.mxu3 %v9848_v32  ;;  %v3468_v41 = vpop.f32.mrf.mxu2 }
 0x521   : > { %v9875_v19 = vadd.f32 %v4212_v57, %v3994_v2  ;;  %v3702_v38 = vadd.f32 %v3468_v41, %v9195_v42  ;;  %v6606_v57 = vor.u32 %v6982_v11, %v6603_v34  ;;  %v9892_v41 = vpack.c.bf16 %v7086_v31, %v7085_v59 }
 0x523   : > { %10948 = vst [vmem:[#allocation94_spill] sm:$0xff] %v9875_v19  ;;  %v9878_v36 = vpop.f32.mrf.mxu3  ;;  %4307 = vmatpush.bf16.msra.mxu2 %v6606_v57  ;;  %v6729_v57 = vld [vmem:[%s10457_s3 + $0x198] sm:$0xf] }
 0x524   : > { %v3602_v13 = vpop.f32.mrf.mxu1  ;;  %v4222_v12 = vpop.f32.mrf.mxu0 }
 0x525   : > { %v3748_v61 = vadd.f32 %v3700_v20, %v3602_v13  ;;  %v7006_v20 = vld [vmem:[%s10457_s3 + $0x19c] sm:$0xf]  ;;  %v6731_v13 = vld [vmem:[%s10457_s3 + $0x1a4] sm:$0xf0] }
 0x527   : > { %v3995_v40 = vadd.f32 %v9293_v8, %v3748_v61 }
 0x528   : > { %v3470_v42 = vpop.f32.mrf.mxu2 }
 0x529   : > { %v9887_v23 = vadd.f32 %v4215_v54, %v3995_v40  ;;  %v3703_v47 = vadd.f32 %v3470_v42, %v10950_v49  ;;  %v7007_v40 = vld [vmem:[%s10457_s3 + $0x1a0] sm:$0xf0] }
 0x52a   : > { %v6730_v42 = vor.u32 %v7007_v40, %v6729_v57  ;;  %v10957_v40 = vld [vmem:[#allocation6_spill] sm:$0xff] }
 0x52b   : > { %10949 = vst [vmem:[#allocation29_spill] sm:$0xff] %v9887_v23  ;;  %v4618_v2 = vpop.f32.mrf.mxu3 }
 0x52c   : > { %v3605_v15 = vpop.f32.mrf.mxu1  ;;  %v4225_v19 = vpop.f32.mrf.mxu0  ;;  %5111 = vmatpush.bf16.msra.mxu1 %v6730_v42 }
 0x52d   : > { %3512 = vmatmul.bf16.gmra.mxu2 %v9241_v1  ;;  %v6734_v19 = vor.u32 %v7006_v20, %v6731_v13  ;;  %v10952_v15 = vld [vmem:[#allocation63_spill] sm:$0xff] }
 0x52e   : > { %4264 = vmatmul.bf16.gmra.mxu0 %v9892_v41 }
 0x52f   : > { %3644 = vmatmul.bf16.gmra.mxu1 %v9241_v1  ;;  %5246 = vmatpush.bf16.msra.mxu0 %v6734_v19 }
 0x530   : > { %4660 = vmatmul.bf16.gmra.mxu3 %v9862_v51  ;;  %v3473_v8 = vpop.f32.mrf.mxu2 }
 0x531   : > { %v7087_v8 = vld [vmem:[%s8756_s9 + $0x148] sm:$0xff] }
 0x533   : > { %v9898_v54 = vpop.f32.mrf.mxu3 }
 0x534   : > { %v3607_v11 = vpop.f32.mrf.mxu1  ;;  %v4227_v34 = vpop.f32.mrf.mxu0 }
 0x535   : > { %v3750_v1 = vadd.f32 %v3702_v38, %v3607_v11  ;;  %v10954_v11 = vld [vmem:[#allocation76_spill] sm:$0xff] }
 0x537   : > { %v3997_v61 = vadd.f32 %v9313_v53, %v3750_v1  ;;  %v7088_v53 = vld [vmem:[%s8756_s9 + $0x150] sm:$0xff] }
 0x538   : > { %v3475_v49 = vpop.f32.mrf.mxu2  ;;  %v9920_v20 = vpack.c.bf16 %v7088_v53, %v7087_v8  ;;  %v10955_v1 = vld [vmem:[#allocation68_spill] sm:$0xff] }
 0x539   : > { %v9913_v2 = vadd.f32 %v4220_v21, %v3997_v61  ;;  %v3705_v59 = vadd.f32 %v3475_v49, %v10952_v15 }
 0x53b   : > { %10951 = vst [vmem:[#allocation99_spill] sm:$0xff] %v9913_v2  ;;  %v9916_v31 = vpop.f32.mrf.mxu3  ;;  %v7089_v2 = vld [vmem:[%s8756_s9 + $0x158] sm:$0xff] }
 0x53c   : > { %10953 = vst [vmem:[#allocation26_spill] sm:$0xff] %v9916_v31  ;;  %v3610_v38 = vpop.f32.mrf.mxu1  ;;  %v4230_v19 = vpop.f32.mrf.mxu0  ;;  %v10959_v31 = vld [vmem:[#allocation77_spill] sm:$0xff] }
 0x53d   : > { %v3751_v13 = vadd.f32 %v3703_v47, %v3610_v38  ;;  %3517 = vmatmul.bf16.gmra.mxu2 %v10954_v11 }
 0x53e   : > { %4269 = vmatmul.bf16.gmra.mxu0 %v9920_v20 }
 0x53f   : > { %v3998_v57 = vadd.f32 %v10955_v1, %v3751_v13  ;;  %3649 = vmatmul.bf16.gmra.mxu1 %v10954_v11  ;;  %v7090_v13 = vld [vmem:[%s8756_s9 + $0x160] sm:$0xff] }
 0x540   : > { %4665 = vmatmul.bf16.gmra.mxu3 %v9892_v41  ;;  %v3478_v21 = vpop.f32.mrf.mxu2  ;;  %v9934_v1 = vpack.c.bf16 %v7090_v13, %v7089_v2 }
 0x541   : > { %v9927_v61 = vadd.f32 %v4222_v12, %v3998_v57  ;;  %v3706_v42 = vadd.f32 %v3478_v21, %v10957_v40  ;;  %v6789_v57 = vld [vmem:[%s10457_s3 + $0x1a0] sm:$0xf]  ;;  %v7008_v21 = vld [vmem:[%s10457_s3 + $0x1a8] sm:$0xf0] }
 0x542   : > { %v6790_v2 = vor.u32 %v7008_v21, %v6789_v57 }
 0x543   : > { %10956 = vst [vmem:[#allocation18_spill] sm:$0xff] %v9927_v61  ;;  %v4626_v49 = vpop.f32.mrf.mxu3 }
 0x544   : > { %v3612_v47 = vpop.f32.mrf.mxu1  ;;  %v4232_v15 = vpop.f32.mrf.mxu0  ;;  %v10962_v49 = vld [vmem:[#allocation79_spill] sm:$0xff]  ;;  %5541 = vmatpush.bf16.msra.mxu3 %v6790_v2 }
 0x548   : > { %v3480_v38 = vpop.f32.mrf.mxu2 }
 0x54b   : > { %v9930_v8 = vpop.f32.mrf.mxu3 }
 0x54c   : > { %10958 = vst [vmem:[#allocation31_spill] sm:$0xff] %v9930_v8  ;;  %v3615_v53 = vpop.f32.mrf.mxu1  ;;  %v4235_v23 = vpop.f32.mrf.mxu0  ;;  %v10965_v8 = vld [vmem:[#allocation64_spill] sm:$0xff] }
 0x54d   : > { %v3753_v11 = vadd.f32 %v3705_v59, %v3615_v53  ;;  %3522 = vmatmul.bf16.gmra.mxu2 %v10959_v31  ;;  %v10963_v53 = vld [vmem:[#allocation10_spill] sm:$0xff] }
 0x54e   : > { %4274 = vmatmul.bf16.gmra.mxu0 %v9934_v1 }
 0x54f   : > { %v4000_v12 = vadd.f32 %v10960_v7, %v3753_v11  ;;  %3654 = vmatmul.bf16.gmra.mxu1 %v10959_v31 }
 0x550   : > { %4670 = vmatmul.bf16.gmra.mxu3 %v9920_v20  ;;  %v3483_v59 = vpop.f32.mrf.mxu2 }
 0x551   : > { %v9947_v40 = vadd.f32 %v4227_v34, %v4000_v12  ;;  %v3708_v7 = vadd.f32 %v3483_v59, %v10962_v49  ;;  %v6979_v34 = vld [vmem:[%s10457_s3 + $0xc4] sm:$0xf]  ;;  %v6595_v12 = vld [vmem:[%s10457_s3 + $0xcc] sm:$0xf0] }
 0x552   : > { %v6598_v2 = vor.u32 %v6979_v34, %v6595_v12  ;;  %v7092_v49 = vld [vmem:[%s8756_s9 + $0x170] sm:$0xff]  ;;  %v7003_v12 = vld [vmem:[%s10457_s3 + $0x184] sm:$0xf] }
 0x553   : > { %10961 = vst [vmem:[#allocation16_spill] sm:$0xff] %v9947_v40  ;;  %v9950_v31 = vpop.f32.mrf.mxu3 }
 0x554   : > { %v3617_v47 = vpop.f32.mrf.mxu1  ;;  %v4237_v38 = vpop.f32.mrf.mxu0  ;;  %4308 = vmatpush.bf16.msra.mxu2 %v6598_v2  ;;  %v6723_v2 = vld [vmem:[%s10457_s3 + $0x18c] sm:$0xf0] }
 0x555   : > { %v3754_v15 = vadd.f32 %v3706_v42, %v3617_v47  ;;  %v7091_v42 = vld [vmem:[%s8756_s9 + $0x168] sm:$0xff] }
 0x556   : > { %v9964_v47 = vpack.c.bf16 %v7092_v49, %v7091_v42 }
 0x557   : > { %v4001_v13 = vadd.f32 %v10963_v53, %v3754_v15 }
 0x558   : > { %v3485_v11 = vpop.f32.mrf.mxu2  ;;  %10966 = vst [vmem:[#allocation34_spill] sm:$0xff] %v9964_v47 }
 0x559   : > { %v9953_v61 = vadd.f32 %v4230_v19, %v4001_v13  ;;  %v3709_v57 = vadd.f32 %v3485_v11, %v10965_v8  ;;  %v10967_v19 = vld [vmem:[#allocation21_spill] sm:$0xff] }
 0x55b   : > { %10964 = vst [vmem:[#allocation22_spill] sm:$0xff] %v9953_v61  ;;  %v4633_v21 = vpop.f32.mrf.mxu3  ;;  %v6721_v61 = vld [vmem:[%s10457_s3 + $0x180] sm:$0xf] }
 0x55c   : > { %v3620_v59 = vpop.f32.mrf.mxu1  ;;  %v4240_v15 = vpop.f32.mrf.mxu0 }
 0x55d   : > { %3527 = vmatmul.bf16.gmra.mxu2 %v10967_v19  ;;  %v6726_v59 = vor.u32 %v7003_v12, %v6723_v2  ;;  %v10970_v15 = vld [vmem:[#allocation5_spill] sm:$0xff]  ;;  %v7004_v12 = vld [vmem:[%s10457_s3 + $0x188] sm:$0xf0] }
 0x55e   : > { %4279 = vmatmul.bf16.gmra.mxu0 %v9964_v47  ;;  %v6722_v2 = vor.u32 %v7004_v12, %v6721_v61 }
 0x55f   : > { %3659 = vmatmul.bf16.gmra.mxu1 %v10967_v19  ;;  %5247 = vmatpush.bf16.msra.mxu0 %v6726_v59 }
 0x560   : > { %4675 = vmatmul.bf16.gmra.mxu3 %v9934_v1  ;;  %v3488_v8 = vpop.f32.mrf.mxu2  ;;  %5112 = vmatpush.bf16.msra.mxu1 %v6722_v2  ;;  %v7005_v2 = vld [vmem:[%s10457_s3 + $0x190] sm:$0xf0] }
 0x563   : > { %v9970_v53 = vpop.f32.mrf.mxu3 }
 0x564   : > { %10968 = vst [vmem:[#allocation20_spill] sm:$0xff] %v9970_v53  ;;  %v3622_v13 = vpop.f32.mrf.mxu1  ;;  %v4242_v21 = vpop.f32.mrf.mxu0 }
 0x565   : > { %v3756_v11 = vadd.f32 %v3708_v7, %v3622_v13  ;;  %v7093_v13 = vld [vmem:[%s8756_s9 + $0x178] sm:$0xff] }
 0x567   : > { %v4003_v34 = vadd.f32 %v9437_v39, %v3756_v11  ;;  %v7094_v39 = vld [vmem:[%s8756_s9 + $0x180] sm:$0xff] }
 0x568   : > { %v3490_v42 = vpop.f32.mrf.mxu2  ;;  %v9986_v11 = vpack.c.bf16 %v7094_v39, %v7093_v13  ;;  %v10974_v39 = vld [vmem:[#allocation70_spill] sm:$0xff] }
 0x569   : > { %v9979_v49 = vadd.f32 %v4235_v23, %v4003_v34  ;;  %v3711_v19 = vadd.f32 %v3490_v42, %v10970_v15  ;;  %v10972_v42 = vld [vmem:[#allocation86_spill] sm:$0xff] }
 0x56b   : > { %10969 = vst [vmem:[#allocation39_spill] sm:$0xff] %v9979_v49  ;;  %v9982_v8 = vpop.f32.mrf.mxu3 }
 0x56c   : > { %10971 = vst [vmem:[#allocation24_spill] sm:$0xff] %v9982_v8  ;;  %v3625_v7 = vpop.f32.mrf.mxu1  ;;  %v4245_v34 = vpop.f32.mrf.mxu0 }
 0x56d   : > { %v3757_v23 = vadd.f32 %v3709_v57, %v3625_v7  ;;  %3532 = vmatmul.bf16.gmra.mxu2 %v10972_v42 }
 0x56e   : > { %4284 = vmatmul.bf16.gmra.mxu0 %v9986_v11 }
 0x56f   : > { %v4004_v59 = vadd.f32 %v9452_v35, %v3757_v23  ;;  %3664 = vmatmul.bf16.gmra.mxu1 %v10972_v42  ;;  %v7095_v35 = vld [vmem:[%s8756_s9 + $0x188] sm:$0xff]  ;;  %v7096_v23 = vld [vmem:[%s8756_s9 + $0x190] sm:$0xff] }
 0x570   : > { %4680 = vmatmul.bf16.gmra.mxu3 %v9964_v47  ;;  %v3493_v15 = vpop.f32.mrf.mxu2  ;;  %v10006_v42 = vpack.c.bf16 %v7096_v23, %v7095_v35 }
 0x571   : > { %v9999_v13 = vadd.f32 %v4237_v38, %v4004_v59  ;;  %v3712_v57 = vadd.f32 %v3493_v15, %v10974_v39 }
 0x573   : > { %10973 = vst [vmem:[#allocation36_spill] sm:$0xff] %v9999_v13  ;;  %v4641_v7 = vpop.f32.mrf.mxu3  ;;  %v7097_v13 = vld [vmem:[%s8756_s9 + $0x198] sm:$0xff] }
 0x574   : > { %v3627_v61 = vpop.f32.mrf.mxu1  ;;  %v4247_v12 = vpop.f32.mrf.mxu0 }
 0x578   : > { %v3495_v49 = vpop.f32.mrf.mxu2 }
 0x579   : > { %v6785_v49 = vld [vmem:[%s10457_s3 + $0x188] sm:$0xf] }
 0x57b   : > { %v10002_v40 = vpop.f32.mrf.mxu3 }
 0x57c   : > { %v3630_v8 = vpop.f32.mrf.mxu1  ;;  %v4250_v47 = vpop.f32.mrf.mxu0 }
 0x57d   : > { %v3759_v53 = vadd.f32 %v3711_v19, %v3630_v8  ;;  %3537 = vmatmul.bf16.gmra.mxu2 %v9427_v37  ;;  %v6786_v19 = vor.u32 %v7005_v2, %v6785_v49 }
 0x57e   : > { %4289 = vmatmul.bf16.gmra.mxu0 %v10006_v42 }
 0x57f   : > { %v4006_v38 = vadd.f32 %v9480_v18, %v3759_v53  ;;  %3669 = vmatmul.bf16.gmra.mxu1 %v9427_v37  ;;  %v10976_v18 = vld [vmem:[#allocation74_spill] sm:$0xff]  ;;  %5542 = vmatpush.bf16.msra.mxu3 %v6786_v19 }
 0x580   : > { %4685 = vmatmul.bf16.gmra.mxu3 %v9986_v11  ;;  %v3498_v8 = vpop.f32.mrf.mxu2 }
 0x581   : > { %v10019_v59 = vadd.f32 %v4242_v21, %v4006_v38  ;;  %v3714_v37 = vadd.f32 %v3498_v8, %v10976_v18  ;;  %v7098_v21 = vld [vmem:[%s8756_s9 + $0x1a0] sm:$0xff] }
 0x582   : > { %v10030_v38 = vpack.c.bf16 %v7098_v21, %v7097_v13 }
 0x583   : > { %10975 = vst [vmem:[#allocation28_spill] sm:$0xff] %v10019_v59  ;;  %v10022_v53 = vpop.f32.mrf.mxu3 }
 0x584   : > { %v3632_v15 = vpop.f32.mrf.mxu1  ;;  %v4252_v7 = vpop.f32.mrf.mxu0 }
 0x585   : > { %v3760_v39 = vadd.f32 %v3712_v57, %v3632_v15 }
 0x587   : > { %v4007_v61 = vadd.f32 %v9512_v33, %v3760_v39 }
 0x588   : > { %v3500_v12 = vpop.f32.mrf.mxu2 }
 0x589   : > { %v10025_v35 = vadd.f32 %v4245_v34, %v4007_v61  ;;  %v3715_v23 = vadd.f32 %v3500_v12, %v9419_v29  ;;  %v7099_v12 = vld [vmem:[%s8756_s9 + $0x1a8] sm:$0xff] }
 0x58b   : > { %10977 = vst [vmem:[#allocation40_spill] sm:$0xff] %v10025_v35  ;;  %v4648_v49 = vpop.f32.mrf.mxu3 }
 0x58c   : > { %v3635_v2 = vpop.f32.mrf.mxu1  ;;  %v4255_v8 = vpop.f32.mrf.mxu0  ;;  %v10045_v49 = vpack.c.bf16 %v7099_v12, %v7099_v12 }
 0x58d   : > { %3542 = vmatmul.bf16.gmra.mxu2 %v9458_v45 }
 0x58e   : > { %4294 = vmatmul.bf16.gmra.mxu0 %v10030_v38  ;;  %10980 = vst [vmem:[#allocation30_spill] sm:$0xff] %v10045_v49 }
 0x58f   : > { %3674 = vmatmul.bf16.gmra.mxu1 %v9458_v45 }
 0x590   : > { %4690 = vmatmul.bf16.gmra.mxu3 %v10006_v42  ;;  %v3503_v33 = vpop.f32.mrf.mxu2 }
 0x591   : > { %v10983_v33 = vld [vmem:[#allocation75_spill] sm:$0xff] }
 0x593   : > { %v10036_v34 = vpop.f32.mrf.mxu3 }
 0x594   : > { %v3637_v29 = vpop.f32.mrf.mxu1  ;;  %v4257_v19 = vpop.f32.mrf.mxu0 }
 0x595   : > { %v3762_v57 = vadd.f32 %v3714_v37, %v3637_v29 }
 0x597   : > { %v4009_v18 = vadd.f32 %v9535_v14, %v3762_v57  ;;  %v10981_v14 = vld [vmem:[#allocation85_spill] sm:$0xff] }
 0x598   : > { %v3505_v13 = vpop.f32.mrf.mxu2 }
 0x599   : > { %v10039_v15 = vadd.f32 %v4250_v47, %v4009_v18  ;;  %v3717_v39 = vadd.f32 %v3505_v13, %v9450_v16  ;;  %v4795_v47 = vshll.u32 %v10981_v14, 16  ;;  %v4793_v13 = vshrl.u32 %v10981_v14, 16 }
 0x59b   : > { %10978 = vst [vmem:[#allocation43_spill] sm:$0xff] %v10039_v15  ;;  %v10042_v61 = vpop.f32.mrf.mxu3 }
 0x59c   : > { %10979 = vst [vmem:[#allocation38_spill] sm:$0xff] %v10042_v61  ;;  %v3640_v45 = vpop.f32.mrf.mxu1  ;;  %v4260_v21 = vpop.f32.mrf.mxu0 }
 0x59d   : > { %v3763_v2 = vadd.f32 %v3715_v23, %v3640_v45  ;;  %3545 = vmatmul.bf16.gmra.mxu2 %v9446_v27  ;;  %v10984_v45 = vld [vmem:[#allocation91_spill] sm:$0xff] }
 0x59e   : > { %4297 = vmatmul.bf16.gmra.mxu0 %v10045_v49  ;;  %v7100_v49 = vld [vmem:[%s8756_s9 + $0x1b0] sm:$0xff] }
 0x59f   : > { %v4010_v37 = vadd.f32 %v9546_v46, %v3763_v2  ;;  %3679 = vmatmul.bf16.gmra.mxu1 %v9446_v27  ;;  %v4797_v46 = vrot.slane %v4795_v47, 1  ;;  %v4800_v2 = vshll.u32 %v10984_v45, 16  ;;  %v10061_v61 = vpack.c.bf16 %v7100_v49, %v7099_v12 }
 0x5a0   : > { %4695 = vmatmul.bf16.gmra.mxu3 %v10030_v38  ;;  %v3508_v16 = vpop.f32.mrf.mxu2 }
 0x5a1   : > { %v10053_v8 = vadd.f32 %v4252_v7, %v4010_v37  ;;  %v3718_v29 = vadd.f32 %v3508_v16, %v10983_v33  ;;  %v4798_v27 = vor.u32 %v4797_v46, %v4793_v13  ;;  %v4802_v35 = vrot.slane %v4800_v2, 1  ;;  %v10989_v13 = vld [vmem:[#allocation88_spill] sm:$0xff] }
 0x5a3   : > { %10982 = vst [vmem:[#allocation47_spill] sm:$0xff] %v10053_v8  ;;  %v4656_v23 = vpop.f32.mrf.mxu3  ;;  %v4803_v16 = vsel %vm2040_vm1, %v4798_v27, %v4802_v35 }
 0x5a4   : > { %v3642_v57 = vpop.f32.mrf.mxu1  ;;  %v4262_v18 = vpop.f32.mrf.mxu0  ;;  %v10987_v23 = vld [vmem:[#allocation14_spill] sm:$0xff] }
 0x5a8   : > { %v3510_v15 = vpop.f32.mrf.mxu2 }
 0x5ab   : > { %v10058_v59 = vpop.f32.mrf.mxu3 }
 0x5ac   : > { %10985 = vst [vmem:[#allocation41_spill] sm:$0xff] %v10058_v59  ;;  %v3645_v7 = vpop.f32.mrf.mxu1  ;;  %v4265_v8 = vpop.f32.mrf.mxu0 }
 0x5ad   : > { %v3765_v37 = vadd.f32 %v3717_v39, %v3645_v7  ;;  %4309 = vmatmul.bf16.vlgmr.msra.gmra.mxu2 %v10981_v14  ;;  %v4804_v14 = vshrl.u32 %v10984_v45, 16 }
 0x5ae   : > { %5248 = vmatmul.bf16.vlgmr.msra.gmra.mxu0 %v4803_v16 }
 0x5af   : > { %v4012_v33 = vadd.f32 %v9571_v52, %v3765_v37  ;;  %5113 = vmatmul.bf16.vlgmr.msra.gmra.mxu1 %v4803_v16  ;;  %v4808_v52 = vshll.u32 %v10989_v13, 16  ;;  %v4806_v27 = vor.u32 %v4804_v14, %v4802_v35 }
 0x5b0   : > { %4700 = vmatmul.bf16.gmra.mxu3 %v10061_v61  ;;  %v3513_v15 = vpop.f32.mrf.mxu2 }
 0x5b1   : > { %v10067_v47 = vadd.f32 %v4257_v19, %v4012_v33  ;;  %v3720_v12 = vadd.f32 %v3513_v15, %v10987_v23  ;;  %v4810_v7 = vrot.slane %v4808_v52, 1  ;;  %v10991_v19 = vld [vmem:[#allocation96_spill] sm:$0xff]  ;;  %v7101_v15 = vld [vmem:[%s8756_s9 + $0x1b8] sm:$0xff]  ;;  %v7102_v23 = vld [vmem:[%s8756_s9 + $0x1c0] sm:$0xff]  ;;  %v4820_v52 = vshrl.u32 %v9528_v43, 16 }
 0x5b3   : > { %10986 = vst [vmem:[#allocation61_spill] sm:$0xff] %v10067_v47  ;;  %v10070_v49 = vpop.f32.mrf.mxu3  ;;  %v10080_v47 = vpack.c.bf16 %v7102_v23, %v7101_v15 }
 0x5b4   : > { %10988 = vst [vmem:[#allocation45_spill] sm:$0xff] %v10070_v49  ;;  %v3647_v39 = vpop.f32.mrf.mxu1  ;;  %v4267_v18 = vpop.f32.mrf.mxu0  ;;  %v4811_v49 = vsel %vm2040_vm1, %v4806_v27, %v4810_v7  ;;  %v4812_v27 = vshrl.u32 %v10989_v13, 16 }
 0x5b5   : > { %v3766_v57 = vadd.f32 %v3718_v29, %v3647_v39  ;;  %10992 = vst [vmem:[#allocation44_spill] sm:$0xff] %v10080_v47 }
 0x5b7   : > { %v4013_v46 = vadd.f32 %v9595_v50, %v3766_v57  ;;  %v4816_v50 = vshll.u32 %v9528_v43, 16 }
 0x5b8   : > { %v3515_v2 = vpop.f32.mrf.mxu2 }
 0x5b9   : > { %v10075_v37 = vadd.f32 %v4260_v21, %v4013_v46  ;;  %v3721_v16 = vadd.f32 %v3515_v2, %v10991_v19  ;;  %v4818_v14 = vrot.slane %v4816_v50, 1  ;;  %v4824_v46 = vshll.u32 %v9551_v48, 16 }
 0x5bb   : > { %10990 = vst [vmem:[#allocation58_spill] sm:$0xff] %v10075_v37  ;;  %v4663_v33 = vpop.f32.mrf.mxu3  ;;  %v4822_v15 = vor.u32 %v4820_v52, %v4818_v14  ;;  %v4826_v23 = vrot.slane %v4824_v46, 1  ;;  %v10997_v46 = vld [vmem:[#allocation93_spill] sm:$0xff] }
 0x5bc   : > { %v3650_v29 = vpop.f32.mrf.mxu1  ;;  %v4270_v39 = vpop.f32.mrf.mxu0 }
 0x5bd   : > { %4312 = vmatmul.bf16.gmra.mxu2 %v10984_v45  ;;  %v10994_v45 = vld [vmem:[#allocation84_spill] sm:$0xff]  ;;  %v4814_v29 = vor.u32 %v4812_v27, %v4810_v7 }
 0x5be   : > { %5251 = vmatmul.bf16.gmra.mxu0 %v4811_v49 }
 0x5bf   : > { %5118 = vmatmul.bf16.gmra.mxu1 %v4811_v49 }
 0x5c0   : > { %4705 = vmatmul.bf16.gmra.mxu3 %v10080_v47  ;;  %v3518_v35 = vpop.f32.mrf.mxu2  ;;  %v4827_v47 = vsel %vm2040_vm1, %v4822_v15, %v4826_v23 }
 0x5c1   : > { %v10995_v35 = vld [vmem:[#allocation78_spill] sm:$0xff] }
 0x5c3   : > { %v10086_v21 = vpop.f32.mrf.mxu3 }
 0x5c4   : > { %10993 = vst [vmem:[#allocation42_spill] sm:$0xff] %v10086_v21  ;;  %v3652_v57 = vpop.f32.mrf.mxu1  ;;  %v4272_v19 = vpop.f32.mrf.mxu0 }
 0x5c5   : > { %v3768_v2 = vadd.f32 %v3720_v12, %v3652_v57  ;;  %v4819_v57 = vsel %vm2040_vm1, %v4814_v29, %v4818_v14 }
 0x5c7   : > { %v4015_v33 = vadd.f32 %v10994_v45, %v3768_v2 }
 0x5c8   : > { %v3520_v49 = vpop.f32.mrf.mxu2 }
 0x5c9   : > { %v10092_v39 = vadd.f32 %v4265_v8, %v4015_v33  ;;  %v3723_v37 = vadd.f32 %v3520_v49, %v10995_v35  ;;  %v4828_v33 = vshrl.u32 %v9551_v48, 16 }
 0x5cb   : > { %v10095_v21 = vpop.f32.mrf.mxu3  ;;  %v4830_v14 = vor.u32 %v4828_v33, %v4826_v23  ;;  %v11000_v23 = vld [vmem:[#allocation17_spill] sm:$0xff] }
 0x5cc   : > { %v3655_v50 = vpop.f32.mrf.mxu1  ;;  %v4275_v12 = vpop.f32.mrf.mxu0 }
 0x5cd   : > { %v3769_v59 = vadd.f32 %v3721_v16, %v3655_v50  ;;  %4316 = vmatmul.bf16.gmra.mxu2 %v10989_v13  ;;  %v10998_v16 = vld [vmem:[#allocation80_spill] sm:$0xff] }
 0x5ce   : > { %5255 = vmatmul.bf16.gmra.mxu0 %v4819_v57  ;;  %v4832_v15 = vshll.u32 %v10998_v16, 16  ;;  %v4836_v33 = vshrl.u32 %v10998_v16, 16 }
 0x5cf   : > { %v4016_v52 = vadd.f32 %v9633_v44, %v3769_v59  ;;  %5123 = vmatmul.bf16.gmra.mxu1 %v4819_v57 }
 0x5d0   : > { %5543 = vmatmul.bf16.vlgmr.msra.gmra.mxu3 %v4827_v47  ;;  %v3523_v8 = vpop.f32.mrf.mxu2  ;;  %v4834_v29 = vrot.slane %v4832_v15, 1  ;;  %v11001_v15 = vld [vmem:[#allocation82_spill] sm:$0xff] }
 0x5d1   : > { %v10101_v7 = vadd.f32 %v4267_v18, %v4016_v52  ;;  %v3724_v2 = vadd.f32 %v3523_v8, %v10997_v46 }
 0x5d2   : > { %v4835_v59 = vsel %vm2040_vm1, %v4830_v14, %v4834_v29 }
 0x5d3   : > { %10996 = vst [vmem:[#allocation53_spill] sm:$0xff] %v10101_v7  ;;  %v4671_v27 = vpop.f32.mrf.mxu3 }
 0x5d4   : > { %v3657_v45 = vpop.f32.mrf.mxu1  ;;  %v4277_v49 = vpop.f32.mrf.mxu0 }
 0x5d8   : > { %v3525_v13 = vpop.f32.mrf.mxu2 }
 0x5db   : > { %v10106_v35 = vpop.f32.mrf.mxu3 }
 0x5dc   : > { %v3660_v44 = vpop.f32.mrf.mxu1  ;;  %v4280_v18 = vpop.f32.mrf.mxu0 }
 0x5dd   : > { %v3771_v50 = vadd.f32 %v3723_v37, %v3660_v44  ;;  %4321 = vmatmul.bf16.gmra.mxu2 %v9528_v43  ;;  %v4840_v37 = vshll.u32 %v11001_v15, 16  ;;  %v11002_v43 = vld [vmem:[#allocation23_spill] sm:$0xff] }
 0x5de   : > { %5260 = vmatmul.bf16.gmra.mxu0 %v4827_v47 }
 0x5df   : > { %v4018_v57 = vadd.f32 %v9648_v26, %v3771_v50  ;;  %5128 = vmatmul.bf16.gmra.mxu1 %v4827_v47  ;;  %v4838_v26 = vor.u32 %v4836_v33, %v4834_v29  ;;  %v4842_v44 = vrot.slane %v4840_v37, 1  ;;  %v4844_v33 = vshrl.u32 %v11001_v15, 16 }
 0x5e0   : > { %5548 = vmatmul.bf16.gmra.mxu3 %v4835_v59  ;;  %v3528_v52 = vpop.f32.mrf.mxu2 }
 0x5e1   : > { %v10111_v8 = vadd.f32 %v4272_v19, %v4018_v57  ;;  %v3726_v46 = vadd.f32 %v3528_v52, %v11000_v23  ;;  %v11004_v19 = vld [vmem:[#allocation95_spill] sm:$0xff]  ;;  %v4843_v23 = vsel %vm2040_vm1, %v4838_v26, %v4842_v44 }
 0x5e3   : > { %10999 = vst [vmem:[#allocation52_spill] sm:$0xff] %v10111_v8  ;;  %v10114_v27 = vpop.f32.mrf.mxu3 }
 0x5e4   : > { %v3662_v45 = vpop.f32.mrf.mxu1  ;;  %v4282_v14 = vpop.f32.mrf.mxu0 }
 0x5e5   : > { %v3772_v49 = vadd.f32 %v3724_v2, %v3662_v45 }
 0x5e7   : > { %v4019_v13 = vadd.f32 %v11002_v43, %v3772_v49 }
 0x5e8   : > { %v3530_v50 = vpop.f32.mrf.mxu2 }
 0x5e9   : > { %v10119_v47 = vadd.f32 %v4275_v12, %v4019_v13  ;;  %v3727_v57 = vadd.f32 %v3530_v50, %v11004_v19  ;;  %v11006_v12 = vld [vmem:[#allocation19_spill] sm:$0xff]  ;;  %v4846_v13 = vor.u32 %v4844_v33, %v4842_v44 }
 0x5ea   : > { %v4848_v37 = vshll.u32 %v11006_v12, 16 }
 0x5eb   : > { %11003 = vst [vmem:[#allocation46_spill] sm:$0xff] %v10119_v47  ;;  %v4678_v8 = vpop.f32.mrf.mxu3 }
 0x5ec   : > { %v3665_v52 = vpop.f32.mrf.mxu1  ;;  %v4285_v7 = vpop.f32.mrf.mxu0  ;;  %v4850_v26 = vrot.slane %v4848_v37, 1 }
 0x5ed   : > { %4326 = vmatmul.bf16.gmra.mxu2 %v9551_v48  ;;  %v11007_v48 = vld [vmem:[#allocation81_spill] sm:$0xff] }
 0x5ee   : > { %5265 = vmatmul.bf16.gmra.mxu0 %v4835_v59 }
 0x5ef   : > { %5133 = vmatmul.bf16.gmra.mxu1 %v4835_v59 }
 0x5f0   : > { %5553 = vmatmul.bf16.gmra.mxu3 %v4843_v23  ;;  %v3533_v2 = vpop.f32.mrf.mxu2 }
 0x5f1   : > { %v4851_v2 = vsel %vm2040_vm1, %v4846_v13, %v4850_v26 }
 0x5f3   : > { %v10124_v45 = vpop.f32.mrf.mxu3 }
 0x5f4   : > { %11005 = vst [vmem:[#allocation105_spill] sm:$0xff] %v10124_v45  ;;  %v3667_v29 = vpop.f32.mrf.mxu1  ;;  %v4287_v43 = vpop.f32.mrf.mxu0 }
 0x5f5   : > { %v3774_v49 = vadd.f32 %v3726_v46, %v3667_v29 }
 0x5f7   : > { %v4021_v8 = vadd.f32 %v9694_v63, %v3774_v49  ;;  %v4852_v49 = vshrl.u32 %v11006_v12, 16 }
 0x5f8   : > { %v3535_v7 = vpop.f32.mrf.mxu2 }
 0x5f9   : > { %v10129_v50 = vadd.f32 %v4280_v18, %v4021_v8  ;;  %v3729_v19 = vadd.f32 %v3535_v7, %v11007_v48  ;;  %v11008_v18 = vld [vmem:[#allocation89_spill] sm:$0xff]  ;;  %v11009_v8 = vld [vmem:[#allocation83_spill] sm:$0xff]  ;;  %v4854_v7 = vor.u32 %v4852_v49, %v4850_v26  ;;  %v4864_v49 = vshll.u32 %v9682_v10, 16 }
 0x5fa   : > { %v4856_v13 = vshll.u32 %v11009_v8, 16 }
 0x5fb   : > { %v10132_v59 = vpop.f32.mrf.mxu3 }
 0x5fc   : > { %v3670_v52 = vpop.f32.mrf.mxu1  ;;  %v4290_v45 = vpop.f32.mrf.mxu0  ;;  %v4858_v48 = vrot.slane %v4856_v13, 1 }
 0x5fd   : > { %v3775_v47 = vadd.f32 %v3727_v57, %v3670_v52  ;;  %4331 = vmatmul.bf16.gmra.mxu2 %v10998_v16 }
 0x5fe   : > { %5270 = vmatmul.bf16.gmra.mxu0 %v4843_v23 }
 0x5ff   : > { %v4022_v46 = vadd.f32 %v9700_v56, %v3775_v47  ;;  %5138 = vmatmul.bf16.gmra.mxu1 %v4843_v23  ;;  %v4859_v47 = vsel %vm2040_vm1, %v4854_v7, %v4858_v48  ;;  %v4866_v7 = vrot.slane %v4864_v49, 1 }
 0x600   : > { %5558 = vmatmul.bf16.gmra.mxu3 %v4851_v2  ;;  %v3538_v63 = vpop.f32.mrf.mxu2 }
 0x601   : > { %v10137_v44 = vadd.f32 %v4282_v14, %v4022_v46  ;;  %v3730_v29 = vadd.f32 %v3538_v63, %v11008_v18 }
 0x603   : > { %v4686_v33 = vpop.f32.mrf.mxu3 }
 0x604   : > { %v3672_v37 = vpop.f32.mrf.mxu1  ;;  %v4292_v57 = vpop.f32.mrf.mxu0 }
 0x605   : > { %v4860_v37 = vshrl.u32 %v11009_v8, 16 }
 0x608   : > { %v3540_v16 = vpop.f32.mrf.mxu2 }
 0x60b   : > { %v10142_v52 = vpop.f32.mrf.mxu3 }
 0x60c   : > { %v3675_v56 = vpop.f32.mrf.mxu1  ;;  %v4295_v14 = vpop.f32.mrf.mxu0 }
 0x60d   : > { %v3777_v23 = vadd.f32 %v3729_v19, %v3675_v56  ;;  %4336 = vmatmul.bf16.gmra.mxu2 %v11001_v15  ;;  %v4862_v15 = vor.u32 %v4860_v37, %v4858_v48  ;;  %v4872_v48 = vshll.u32 %v9704_v62, 16 }
 0x60e   : > { %5275 = vmatmul.bf16.gmra.mxu0 %v4851_v2 }
 0x60f   : > { %v4024_v46 = vadd.f32 %v9714_v58, %v3777_v23  ;;  %5143 = vmatmul.bf16.gmra.mxu1 %v4851_v2 }
 0x610   : > { %5563 = vmatmul.bf16.gmra.mxu3 %v4859_v47  ;;  %v3543_v63 = vpop.f32.mrf.mxu2 }
 0x611   : > { %v10147_v18 = vadd.f32 %v4287_v43, %v4024_v46  ;;  %v4867_v43 = vsel %vm2040_vm1, %v4862_v15, %v4866_v7 }
 0x613   : > { %11010 = vst [vmem:[#allocation37_spill] sm:$0xff] %v10147_v18  ;;  %v10149_v26 = vpop.f32.mrf.mxu3 }
 0x614   : > { %v3677_v33 = vpop.f32.mrf.mxu1  ;;  %v4296_v19 = vpop.f32.mrf.mxu0 }
 0x615   : > { %v3778_v13 = vadd.f32 %v3730_v29, %v3677_v33  ;;  %v4874_v33 = vrot.slane %v4872_v48, 1 }
 0x617   : > { %v4025_v57 = vadd.f32 %v9740_v22, %v3778_v13  ;;  %v4868_v22 = vshrl.u32 %v9682_v10, 16 }
 0x618   : > { %v3544_v58 = vpop.f32.mrf.mxu2 }
 0x619   : > { %v10154_v16 = vadd.f32 %v4290_v45, %v4025_v57  ;;  %v4870_v63 = vor.u32 %v4868_v22, %v4866_v7  ;;  %v4876_v58 = vshrl.u32 %v9704_v62, 16  ;;  %v4880_v7 = vshll.u32 %v9718_v9, 16 }
 0x61b   : > { %11011 = vst [vmem:[#allocation62_spill] sm:$0xff] %v10154_v16  ;;  %v4693_v2 = vpop.f32.mrf.mxu3  ;;  %v4875_v13 = vsel %vm2040_vm1, %v4870_v63, %v4874_v33 }
 0x61c   : > { %v3680_v56 = vpop.f32.mrf.mxu1  ;;  %v4298_v23 = vpop.f32.mrf.mxu0 }
 0x61d   : > { %4341 = vmatmul.bf16.gmra.mxu2 %v11006_v12  ;;  %v4878_v56 = vor.u32 %v4876_v58, %v4874_v33  ;;  %v4882_v23 = vrot.slane %v4880_v7, 1  ;;  %v4888_v33 = vshll.u32 %v9754_v4, 16  ;;  %v11014_v7 = vld [vmem:[#allocation92_spill] sm:$0xff] }
 0x61e   : > { %5280 = vmatmul.bf16.gmra.mxu0 %v4859_v47 }
 0x61f   : > { %5148 = vmatmul.bf16.gmra.mxu1 %v4859_v47  ;;  %v4883_v22 = vsel %vm2040_vm1, %v4878_v56, %v4882_v23 }
 0x620   : > { %5568 = vmatmul.bf16.gmra.mxu3 %v4867_v43  ;;  %v3546_v14 = vpop.f32.mrf.mxu2 }
 0x623   : > { %v10158_v29 = vpop.f32.mrf.mxu3 }
 0x624   : > { %v3682_v46 = vpop.f32.mrf.mxu1  ;;  %v4299_v45 = vpop.f32.mrf.mxu0 }
 0x628   : > { %v3547_v37 = vpop.f32.mrf.mxu2 }
 0x629   : > { %v4884_v37 = vshrl.u32 %v9718_v9, 16 }
 0x62b   : > { %v10162_v49 = vpop.f32.mrf.mxu3 }
 0x62c   : > { %v5114_v12 = vpop.f32.mrf.mxu1  ;;  %v5249_v19 = vpop.f32.mrf.mxu0 }
 0x62d   : > { %4346 = vmatmul.bf16.gmra.mxu2 %v11009_v8 }
 0x62e   : > { %5285 = vmatmul.bf16.gmra.mxu0 %v4867_v43 }
 0x62f   : > { %5153 = vmatmul.bf16.gmra.mxu1 %v4867_v43 }
 0x630   : > { %5573 = vmatmul.bf16.gmra.mxu3 %v4875_v13  ;;  %v4310_v47 = vpop.f32.mrf.mxu2 }
 0x631   : > { %v4886_v47 = vor.u32 %v4884_v37, %v4882_v23 }
 0x633   : > { %v4701_v57 = vpop.f32.mrf.mxu3 }
 0x634   : > { %v5116_v15 = vpop.f32.mrf.mxu1  ;;  %v5250_v2 = vpop.f32.mrf.mxu0  ;;  %v4890_v57 = vrot.slane %v4888_v33, 1 }
 0x638   : > { %v4311_v14 = vpop.f32.mrf.mxu2 }
 0x63b   : > { %v10168_v46 = vpop.f32.mrf.mxu3 }
 0x63c   : > { %11012 = vst [vmem:[#allocation101_spill] sm:$0xff] %v10168_v46  ;;  %v5119_v48 = vpop.f32.mrf.mxu1  ;;  %v5252_v8 = vpop.f32.mrf.mxu0 }
 0x63d   : > { %4351 = vmatmul.bf16.gmra.mxu2 %v9682_v10 }
 0x63e   : > { %5290 = vmatmul.bf16.gmra.mxu0 %v4875_v13 }
 0x63f   : > { %5158 = vmatmul.bf16.gmra.mxu1 %v4875_v13  ;;  %v4891_v13 = vsel %vm2040_vm1, %v4886_v47, %v4890_v57 }
 0x640   : > { %5578 = vmatmul.bf16.gmra.mxu3 %v4883_v22  ;;  %v4313_v43 = vpop.f32.mrf.mxu2 }
 0x643   : > { %v10172_v45 = vpop.f32.mrf.mxu3 }
 0x644   : > { %11013 = vst [vmem:[#allocation32_spill] sm:$0xff] %v10172_v45  ;;  %v5121_v63 = vpop.f32.mrf.mxu1  ;;  %v5253_v19 = vpop.f32.mrf.mxu0 }
 0x648   : > { %v4314_v58 = vpop.f32.mrf.mxu2 }
 0x649   : > { %v4484_v2 = vadd.f32 %v11014_v7, %v4314_v58 }
 0x64b   : > { %v4708_v56 = vpop.f32.mrf.mxu3  ;;  %v4711_v10 = vadd.f32 %v9766_v28, %v4484_v2 }
 0x64c   : > { %v5124_v14 = vpop.f32.mrf.mxu1  ;;  %v5256_v48 = vpop.f32.mrf.mxu0 }
 0x64d   : > { %4356 = vmatmul.bf16.gmra.mxu2 %v9704_v62  ;;  %v5375_v8 = vadd.f32 %v5114_v12, %v4711_v10  ;;  %v4892_v12 = vshrl.u32 %v9754_v4, 16 }
 0x64e   : > { %5295 = vmatmul.bf16.gmra.mxu0 %v4883_v22 }
 0x64f   : > { %5163 = vmatmul.bf16.gmra.mxu1 %v4883_v22  ;;  %v5423_v43 = vadd.f32 %v5375_v8, %v5253_v19  ;;  %v4896_v19 = vshll.u32 %v9776_v17, 16  ;;  %v4894_v2 = vor.u32 %v4892_v12, %v4890_v57  ;;  %v11015_v57 = vld [vmem:[#allocation87_spill] sm:$0xff] }
 0x650   : > { %5583 = vmatmul.bf16.gmra.mxu3 %v4891_v13  ;;  %v4317_v23 = vpop.f32.mrf.mxu2  ;;  %v11016_v12 = vld [vmem:[#allocation27_spill] sm:$0xff] }
 0x651   : > { %v4485_v28 = vadd.f32 %v9711_v55, %v4317_v23  ;;  %v4898_v56 = vrot.slane %v4896_v19, 1 }
 0x653   : > { %v5544_v37 = vpop.f32.mrf.mxu3  ;;  %v4712_v47 = vadd.f32 %v9772_v0, %v4485_v28  ;;  %v4899_v55 = vsel %vm2040_vm1, %v4894_v2, %v4898_v56 }
 0x654   : > { %v5664_v33 = vadd.f32 %v5544_v37, %v5423_v43  ;;  %v5126_v62 = vpop.f32.mrf.mxu1  ;;  %v5258_v22 = vpop.f32.mrf.mxu0 }
 0x655   : > { %v5376_v58 = vadd.f32 %v5116_v15, %v4712_v47 }
 0x656   : > { %6815 = vst [vmem:[%s10184_s7 + $0x30] sm:$0xff] %v5664_v33  ;;  %v5900_v23 = vmul.f32 %v5664_v33, %v5664_v33 }
 0x657   : > { %v5424_v7 = vadd.f32 %v5376_v58, %v5256_v48  ;;  %v4900_v58 = vshrl.u32 %v9776_v17, 16 }
 0x658   : > { %v4319_v10 = vpop.f32.mrf.mxu2 }
 0x659   : > { %v4902_v2 = vor.u32 %v4900_v58, %v4898_v56 }
 0x65b   : > { %v5546_v8 = vpop.f32.mrf.mxu3 }
 0x65c   : > { %v5665_v45 = vadd.f32 %v5546_v8, %v5424_v7  ;;  %v5129_v43 = vpop.f32.mrf.mxu1  ;;  %v5261_v37 = vpop.f32.mrf.mxu0 }
 0x65d   : > { %4361 = vmatmul.bf16.gmra.mxu2 %v9718_v9 }
 0x65e   : > { %6816 = vst [vmem:[%s10184_s7 + $0x38] sm:$0xff] %v5665_v45  ;;  %v5847_v0 = vadd.f32 %v5665_v45, %v5664_v33  ;;  %v5901_v28 = vmul.f32 %v5665_v45, %v5665_v45  ;;  %5300 = vmatmul.bf16.gmra.mxu0 %v4891_v13  ;;  %v4904_v45 = vshll.u32 %v9790_v30, 16 }
 0x65f   : > { %5168 = vmatmul.bf16.gmra.mxu1 %v4891_v13  ;;  %v11017_v13 = vld [vmem:[#allocation25_spill] sm:$0xff] }
 0x660   : > { %v5948_v62 = vadd.f32 %v5901_v28, %v5900_v23  ;;  %5588 = vmatmul.bf16.gmra.mxu3 %v4899_v55  ;;  %v4322_v15 = vpop.f32.mrf.mxu2  ;;  %v4906_v10 = vrot.slane %v4904_v45, 1 }
 0x661   : > { %v4487_v48 = vadd.f32 %v11015_v57, %v4322_v15  ;;  %v11018_v57 = vld [vmem:[#allocation50_spill] sm:$0xff] }
 0x663   : > { %v5549_v47 = vpop.f32.mrf.mxu3  ;;  %v4714_v19 = vadd.f32 %v11016_v12, %v4487_v48  ;;  %v4907_v48 = vsel %vm2040_vm1, %v4902_v2, %v4906_v10  ;;  %v4912_v2 = vshll.u32 %v9820_v25, 16 }
 0x664   : > { %v10196_v22 = vpop.f32.mrf.mxu1  ;;  %v5263_v33 = vpop.f32.mrf.mxu0 }
 0x665   : > { %v5378_v7 = vadd.f32 %v5121_v63, %v4714_v19 }
 0x667   : > { %v5426_v9 = vadd.f32 %v5378_v7, %v5261_v37 }
 0x668   : > { %v4324_v8 = vpop.f32.mrf.mxu2 }
 0x669   : > { %v4488_v23 = vadd.f32 %v11017_v13, %v4324_v8 }
 0x66b   : > { %v5551_v28 = vpop.f32.mrf.mxu3  ;;  %v4715_v47 = vadd.f32 %v11018_v57, %v4488_v23 }
 0x66c   : > { %v5667_v15 = vadd.f32 %v5551_v28, %v5426_v9  ;;  %v5134_v12 = vpop.f32.mrf.mxu1  ;;  %v5266_v18 = vpop.f32.mrf.mxu0  ;;  %v4908_v9 = vshrl.u32 %v9790_v30, 16 }
 0x66d   : > { %4366 = vmatmul.bf16.gmra.mxu2 %v9754_v4  ;;  %v5379_v63 = vadd.f32 %v5124_v14, %v4715_v47  ;;  %v4914_v14 = vrot.slane %v4912_v2, 1  ;;  %v11020_v12 = vld [vmem:[#allocation90_spill] sm:$0xff] }
 0x66e   : > { %6818 = vst [vmem:[%s10184_s7 + $0x48] sm:$0xff] %v5667_v15  ;;  %v5849_v16 = vadd.f32 %v5847_v0, %v5667_v15  ;;  %v5903_v46 = vmul.f32 %v5667_v15, %v5667_v15  ;;  %5305 = vmatmul.bf16.gmra.mxu0 %v4899_v55  ;;  %v4910_v4 = vor.u32 %v4908_v9, %v4906_v10 }
 0x66f   : > { %5173 = vmatmul.bf16.gmra.mxu1 %v4899_v55  ;;  %v5427_v37 = vadd.f32 %v5379_v63, %v5263_v33 }
 0x670   : > { %v5950_v56 = vadd.f32 %v5948_v62, %v5903_v46  ;;  %5593 = vmatmul.bf16.gmra.mxu3 %v4907_v48  ;;  %v4327_v19 = vpop.f32.mrf.mxu2  ;;  %v11019_v62 = vld [vmem:[#allocation97_spill] sm:$0xff]  ;;  %v4915_v28 = vsel %vm2040_vm1, %v4910_v4, %v4914_v14 }
 0x673   : > { %v5554_v58 = vpop.f32.mrf.mxu3 }
 0x674   : > { %v5668_v45 = vadd.f32 %v5554_v58, %v5427_v37  ;;  %v5136_v7 = vpop.f32.mrf.mxu1  ;;  %v5268_v18 = vpop.f32.mrf.mxu0  ;;  %v4916_v58 = vshrl.u32 %v9820_v25, 16 }
 0x676   : > { %6819 = vst [vmem:[%s10184_s7 + $0x50] sm:$0xff] %v5668_v45  ;;  %v5850_v0 = vadd.f32 %v5849_v16, %v5668_v45  ;;  %v5904_v8 = vmul.f32 %v5668_v45, %v5668_v45  ;;  %v4920_v45 = vshll.u32 %v9848_v32, 16 }
 0x678   : > { %v5951_v13 = vadd.f32 %v5950_v56, %v5904_v8  ;;  %v4329_v46 = vpop.f32.mrf.mxu2  ;;  %v4922_v4 = vrot.slane %v4920_v45, 1 }
 0x679   : > { %v4490_v23 = vadd.f32 %v11019_v62, %v4329_v46 }
 0x67b   : > { %v5556_v33 = vpop.f32.mrf.mxu3  ;;  %v4717_v55 = vadd.f32 %v9832_v3, %v4490_v23 }
 0x67c   : > { %v10211_v15 = vpop.f32.mrf.mxu1  ;;  %v5271_v57 = vpop.f32.mrf.mxu0 }
 0x67d   : > { %4371 = vmatmul.bf16.gmra.mxu2 %v9776_v17  ;;  %v5381_v16 = vadd.f32 %v5129_v43, %v4717_v55 }
 0x67e   : > { %5310 = vmatmul.bf16.gmra.mxu0 %v4907_v48 }
 0x67f   : > { %5178 = vmatmul.bf16.gmra.mxu1 %v4907_v48  ;;  %v5429_v47 = vadd.f32 %v5381_v16, %v5268_v18  ;;  %v4918_v18 = vor.u32 %v4916_v58, %v4914_v14 }
 0x680   : > { %5598 = vmatmul.bf16.gmra.mxu3 %v4915_v28  ;;  %v4332_v10 = vpop.f32.mrf.mxu2 }
 0x681   : > { %v4491_v63 = vadd.f32 %v11020_v12, %v4332_v10 }
 0x683   : > { %v5559_v56 = vpop.f32.mrf.mxu3  ;;  %v4718_v3 = vadd.f32 %v9844_v5, %v4491_v63  ;;  %v4923_v5 = vsel %vm2040_vm1, %v4918_v18, %v4922_v4  ;;  %v4924_v63 = vshrl.u32 %v9848_v32, 16 }
 0x684   : > { %v5670_v37 = vadd.f32 %v5559_v56, %v5429_v47  ;;  %v5141_v19 = vpop.f32.mrf.mxu1  ;;  %v5273_v9 = vpop.f32.mrf.mxu0  ;;  %v4928_v56 = vshll.u32 %v9862_v51, 16 }
 0x685   : > { %v5382_v2 = vadd.f32 %v10196_v22, %v4718_v3  ;;  %v4926_v19 = vor.u32 %v4924_v63, %v4922_v4 }
 0x686   : > { %6821 = vst [vmem:[%s10184_s7 + $0x60] sm:$0xff] %v5670_v37  ;;  %v5852_v17 = vadd.f32 %v5850_v0, %v5670_v37  ;;  %v5906_v43 = vmul.f32 %v5670_v37, %v5670_v37  ;;  %v4930_v58 = vrot.slane %v4928_v56, 1 }
 0x687   : > { %v5430_v8 = vadd.f32 %v5382_v2, %v5271_v57 }
 0x688   : > { %v5953_v48 = vadd.f32 %v5951_v13, %v5906_v43  ;;  %v4334_v46 = vpop.f32.mrf.mxu2  ;;  %v11021_v13 = vld [vmem:[#allocation98_spill] sm:$0xff] }
 0x68b   : > { %v5561_v62 = vpop.f32.mrf.mxu3 }
 0x68c   : > { %v5671_v23 = vadd.f32 %v5561_v62, %v5430_v8  ;;  %v5144_v33 = vpop.f32.mrf.mxu1  ;;  %v5276_v47 = vpop.f32.mrf.mxu0 }
 0x68d   : > { %4376 = vmatmul.bf16.gmra.mxu2 %v9790_v30 }
 0x68e   : > { %6822 = vst [vmem:[%s10184_s7 + $0x68] sm:$0xff] %v5671_v23  ;;  %v5853_v55 = vadd.f32 %v5852_v17, %v5671_v23  ;;  %v5907_v16 = vmul.f32 %v5671_v23, %v5671_v23  ;;  %5315 = vmatmul.bf16.gmra.mxu0 %v4915_v28 }
 0x68f   : > { %5183 = vmatmul.bf16.gmra.mxu1 %v4915_v28 }
 0x690   : > { %v5954_v0 = vadd.f32 %v5953_v48, %v5907_v16  ;;  %5603 = vmatmul.bf16.gmra.mxu3 %v4923_v5  ;;  %v4337_v22 = vpop.f32.mrf.mxu2  ;;  %v4932_v16 = vshrl.u32 %v9862_v51, 16 }
 0x691   : > { %v4493_v14 = vadd.f32 %v11021_v13, %v4337_v22 }
 0x693   : > { %v5564_v57 = vpop.f32.mrf.mxu3  ;;  %v4720_v10 = vadd.f32 %v9858_v6, %v4493_v14  ;;  %v4931_v6 = vsel %vm2040_vm1, %v4926_v19, %v4930_v58  ;;  %v4934_v14 = vor.u32 %v4932_v16, %v4930_v58  ;;  %v11022_v58 = vld [vmem:[#allocation33_spill] sm:$0xff] }
 0x694   : > { %v10225_v12 = vpop.f32.mrf.mxu1  ;;  %v5278_v37 = vpop.f32.mrf.mxu0 }
 0x695   : > { %v5384_v3 = vadd.f32 %v5136_v7, %v4720_v10 }
 0x697   : > { %v5432_v30 = vadd.f32 %v5384_v3, %v5276_v47 }
 0x698   : > { %v4339_v45 = vpop.f32.mrf.mxu2 }
 0x699   : > { %v4494_v28 = vadd.f32 %v9815_v60, %v4339_v45 }
 0x69b   : > { %v5566_v17 = vpop.f32.mrf.mxu3  ;;  %v4721_v9 = vadd.f32 %v9878_v36, %v4494_v28 }
 0x69c   : > { %v5673_v43 = vadd.f32 %v5566_v17, %v5432_v30  ;;  %v5149_v2 = vpop.f32.mrf.mxu1  ;;  %v5281_v18 = vpop.f32.mrf.mxu0  ;;  %v11023_v17 = vld [vmem:[#allocation26_spill] sm:$0xff] }
 0x69d   : > { %4381 = vmatmul.bf16.gmra.mxu2 %v9820_v25  ;;  %v5385_v7 = vadd.f32 %v10211_v15, %v4721_v9  ;;  %v4940_v9 = vshrl.u32 %v9892_v41, 16  ;;  %v4944_v2 = vshll.u32 %v9920_v20, 16 }
 0x69e   : > { %6824 = vst [vmem:[%s10184_s7 + $0x78] sm:$0xff] %v5673_v43  ;;  %v5855_v48 = vadd.f32 %v5853_v55, %v5673_v43  ;;  %v5909_v8 = vmul.f32 %v5673_v43, %v5673_v43  ;;  %5320 = vmatmul.bf16.gmra.mxu0 %v4923_v5  ;;  %v4936_v55 = vshll.u32 %v9892_v41, 16 }
 0x69f   : > { %5188 = vmatmul.bf16.gmra.mxu1 %v4923_v5  ;;  %v5433_v60 = vadd.f32 %v5385_v7, %v5278_v37 }
 0x6a0   : > { %v5956_v4 = vadd.f32 %v5954_v0, %v5909_v8  ;;  %5608 = vmatmul.bf16.gmra.mxu3 %v4931_v6  ;;  %v4342_v46 = vpop.f32.mrf.mxu2  ;;  %v4938_v15 = vrot.slane %v4936_v55, 1 }
 0x6a2   : > { %v4939_v63 = vsel %vm2040_vm1, %v4934_v14, %v4938_v15  ;;  %v4942_v7 = vor.u32 %v4940_v9, %v4938_v15 }
 0x6a3   : > { %v5569_v62 = vpop.f32.mrf.mxu3 }
 0x6a4   : > { %v5674_v36 = vadd.f32 %v5569_v62, %v5433_v60  ;;  %v5151_v23 = vpop.f32.mrf.mxu1  ;;  %v5283_v13 = vpop.f32.mrf.mxu0 }
 0x6a6   : > { %6825 = vst [vmem:[%s10184_s7 + $0x80] sm:$0xff] %v5674_v36  ;;  %v5856_v47 = vadd.f32 %v5855_v48, %v5674_v36  ;;  %v5910_v22 = vmul.f32 %v5674_v36, %v5674_v36 }
 0x6a8   : > { %v5957_v25 = vadd.f32 %v5956_v4, %v5910_v22  ;;  %v4344_v0 = vpop.f32.mrf.mxu2  ;;  %v4946_v4 = vrot.slane %v4944_v2, 1 }
 0x6a9   : > { %v4496_v57 = vadd.f32 %v9841_v24, %v4344_v0  ;;  %v11025_v0 = vld [vmem:[#allocation31_spill] sm:$0xff] }
 0x6aa   : > { %v4947_v36 = vsel %vm2040_vm1, %v4942_v7, %v4946_v4 }
 0x6ab   : > { %v5571_v10 = vpop.f32.mrf.mxu3  ;;  %v4723_v5 = vadd.f32 %v9898_v54, %v4496_v57 }
 0x6ac   : > { %v10241_v56 = vpop.f32.mrf.mxu1  ;;  %v5286_v37 = vpop.f32.mrf.mxu0 }
 0x6ad   : > { %4386 = vmatmul.bf16.gmra.mxu2 %v9848_v32  ;;  %v5387_v3 = vadd.f32 %v5144_v33, %v4723_v5  ;;  %v4948_v5 = vshrl.u32 %v9920_v20, 16 }
 0x6ae   : > { %5325 = vmatmul.bf16.gmra.mxu0 %v4931_v6 }
 0x6af   : > { %5193 = vmatmul.bf16.gmra.mxu1 %v4931_v6  ;;  %v5435_v30 = vadd.f32 %v5387_v3, %v5283_v13 }
 0x6b0   : > { %5613 = vmatmul.bf16.gmra.mxu3 %v4939_v63  ;;  %v4347_v19 = vpop.f32.mrf.mxu2 }
 0x6b1   : > { %v4497_v45 = vadd.f32 %v11022_v58, %v4347_v19  ;;  %v4950_v19 = vor.u32 %v4948_v5, %v4946_v4  ;;  %v4956_v4 = vshrl.u32 %v9934_v1, 16 }
 0x6b3   : > { %v5574_v24 = vpop.f32.mrf.mxu3  ;;  %v4724_v54 = vadd.f32 %v11023_v17, %v4497_v45 }
 0x6b4   : > { %v5676_v28 = vadd.f32 %v5574_v24, %v5435_v30  ;;  %v5156_v43 = vpop.f32.mrf.mxu1  ;;  %v5288_v48 = vpop.f32.mrf.mxu0 }
 0x6b5   : > { %v5388_v8 = vadd.f32 %v10225_v12, %v4724_v54 }
 0x6b6   : > { %6827 = vst [vmem:[%s10184_s7 + $0x90] sm:$0xff] %v5676_v28  ;;  %v5858_v32 = vadd.f32 %v5856_v47, %v5676_v28  ;;  %v5912_v33 = vmul.f32 %v5676_v28, %v5676_v28 }
 0x6b7   : > { %v5436_v18 = vadd.f32 %v5388_v8, %v5286_v37  ;;  %v4952_v37 = vshll.u32 %v9934_v1, 16 }
 0x6b8   : > { %v5959_v6 = vadd.f32 %v5957_v25, %v5912_v33  ;;  %v4349_v60 = vpop.f32.mrf.mxu2  ;;  %v11024_v25 = vld [vmem:[#allocation94_spill] sm:$0xff] }
 0x6b9   : > { %v4954_v58 = vrot.slane %v4952_v37, 1  ;;  %v11027_v60 = vld [vmem:[#allocation34_spill] sm:$0xff] }
 0x6bb   : > { %v5576_v46 = vpop.f32.mrf.mxu3  ;;  %v4955_v43 = vsel %vm2040_vm1, %v4950_v19, %v4954_v58 }
 0x6bc   : > { %v5677_v62 = vadd.f32 %v5576_v46, %v5436_v18  ;;  %v5159_v16 = vpop.f32.mrf.mxu1  ;;  %v5291_v13 = vpop.f32.mrf.mxu0  ;;  %v4960_v46 = vshll.u32 %v11027_v60, 16 }
 0x6bd   : > { %4391 = vmatmul.bf16.gmra.mxu2 %v9862_v51 }
 0x6be   : > { %6828 = vst [vmem:[%s10184_s7 + $0x98] sm:$0xff] %v5677_v62  ;;  %v5859_v55 = vadd.f32 %v5858_v32, %v5677_v62  ;;  %v5913_v22 = vmul.f32 %v5677_v62, %v5677_v62  ;;  %5330 = vmatmul.bf16.gmra.mxu0 %v4939_v63 }
 0x6bf   : > { %5198 = vmatmul.bf16.gmra.mxu1 %v4939_v63  ;;  %v11026_v63 = vld [vmem:[#allocation29_spill] sm:$0xff] }
 0x6c0   : > { %v5960_v47 = vadd.f32 %v5959_v6, %v5913_v22  ;;  %5618 = vmatmul.bf16.gmra.mxu3 %v4947_v36  ;;  %v4352_v12 = vpop.f32.mrf.mxu2 }
 0x6c1   : > { %v4499_v14 = vadd.f32 %v11024_v25, %v4352_v12  ;;  %v11028_v12 = vld [vmem:[#allocation99_spill] sm:$0xff] }
 0x6c3   : > { %v5579_v15 = vpop.f32.mrf.mxu3  ;;  %v4726_v57 = vadd.f32 %v11025_v0, %v4499_v14 }
 0x6c4   : > { %v10255_v10 = vpop.f32.mrf.mxu1  ;;  %v5293_v3 = vpop.f32.mrf.mxu0 }
 0x6c5   : > { %v5390_v30 = vadd.f32 %v5151_v23, %v4726_v57 }
 0x6c7   : > { %v5438_v51 = vadd.f32 %v5390_v30, %v5291_v13  ;;  %v4958_v13 = vor.u32 %v4956_v4, %v4954_v58 }
 0x6c8   : > { %v4354_v45 = vpop.f32.mrf.mxu2 }
 0x6c9   : > { %v4500_v24 = vadd.f32 %v11026_v63, %v4354_v45  ;;  %v11031_v63 = vld [vmem:[#allocation24_spill] sm:$0xff] }
 0x6cb   : > { %v5581_v28 = vpop.f32.mrf.mxu3  ;;  %v4727_v54 = vadd.f32 %v9950_v31, %v4500_v24 }
 0x6cc   : > { %v5679_v17 = vadd.f32 %v5581_v28, %v5438_v51  ;;  %v5164_v9 = vpop.f32.mrf.mxu1  ;;  %v5296_v33 = vpop.f32.mrf.mxu0  ;;  %v11030_v51 = vld [vmem:[#allocation18_spill] sm:$0xff] }
 0x6cd   : > { %4396 = vmatmul.bf16.gmra.mxu2 %v9892_v41  ;;  %v5391_v23 = vadd.f32 %v10241_v56, %v4727_v54  ;;  %v4962_v56 = vrot.slane %v4960_v46, 1  ;;  %v4968_v54 = vshll.u32 %v9986_v11, 16 }
 0x6ce   : > { %6830 = vst [vmem:[%s10184_s7 + $0xa8] sm:$0xff] %v5679_v17  ;;  %v5861_v2 = vadd.f32 %v5859_v55, %v5679_v17  ;;  %v5915_v32 = vmul.f32 %v5679_v17, %v5679_v17  ;;  %5335 = vmatmul.bf16.gmra.mxu0 %v4947_v36  ;;  %v4964_v17 = vshrl.u32 %v11027_v60, 16 }
 0x6cf   : > { %5203 = vmatmul.bf16.gmra.mxu1 %v4947_v36  ;;  %v5439_v8 = vadd.f32 %v5391_v23, %v5293_v3  ;;  %v11029_v36 = vld [vmem:[#allocation20_spill] sm:$0xff]  ;;  %v4963_v0 = vsel %vm2040_vm1, %v4958_v13, %v4962_v56  ;;  %v4970_v23 = vrot.slane %v4968_v54, 1 }
 0x6d0   : > { %v5962_v48 = vadd.f32 %v5960_v47, %v5915_v32  ;;  %5623 = vmatmul.bf16.gmra.mxu3 %v4955_v43  ;;  %v4357_v6 = vpop.f32.mrf.mxu2  ;;  %v4966_v33 = vor.u32 %v4964_v17, %v4962_v56 }
 0x6d3   : > { %v5584_v18 = vpop.f32.mrf.mxu3 }
 0x6d4   : > { %v5680_v31 = vadd.f32 %v5584_v18, %v5439_v8  ;;  %v5166_v7 = vpop.f32.mrf.mxu1  ;;  %v5298_v22 = vpop.f32.mrf.mxu0  ;;  %v4971_v18 = vsel %vm2040_vm1, %v4966_v33, %v4970_v23 }
 0x6d6   : > { %6831 = vst [vmem:[%s10184_s7 + $0xb0] sm:$0xff] %v5680_v31  ;;  %v5862_v62 = vadd.f32 %v5861_v2, %v5680_v31  ;;  %v5916_v55 = vmul.f32 %v5680_v31, %v5680_v31 }
 0x6d8   : > { %v5963_v41 = vadd.f32 %v5962_v48, %v5916_v55  ;;  %v4359_v47 = vpop.f32.mrf.mxu2 }
 0x6d9   : > { %v4502_v25 = vadd.f32 %v11028_v12, %v4359_v47  ;;  %v4972_v12 = vshrl.u32 %v9986_v11, 16 }
 0x6db   : > { %v5586_v14 = vpop.f32.mrf.mxu3  ;;  %v4729_v15 = vadd.f32 %v11029_v36, %v4502_v25  ;;  %v4976_v25 = vshll.u32 %v10006_v42, 16 }
 0x6dc   : > { %v10271_v57 = vpop.f32.mrf.mxu1  ;;  %v5301_v5 = vpop.f32.mrf.mxu0 }
 0x6dd   : > { %4401 = vmatmul.bf16.gmra.mxu2 %v9920_v20  ;;  %v5393_v37 = vadd.f32 %v5159_v16, %v4729_v15  ;;  %v4974_v15 = vor.u32 %v4972_v12, %v4970_v23 }
 0x6de   : > { %5340 = vmatmul.bf16.gmra.mxu0 %v4955_v43 }
 0x6df   : > { %5208 = vmatmul.bf16.gmra.mxu1 %v4955_v43  ;;  %v5441_v3 = vadd.f32 %v5393_v37, %v5298_v22  ;;  %v11032_v22 = vld [vmem:[#allocation16_spill] sm:$0xff] }
 0x6e0   : > { %5628 = vmatmul.bf16.gmra.mxu3 %v4963_v0  ;;  %v4362_v30 = vpop.f32.mrf.mxu2 }
 0x6e1   : > { %v4503_v19 = vadd.f32 %v11030_v51, %v4362_v30 }
 0x6e3   : > { %v5589_v58 = vpop.f32.mrf.mxu3  ;;  %v4730_v24 = vadd.f32 %v11031_v63, %v4503_v19 }
 0x6e4   : > { %v5682_v45 = vadd.f32 %v5589_v58, %v5441_v3  ;;  %v5171_v28 = vpop.f32.mrf.mxu1  ;;  %v5303_v9 = vpop.f32.mrf.mxu0 }
 0x6e5   : > { %v5394_v2 = vadd.f32 %v10255_v10, %v4730_v24  ;;  %v4980_v9 = vshrl.u32 %v10006_v42, 16 }
 0x6e6   : > { %6833 = vst [vmem:[%s10184_s7 + $0xc0] sm:$0xff] %v5682_v45  ;;  %v5864_v20 = vadd.f32 %v5862_v62, %v5682_v45  ;;  %v5918_v16 = vmul.f32 %v5682_v45, %v5682_v45 }
 0x6e7   : > { %v5442_v32 = vadd.f32 %v5394_v2, %v5301_v5  ;;  %v4978_v5 = vrot.slane %v4976_v25, 1  ;;  %v4984_v2 = vshll.u32 %v10030_v38, 16 }
 0x6e8   : > { %v5965_v43 = vadd.f32 %v5963_v41, %v5918_v16  ;;  %v4364_v48 = vpop.f32.mrf.mxu2 }
 0x6e9   : > { %v4982_v23 = vor.u32 %v4980_v9, %v4978_v5  ;;  %v11038_v9 = vld [vmem:[#allocation41_spill] sm:$0xff] }
 0x6eb   : > { %v5591_v8 = vpop.f32.mrf.mxu3 }
 0x6ec   : > { %v5683_v6 = vadd.f32 %v5591_v8, %v5442_v32  ;;  %v5174_v31 = vpop.f32.mrf.mxu1  ;;  %v5306_v55 = vpop.f32.mrf.mxu0  ;;  %v11034_v8 = vld [vmem:[#allocation39_spill] sm:$0xff] }
 0x6ed   : > { %4406 = vmatmul.bf16.gmra.mxu2 %v9934_v1 }
 0x6ee   : > { %6834 = vst [vmem:[%s10184_s7 + $0xc8] sm:$0xff] %v5683_v6  ;;  %v5865_v4 = vadd.f32 %v5864_v20, %v5683_v6  ;;  %v5919_v46 = vmul.f32 %v5683_v6, %v5683_v6  ;;  %5345 = vmatmul.bf16.gmra.mxu0 %v4963_v0 }
 0x6ef   : > { %5213 = vmatmul.bf16.gmra.mxu1 %v4963_v0  ;;  %v11033_v0 = vld [vmem:[#allocation22_spill] sm:$0xff] }
 0x6f0   : > { %v5966_v62 = vadd.f32 %v5965_v43, %v5919_v46  ;;  %5633 = vmatmul.bf16.gmra.mxu3 %v4971_v18  ;;  %v4367_v10 = vpop.f32.mrf.mxu2 }
 0x6f1   : > { %v4505_v41 = vadd.f32 %v11032_v22, %v4367_v10 }
 0x6f3   : > { %v5594_v13 = vpop.f32.mrf.mxu3  ;;  %v4732_v56 = vadd.f32 %v10002_v40, %v4505_v41  ;;  %v4979_v40 = vsel %vm2040_vm1, %v4974_v15, %v4978_v5  ;;  %v4992_v15 = vshll.u32 %v10061_v61, 16 }
 0x6f4   : > { %v10285_v47 = vpop.f32.mrf.mxu1  ;;  %v5308_v14 = vpop.f32.mrf.mxu0  ;;  %v11035_v13 = vld [vmem:[#allocation36_spill] sm:$0xff] }
 0x6f5   : > { %v5396_v36 = vadd.f32 %v5166_v7, %v4732_v56 }
 0x6f7   : > { %v5444_v1 = vadd.f32 %v5396_v36, %v5306_v55 }
 0x6f8   : > { %v4369_v37 = vpop.f32.mrf.mxu2 }
 0x6f9   : > { %v4506_v3 = vadd.f32 %v11033_v0, %v4369_v37 }
 0x6fb   : > { %v5596_v30 = vpop.f32.mrf.mxu3  ;;  %v4733_v19 = vadd.f32 %v10022_v53, %v4506_v3 }
 0x6fc   : > { %v5685_v51 = vadd.f32 %v5596_v30, %v5444_v1  ;;  %v5179_v58 = vpop.f32.mrf.mxu1  ;;  %v5311_v24 = vpop.f32.mrf.mxu0  ;;  %v4988_v1 = vshrl.u32 %v10030_v38, 16 }
 0x6fd   : > { %4411 = vmatmul.bf16.gmra.mxu2 %v11027_v60  ;;  %v5397_v7 = vadd.f32 %v10271_v57, %v4733_v19  ;;  %v4986_v57 = vrot.slane %v4984_v2, 1 }
 0x6fe   : > { %6836 = vst [vmem:[%s10184_s7 + $0xd8] sm:$0xff] %v5685_v51  ;;  %v5867_v45 = vadd.f32 %v5865_v4, %v5685_v51  ;;  %v5921_v63 = vmul.f32 %v5685_v51, %v5685_v51  ;;  %5350 = vmatmul.bf16.gmra.mxu0 %v4971_v18  ;;  %v4994_v51 = vrot.slane %v4992_v15, 1 }
 0x6ff   : > { %5218 = vmatmul.bf16.gmra.mxu1 %v4971_v18  ;;  %v5445_v17 = vadd.f32 %v5397_v7, %v5308_v14  ;;  %v4987_v46 = vsel %vm2040_vm1, %v4982_v23, %v4986_v57  ;;  %v11036_v14 = vld [vmem:[#allocation38_spill] sm:$0xff]  ;;  %v4990_v30 = vor.u32 %v4988_v1, %v4986_v57 }
 0x700   : > { %v5968_v28 = vadd.f32 %v5966_v62, %v5921_v63  ;;  %5638 = vmatmul.bf16.gmra.mxu3 %v4979_v40  ;;  %v4372_v54 = vpop.f32.mrf.mxu2 }
 0x701   : > { %v11037_v54 = vld [vmem:[#allocation28_spill] sm:$0xff] }
 0x703   : > { %v5599_v20 = vpop.f32.mrf.mxu3 }
 0x704   : > { %v5686_v53 = vadd.f32 %v5599_v20, %v5445_v17  ;;  %v5181_v16 = vpop.f32.mrf.mxu1  ;;  %v5313_v33 = vpop.f32.mrf.mxu0 }
 0x706   : > { %6837 = vst [vmem:[%s10184_s7 + $0xe0] sm:$0xff] %v5686_v53  ;;  %v5868_v43 = vadd.f32 %v5867_v45, %v5686_v53  ;;  %v5922_v32 = vmul.f32 %v5686_v53, %v5686_v53  ;;  %v4995_v45 = vsel %vm2040_vm1, %v4990_v30, %v4994_v51 }
 0x708   : > { %v5969_v60 = vadd.f32 %v5968_v28, %v5922_v32  ;;  %v4374_v48 = vpop.f32.mrf.mxu2  ;;  %v4996_v32 = vshrl.u32 %v10061_v61, 16 }
 0x709   : > { %v4508_v6 = vadd.f32 %v11034_v8, %v4374_v48 }
 0x70a   : > { %v4998_v48 = vor.u32 %v4996_v32, %v4994_v51 }
 0x70b   : > { %v5601_v4 = vpop.f32.mrf.mxu3  ;;  %v4735_v18 = vadd.f32 %v10036_v34, %v4508_v6 }
 0x70c   : > { %v10301_v55 = vpop.f32.mrf.mxu1  ;;  %v5316_v62 = vpop.f32.mrf.mxu0  ;;  %v11040_v4 = vld [vmem:[#allocation40_spill] sm:$0xff] }
 0x70d   : > { %4416 = vmatmul.bf16.gmra.mxu2 %v9986_v11  ;;  %v5399_v10 = vadd.f32 %v5174_v31, %v4735_v18 }
 0x70e   : > { %5355 = vmatmul.bf16.gmra.mxu0 %v4979_v40 }
 0x70f   : > { %5223 = vmatmul.bf16.gmra.mxu1 %v4979_v40  ;;  %v5447_v22 = vadd.f32 %v5399_v10, %v5313_v33  ;;  %v11039_v33 = vld [vmem:[#allocation44_spill] sm:$0xff]  ;;  %v11041_v10 = vld [vmem:[#allocation45_spill] sm:$0xff] }
 0x710   : > { %5643 = vmatmul.bf16.gmra.mxu3 %v4987_v46  ;;  %v4377_v41 = vpop.f32.mrf.mxu2 }
 0x711   : > { %v4509_v56 = vadd.f32 %v11035_v13, %v4377_v41 }
 0x713   : > { %v5604_v12 = vpop.f32.mrf.mxu3  ;;  %v4736_v34 = vadd.f32 %v11036_v14, %v4509_v56 }
 0x714   : > { %v5688_v25 = vadd.f32 %v5604_v12, %v5447_v22  ;;  %v5186_v36 = vpop.f32.mrf.mxu1  ;;  %v5318_v5 = vpop.f32.mrf.mxu0 }
 0x715   : > { %v5400_v37 = vadd.f32 %v10285_v47, %v4736_v34  ;;  %v5477_v5 = vshrl.u32 %v11039_v33, 16 }
 0x716   : > { %6839 = vst [vmem:[%s10184_s7 + $0xf0] sm:$0xff] %v5688_v25  ;;  %v5870_v11 = vadd.f32 %v5868_v43, %v5688_v25  ;;  %v5924_v31 = vmul.f32 %v5688_v25, %v5688_v25  ;;  %v3016_v25 = vld [vmem:[%s8756_s9 + $0x1c8] sm:$0xff] }
 0x717   : > { %v5448_v3 = vadd.f32 %v5400_v37, %v5316_v62  ;;  %v5471_v36 = vpack.c.bf16 %v3016_v25, %v3016_v25 }
 0x718   : > { %v5971_v0 = vadd.f32 %v5969_v60, %v5924_v31  ;;  %v4379_v19 = vpop.f32.mrf.mxu2  ;;  %v5473_v60 = vshll.u32 %v11039_v33, 16 }
 0x719   : > { %v5481_v37 = vshll.u32 %v5471_v36, 16 }
 0x71a   : > { %v5475_v8 = vrot.slane %v5473_v60, 1 }
 0x71b   : > { %v5606_v40 = vpop.f32.mrf.mxu3 }
 0x71c   : > { %v5689_v58 = vadd.f32 %v5606_v40, %v5448_v3  ;;  %v5189_v63 = vpop.f32.mrf.mxu1  ;;  %v5321_v28 = vpop.f32.mrf.mxu0  ;;  %v5476_v41 = vsel %vm2040_vm1, %v4998_v48, %v5475_v8  ;;  %v5479_v51 = vor.u32 %v5477_v5, %v5475_v8  ;;  %v11042_v40 = vld [vmem:[#allocation43_spill] sm:$0xff] }
 0x71d   : > { %4421 = vmatmul.bf16.gmra.mxu2 %v10006_v42 }
 0x71e   : > { %6840 = vst [vmem:[%s10184_s7 + $0xf8] sm:$0xff] %v5689_v58  ;;  %v5871_v24 = vadd.f32 %v5870_v11, %v5689_v58  ;;  %v5925_v7 = vmul.f32 %v5689_v58, %v5689_v58  ;;  %5360 = vmatmul.bf16.gmra.mxu0 %v4987_v46 }
 0x71f   : > { %5228 = vmatmul.bf16.gmra.mxu1 %v4987_v46 }
 0x720   : > { %v5972_v17 = vadd.f32 %v5971_v0, %v5925_v7  ;;  %5648 = vmatmul.bf16.gmra.mxu3 %v4995_v45  ;;  %v4382_v47 = vpop.f32.mrf.mxu2 }
 0x721   : > { %v4511_v20 = vadd.f32 %v11037_v54, %v4382_v47 }
 0x723   : > { %v5609_v53 = vpop.f32.mrf.mxu3  ;;  %v4738_v2 = vadd.f32 %v11038_v9, %v4511_v20  ;;  %v11044_v20 = vld [vmem:[#allocation30_spill] sm:$0xff] }
 0x724   : > { %v10315_v43 = vpop.f32.mrf.mxu1  ;;  %v5323_v23 = vpop.f32.mrf.mxu0 }
 0x725   : > { %v5402_v42 = vadd.f32 %v5181_v16, %v4738_v2  ;;  %v11045_v2 = vld [vmem:[#allocation47_spill] sm:$0xff] }
 0x727   : > { %v5450_v57 = vadd.f32 %v5402_v42, %v5321_v28 }
 0x728   : > { %v4384_v6 = vpop.f32.mrf.mxu2 }
 0x729   : > { %v4512_v18 = vadd.f32 %v11040_v4, %v4384_v6 }
 0x72b   : > { %v5611_v46 = vpop.f32.mrf.mxu3  ;;  %v4739_v22 = vadd.f32 %v11041_v10, %v4512_v18 }
 0x72c   : > { %v5691_v62 = vadd.f32 %v5611_v46, %v5450_v57  ;;  %v5194_v13 = vpop.f32.mrf.mxu1  ;;  %v5326_v12 = vpop.f32.mrf.mxu0 }
 0x72d   : > { %4426 = vmatmul.bf16.gmra.mxu2 %v10030_v38  ;;  %v5403_v16 = vadd.f32 %v10301_v55, %v4739_v22  ;;  %v5483_v55 = vrot.slane %v5481_v37, 1 }
 0x72e   : > { %6842 = vst [vmem:[%s10184_s7 + $0x108] sm:$0xff] %v5691_v62  ;;  %v5873_v61 = vadd.f32 %v5871_v24, %v5691_v62  ;;  %v5927_v56 = vmul.f32 %v5691_v62, %v5691_v62  ;;  %5365 = vmatmul.bf16.gmra.mxu0 %v4995_v45 }
 0x72f   : > { %5233 = vmatmul.bf16.gmra.mxu1 %v4995_v45  ;;  %v5451_v34 = vadd.f32 %v5403_v16, %v5323_v23  ;;  %v11043_v45 = vld [vmem:[#allocation42_spill] sm:$0xff]  ;;  %v5484_v28 = vsel %vm2040_vm1, %v5479_v51, %v5483_v55 }
 0x730   : > { %v5974_v14 = vadd.f32 %v5972_v17, %v5927_v56  ;;  %5653 = vmatmul.bf16.gmra.mxu3 %v5476_v41  ;;  %v4387_v1 = vpop.f32.mrf.mxu2  ;;  %v11046_v56 = vld [vmem:[#allocation61_spill] sm:$0xff] }
 0x733   : > { %v5614_v15 = vpop.f32.mrf.mxu3 }
 0x734   : > { %v5692_v11 = vadd.f32 %v5614_v15, %v5451_v34  ;;  %v5196_v31 = vpop.f32.mrf.mxu1  ;;  %v5328_v30 = vpop.f32.mrf.mxu0  ;;  %v11047_v15 = vld [vmem:[#allocation58_spill] sm:$0xff] }
 0x736   : > { %6843 = vst [vmem:[%s10184_s7 + $0x110] sm:$0xff] %v5692_v11  ;;  %v5874_v0 = vadd.f32 %v5873_v61, %v5692_v11  ;;  %v5928_v3 = vmul.f32 %v5692_v11, %v5692_v11 }
 0x738   : > { %v5975_v38 = vadd.f32 %v5974_v14, %v5928_v3  ;;  %v4389_v19 = vpop.f32.mrf.mxu2 }
 0x739   : > { %v4514_v58 = vadd.f32 %v11042_v40, %v4389_v19 }
 0x73b   : > { %v5616_v24 = vpop.f32.mrf.mxu3  ;;  %v4741_v7 = vadd.f32 %v11043_v45, %v4514_v58 }
 0x73c   : > { %v5199_v17 = vpop.f32.mrf.mxu1  ;;  %v5331_v47 = vpop.f32.mrf.mxu0 }
 0x73d   : > { %v5405_v54 = vadd.f32 %v5189_v63, %v4741_v7  ;;  %4431 = vmatmul.bf16.gmra.mxu2 %v11044_v20 }
 0x73e   : > { %5370 = vmatmul.bf16.gmra.mxu0 %v4998_v48 }
 0x73f   : > { %5236 = vmatmul.bf16.gmra.mxu1 %v4998_v48  ;;  %v5453_v53 = vadd.f32 %v5405_v54, %v5328_v30 }
 0x740   : > { %5658 = vmatmul.bf16.gmra.mxu3 %v5484_v28  ;;  %v4392_v9 = vpop.f32.mrf.mxu2 }
 0x741   : > { %v4515_v32 = vadd.f32 %v11045_v2, %v4392_v9 }
 0x743   : > { %v5619_v33 = vpop.f32.mrf.mxu3  ;;  %v4742_v23 = vadd.f32 %v10095_v21, %v4515_v32 }
 0x744   : > { %v5694_v60 = vadd.f32 %v5619_v33, %v5453_v53  ;;  %v5201_v42 = vpop.f32.mrf.mxu1  ;;  %v5333_v6 = vpop.f32.mrf.mxu0  ;;  %v11048_v53 = vld [vmem:[#allocation105_spill] sm:$0xff] }
 0x745   : > { %v5406_v63 = vadd.f32 %v10315_v43, %v4742_v23  ;;  %v11049_v23 = vld [vmem:[#allocation53_spill] sm:$0xff] }
 0x746   : > { %6845 = vst [vmem:[%s10184_s7 + $0x120] sm:$0xff] %v5694_v60  ;;  %v5876_v57 = vadd.f32 %v5874_v0, %v5694_v60  ;;  %v5930_v8 = vmul.f32 %v5694_v60, %v5694_v60 }
 0x747   : > { %v5454_v18 = vadd.f32 %v5406_v63, %v5331_v47 }
 0x748   : > { %v5977_v4 = vadd.f32 %v5975_v38, %v5930_v8  ;;  %v4394_v46 = vpop.f32.mrf.mxu2 }
 0x74b   : > { %v5621_v62 = vpop.f32.mrf.mxu3 }
 0x74c   : > { %v5695_v48 = vadd.f32 %v5621_v62, %v5454_v18  ;;  %v5204_v10 = vpop.f32.mrf.mxu1  ;;  %v5336_v13 = vpop.f32.mrf.mxu0 }
 0x74e   : > { %6846 = vst [vmem:[%s10184_s7 + $0x128] sm:$0xff] %v5695_v48  ;;  %v5877_v22 = vadd.f32 %v5876_v57, %v5695_v48  ;;  %v5931_v41 = vmul.f32 %v5695_v48, %v5695_v48 }
 0x750   : > { %v5978_v61 = vadd.f32 %v5977_v4, %v5931_v41  ;;  %v4397_v21 = vpop.f32.mrf.mxu2 }
 0x751   : > { %v4517_v12 = vadd.f32 %v11046_v56, %v4397_v21 }
 0x753   : > { %v5624_v25 = vpop.f32.mrf.mxu3  ;;  %v4744_v16 = vadd.f32 %v10106_v35, %v4517_v12 }
 0x754   : > { %v5206_v14 = vpop.f32.mrf.mxu1  ;;  %v5338_v43 = vpop.f32.mrf.mxu0 }
 0x755   : > { %v5408_v34 = vadd.f32 %v5196_v31, %v4744_v16 }
 0x757   : > { %v5456_v36 = vadd.f32 %v5408_v34, %v5336_v13 }
 0x758   : > { %v4399_v1 = vpop.f32.mrf.mxu2 }
 0x759   : > { %v4518_v11 = vadd.f32 %v11047_v15, %v4399_v1 }
 0x75b   : > { %v5626_v5 = vpop.f32.mrf.mxu3  ;;  %v4745_v0 = vadd.f32 %v10114_v27, %v4518_v11 }
 0x75c   : > { %v5697_v37 = vadd.f32 %v5626_v5, %v5456_v36  ;;  %v5209_v3 = vpop.f32.mrf.mxu1  ;;  %v5341_v51 = vpop.f32.mrf.mxu0  ;;  %v11051_v5 = vld [vmem:[#allocation46_spill] sm:$0xff] }
 0x75d   : > { %v5409_v55 = vadd.f32 %v5199_v17, %v4745_v0 }
 0x75e   : > { %6848 = vst [vmem:[%s10184_s7 + $0x138] sm:$0xff] %v5697_v37  ;;  %v5879_v30 = vadd.f32 %v5877_v22, %v5697_v37  ;;  %v5933_v38 = vmul.f32 %v5697_v37, %v5697_v37 }
 0x75f   : > { %v5457_v35 = vadd.f32 %v5409_v55, %v5338_v43 }
 0x760   : > { %v5980_v19 = vadd.f32 %v5978_v61, %v5933_v38  ;;  %v4402_v40 = vpop.f32.mrf.mxu2 }
 0x763   : > { %v5629_v58 = vpop.f32.mrf.mxu3 }
 0x764   : > { %v5698_v31 = vadd.f32 %v5629_v58, %v5457_v35  ;;  %v5211_v24 = vpop.f32.mrf.mxu1  ;;  %v5343_v28 = vpop.f32.mrf.mxu0 }
 0x766   : > { %6849 = vst [vmem:[%s10184_s7 + $0x140] sm:$0xff] %v5698_v31  ;;  %v5880_v45 = vadd.f32 %v5879_v30, %v5698_v31  ;;  %v5934_v7 = vmul.f32 %v5698_v31, %v5698_v31 }
 0x768   : > { %v5981_v47 = vadd.f32 %v5980_v19, %v5934_v7  ;;  %v4404_v54 = vpop.f32.mrf.mxu2 }
 0x769   : > { %v4520_v27 = vadd.f32 %v10092_v39, %v4404_v54 }
 0x76b   : > { %v5631_v20 = vpop.f32.mrf.mxu3  ;;  %v4747_v9 = vadd.f32 %v11048_v53, %v4520_v27 }
 0x76c   : > { %v5214_v2 = vpop.f32.mrf.mxu1  ;;  %v5346_v17 = vpop.f32.mrf.mxu0 }
 0x76d   : > { %v5411_v32 = vadd.f32 %v5204_v10, %v4747_v9 }
 0x76f   : > { %v5459_v33 = vadd.f32 %v5411_v32, %v5343_v28 }
 0x770   : > { %v4407_v60 = vpop.f32.mrf.mxu2 }
 0x771   : > { %v4521_v42 = vadd.f32 %v11049_v23, %v4407_v60 }
 0x773   : > { %v5634_v57 = vpop.f32.mrf.mxu3  ;;  %v4748_v6 = vadd.f32 %v10132_v59, %v4521_v42  ;;  %v11050_v59 = vld [vmem:[#allocation52_spill] sm:$0xff] }
 0x774   : > { %v5700_v8 = vadd.f32 %v5634_v57, %v5459_v33  ;;  %v5216_v63 = vpop.f32.mrf.mxu1  ;;  %v5348_v39 = vpop.f32.mrf.mxu0 }
 0x775   : > { %v5412_v46 = vadd.f32 %v5206_v14, %v4748_v6 }
 0x776   : > { %6851 = vst [vmem:[%s10184_s7 + $0x150] sm:$0xff] %v5700_v8  ;;  %v5882_v4 = vadd.f32 %v5880_v45, %v5700_v8  ;;  %v5936_v18 = vmul.f32 %v5700_v8, %v5700_v8 }
 0x777   : > { %v5460_v48 = vadd.f32 %v5412_v46, %v5346_v17 }
 0x778   : > { %v5983_v62 = vadd.f32 %v5981_v47, %v5936_v18  ;;  %v4409_v22 = vpop.f32.mrf.mxu2 }
 0x77b   : > { %v5636_v41 = vpop.f32.mrf.mxu3 }
 0x77c   : > { %v5701_v10 = vadd.f32 %v5636_v41, %v5460_v48  ;;  %v5219_v13 = vpop.f32.mrf.mxu1  ;;  %v5351_v56 = vpop.f32.mrf.mxu0 }
 0x77e   : > { %6852 = vst [vmem:[%s10184_s7 + $0x158] sm:$0xff] %v5701_v10  ;;  %v5883_v61 = vadd.f32 %v5882_v4, %v5701_v10  ;;  %v5937_v21 = vmul.f32 %v5701_v10, %v5701_v10 }
 0x780   : > { %v5984_v12 = vadd.f32 %v5983_v62, %v5937_v21  ;;  %v4412_v25 = vpop.f32.mrf.mxu2 }
 0x781   : > { %v4523_v16 = vadd.f32 %v11050_v59, %v4412_v25 }
 0x783   : > { %v5639_v43 = vpop.f32.mrf.mxu3  ;;  %v4750_v34 = vadd.f32 %v10142_v52, %v4523_v16 }
 0x784   : > { %v5221_v36 = vpop.f32.mrf.mxu1  ;;  %v5353_v14 = vpop.f32.mrf.mxu0  ;;  %v7111_v43 = vmov 0.0  }
 0x785   : > { %v5414_v1 = vadd.f32 %v5211_v24, %v4750_v34  ;;  %5773 = vst [vmem:[%s10184_s7] sm:$0xff] %v7111_v43 }
 0x786   : > { %5774 = vst [vmem:[%s10184_s7 + $0x8] sm:$0xff] %v7111_v43 }
 0x787   : > { %v5462_v15 = vadd.f32 %v5414_v1, %v5351_v56  ;;  %v11053_v56 = vld [vmem:[#allocation101_spill] sm:$0xff]  ;;  %5775 = vst [vmem:[%s10184_s7 + $0x10] sm:$0xff] %v7111_v43 }
 0x788   : > { %v4414_v11 = vpop.f32.mrf.mxu2  ;;  %5776 = vst [vmem:[%s10184_s7 + $0x18] sm:$0xff] %v7111_v43 }
 0x789   : > { %v4524_v37 = vadd.f32 %v11051_v5, %v4414_v11  ;;  %5777 = vst [vmem:[%s10184_s7 + $0x20] sm:$0xff] %v7111_v43  ;;  %v11055_v5 = vld [vmem:[#allocation32_spill] sm:$0xff] }
 0x78a   : > { %5778 = vst [vmem:[%s10184_s7 + $0x28] sm:$0xff] %v7111_v43 }
 0x78b   : > { %v5641_v0 = vpop.f32.mrf.mxu3  ;;  %v4751_v30 = vadd.f32 %v10149_v26, %v4524_v37  ;;  %6817 = vst [vmem:[%s10184_s7 + $0x40] sm:$0xff] %v7111_v43 }
 0x78c   : > { %v5703_v3 = vadd.f32 %v5641_v0, %v5462_v15  ;;  %v5224_v38 = vpop.f32.mrf.mxu1  ;;  %v5356_v19 = vpop.f32.mrf.mxu0  ;;  %6820 = vst [vmem:[%s10184_s7 + $0x58] sm:$0xff] %v7111_v43 }
 0x78d   : > { %v5415_v35 = vadd.f32 %v5214_v2, %v4751_v30  ;;  %6823 = vst [vmem:[%s10184_s7 + $0x70] sm:$0xff] %v7111_v43 }
 0x78e   : > { %6854 = vst [vmem:[%s10184_s7 + $0x168] sm:$0xff] %v5703_v3  ;;  %v5885_v51 = vadd.f32 %v5883_v61, %v5703_v3  ;;  %v5939_v55 = vmul.f32 %v5703_v3, %v5703_v3 }
 0x78f   : > { %v5463_v52 = vadd.f32 %v5415_v35, %v5353_v14  ;;  %v11054_v14 = vld [vmem:[#allocation62_spill] sm:$0xff]  ;;  %6826 = vst [vmem:[%s10184_s7 + $0x88] sm:$0xff] %v7111_v43 }
 0x790   : > { %v5986_v40 = vadd.f32 %v5984_v12, %v5939_v55  ;;  %v4417_v58 = vpop.f32.mrf.mxu2  ;;  %6829 = vst [vmem:[%s10184_s7 + $0xa0] sm:$0xff] %v7111_v43 }
 0x791   : > { %6832 = vst [vmem:[%s10184_s7 + $0xb8] sm:$0xff] %v7111_v43 }
 0x792   : > { %6835 = vst [vmem:[%s10184_s7 + $0xd0] sm:$0xff] %v7111_v43 }
 0x793   : > { %v5644_v31 = vpop.f32.mrf.mxu3  ;;  %6838 = vst [vmem:[%s10184_s7 + $0xe8] sm:$0xff] %v7111_v43 }
 0x794   : > { %v5704_v24 = vadd.f32 %v5644_v31, %v5463_v52  ;;  %v5226_v45 = vpop.f32.mrf.mxu1  ;;  %v5358_v47 = vpop.f32.mrf.mxu0  ;;  %6841 = vst [vmem:[%s10184_s7 + $0x100] sm:$0xff] %v7111_v43 }
 0x795   : > { %6844 = vst [vmem:[%s10184_s7 + $0x118] sm:$0xff] %v7111_v43 }
 0x796   : > { %6855 = vst [vmem:[%s10184_s7 + $0x170] sm:$0xff] %v5704_v24  ;;  %v5886_v7 = vadd.f32 %v5885_v51, %v5704_v24  ;;  %v5940_v28 = vmul.f32 %v5704_v24, %v5704_v24 }
 0x797   : > { %6847 = vst [vmem:[%s10184_s7 + $0x130] sm:$0xff] %v7111_v43 }
 0x798   : > { %v5987_v54 = vadd.f32 %v5986_v40, %v5940_v28  ;;  %v4419_v27 = vpop.f32.mrf.mxu2  ;;  %6850 = vst [vmem:[%s10184_s7 + $0x148] sm:$0xff] %v7111_v43 }
 0x799   : > { %v4526_v26 = vadd.f32 %v10129_v50, %v4419_v27  ;;  %6853 = vst [vmem:[%s10184_s7 + $0x160] sm:$0xff] %v7111_v43 }
 0x79a   : > { %6856 = vst [vmem:[%s10184_s7 + $0x178] sm:$0xff] %v7111_v43 }
 0x79b   : > { %v5646_v20 = vpop.f32.mrf.mxu3  ;;  %v4753_v53 = vadd.f32 %v10158_v29, %v4526_v26  ;;  %6859 = vst [vmem:[%s10184_s7 + $0x190] sm:$0xff] %v7111_v43 }
 0x79c   : > { %v5229_v9 = vpop.f32.mrf.mxu1  ;;  %v5361_v2 = vpop.f32.mrf.mxu0  ;;  %6862 = vst [vmem:[%s10184_s7 + $0x1a8] sm:$0xff] %v7111_v43 }
 0x79d   : > { %v5417_v17 = vadd.f32 %v5219_v13, %v4753_v53  ;;  %v11052_v13 = vld [vmem:[#allocation37_spill] sm:$0xff]  ;;  %6863 = vst [vmem:[%s10184_s7 + $0x1b0] sm:$0xff] %v7111_v43 }
 0x79e   : > { %6864 = vst [vmem:[%s10184_s7 + $0x1b8] sm:$0xff] %v7111_v43 }
 0x79f   : > { %v5465_v32 = vadd.f32 %v5417_v17, %v5358_v47  ;;  %6865 = vst [vmem:[%s10184_s7 + $0x1c0] sm:$0xff] %v7111_v43 }
 0x7a0   : > { %v4422_v33 = vpop.f32.mrf.mxu2  ;;  %6866 = vst [vmem:[%s10184_s7 + $0x1c8] sm:$0xff] %v7111_v43 }
 0x7a1   : > { %v4527_v60 = vadd.f32 %v10137_v44, %v4422_v33  ;;  %6867 = vst [vmem:[%s10184_s7 + $0x1d0] sm:$0xff] %v7111_v43 }
 0x7a2   : > { %6868 = vst [vmem:[%s10184_s7 + $0x1d8] sm:$0xff] %v7111_v43 }
 0x7a3   : > { %v5649_v23 = vpop.f32.mrf.mxu3  ;;  %v4754_v57 = vadd.f32 %v10162_v49, %v4527_v60  ;;  %6869 = vst [vmem:[%s10184_s7 + $0x1e0] sm:$0xff] %v7111_v43 }
 0x7a4   : > { %v5706_v42 = vadd.f32 %v5649_v23, %v5465_v32  ;;  %v5231_v8 = vpop.f32.mrf.mxu1  ;;  %v5363_v50 = vpop.f32.mrf.mxu0  ;;  %6870 = vst [vmem:[%s10184_s7 + $0x1e8] sm:$0xff] %v7111_v43 }
 0x7a5   : > { %v5418_v4 = vadd.f32 %v5221_v36, %v4754_v57  ;;  %6871 = vst [vmem:[%s10184_s7 + $0x1f0] sm:$0xff] %v7111_v43 }
 0x7a6   : > { %6857 = vst [vmem:[%s10184_s7 + $0x180] sm:$0xff] %v5706_v42  ;;  %v5888_v6 = vadd.f32 %v5886_v7, %v5706_v42  ;;  %v5942_v63 = vmul.f32 %v5706_v42, %v5706_v42 }
 0x7a7   : > { %v5466_v29 = vadd.f32 %v5418_v4, %v5361_v2  ;;  %6872 = vst [vmem:[%s10184_s7 + $0x1f8] sm:$0xff] %v7111_v43 }
 0x7a8   : > { %v5989_v18 = vadd.f32 %v5987_v54, %v5942_v63  ;;  %v4424_v39 = vpop.f32.mrf.mxu2  ;;  %6873 = vst [vmem:[%s10184_s7 + $0x200] sm:$0xff] %v7111_v43 }
 0x7a9   : > { %6874 = vst [vmem:[%s10184_s7 + $0x208] sm:$0xff] %v7111_v43 }
 0x7aa   : > { %6875 = vst [vmem:[%s10184_s7 + $0x210] sm:$0xff] %v7111_v43 }
 0x7ab   : > { %v5651_v46 = vpop.f32.mrf.mxu3  ;;  %6876 = vst [vmem:[%s10184_s7 + $0x218] sm:$0xff] %v7111_v43 }
 0x7ac   : > { %v5707_v62 = vadd.f32 %v5651_v46, %v5466_v29  ;;  %v5234_v48 = vpop.f32.mrf.mxu1  ;;  %v5366_v49 = vpop.f32.mrf.mxu0  ;;  %6877 = vst [vmem:[%s10184_s7 + $0x220] sm:$0xff] %v7111_v43 }
 0x7ad   : > { %6878 = vst [vmem:[%s10184_s7 + $0x228] sm:$0xff] %v7111_v43 }
 0x7ae   : > { %6858 = vst [vmem:[%s10184_s7 + $0x188] sm:$0xff] %v5707_v62  ;;  %v5889_v44 = vadd.f32 %v5888_v6, %v5707_v62  ;;  %v5943_v22 = vmul.f32 %v5707_v62, %v5707_v62 }
 0x7af   : > { %6879 = vst [vmem:[%s10184_s7 + $0x230] sm:$0xff] %v7111_v43 }
 0x7b0   : > { %v5990_v41 = vadd.f32 %v5989_v18, %v5943_v22  ;;  %v4427_v10 = vpop.f32.mrf.mxu2  ;;  %6880 = vst [vmem:[%s10184_s7 + $0x238] sm:$0xff] %v7111_v43 }
 0x7b1   : > { %v4529_v61 = vadd.f32 %v11052_v13, %v4427_v10 }
 0x7b3   : > { %v5654_v21 = vpop.f32.mrf.mxu3  ;;  %v4756_v12 = vadd.f32 %v11053_v56, %v4529_v61 }
 0x7b4   : > { %v5235_v25 = vpop.f32.mrf.mxu1  ;;  %v5368_v59 = vpop.f32.mrf.mxu0 }
 0x7b5   : > { %v5420_v16 = vadd.f32 %v5226_v45, %v4756_v12 }
 0x7b7   : > { %v5468_v34 = vadd.f32 %v5420_v16, %v5366_v49 }
 0x7b8   : > { %v4429_v36 = vpop.f32.mrf.mxu2 }
 0x7b9   : > { %v4530_v1 = vadd.f32 %v11054_v14, %v4429_v36 }
 0x7bb   : > { %v5656_v15 = vpop.f32.mrf.mxu3  ;;  %v4757_v37 = vadd.f32 %v11055_v5, %v4530_v1 }
 0x7bc   : > { %v5709_v11 = vadd.f32 %v5656_v15, %v5468_v34  ;;  %v5237_v0 = vpop.f32.mrf.mxu1  ;;  %v5371_v38 = vpop.f32.mrf.mxu0 }
 0x7bd   : > { %v5421_v51 = vadd.f32 %v5229_v9, %v4757_v37 }
 0x7be   : > { %6860 = vst [vmem:[%s10184_s7 + $0x198] sm:$0xff] %v5709_v11  ;;  %v5891_v3 = vadd.f32 %v5889_v44, %v5709_v11  ;;  %v5945_v30 = vmul.f32 %v5709_v11, %v5709_v11 }
 0x7bf   : > { %v5469_v19 = vadd.f32 %v5421_v51, %v5368_v59 }
 0x7c0   : > { %v5992_v55 = vadd.f32 %v5990_v41, %v5945_v30  ;;  %v4432_v35 = vpop.f32.mrf.mxu2 }
 0x7c3   : > { %v5659_v40 = vpop.f32.mrf.mxu3 }
 0x7c4   : > { %v5710_v52 = vadd.f32 %v5659_v40, %v5469_v19  ;;  %v5238_v58 = vpop.f32.mrf.mxu1  ;;  %v5373_v45 = vpop.f32.mrf.mxu0 }
 0x7c6   : > { %6861 = vst [vmem:[%s10184_s7 + $0x1a0] sm:$0xff] %v5710_v52  ;;  %v5892_v31 = vadd.f32 %v5891_v3, %v5710_v52  ;;  %v5946_v24 = vmul.f32 %v5710_v52, %v5710_v52 }
 0x7c8   : > { %v5894_v7 = vrot.slane %v5892_v31, 4  ;;  %v5993_v28 = vadd.f32 %v5992_v55, %v5946_v24  ;;  %v4434_v27 = vpop.f32.mrf.mxu2 }
 0x7ca   : > { %v5895_v47 = vadd.f32 %v5894_v7, %v5892_v31  ;;  %v5995_v54 = vrot.slane %v5993_v28, 4 }
 0x7cb   : > { %v5661_v26 = vpop.f32.mrf.mxu3 }
 0x7cc   : > { %v5896_v20 = vrot.slane %v5895_v47, 2  ;;  %v5996_v53 = vadd.f32 %v5995_v54, %v5993_v28 }
 0x7ce   : > { %v5897_v9 = vadd.f32 %v5896_v20, %v5895_v47  ;;  %v5997_v2 = vrot.slane %v5996_v53, 2 }
 0x7d0   : > { %v5898_v17 = vrot.slane %v5897_v9, 1  ;;  %v5998_v32 = vadd.f32 %v5997_v2, %v5996_v53 }
 0x7d2   : > { %v5999_v33 = vrot.slane %v5998_v32, 1  ;;  %v5899_v60 = vadd.f32 %v5898_v17, %v5897_v9 }
 0x7d4   : > { %v6000_v23 = vadd.f32 %v5999_v33, %v5998_v32 }
 0x7d6   : > { %v6002_v42 = vsel %vm6001_vm2, %v5899_v60, %v6000_v23 }
 0x7d7   : > { %6003 = vst [vmem:[%s255_s11] sm:$0x3] %v6002_v42 }
 0x7d8 PF: > { %s16_s18 = sadd.s32 1, %s7109_s18  }
 0x7d9   : > { %p13_p4 = scmp.ge.s32.totalorder %s16_s18, 4  }
 0x7db   :  { %15 = sbr.rel (!%p13_p4) target bundleno = 1 (0x1), region = 87 }

</bundles_post_ra>
